<compile_context>
chip_gen: v7x
topology: tpu7x:2x2x1
jax: 0.10.0
libtpu: 0.0.40
codegen_flags: <defaults>
</compile_context>

<pallas_src>
import math

import jax
import jax.numpy as jnp
from jax.experimental import pallas as pl
from jax.experimental.pallas import tpu as pltpu

IN, H1, H2, H3 = 784, 1024, 512, 256


def discriminator_kernel(x_ref,
                         w1_ref, b1_ref,
                         w2_ref, b2_ref,
                         w3_ref, b3_ref,
                         w4_ref, b4_ref,
                         o_ref):
    # x_ref: (IN, tm) bf16  (batch on the lane axis)
    # Linear(784, 1024) + ReLU.  f32 accumulation on the MXU, bias is a (H1, 1) column
    # lane-broadcast against (H1, tm).  Dropout(0.3) is identity at eval.
    h1 = jnp.dot(w1_ref[...], x_ref[...],
                 preferred_element_type=jnp.float32) + b1_ref[...]
    h1 = jnp.maximum(h1, 0.0)

    # Linear(1024, 512) + ReLU
    h2 = jnp.dot(w2_ref[...], h1.astype(jnp.bfloat16),
                 preferred_element_type=jnp.float32) + b2_ref[...]
    h2 = jnp.maximum(h2, 0.0)

    # Linear(512, 256) + ReLU
    h3 = jnp.dot(w3_ref[...], h2.astype(jnp.bfloat16),
                 preferred_element_type=jnp.float32) + b3_ref[...]
    h3 = jnp.maximum(h3, 0.0)

    # Linear(256, 1) + Sigmoid, as a VPU multiply + cross-sublane (XLU) reduction:
    # avoids a degenerate N=1 MXU pass and yields a lane-dense (1, tm) row directly.
    logits = jnp.sum(h3 * w4_ref[...], axis=0, keepdims=True) + b4_ref[0, 0]
    o_ref[...] = jax.nn.sigmoid(logits).astype(o_ref.dtype)


def discriminator_forward(x_nchw, params, *, tm=512):
    """x_nchw: (B, 1, 28, 28) float32. Returns (B, 1) float32 in (0, 1)."""
    B = x_nchw.shape[0]
    # Flatten exactly like torch's x.view(x.size(0), 784), cast to bf16 in the wrapper
    # (numerically identical: the matmuls consume bf16 anyway), and transpose so the
    # batch sits on the lane axis -> lane-dense output stores.
    x = x_nchw.reshape(B, IN).astype(jnp.bfloat16).T          # (IN, B)

    (w1, b1), (w2, b2), (w3, b3), (w4, b4) = params
    w1b = w1.astype(jnp.bfloat16)                              # (H1, IN)
    w2b = w2.astype(jnp.bfloat16)                              # (H2, H1)
    w3b = w3.astype(jnp.bfloat16)                              # (H3, H2)
    w4c = w4.reshape(H3, 1).astype(jnp.float32)                # (H3, 1) column, VPU path
    b4s = b4.reshape(1, 1).astype(jnp.float32)                 # scalar -> SMEM

    # Batch tile (lane axis): multiple of 128; shrink for tiny batches, cap at `tm`.
    tm = int(min(tm, 128 * math.ceil(B / 128)))
    Bp = tm * math.ceil(B / tm)
    if Bp != B:
        x = jnp.pad(x, ((0, 0), (0, Bp - B)))
    grid = (Bp // tm,)

    flops = 2 * Bp * (IN * H1 + H1 * H2 + H2 * H3 + H3)
    weight_bytes = 2 * (H1 * IN + H2 * H1 + H3 * H2) + 4 * H3
    bias_bytes = 4 * (H1 + H2 + H3 + 1)
    bytes_accessed = weight_bytes + bias_bytes + Bp * IN * 2 + Bp * 4

    out = pl.pallas_call(
        discriminator_kernel,
        out_shape=jax.ShapeDtypeStruct((1, Bp), jnp.float32),
        grid=grid,
        in_specs=[
            pl.BlockSpec((IN, tm), lambda i: (0, i)),   # x tile (walks the batch, lanes)
            pl.BlockSpec((H1, IN), lambda i: (0, 0)),   # w1 -- VMEM-resident across grid
            pl.BlockSpec((H1, 1), lambda i: (0, 0)),    # b1 column
            pl.BlockSpec((H2, H1), lambda i: (0, 0)),   # w2
            pl.BlockSpec((H2, 1), lambda i: (0, 0)),    # b2
            pl.BlockSpec((H3, H2), lambda i: (0, 0)),   # w3
            pl.BlockSpec((H3, 1), lambda i: (0, 0)),    # b3
            pl.BlockSpec((H3, 1), lambda i: (0, 0)),    # w4 column (VPU/XLU reduction)
            pl.BlockSpec(memory_space=pltpu.MemorySpace.SMEM),  # b4 scalar
        ],
        out_specs=pl.BlockSpec((1, tm), lambda i: (0, i)),      # lane-dense output row
        compiler_params=pltpu.CompilerParams(
            # v7x: batch tiles may split across TCs; no-op on single-TC v5e/v6e.
            dimension_semantics=("parallel",),
            vmem_limit_bytes=48 * 1024 * 1024,
        ),
        cost_estimate=pl.CostEstimate(
            flops=flops, transcendentals=2 * Bp, bytes_accessed=bytes_accessed),
    )(x, w1b, b1, w2b, b2, w3b, b3, w4c, b4s)

    return out[0, :B].reshape(B, 1)


def init_params(key):
    """Deterministic init matching nn.Linear: W stored (out, in), b stored (out, 1)."""
    dims = [(IN, H1), (H1, H2), (H2, H3), (H3, 1)]
    params = []
    for i, (fan_in, fan_out) in enumerate(dims):
        kw, kb = jax.random.split(jax.random.fold_in(key, i))
        bound = 1.0 / (fan_in ** 0.5)  # PyTorch nn.Linear default uniform bound
        w = jax.random.uniform(kw, (fan_out, fan_in), jnp.float32, -bound, bound)
        b = jax.random.uniform(kb, (fan_out, 1), jnp.float32, -bound, bound)
        params.append((w, b))
    return params


def _reference(x_nchw, params):
    """Pure-JAX f32 reference (eval mode, dropout = identity)."""
    x = x_nchw.reshape(x_nchw.shape[0], IN)
    (w1, b1), (w2, b2), (w3, b3), (w4, b4) = params
    h = jnp.maximum(x @ w1.T + b1.T, 0.0)
    h = jnp.maximum(h @ w2.T + b2.T, 0.0)
    h = jnp.maximum(h @ w3.T + b3.T, 0.0)
    return jax.nn.sigmoid(h @ w4.T + b4.T)


if __name__ == "__main__":
    key = jax.random.PRNGKey(0)
    k_x, k_p = jax.random.split(key)

    # Small MNIST-like batch: (batch=2, channels=1, 28, 28) -> 784 features.
    x = jax.random.normal(k_x, (2, 1, 28, 28), dtype=jnp.float32)
    params = init_params(k_p)

    out = discriminator_forward(x, params)
    out = jax.block_until_ready(out)

    assert out.shape == (2, 1)
    assert bool(jnp.all((out > 0.0) & (out < 1.0)))

    # bf16 weights/activations => small deviation from the f32 reference; loose tolerance.
    ref = _reference(x, params)
    assert bool(jnp.all(jnp.abs(out - ref) < 2e-2)), "mismatch vs f32 reference"

    print("KERNEL_OK")
</pallas_src>

<mosaic_0001>
module attributes {stable_mosaic.version = 11 : i64} {
  func.func @discriminator_kernel(%arg0: i32, %arg1: memref<784x128xbf16, #tpu.memory_space<vmem>>, %arg2: memref<1024x784xbf16, #tpu.memory_space<vmem>>, %arg3: memref<1024x1xf32, #tpu.memory_space<vmem>>, %arg4: memref<512x1024xbf16, #tpu.memory_space<vmem>>, %arg5: memref<512x1xf32, #tpu.memory_space<vmem>>, %arg6: memref<256x512xbf16, #tpu.memory_space<vmem>>, %arg7: memref<256x1xf32, #tpu.memory_space<vmem>>, %arg8: memref<256x1xf32, #tpu.memory_space<vmem>>, %arg9: memref<1x1xf32, #tpu.memory_space<smem>>, %arg10: memref<1x128xf32, #tpu.memory_space<vmem>>) attributes {dimension_semantics = [#tpu.dimension_semantics<parallel>], iteration_bounds = array<i64: 1>, scalar_prefetch = 0 : i64, scratch_operands = 0 : i64, tpu.core_type = #tpu.core_type<tc>, window_params = [{transform_indices = @transform_0, window_bounds = array<i64: 784, 128>}, {pipeline_mode = #tpu.pipeline_mode<synchronous>, transform_indices = @transform_1, window_bounds = array<i64: 1024, 784>}, {pipeline_mode = #tpu.pipeline_mode<synchronous>, transform_indices = @transform_2, window_bounds = array<i64: 1024, 1>}, {pipeline_mode = #tpu.pipeline_mode<synchronous>, transform_indices = @transform_3, window_bounds = array<i64: 512, 1024>}, {pipeline_mode = #tpu.pipeline_mode<synchronous>, transform_indices = @transform_4, window_bounds = array<i64: 512, 1>}, {pipeline_mode = #tpu.pipeline_mode<synchronous>, transform_indices = @transform_5, window_bounds = array<i64: 256, 512>}, {pipeline_mode = #tpu.pipeline_mode<synchronous>, transform_indices = @transform_6, window_bounds = array<i64: 256, 1>}, {pipeline_mode = #tpu.pipeline_mode<synchronous>, transform_indices = @transform_7, window_bounds = array<i64: 256, 1>}, {transform_indices = @transform_8, window_bounds = array<i64: 1, 1>}, {transform_indices = @transform_9, window_bounds = array<i64: 1, 128>}]} {
    %c0 = arith.constant 0 : index
    %c0_0 = arith.constant 0 : index
    %0 = vector.load %arg2[%c0, %c0_0] : memref<1024x784xbf16, #tpu.memory_space<vmem>>, vector<1024x784xbf16>
    %c0_1 = arith.constant 0 : index
    %c0_2 = arith.constant 0 : index
    %1 = vector.load %arg1[%c0_1, %c0_2] : memref<784x128xbf16, #tpu.memory_space<vmem>>, vector<784x128xbf16>
    %cst = arith.constant dense<0.000000e+00> : vector<1024x128xf32>
    %2 = tpu.matmul %0, %1, %cst {dimension_numbers = #tpu.dot_dimension_numbers<[1], [0], [0], [1], [0, 0, 1, 1], [], []>} : vector<1024x784xbf16>, vector<784x128xbf16>, vector<1024x128xf32> -> vector<1024x128xf32>
    %c0_3 = arith.constant 0 : index
    %c0_4 = arith.constant 0 : index
    %3 = vector.load %arg3[%c0_3, %c0_4] : memref<1024x1xf32, #tpu.memory_space<vmem>>, vector<1024x1xf32>
    %4 = vector.broadcast %3 : vector<1024x1xf32> to vector<1024x128xf32>
    %5 = arith.addf %2, %4 : vector<1024x128xf32>
    %cst_5 = arith.constant 0.000000e+00 : f32
    %6 = vector.broadcast %cst_5 : f32 to vector<1024x128xf32>
    %7 = arith.maximumf %5, %6 : vector<1024x128xf32>
    %c0_6 = arith.constant 0 : index
    %c0_7 = arith.constant 0 : index
    %8 = vector.load %arg4[%c0_6, %c0_7] : memref<512x1024xbf16, #tpu.memory_space<vmem>>, vector<512x1024xbf16>
    %9 = arith.truncf %7 : vector<1024x128xf32> to vector<1024x128xbf16>
    %cst_8 = arith.constant dense<0.000000e+00> : vector<512x128xf32>
    %10 = tpu.matmul %8, %9, %cst_8 {dimension_numbers = #tpu.dot_dimension_numbers<[1], [0], [0], [1], [0, 0, 1, 1], [], []>} : vector<512x1024xbf16>, vector<1024x128xbf16>, vector<512x128xf32> -> vector<512x128xf32>
    %c0_9 = arith.constant 0 : index
    %c0_10 = arith.constant 0 : index
    %11 = vector.load %arg5[%c0_9, %c0_10] : memref<512x1xf32, #tpu.memory_space<vmem>>, vector<512x1xf32>
    %12 = vector.broadcast %11 : vector<512x1xf32> to vector<512x128xf32>
    %13 = arith.addf %10, %12 : vector<512x128xf32>
    %cst_11 = arith.constant 0.000000e+00 : f32
    %14 = vector.broadcast %cst_11 : f32 to vector<512x128xf32>
    %15 = arith.maximumf %13, %14 : vector<512x128xf32>
    %c0_12 = arith.constant 0 : index
    %c0_13 = arith.constant 0 : index
    %16 = vector.load %arg6[%c0_12, %c0_13] : memref<256x512xbf16, #tpu.memory_space<vmem>>, vector<256x512xbf16>
    %17 = arith.truncf %15 : vector<512x128xf32> to vector<512x128xbf16>
    %cst_14 = arith.constant dense<0.000000e+00> : vector<256x128xf32>
    %18 = tpu.matmul %16, %17, %cst_14 {dimension_numbers = #tpu.dot_dimension_numbers<[1], [0], [0], [1], [0, 0, 1, 1], [], []>} : vector<256x512xbf16>, vector<512x128xbf16>, vector<256x128xf32> -> vector<256x128xf32>
    %c0_15 = arith.constant 0 : index
    %c0_16 = arith.constant 0 : index
    %19 = vector.load %arg7[%c0_15, %c0_16] : memref<256x1xf32, #tpu.memory_space<vmem>>, vector<256x1xf32>
    %20 = vector.broadcast %19 : vector<256x1xf32> to vector<256x128xf32>
    %21 = arith.addf %18, %20 : vector<256x128xf32>
    %cst_17 = arith.constant 0.000000e+00 : f32
    %22 = vector.broadcast %cst_17 : f32 to vector<256x128xf32>
    %23 = arith.maximumf %21, %22 : vector<256x128xf32>
    %c0_18 = arith.constant 0 : index
    %c0_19 = arith.constant 0 : index
    %24 = vector.load %arg8[%c0_18, %c0_19] : memref<256x1xf32, #tpu.memory_space<vmem>>, vector<256x1xf32>
    %25 = vector.broadcast %24 : vector<256x1xf32> to vector<256x128xf32>
    %26 = arith.mulf %23, %25 : vector<256x128xf32>
    %cst_20 = arith.constant dense<0.000000e+00> : vector<128xf32>
    %27 = vector.multi_reduction <add>, %26, %cst_20 [0] : vector<256x128xf32> to vector<128xf32>
    %28 = vector.shape_cast %27 : vector<128xf32> to vector<1x128xf32>
    %c0_21 = arith.constant 0 : index
    %c0_22 = arith.constant 0 : index
    %29 = memref.load %arg9[%c0_21, %c0_22] : memref<1x1xf32, #tpu.memory_space<smem>>
    %30 = vector.broadcast %29 : f32 to vector<1x128xf32>
    %31 = arith.addf %28, %30 : vector<1x128xf32>
    %32 = arith.negf %31 : vector<1x128xf32>
    %33 = math.exp %32 : vector<1x128xf32>
    %cst_23 = arith.constant 1.000000e+00 : f32
    %34 = vector.broadcast %cst_23 : f32 to vector<1x128xf32>
    %35 = arith.addf %34, %33 : vector<1x128xf32>
    %36 = arith.divf %34, %35 : vector<1x128xf32>
    %c0_24 = arith.constant 0 : index
    %c0_25 = arith.constant 0 : index
    %37 = vector.load %arg10[%c0_24, %c0_25] : memref<1x128xf32, #tpu.memory_space<vmem>>, vector<1x128xf32>
    tpu.vector_store %arg10[%c0_24, %c0_25], %36 {strides = array<i32>} : memref<1x128xf32, #tpu.memory_space<vmem>>, vector<1x128xf32>,
    return
  }
  func.func @transform_0(%arg0: i32) -> (i32, i32) {
    %c0_i32 = arith.constant 0 : i32
    %c0_i32_0 = arith.constant 0 : i32
    return %c0_i32, %arg0 : i32, i32
  }
  func.func @transform_1(%arg0: i32) -> (i32, i32) {
    %c0_i32 = arith.constant 0 : i32
    %c0_i32_0 = arith.constant 0 : i32
    %c0_i32_1 = arith.constant 0 : i32
    return %c0_i32, %c0_i32_0 : i32, i32
  }
  func.func @transform_2(%arg0: i32) -> (i32, i32) {
    %c0_i32 = arith.constant 0 : i32
    %c0_i32_0 = arith.constant 0 : i32
    %c0_i32_1 = arith.constant 0 : i32
    return %c0_i32, %c0_i32_0 : i32, i32
  }
  func.func @transform_3(%arg0: i32) -> (i32, i32) {
    %c0_i32 = arith.constant 0 : i32
    %c0_i32_0 = arith.constant 0 : i32
    %c0_i32_1 = arith.constant 0 : i32
    return %c0_i32, %c0_i32_0 : i32, i32
  }
  func.func @transform_4(%arg0: i32) -> (i32, i32) {
    %c0_i32 = arith.constant 0 : i32
    %c0_i32_0 = arith.constant 0 : i32
    %c0_i32_1 = arith.constant 0 : i32
    return %c0_i32, %c0_i32_0 : i32, i32
  }
  func.func @transform_5(%arg0: i32) -> (i32, i32) {
    %c0_i32 = arith.constant 0 : i32
    %c0_i32_0 = arith.constant 0 : i32
    %c0_i32_1 = arith.constant 0 : i32
    return %c0_i32, %c0_i32_0 : i32, i32
  }
  func.func @transform_6(%arg0: i32) -> (i32, i32) {
    %c0_i32 = arith.constant 0 : i32
    %c0_i32_0 = arith.constant 0 : i32
    %c0_i32_1 = arith.constant 0 : i32
    return %c0_i32, %c0_i32_0 : i32, i32
  }
  func.func @transform_7(%arg0: i32) -> (i32, i32) {
    %c0_i32 = arith.constant 0 : i32
    %c0_i32_0 = arith.constant 0 : i32
    %c0_i32_1 = arith.constant 0 : i32
    return %c0_i32, %c0_i32_0 : i32, i32
  }
  func.func @transform_8(%arg0: i32) -> (i32, i32) {
    %c0_i32 = arith.constant 0 : i32
    %c0_i32_0 = arith.constant 0 : i32
    %c0_i32_1 = arith.constant 0 : i32
    return %c0_i32, %c0_i32_0 : i32, i32
  }
  func.func @transform_9(%arg0: i32) -> (i32, i32) {
    %c0_i32 = arith.constant 0 : i32
    %c0_i32_0 = arith.constant 0 : i32
    return %c0_i32, %arg0 : i32, i32
  }
}

</mosaic_0001>

<bundles_post_ra>
// kernel: tpu_custom_call.1
= control target key start
LH: loop header
LB: loop body
LE: loop exit
PB: predicated region body
PF: predicated region fallthrough
CT: control target
= control target key end

     0   :  { %v18805_v1 = vmov 0   ;;  %s18795_s0 = inlined_call_operand.vmem [shape: bf16[784,128], index: 0, kind: input, shape index: {}]   ;;  %s18796_s1 = inlined_call_operand.vmem [shape: bf16[1024,784], index: 1, kind: input, shape index: {}]   ;;  %s18797_s2 = inlined_call_operand.vmem [shape: f32[1024,1], index: 2, kind: input, shape index: {}]   ;;  %s18798_s3 = inlined_call_operand.vmem [shape: bf16[512,1024], index: 3, kind: input, shape index: {}]   ;;  %s18799_s4 = inlined_call_operand.vmem [shape: f32[512,1], index: 4, kind: input, shape index: {}]   ;;  %s18800_s5 = inlined_call_operand.vmem [shape: bf16[256,512], index: 5, kind: input, shape index: {}]   ;;  %s18801_s6 = inlined_call_operand.vmem [shape: f32[256,1], index: 6, kind: input, shape index: {}]   ;;  %s18802_s7 = inlined_call_operand.vmem [shape: f32[256,1], index: 7, kind: input, shape index: {}]   ;;  %s18803_s8 = inlined_call_operand.<no memory space> [shape: f32[1,1], index: 8, kind: input, shape index: {}]   ;;  %s18804_s9 = inlined_call_operand.hbm [shape: f32[1,128], index: 9, kind: output, shape index: {}]  }
   0x1   :  { %v13292_v0 = vld [vmem:[%s18795_s0] sm:$0xff]   ;;  %4140 = vmatprep.subr.bf16.mxu0 %v18805_v1  ;;  %13290 = vset.pattern.permute.xlu0 %v18805_v1  ;;  %v13293_v2 = vld [vmem:[%s18795_s0 + $0x8] sm:$0xff]   ;;  %v13294_v3 = vld [vmem:[%s18795_s0 + $0x10] sm:$0xff]  }
   0x2   :  { %4141 = vmatpush1.bf16.msra.mxu0 %v13292_v0  ;;  %13291 = vset.pattern.permute.xlu1 %v18805_v1  ;;  %v13295_v4 = vld [vmem:[%s18795_s0 + $0x18] sm:$0xff]   ;;  %v13296_v5 = vld [vmem:[%s18795_s0 + $0x20] sm:$0xff]   ;;  %v13297_v7 = vld [vmem:[%s18795_s0 + $0x28] sm:$0xff]  }
   0x3   :  { %4142 = vmatprep.subr.bf16.mxu0 %v18805_v1  ;;  %v13310_v6 = vld [vmem:[%s18796_s1 + $0x4] ss:$28 sps:$4 sm:$0xff]   ;;  %v13298_v8 = vld [vmem:[%s18795_s0 + $0x30] sm:$0xff]   ;;  %v13299_v9 = vld [vmem:[%s18795_s0 + $0x38] sm:$0xff]  }
   0x4   :  { %4172 = vmatprep.mubr.bf16.mxu0 %v13310_v6  ;;  %v13300_v10 = vld [vmem:[%s18795_s0 + $0x40] sm:$0xff]   ;;  %v13301_v11 = vld [vmem:[%s18795_s0 + $0x48] sm:$0xff]   ;;  %v13302_v12 = vld [vmem:[%s18795_s0 + $0x50] sm:$0xff]  }
   0x5   :  { %v13303_v13 = vld [vmem:[%s18795_s0 + $0x58] sm:$0xff]   ;;  %v13304_v14 = vld [vmem:[%s18795_s0 + $0x60] sm:$0xff]   ;;  %v13305_v15 = vld [vmem:[%s18795_s0 + $0x68] sm:$0xff]  }
   0x6   :  { %4143 = vmatpush1.bf16.msra.mxu0 %v13293_v2  ;;  %v13306_v16 = vld [vmem:[%s18795_s0 + $0x70] sm:$0xff]   ;;  %v13307_v17 = vld [vmem:[%s18795_s0 + $0x78] sm:$0xff]   ;;  %v13317_v23 = vld [vmem:[%s18796_s1 + $0xac] ss:$28 sps:$4 sm:$0xff]  }
   0x7   :  { %4144 = vmatprep.subr.bf16.mxu0 %v18805_v1  ;;  %v13308_v18 = vld [vmem:[%s18796_s1] ss:$28 sps:$4 sm:$0xff]   ;;  %v13313_v20 = vld [vmem:[%s18796_s1 + $0x38] ss:$28 sps:$4 sm:$0xff]   ;;  %v13316_v22 = vld [vmem:[%s18796_s1 + $0x70] ss:$28 sps:$4 sm:$0xff]  }
   0x8   :  { %v13311_v19 = vld [vmem:[%s18796_s1 + $0x3c] ss:$28 sps:$4 sm:$0xff]   ;;  %v13314_v21 = vld [vmem:[%s18796_s1 + $0x74] ss:$28 sps:$4 sm:$0xff]   ;;  %v13319_v24 = vld [vmem:[%s18796_s1 + $0xa8] ss:$28 sps:$4 sm:$0xff]  }
   0x9   :  { %v13320_v25 = vld [vmem:[%s18796_s1 + $0xe4] ss:$28 sps:$4 sm:$0xff]   ;;  %v13323_v27 = vld [vmem:[%s18796_s1 + $0x11c] ss:$28 sps:$4 sm:$0xff]   ;;  %v13326_v29 = vld [vmem:[%s18796_s1 + $0x154] ss:$28 sps:$4 sm:$0xff]  }
   0xa   :  { %4145 = vmatpush1.bf16.msra.mxu0 %v13294_v3  ;;  %v13322_v26 = vld [vmem:[%s18796_s1 + $0xe0] ss:$28 sps:$4 sm:$0xff]   ;;  %v13325_v28 = vld [vmem:[%s18796_s1 + $0x118] ss:$28 sps:$4 sm:$0xff]   ;;  %v13328_v30 = vld [vmem:[%s18796_s1 + $0x150] ss:$28 sps:$4 sm:$0xff]  }
   0xb   :  { %4146 = vmatprep.subr.bf16.mxu0 %v18805_v1  ;;  %v13329_v31 = vld [vmem:[%s18796_s1 + $0x18c] ss:$28 sps:$4 sm:$0xff]   ;;  %v13332_v33 = vld [vmem:[%s18796_s1 + $0x1c4] ss:$28 sps:$4 sm:$0xff]   ;;  %v13335_v35 = vld [vmem:[%s18796_s1 + $0x1fc] ss:$28 sps:$4 sm:$0xff]  }
   0xc   :  { %v13331_v32 = vld [vmem:[%s18796_s1 + $0x188] ss:$28 sps:$4 sm:$0xff]   ;;  %v13334_v34 = vld [vmem:[%s18796_s1 + $0x1c0] ss:$28 sps:$4 sm:$0xff]   ;;  %v13337_v37 = vld [vmem:[%s18796_s1 + $0x1f8] ss:$28 sps:$4 sm:$0xff]  }
   0xd   :  { %v13383_v36 = vld [vmem:[%s18795_s0 + $0x80] sm:$0xff]   ;;  %v13338_v38 = vld [vmem:[%s18796_s1 + $0x234] ss:$28 sps:$4 sm:$0xff]   ;;  %v13341_v40 = vld [vmem:[%s18796_s1 + $0x26c] ss:$28 sps:$4 sm:$0xff]  }
   0xe   :  { %4147 = vmatpush1.bf16.msra.mxu0 %v13295_v4  ;;  %v13340_v39 = vld [vmem:[%s18796_s1 + $0x230] ss:$28 sps:$4 sm:$0xff]   ;;  %v13343_v41 = vld [vmem:[%s18796_s1 + $0x268] ss:$28 sps:$4 sm:$0xff]   ;;  %v13346_v43 = vld [vmem:[%s18796_s1 + $0x2a0] ss:$28 sps:$4 sm:$0xff]  }
   0xf   :  { %4148 = vmatprep.subr.bf16.mxu0 %v18805_v1  ;;  %v13344_v42 = vld [vmem:[%s18796_s1 + $0x2a4] ss:$28 sps:$4 sm:$0xff]   ;;  %v13347_v44 = vld [vmem:[%s18796_s1 + $0x2dc] ss:$28 sps:$4 sm:$0xff]   ;;  %v13396_v45 = vld [vmem:[%s18795_s0 + $0x88] sm:$0xff]  }
  0x10   :  { %v13349_v46 = vld [vmem:[%s18796_s1 + $0x2d8] ss:$28 sps:$4 sm:$0xff]   ;;  %v13352_v48 = vld [vmem:[%s18796_s1 + $0x310] ss:$28 sps:$4 sm:$0xff]   ;;  %v13355_v50 = vld [vmem:[%s18796_s1 + $0x348] ss:$28 sps:$4 sm:$0xff]  }
  0x11   :  { %v13350_v47 = vld [vmem:[%s18796_s1 + $0x314] ss:$28 sps:$4 sm:$0xff]   ;;  %v13353_v49 = vld [vmem:[%s18796_s1 + $0x34c] ss:$28 sps:$4 sm:$0xff]   ;;  %v13356_v51 = vld [vmem:[%s18796_s1 + $0x384] ss:$28 sps:$4 sm:$0xff]  }
  0x12   :  { %4149 = vmatpush1.bf16.msra.mxu0 %v13296_v5  ;;  %v13358_v52 = vld [vmem:[%s18796_s1 + $0x380] ss:$28 sps:$4 sm:$0xff]   ;;  %v13409_v54 = vld [vmem:[%s18795_s0 + $0x90] sm:$0xff]   ;;  %v13365_v58 = vld [vmem:[%s18796_s1 + $0x42c] ss:$28 sps:$4 sm:$0xff]  }
  0x13   :  { %4150 = vmatprep.subr.bf16.mxu0 %v18805_v1  ;;  %v13359_v53 = vld [vmem:[%s18796_s1 + $0x3bc] ss:$28 sps:$4 sm:$0xff]   ;;  %v13362_v56 = vld [vmem:[%s18796_s1 + $0x3f4] ss:$28 sps:$4 sm:$0xff]   ;;  %v13367_v59 = vld [vmem:[%s18796_s1 + $0x428] ss:$28 sps:$4 sm:$0xff]  }
  0x14   :  { %v13361_v55 = vld [vmem:[%s18796_s1 + $0x3b8] ss:$28 sps:$4 sm:$0xff]   ;;  %v13364_v57 = vld [vmem:[%s18796_s1 + $0x3f0] ss:$28 sps:$4 sm:$0xff]   ;;  %v13368_v60 = vld [vmem:[%s18796_s1 + $0x464] ss:$28 sps:$4 sm:$0xff]  }
  0x15   :  { %v13370_v61 = vld [vmem:[%s18796_s1 + $0x460] ss:$28 sps:$4 sm:$0xff]   ;;  %v13373_v0 = vld [vmem:[%s18796_s1 + $0x498] ss:$28 sps:$4 sm:$0xff]   ;;  %v13376_v3 = vld [vmem:[%s18796_s1 + $0x4d0] ss:$28 sps:$4 sm:$0xff]  }
  0x16   :  { %4151 = vmatpush1.bf16.msra.mxu0 %v13297_v7  ;;  %v13371_v62 = vld [vmem:[%s18796_s1 + $0x49c] ss:$28 sps:$4 sm:$0xff]   ;;  %v13374_v2 = vld [vmem:[%s18796_s1 + $0x4d4] ss:$28 sps:$4 sm:$0xff]   ;;  %v13377_v4 = vld [vmem:[%s18796_s1 + $0x50c] ss:$28 sps:$4 sm:$0xff]  }
  0x17   :  { %4152 = vmatprep.subr.bf16.mxu0 %v18805_v1  ;;  %v13422_v63 = vld [vmem:[%s18795_s0 + $0x98] sm:$0xff]   ;;  %v13379_v5 = vld [vmem:[%s18796_s1 + $0x508] ss:$28 sps:$4 sm:$0xff]  }
  0x18   :  { %v13380_v6 = vld [vmem:[%s18796_s1 + $0x544] ss:$28 sps:$4 sm:$0xff]  }
  0x19   :  { %v13382_v7 = vld [vmem:[%s18796_s1 + $0x540] ss:$28 sps:$4 sm:$0xff]  }
  0x1a   :  { %4153 = vmatpush1.bf16.msra.mxu0 %v13298_v8  ;;  %v13384_v8 = vld [vmem:[%s18796_s1 + $0x57c] ss:$28 sps:$4 sm:$0xff]  }
  0x1b   :  { %4154 = vmatprep.subr.bf16.mxu0 %v18805_v1 }
  0x1e   :  { %4155 = vmatpush1.bf16.msra.mxu0 %v13299_v9  ;;  %v13435_v9 = vld [vmem:[%s18795_s0 + $0xa0] sm:$0xff]  }
  0x1f   :  { %4156 = vmatprep.subr.bf16.mxu0 %v18805_v1 }
  0x22   :  { %4157 = vmatpush1.bf16.msra.mxu0 %v13300_v10 }
  0x23   :  { %4158 = vmatprep.subr.bf16.mxu0 %v18805_v1 }
  0x26   :  { %4159 = vmatpush1.bf16.msra.mxu0 %v13301_v11 }
  0x27   :  { %4160 = vmatprep.subr.bf16.mxu0 %v18805_v1 }
  0x2a   :  { %4161 = vmatpush1.bf16.msra.mxu0 %v13302_v12 }
  0x2b   :  { %4162 = vmatprep.subr.bf16.mxu0 %v18805_v1 }
  0x2e   :  { %4163 = vmatpush1.bf16.msra.mxu0 %v13303_v13 }
  0x2f   :  { %4164 = vmatprep.subr.bf16.mxu0 %v18805_v1 }
  0x32   :  { %4165 = vmatpush1.bf16.msra.mxu0 %v13304_v14 }
  0x33   :  { %4166 = vmatprep.subr.bf16.mxu0 %v18805_v1 }
  0x36   :  { %4167 = vmatpush1.bf16.msra.mxu0 %v13305_v15 }
  0x37   :  { %4168 = vmatprep.subr.bf16.mxu0 %v18805_v1 }
  0x3a   :  { %4169 = vmatpush1.bf16.msra.mxu0 %v13306_v16 }
  0x3b   :  { %4170 = vmatprep.subr.bf16.mxu0 %v18805_v1 }
  0x3e   :  { %4171 = vmatpush1.bf16.msra.mxu0 %v13307_v17 }
  0x3f   :  { %4685 = vmatprep.subr.bf16.mxu0 %v18805_v1 }
  0x41   :  { %4173 = vmatmul.mubr.bf16.vlgmr.msra.gmra.mrb[0].mxu0 %v13308_v18 }
  0x42   :  { %4180 = vmatprep.mubr.bf16.mxu0 %v13311_v19  ;;  %4686 = vmatpush1.bf16.msra.mxu0 %v13383_v36 }
  0x43   :  { %4687 = vmatprep.subr.bf16.mxu0 %v18805_v1 }
  0x46   :  { %4688 = vmatpush1.bf16.msra.mxu0 %v13396_v45 }
  0x47   :  { %4689 = vmatprep.subr.bf16.mxu0 %v18805_v1 }
  0x49   :  { %4181 = vmatmul.mubr.bf16.gmra.mrb[4].mxu0 %v13313_v20 }
  0x4a   :  { %4188 = vmatprep.mubr.bf16.mxu0 %v13314_v21  ;;  %4690 = vmatpush1.bf16.msra.mxu0 %v13409_v54 }
  0x4b   :  { %4691 = vmatprep.subr.bf16.mxu0 %v18805_v1 }
  0x4e   :  { %4692 = vmatpush1.bf16.msra.mxu0 %v13422_v63 }
  0x4f   :  { %4693 = vmatprep.subr.bf16.mxu0 %v18805_v1 }
  0x51   :  { %4189 = vmatmul.mubr.bf16.gmra.mrb[8].mxu0 %v13316_v22 }
  0x52   :  { %4196 = vmatprep.mubr.bf16.mxu0 %v13317_v23  ;;  %4694 = vmatpush1.bf16.msra.mxu0 %v13435_v9 }
  0x59   :  { %4197 = vmatmul.mubr.bf16.gmra.mrb[12].mxu0 %v13319_v24 }
  0x5a   :  { %4204 = vmatprep.mubr.bf16.mxu0 %v13320_v25 }
  0x61   :  { %4205 = vmatmul.mubr.bf16.gmra.mrb[16].mxu0 %v13322_v26 }
  0x62   :  { %4212 = vmatprep.mubr.bf16.mxu0 %v13323_v27 }
  0x69   :  { %4213 = vmatmul.mubr.bf16.gmra.mrb[20].mxu0 %v13325_v28 }
  0x6a   :  { %4220 = vmatprep.mubr.bf16.mxu0 %v13326_v29 }
  0x71   :  { %4221 = vmatmul.mubr.bf16.gmra.mrb[24].mxu0 %v13328_v30 }
  0x72   :  { %4228 = vmatprep.mubr.bf16.mxu0 %v13329_v31 }
  0x79   :  { %4229 = vmatmul.mubr.bf16.gmra.mrb[28].mxu0 %v13331_v32 }
  0x7a   :  { %4236 = vmatprep.mubr.bf16.mxu0 %v13332_v33 }
  0x81   :  { %4237 = vmatmul.mubr.bf16.gmra.mrb[32].mxu0 %v13334_v34 }
  0x82   :  { %4244 = vmatprep.mubr.bf16.mxu0 %v13335_v35 }
  0x89   :  { %4245 = vmatmul.mubr.bf16.gmra.mrb[36].mxu0 %v13337_v37 }
  0x8a   :  { %4252 = vmatprep.mubr.bf16.mxu0 %v13338_v38 }
  0x91   :  { %4253 = vmatmul.mubr.bf16.gmra.mrb[40].mxu0 %v13340_v39 }
  0x92   :  { %4260 = vmatprep.mubr.bf16.mxu0 %v13341_v40 }
  0x99   :  { %4261 = vmatmul.mubr.bf16.gmra.mrb[44].mxu0 %v13343_v41 }
  0x9a   :  { %4268 = vmatprep.mubr.bf16.mxu0 %v13344_v42 }
  0xa1   :  { %4269 = vmatmul.mubr.bf16.gmra.mrb[48].mxu0 %v13346_v43 }
  0xa2   :  { %4276 = vmatprep.mubr.bf16.mxu0 %v13347_v44 }
  0xa9   :  { %4277 = vmatmul.mubr.bf16.gmra.mrb[52].mxu0 %v13349_v46 }
  0xaa   :  { %4284 = vmatprep.mubr.bf16.mxu0 %v13350_v47 }
  0xb1   :  { %4285 = vmatmul.mubr.bf16.gmra.mrb[56].mxu0 %v13352_v48 }
  0xb2   :  { %4292 = vmatprep.mubr.bf16.mxu0 %v13353_v49 }
  0xb9   :  { %4293 = vmatmul.mubr.bf16.gmra.mrb[60].mxu0 %v13355_v50 }
  0xba   :  { %4300 = vmatprep.mubr.bf16.mxu0 %v13356_v51 }
  0xc1   :  { %4301 = vmatmul.mubr.bf16.gmra.mrb[64].mxu0 %v13358_v52 }
  0xc2   :  { %4308 = vmatprep.mubr.bf16.mxu0 %v13359_v53 }
  0xc9   :  { %4309 = vmatmul.mubr.bf16.gmra.mrb[68].mxu0 %v13361_v55 }
  0xca   :  { %4316 = vmatprep.mubr.bf16.mxu0 %v13362_v56 }
  0xd1   :  { %4317 = vmatmul.mubr.bf16.gmra.mrb[72].mxu0 %v13364_v57 }
  0xd2   :  { %4324 = vmatprep.mubr.bf16.mxu0 %v13365_v58 }
  0xd9   :  { %4325 = vmatmul.mubr.bf16.gmra.mrb[76].mxu0 %v13367_v59 }
  0xda   :  { %4332 = vmatprep.mubr.bf16.mxu0 %v13368_v60 }
  0xe1   :  { %4333 = vmatmul.mubr.bf16.gmra.mrb[80].mxu0 %v13370_v61 }
  0xe2   :  { %4340 = vmatprep.mubr.bf16.mxu0 %v13371_v62 }
  0xe9   :  { %4341 = vmatmul.mubr.bf16.gmra.mrb[84].mxu0 %v13373_v0 }
  0xea   :  { %4348 = vmatprep.mubr.bf16.mxu0 %v13374_v2 }
  0xf1   :  { %4349 = vmatmul.mubr.bf16.gmra.mrb[88].mxu0 %v13376_v3 }
  0xf2   :  { %4356 = vmatprep.mubr.bf16.mxu0 %v13377_v4 }
  0xf9   :  { %4357 = vmatmul.mubr.bf16.gmra.mrb[92].mxu0 %v13379_v5 }
  0xfa   :  { %4364 = vmatprep.mubr.bf16.mxu0 %v13380_v6 }
 0x101   :  { %4365 = vmatmul.mubr.bf16.gmra.mrb[96].mxu0 %v13382_v7 }
 0x102   :  { %4372 = vmatprep.mubr.bf16.mxu0 %v13384_v8 }
 0x103   :  { %15 = vsyncpa [#allocation4], 0  ;;  %4695 = vmatprep.subr.bf16.mxu0 %v18805_v1  ;;  %v13386_v10 = vld [vmem:[%s18796_s1 + $0x578] ss:$28 sps:$4 sm:$0xff]   ;;  %v13389_v12 = vld [vmem:[%s18796_s1 + $0x5b0] ss:$28 sps:$4 sm:$0xff]  }
 0x104   :  { %v13387_v11 = vld [vmem:[%s18796_s1 + $0x5b4] ss:$28 sps:$4 sm:$0xff]   ;;  %v13390_v13 = vld [vmem:[%s18796_s1 + $0x5ec] ss:$28 sps:$4 sm:$0xff]   ;;  %v13393_v15 = vld [vmem:[%s18796_s1 + $0x624] ss:$28 sps:$4 sm:$0xff]  }
 0x105   :  { %v13392_v14 = vld [vmem:[%s18796_s1 + $0x5e8] ss:$28 sps:$4 sm:$0xff]   ;;  %v13395_v16 = vld [vmem:[%s18796_s1 + $0x620] ss:$28 sps:$4 sm:$0xff]   ;;  %v13399_v19 = vld [vmem:[%s18796_s1 + $0x658] ss:$28 sps:$4 sm:$0xff]  }
 0x106   :  { %v13397_v17 = vld [vmem:[%s18796_s1 + $0x65c] ss:$28 sps:$4 sm:$0xff]   ;;  %v13448_v18 = vld [vmem:[%s18795_s0 + $0xa8] sm:$0xff]   ;;  %v13400_v20 = vld [vmem:[%s18796_s1 + $0x694] ss:$28 sps:$4 sm:$0xff]   ;;  %vm3947_vm0 = vcmask 130048  }
 0x107   :  { %4696 = vmatpush1.bf16.msra.mxu0 %v13448_v18  ;;  %v13402_v21 = vld [vmem:[%s18796_s1 + $0x690] ss:$28 sps:$4 sm:$0xff]   ;;  %v13405_v23 = vld [vmem:[%s18796_s1 + $0x6c8] ss:$28 sps:$4 sm:$0xff]   ;;  %v13408_v25 = vld [vmem:[%s18796_s1 + $0x700] ss:$28 sps:$4 sm:$0xff]  }
 0x108   :  { %4697 = vmatprep.subr.bf16.mxu0 %v18805_v1  ;;  %v13403_v22 = vld [vmem:[%s18796_s1 + $0x6cc] ss:$28 sps:$4 sm:$0xff]   ;;  %v13406_v24 = vld [vmem:[%s18796_s1 + $0x704] ss:$28 sps:$4 sm:$0xff]   ;;  %v13410_v26 = vld [vmem:[%s18796_s1 + $0x73c] ss:$28 sps:$4 sm:$0xff]  }
 0x109   :  { %4373 = vmatmul.mubr.bf16.gmra.mrb[100].mxu0 %v13386_v10  ;;  %v13461_v27 = vld [vmem:[%s18795_s0 + $0xb0] sm:$0xff]   ;;  %v13416_v31 = vld [vmem:[%s18796_s1 + $0x7ac] ss:$28 sps:$4 sm:$0xff]   ;;  %v13419_v33 = vld [vmem:[%s18796_s1 + $0x7e4] ss:$28 sps:$4 sm:$0xff]   ;;  %s14106_s16 = smov [#allocation3]  }
 0x10a   :  { %4380 = vmatprep.mubr.bf16.mxu0 %v13387_v11  ;;  %v13412_v28 = vld [vmem:[%s18796_s1 + $0x738] ss:$28 sps:$4 sm:$0xff]   ;;  %v13415_v30 = vld [vmem:[%s18796_s1 + $0x770] ss:$28 sps:$4 sm:$0xff]   ;;  %v13418_v32 = vld [vmem:[%s18796_s1 + $0x7a8] ss:$28 sps:$4 sm:$0xff]  }
 0x10b   :  { %4698 = vmatpush1.bf16.msra.mxu0 %v13461_v27  ;;  %v13413_v29 = vld [vmem:[%s18796_s1 + $0x774] ss:$28 sps:$4 sm:$0xff]   ;;  %v13421_v34 = vld [vmem:[%s18796_s1 + $0x7e0] ss:$28 sps:$4 sm:$0xff]   ;;  %v13429_v40 = vld [vmem:[%s18796_s1 + $0x88c] ss:$28 sps:$4 sm:$0xff]  }
 0x10c   :  { %4699 = vmatprep.subr.bf16.mxu0 %v18805_v1  ;;  %v13423_v35 = vld [vmem:[%s18796_s1 + $0x81c] ss:$28 sps:$4 sm:$0xff]   ;;  %v13426_v38 = vld [vmem:[%s18796_s1 + $0x854] ss:$28 sps:$4 sm:$0xff]   ;;  %v13431_v41 = vld [vmem:[%s18796_s1 + $0x888] ss:$28 sps:$4 sm:$0xff]  }
 0x10d   :  { %v13474_v36 = vld [vmem:[%s18795_s0 + $0xb8] sm:$0xff]   ;;  %v13428_v39 = vld [vmem:[%s18796_s1 + $0x850] ss:$28 sps:$4 sm:$0xff]   ;;  %v13432_v42 = vld [vmem:[%s18796_s1 + $0x8c4] ss:$28 sps:$4 sm:$0xff]   ;;  %s10891_s17 = sshll.u32 %s14106_s16, 4  ;;  %s10892_s17 = int_to_ptr.vmem [resolvable:$true] %s10891_s17 }
 0x10e   :  { %v13425_v37 = vld [vmem:[%s18796_s1 + $0x818] ss:$28 sps:$4 sm:$0xff]   ;;  %v13434_v43 = vld [vmem:[%s18796_s1 + $0x8c0] ss:$28 sps:$4 sm:$0xff]   ;;  %v13441_v48 = vld [vmem:[%s18796_s1 + $0x930] ss:$28 sps:$4 sm:$0xff]   ;;  %p14086_p1 = scmp.lt.s32.totalorder %s10892_s17, %s10892_s17 }
 0x10f   :  { %4700 = vmatpush1.bf16.msra.mxu0 %v13474_v36  ;;  %v13436_v44 = vld [vmem:[%s18796_s1 + $0x8fc] ss:$28 sps:$4 sm:$0xff]   ;;  %v13487_v45 = vld [vmem:[%s18795_s0 + $0xc0] sm:$0xff]   ;;  %v13439_v47 = vld [vmem:[%s18796_s1 + $0x934] ss:$28 sps:$4 sm:$0xff]   ;;  %s14081_s18 = scalar_lea.vmem %s10892_s17, 16 }
 0x110   :  { %4701 = vmatprep.subr.bf16.mxu0 %v18805_v1  ;;  %v13438_v46 = vld [vmem:[%s18796_s1 + $0x8f8] ss:$28 sps:$4 sm:$0xff]   ;;  %v13442_v49 = vld [vmem:[%s18796_s1 + $0x96c] ss:$28 sps:$4 sm:$0xff]   ;;  %v13445_v51 = vld [vmem:[%s18796_s1 + $0x9a4] ss:$28 sps:$4 sm:$0xff]   ;;  %p14082_p0 = scmp.ne.s32.totalorder %s10892_s17, %s14081_s18 }
 0x111   :  { %4381 = vmatmul.mubr.bf16.gmra.mrb[104].mxu0 %v13389_v12  ;;  %v13444_v50 = vld [vmem:[%s18796_s1 + $0x968] ss:$28 sps:$4 sm:$0xff]   ;;  %v13447_v52 = vld [vmem:[%s18796_s1 + $0x9a0] ss:$28 sps:$4 sm:$0xff]   ;;  %v13451_v55 = vld [vmem:[%s18796_s1 + $0x9d8] ss:$28 sps:$4 sm:$0xff]  }
 0x112   :  { %4388 = vmatprep.mubr.bf16.mxu0 %v13390_v13  ;;  %v13449_v53 = vld [vmem:[%s18796_s1 + $0x9dc] ss:$28 sps:$4 sm:$0xff]   ;;  %v13500_v54 = vld [vmem:[%s18795_s0 + $0xc8] sm:$0xff]   ;;  %v13452_v56 = vld [vmem:[%s18796_s1 + $0xa14] ss:$28 sps:$4 sm:$0xff]   ;;  %s14085_s19 = scalar_lea.vmem %s10892_s17, 32 }
 0x113   :  { %4702 = vmatpush1.bf16.msra.mxu0 %v13487_v45  ;;  %v13504_v57 = vld [vmem:[%s18795_s0 + $0xd0] sm:$0xff]   ;;  %v13505_v58 = vld [vmem:[%s18795_s0 + $0xd8] sm:$0xff]   ;;  %v13455_v60 = vld [vmem:[%s18796_s1 + $0xa4c] ss:$28 sps:$4 sm:$0xff]   ;;  %p14087_p2 = scmp.lt.s32.totalorder %s14085_s19, %s14081_s18 }
 0x114   :  { %4703 = vmatprep.subr.bf16.mxu0 %v18805_v1  ;;  %v13454_v59 = vld [vmem:[%s18796_s1 + $0xa10] ss:$28 sps:$4 sm:$0xff]   ;;  %v13509_v61 = vld [vmem:[%s18795_s0 + $0xe0] sm:$0xff]   ;;  %v13515_v3 = vld [vmem:[%s18795_s0 + $0xf8] sm:$0xff]  }
 0x115   :  { %v13510_v62 = vld [vmem:[%s18795_s0 + $0xe8] sm:$0xff]   ;;  %v13458_v0 = vld [vmem:[%s18796_s1 + $0xa84] ss:$28 sps:$4 sm:$0xff]   ;;  %v13514_v2 = vld [vmem:[%s18795_s0 + $0xf0] sm:$0xff]   ;;  %p14088_p3 = por %p14087_p2, %p14086_p1 }
 0x116   :  { %v13457_v63 = vld [vmem:[%s18796_s1 + $0xa48] ss:$28 sps:$4 sm:$0xff]   ;;  %v13460_v4 = vld [vmem:[%s18796_s1 + $0xa80] ss:$28 sps:$4 sm:$0xff]   ;;  %v13464_v6 = vld [vmem:[%s18796_s1 + $0xab8] ss:$28 sps:$4 sm:$0xff]  }
 0x117   :  { %4704 = vmatpush1.bf16.msra.mxu0 %v13500_v54  ;;  %v13462_v5 = vld [vmem:[%s18796_s1 + $0xabc] ss:$28 sps:$4 sm:$0xff]   ;;  %v13465_v7 = vld [vmem:[%s18796_s1 + $0xaf4] ss:$28 sps:$4 sm:$0xff]   ;;  %v13468_v9 = vld [vmem:[%s18796_s1 + $0xb2c] ss:$28 sps:$4 sm:$0xff]   ;;  %p14089_p4 = pnand %p14088_p3, %p14082_p0 }
 0x118   :  { %4705 = vmatprep.subr.bf16.mxu0 %v18805_v1  ;;  %v13467_v8 = vld [vmem:[%s18796_s1 + $0xaf0] ss:$28 sps:$4 sm:$0xff]   ;;  %v13470_v10 = vld [vmem:[%s18796_s1 + $0xb28] ss:$28 sps:$4 sm:$0xff]   ;;  %v13473_v12 = vld [vmem:[%s18796_s1 + $0xb60] ss:$28 sps:$4 sm:$0xff]  }
 0x119   :  { %4389 = vmatmul.mubr.bf16.gmra.mrb[108].mxu0 %v13392_v14  ;;  %v13471_v11 = vld [vmem:[%s18796_s1 + $0xb64] ss:$28 sps:$4 sm:$0xff]   ;;  %v13475_v13 = vld [vmem:[%s18796_s1 + $0xb9c] ss:$28 sps:$4 sm:$0xff]   ;;  %v13527_v45 = vld [vmem:[%s18796_s1 + $0xb0] ss:$28 sps:$4 sm:$0xff]  }
 0x11a   :  { %4396 = vmatprep.mubr.bf16.mxu0 %v13393_v15  ;;  %v13477_v14 = vld [vmem:[%s18796_s1 + $0xb98] ss:$28 sps:$4 sm:$0xff]   ;;  %v13483_v18 = vld [vmem:[%s18796_s1 + $0xc08] ss:$28 sps:$4 sm:$0xff]  }
 0x11b   :  { %4706 = vmatpush1.bf16.msra.mxu0 %v13504_v57  ;;  %v13478_v15 = vld [vmem:[%s18796_s1 + $0xbd4] ss:$28 sps:$4 sm:$0xff]   ;;  %v13497_v27 = vld [vmem:[%s18796_s1 + $0xd24] ss:$28 sps:$4 sm:$0xff]  }
 0x11c   :  { %4707 = vmatprep.subr.bf16.mxu0 %v18805_v1  ;;  %v13516_v36 = vld [vmem:[%s18796_s1 + $0x8] ss:$28 sps:$4 sm:$0xff]   ;;  %v13533_v57 = vld [vmem:[%s18796_s1 + $0x120] ss:$28 sps:$4 sm:$0xff]  }
 0x11d   :  { %v653_v54 = vld [vmem:[%s18797_s2 + $0x40] sm:$0xff] }
 0x11f   :  { %4708 = vmatpush1.bf16.msra.mxu0 %v13505_v58  ;;  %v13534_v58 = vld [vmem:[%s18796_s1 + $0x15c] ss:$28 sps:$4 sm:$0xff]  }
 0x120   :  { %4709 = vmatprep.subr.bf16.mxu0 %v18805_v1 }
 0x121   :  { %4397 = vmatmul.mubr.bf16.gmra.mrb[112].mxu0 %v13395_v16  ;;  %v13480_v16 = vld [vmem:[%s18796_s1 + $0xbd0] ss:$28 sps:$4 sm:$0xff]  }
 0x122   :  { %4404 = vmatprep.mubr.bf16.mxu0 %v13397_v17  ;;  %v13481_v17 = vld [vmem:[%s18796_s1 + $0xc0c] ss:$28 sps:$4 sm:$0xff]  }
 0x123   :  { %4710 = vmatpush1.bf16.msra.mxu0 %v13509_v61  ;;  %v658_v61 = vld [vmem:[%s18797_s2 + $0x68] sm:$0xff] }
 0x124   :  { %4711 = vmatprep.subr.bf16.mxu0 %v18805_v1 }
 0x127   :  { %4712 = vmatpush1.bf16.msra.mxu0 %v13510_v62  ;;  %v659_v62 = vld [vmem:[%s18797_s2 + $0x70] sm:$0xff] }
 0x128   :  { %4713 = vmatprep.subr.bf16.mxu0 %v18805_v1 }
 0x129   :  { %4405 = vmatmul.mubr.bf16.gmra.mrb[116].mxu0 %v13399_v19  ;;  %v13484_v19 = vld [vmem:[%s18796_s1 + $0xc44] ss:$28 sps:$4 sm:$0xff]  }
 0x12a   :  { %4412 = vmatprep.mubr.bf16.mxu0 %v13400_v20  ;;  %v13486_v20 = vld [vmem:[%s18796_s1 + $0xc40] ss:$28 sps:$4 sm:$0xff]  }
 0x12b   :  { %4714 = vmatpush1.bf16.msra.mxu0 %v13514_v2  ;;  %v660_v2 = vld [vmem:[%s18797_s2 + $0x78] sm:$0xff] }
 0x12c   :  { %4715 = vmatprep.subr.bf16.mxu0 %v18805_v1 }
 0x12f   :  { %4716 = vmatpush1.bf16.msra.mxu0 %v13515_v3  ;;  %v661_v3 = vld [vmem:[%s18797_s2 + $0x80] sm:$0xff] }
 0x130   :  { %5230 = vmatprep.subr.bf16.mxu0 %v18805_v1 }
 0x131   :  { %4413 = vmatmul.mubr.bf16.gmra.mrb[120].mxu0 %v13402_v21  ;;  %v13488_v21 = vld [vmem:[%s18796_s1 + $0xc7c] ss:$28 sps:$4 sm:$0xff]  }
 0x132   :  { %4420 = vmatprep.mubr.bf16.mxu0 %v13403_v22  ;;  %v13490_v22 = vld [vmem:[%s18796_s1 + $0xc78] ss:$28 sps:$4 sm:$0xff]  }
 0x139   :  { %4421 = vmatmul.mubr.bf16.gmra.mrb[124].mxu0 %v13405_v23  ;;  %v13491_v23 = vld [vmem:[%s18796_s1 + $0xcb4] ss:$28 sps:$4 sm:$0xff]  }
 0x13a   :  { %4428 = vmatprep.mubr.bf16.mxu0 %v13406_v24  ;;  %v13493_v24 = vld [vmem:[%s18796_s1 + $0xcb0] ss:$28 sps:$4 sm:$0xff]  }
 0x141   :  { %4429 = vmatmul.mubr.bf16.gmra.mrb[128].mxu0 %v13408_v25  ;;  %v13494_v25 = vld [vmem:[%s18796_s1 + $0xcec] ss:$28 sps:$4 sm:$0xff]  }
 0x142   :  { %4436 = vmatprep.mubr.bf16.mxu0 %v13410_v26  ;;  %v13496_v26 = vld [vmem:[%s18796_s1 + $0xce8] ss:$28 sps:$4 sm:$0xff]  }
 0x149   :  { %4437 = vmatmul.mubr.bf16.gmra.mrb[132].mxu0 %v13412_v28  ;;  %v13499_v28 = vld [vmem:[%s18796_s1 + $0xd20] ss:$28 sps:$4 sm:$0xff]  }
 0x14a   :  { %4444 = vmatprep.mubr.bf16.mxu0 %v13413_v29  ;;  %v13501_v29 = vld [vmem:[%s18796_s1 + $0xd5c] ss:$28 sps:$4 sm:$0xff]  }
 0x151   :  { %4445 = vmatmul.mubr.bf16.gmra.mrb[136].mxu0 %v13415_v30  ;;  %v13503_v30 = vld [vmem:[%s18796_s1 + $0xd58] ss:$28 sps:$4 sm:$0xff]  }
 0x152   :  { %4452 = vmatprep.mubr.bf16.mxu0 %v13416_v31  ;;  %v13506_v31 = vld [vmem:[%s18796_s1 + $0xd94] ss:$28 sps:$4 sm:$0xff]  }
 0x159   :  { %4453 = vmatmul.mubr.bf16.gmra.mrb[140].mxu0 %v13418_v32  ;;  %v13508_v32 = vld [vmem:[%s18796_s1 + $0xd90] ss:$28 sps:$4 sm:$0xff]  }
 0x15a   :  { %4460 = vmatprep.mubr.bf16.mxu0 %v13419_v33  ;;  %v13511_v33 = vld [vmem:[%s18796_s1 + $0xdcc] ss:$28 sps:$4 sm:$0xff]  }
 0x161   :  { %4461 = vmatmul.mubr.bf16.gmra.mrb[144].mxu0 %v13421_v34  ;;  %v13513_v34 = vld [vmem:[%s18796_s1 + $0xdc8] ss:$28 sps:$4 sm:$0xff]  }
 0x162   :  { %4468 = vmatprep.mubr.bf16.mxu0 %v13423_v35  ;;  %v13518_v35 = vld [vmem:[%s18796_s1 + $0xc] ss:$28 sps:$4 sm:$0xff]  }
 0x169   :  { %4469 = vmatmul.mubr.bf16.gmra.mrb[148].mxu0 %v13425_v37  ;;  %v13519_v37 = vld [vmem:[%s18796_s1 + $0x44] ss:$28 sps:$4 sm:$0xff]  }
 0x16a   :  { %4476 = vmatprep.mubr.bf16.mxu0 %v13426_v38  ;;  %v13521_v38 = vld [vmem:[%s18796_s1 + $0x40] ss:$28 sps:$4 sm:$0xff]  }
 0x171   :  { %4477 = vmatmul.mubr.bf16.gmra.mrb[152].mxu0 %v13428_v39  ;;  %v13522_v39 = vld [vmem:[%s18796_s1 + $0x7c] ss:$28 sps:$4 sm:$0xff]  }
 0x172   :  { %4484 = vmatprep.mubr.bf16.mxu0 %v13429_v40  ;;  %v13524_v40 = vld [vmem:[%s18796_s1 + $0x78] ss:$28 sps:$4 sm:$0xff]  }
 0x179   :  { %4485 = vmatmul.mubr.bf16.gmra.mrb[156].mxu0 %v13431_v41  ;;  %v13525_v41 = vld [vmem:[%s18796_s1 + $0xb4] ss:$28 sps:$4 sm:$0xff]  }
 0x17a   :  { %4492 = vmatprep.mubr.bf16.mxu0 %v13432_v42  ;;  %v645_v42 = vld [vmem:[%s18797_s2] sm:$0xff] }
 0x17b   :  { %775 = vperm.xlu0 %13290, %v645_v42   ;;  %v686_v42 = vld [vmem:[%s18797_s2 + $0x148] sm:$0xff] }
 0x181   :  { %4493 = vmatmul.mubr.bf16.gmra.mrb[160].mxu0 %v13434_v43  ;;  %v647_v43 = vld [vmem:[%s18797_s2 + $0x10] sm:$0xff] }
 0x182   :  { %4500 = vmatprep.mubr.bf16.mxu0 %v13436_v44  ;;  %785 = vperm.xlu1 %13291, %v647_v43   ;;  %v646_v44 = vld [vmem:[%s18797_s2 + $0x8] sm:$0xff]  ;;  %v687_v43 = vld [vmem:[%s18797_s2 + $0x150] sm:$0xff] }
 0x183   :  { %780 = vperm.xlu0 %13290, %v646_v44   ;;  %v13557_v44 = vld [vmem:[%s18796_s1 + $0x2e0] ss:$28 sps:$4 sm:$0xff]  }
 0x189   :  { %4501 = vmatmul.mubr.bf16.gmra.mrb[164].mxu0 %v13438_v46  ;;  %v13528_v46 = vld [vmem:[%s18796_s1 + $0xec] ss:$28 sps:$4 sm:$0xff]  }
 0x18a   :  { %4508 = vmatprep.mubr.bf16.mxu0 %v13439_v47  ;;  %v648_v47 = vld [vmem:[%s18797_s2 + $0x18] sm:$0xff] }
 0x18b   :  { %790 = vperm.xlu1 %13291, %v648_v47   ;;  %v689_v47 = vld [vmem:[%s18797_s2 + $0x160] sm:$0xff] }
 0x191   :  { %4509 = vmatmul.mubr.bf16.gmra.mrb[168].mxu0 %v13441_v48  ;;  %v649_v48 = vld [vmem:[%s18797_s2 + $0x20] sm:$0xff] }
 0x192   :  { %4516 = vmatprep.mubr.bf16.mxu0 %v13442_v49  ;;  %795 = vperm.xlu0 %13290, %v649_v48   ;;  %v650_v49 = vld [vmem:[%s18797_s2 + $0x28] sm:$0xff] }
 0x193   :  { %800 = vperm.xlu1 %13291, %v650_v49   ;;  %v690_v48 = vld [vmem:[%s18797_s2 + $0x168] sm:$0xff]  ;;  %v691_v49 = vld [vmem:[%s18797_s2 + $0x170] sm:$0xff] }
 0x199   :  { %4517 = vmatmul.mubr.bf16.gmra.mrb[172].mxu0 %v13444_v50  ;;  %v651_v50 = vld [vmem:[%s18797_s2 + $0x30] sm:$0xff] }
 0x19a   :  { %4524 = vmatprep.mubr.bf16.mxu0 %v13445_v51  ;;  %v13530_v51 = vld [vmem:[%s18796_s1 + $0xe8] ss:$28 sps:$4 sm:$0xff]   ;;  %805 = vperm.xlu0 %13290, %v651_v50   ;;  %v13560_v50 = vld [vmem:[%s18796_s1 + $0x318] ss:$28 sps:$4 sm:$0xff]  }
 0x19e   :  { %815 = vperm.xlu0 %13290, %v653_v54   ;;  %v694_v54 = vld [vmem:[%s18797_s2 + $0x188] sm:$0xff] }
 0x1a1   :  { %4525 = vmatmul.mubr.bf16.gmra.mrb[176].mxu0 %v13447_v52  ;;  %v13531_v52 = vld [vmem:[%s18796_s1 + $0x124] ss:$28 sps:$4 sm:$0xff]  }
 0x1a2   :  { %4532 = vmatprep.mubr.bf16.mxu0 %v13449_v53  ;;  %v652_v53 = vld [vmem:[%s18797_s2 + $0x38] sm:$0xff] }
 0x1a3   :  { %810 = vperm.xlu1 %13291, %v652_v53   ;;  %v693_v53 = vld [vmem:[%s18797_s2 + $0x180] sm:$0xff] }
 0x1a9   :  { %4533 = vmatmul.mubr.bf16.gmra.mrb[180].mxu0 %v13451_v55  ;;  %v654_v55 = vld [vmem:[%s18797_s2 + $0x48] sm:$0xff] }
 0x1aa   :  { %4540 = vmatprep.mubr.bf16.mxu0 %v13452_v56  ;;  %v655_v56 = vld [vmem:[%s18797_s2 + $0x50] sm:$0xff]  ;;  %820 = vperm.xlu1 %13291, %v654_v55  }
 0x1ab   :  { %825 = vperm.xlu0 %13290, %v655_v56   ;;  %v695_v55 = vld [vmem:[%s18797_s2 + $0x190] sm:$0xff] }
 0x1ac   :  { %v13563_v56 = vld [vmem:[%s18796_s1 + $0x350] ss:$28 sps:$4 sm:$0xff]  }
 0x1b1   :  { %4541 = vmatmul.mubr.bf16.gmra.mrb[184].mxu0 %v13454_v59  ;;  %v656_v59 = vld [vmem:[%s18797_s2 + $0x58] sm:$0xff] }
 0x1b2   :  { %4548 = vmatprep.mubr.bf16.mxu0 %v13455_v60  ;;  %v657_v60 = vld [vmem:[%s18797_s2 + $0x60] sm:$0xff]  ;;  %830 = vperm.xlu1 %13291, %v656_v59  }
 0x1b3   :  { %835 = vperm.xlu0 %13290, %v657_v60   ;;  %v697_v59 = vld [vmem:[%s18797_s2 + $0x1a0] sm:$0xff]  ;;  %v698_v60 = vld [vmem:[%s18797_s2 + $0x1a8] sm:$0xff] }
 0x1b6   :  { %840 = vperm.xlu1 %13291, %v658_v61   ;;  %v699_v61 = vld [vmem:[%s18797_s2 + $0x1b0] sm:$0xff] }
 0x1b7   :  { %845 = vperm.xlu0 %13290, %v659_v62   ;;  %v13566_v62 = vld [vmem:[%s18796_s1 + $0x388] ss:$28 sps:$4 sm:$0xff]  }
 0x1b9   :  { %4549 = vmatmul.mubr.bf16.gmra.mrb[188].mxu0 %v13457_v63  ;;  %v13536_v63 = vld [vmem:[%s18796_s1 + $0x158] ss:$28 sps:$4 sm:$0xff]  }
 0x1ba   :  { %4556 = vmatprep.mubr.bf16.mxu0 %v13458_v0  ;;  %v13537_v0 = vld [vmem:[%s18796_s1 + $0x194] ss:$28 sps:$4 sm:$0xff]   ;;  %850 = vperm.xlu1 %13291, %v660_v2   ;;  %v701_v2 = vld [vmem:[%s18797_s2 + $0x1c0] sm:$0xff] }
 0x1bb   :  { %855 = vperm.xlu0 %13290, %v661_v3   ;;  %v13617_v3 = vld [vmem:[%s18795_s0 + $0x110] sm:$0xff]  }
 0x1c1   :  { %4557 = vmatmul.mubr.bf16.gmra.mrb[192].mxu0 %v13460_v4  ;;  %v662_v4 = vld [vmem:[%s18797_s2 + $0x88] sm:$0xff] }
 0x1c2   :  { %4564 = vmatprep.mubr.bf16.mxu0 %v13462_v5  ;;  %v663_v5 = vld [vmem:[%s18797_s2 + $0x90] sm:$0xff]  ;;  %860 = vperm.xlu1 %13291, %v662_v4   ;;  %v702_v4 = vld [vmem:[%s18797_s2 + $0x1c8] sm:$0xff] }
 0x1c3   :  { %865 = vperm.xlu0 %13290, %v663_v5   ;;  %v703_v5 = vld [vmem:[%s18797_s2 + $0x1d0] sm:$0xff] }
 0x1c9   :  { %4565 = vmatmul.mubr.bf16.gmra.mrb[196].mxu0 %v13464_v6  ;;  %v13539_v6 = vld [vmem:[%s18796_s1 + $0x190] ss:$28 sps:$4 sm:$0xff]  }
 0x1ca   :  { %4572 = vmatprep.mubr.bf16.mxu0 %v13465_v7  ;;  %v13540_v7 = vld [vmem:[%s18796_s1 + $0x1cc] ss:$28 sps:$4 sm:$0xff]  }
 0x1d1   :  { %4573 = vmatmul.mubr.bf16.gmra.mrb[200].mxu0 %v13467_v8  ;;  %v664_v8 = vld [vmem:[%s18797_s2 + $0x98] sm:$0xff] }
 0x1d2   :  { %4580 = vmatprep.mubr.bf16.mxu0 %v13468_v9  ;;  %v665_v9 = vld [vmem:[%s18797_s2 + $0xa0] sm:$0xff]  ;;  %870 = vperm.xlu1 %13291, %v664_v8   ;;  %v704_v8 = vld [vmem:[%s18797_s2 + $0x1d8] sm:$0xff] }
 0x1d3   :  { %875 = vperm.xlu0 %13290, %v665_v9   ;;  %v705_v9 = vld [vmem:[%s18797_s2 + $0x1e0] sm:$0xff] }
 0x1d9   :  { %4581 = vmatmul.mubr.bf16.gmra.mrb[204].mxu0 %v13470_v10  ;;  %v666_v10 = vld [vmem:[%s18797_s2 + $0xa8] sm:$0xff] }
 0x1da   :  { %4588 = vmatprep.mubr.bf16.mxu0 %v13471_v11  ;;  %v667_v11 = vld [vmem:[%s18797_s2 + $0xb0] sm:$0xff]  ;;  %880 = vperm.xlu1 %13291, %v666_v10   ;;  %v706_v10 = vld [vmem:[%s18797_s2 + $0x1e8] sm:$0xff] }
 0x1db   :  { %885 = vperm.xlu0 %13290, %v667_v11   ;;  %v707_v11 = vld [vmem:[%s18797_s2 + $0x1f0] sm:$0xff] }
 0x1e1   :  { %4589 = vmatmul.mubr.bf16.gmra.mrb[208].mxu0 %v13473_v12  ;;  %v13542_v12 = vld [vmem:[%s18796_s1 + $0x1c8] ss:$28 sps:$4 sm:$0xff]  }
 0x1e2   :  { %4596 = vmatprep.mubr.bf16.mxu0 %v13475_v13  ;;  %v13543_v13 = vld [vmem:[%s18796_s1 + $0x204] ss:$28 sps:$4 sm:$0xff]  }
 0x1e9   :  { %4597 = vmatmul.mubr.bf16.gmra.mrb[212].mxu0 %v13477_v14  ;;  %v668_v14 = vld [vmem:[%s18797_s2 + $0xb8] sm:$0xff] }
 0x1ea   :  { %4604 = vmatprep.mubr.bf16.mxu0 %v13478_v15  ;;  %v669_v15 = vld [vmem:[%s18797_s2 + $0xc0] sm:$0xff]  ;;  %890 = vperm.xlu1 %13291, %v668_v14  }
 0x1eb   :  { %895 = vperm.xlu0 %13290, %v669_v15   ;;  %v708_v15 = vld [vmem:[%s18797_s2 + $0x1f8] sm:$0xff] }
 0x1f1   :  { %4605 = vmatmul.mubr.bf16.gmra.mrb[216].mxu0 %v13480_v16  ;;  %v13591_v16 = vld [vmem:[%s18795_s0 + $0x100] sm:$0xff]  }
 0x1f2   :  { %4612 = vmatprep.mubr.bf16.mxu0 %v13481_v17  ;;  %v670_v17 = vld [vmem:[%s18797_s2 + $0xc8] sm:$0xff] }
 0x1f3   :  { %900 = vperm.xlu1 %13291, %v670_v17  }
 0x1f9   :  { %4613 = vmatmul.mubr.bf16.gmra.mrb[220].mxu0 %v13483_v18  ;;  %v671_v18 = vld [vmem:[%s18797_s2 + $0xd0] sm:$0xff] }
 0x1fa   :  { %4620 = vmatprep.mubr.bf16.mxu0 %v13484_v19  ;;  %v13545_v19 = vld [vmem:[%s18796_s1 + $0x200] ss:$28 sps:$4 sm:$0xff]   ;;  %905 = vperm.xlu0 %13290, %v671_v18   ;;  %v14990_v14 = vpop.permute.xlu0 %775  ;;  %v710_v18 = vld [vmem:[%s18797_s2 + $0x208] sm:$0xff] }
 0x201   :  { %4621 = vmatmul.mubr.bf16.gmra.mrb[224].mxu0 %v13486_v20  ;;  %v13546_v20 = vld [vmem:[%s18796_s1 + $0x23c] ss:$28 sps:$4 sm:$0xff]   ;;  %v14998_v17 = vpop.permute.xlu1 %785 }
 0x202   :  { %4628 = vmatprep.mubr.bf16.mxu0 %v13488_v21  ;;  %v672_v21 = vld [vmem:[%s18797_s2 + $0xd8] sm:$0xff] }
 0x203   :  { %910 = vperm.xlu1 %13291, %v672_v21   ;;  %v15009_v21 = vpop.permute.xlu0 %780 }
 0x209   :  { %4629 = vmatmul.mubr.bf16.gmra.mrb[228].mxu0 %v13490_v22  ;;  %v673_v22 = vld [vmem:[%s18797_s2 + $0xe0] sm:$0xff] }
 0x20a   :  { %4636 = vmatprep.mubr.bf16.mxu0 %v13491_v23  ;;  %915 = vperm.xlu0 %13290, %v673_v22   ;;  %v674_v23 = vld [vmem:[%s18797_s2 + $0xe8] sm:$0xff] }
 0x20b   :  { %920 = vperm.xlu1 %13291, %v674_v23   ;;  %v13576_v22 = vld [vmem:[%s18796_s1 + $0x46c] ss:$28 sps:$4 sm:$0xff]   ;;  %v15014_v23 = vpop.permute.xlu1 %790 }
 0x211   :  { %4637 = vmatmul.mubr.bf16.gmra.mrb[232].mxu0 %v13493_v24  ;;  %v675_v24 = vld [vmem:[%s18797_s2 + $0xf0] sm:$0xff] }
 0x212   :  { %4644 = vmatprep.mubr.bf16.mxu0 %v13494_v25  ;;  %v13548_v25 = vld [vmem:[%s18796_s1 + $0x238] ss:$28 sps:$4 sm:$0xff]   ;;  %925 = vperm.xlu0 %13290, %v675_v24  }
 0x213   :  { %v712_v24 = vld [vmem:[%s18797_s2 + $0x218] sm:$0xff] }
 0x219   :  { %4645 = vmatmul.mubr.bf16.gmra.mrb[236].mxu0 %v13496_v26  ;;  %v13549_v26 = vld [vmem:[%s18796_s1 + $0x274] ss:$28 sps:$4 sm:$0xff]  }
 0x21a   :  { %4652 = vmatprep.mubr.bf16.mxu0 %v13497_v27  ;;  %v676_v27 = vld [vmem:[%s18797_s2 + $0xf8] sm:$0xff] }
 0x21b   :  { %930 = vperm.xlu1 %13291, %v676_v27   ;;  %v714_v27 = vld [vmem:[%s18797_s2 + $0x228] sm:$0xff] }
 0x221   :  { %4653 = vmatmul.mubr.bf16.gmra.mrb[240].mxu0 %v13499_v28  ;;  %v677_v28 = vld [vmem:[%s18797_s2 + $0x100] sm:$0xff] }
 0x222   :  { %4660 = vmatprep.mubr.bf16.mxu0 %v13501_v29  ;;  %935 = vperm.xlu0 %13290, %v677_v28   ;;  %v678_v29 = vld [vmem:[%s18797_s2 + $0x108] sm:$0xff]  ;;  %v715_v28 = vld [vmem:[%s18797_s2 + $0x230] sm:$0xff] }
 0x223   :  { %940 = vperm.xlu1 %13291, %v678_v29   ;;  %v13578_v29 = vld [vmem:[%s18796_s1 + $0x468] ss:$28 sps:$4 sm:$0xff]  }
 0x229   :  { %4661 = vmatmul.mubr.bf16.gmra.mrb[244].mxu0 %v13503_v30  ;;  %v679_v30 = vld [vmem:[%s18797_s2 + $0x110] sm:$0xff] }
 0x22a   :  { %4668 = vmatprep.mubr.bf16.mxu0 %v13506_v31  ;;  %v13551_v31 = vld [vmem:[%s18796_s1 + $0x270] ss:$28 sps:$4 sm:$0xff]   ;;  %945 = vperm.xlu0 %13290, %v679_v30   ;;  %v15033_v30 = vpop.permute.xlu1 %800 }
 0x231   :  { %4669 = vmatmul.mubr.bf16.gmra.mrb[248].mxu0 %v13508_v32  ;;  %v13552_v32 = vld [vmem:[%s18796_s1 + $0x2ac] ss:$28 sps:$4 sm:$0xff]  }
 0x232   :  { %4676 = vmatprep.mubr.bf16.mxu0 %v13511_v33  ;;  %v680_v33 = vld [vmem:[%s18797_s2 + $0x118] sm:$0xff] }
 0x233   :  { %950 = vperm.xlu1 %13291, %v680_v33   ;;  %v15040_v33 = vpop.permute.xlu1 %810 }
 0x239   :  { %4677 = vmatmul.mubr.bf16.gmra.mrb[252].mxu0 %v13513_v34  ;;  %v681_v34 = vld [vmem:[%s18797_s2 + $0x120] sm:$0xff] }
 0x23a   :  { %4717 = vmatprep.mubr.bf16.mxu0 %v13518_v35  ;;  %955 = vperm.xlu0 %13290, %v681_v34   ;;  %v682_v35 = vld [vmem:[%s18797_s2 + $0x128] sm:$0xff]  ;;  %v716_v34 = vld [vmem:[%s18797_s2 + $0x238] sm:$0xff] }
 0x23b   :  { %960 = vperm.xlu1 %13291, %v682_v35   ;;  %v717_v35 = vld [vmem:[%s18797_s2 + $0x240] sm:$0xff] }
 0x241   :  { %4718 = vmatmul.mubr.bf16.vlgmr.msra.gmra.mrb[0].mxu0 %v13516_v36  ;;  %v683_v36 = vld [vmem:[%s18797_s2 + $0x130] sm:$0xff] }
 0x242   :  { %4725 = vmatprep.mubr.bf16.mxu0 %v13519_v37  ;;  %5231 = vmatpush1.bf16.msra.mxu0 %v13591_v16  ;;  %v13554_v37 = vld [vmem:[%s18796_s1 + $0x2a8] ss:$28 sps:$4 sm:$0xff]  }
 0x243   :  { %5232 = vmatprep.subr.bf16.mxu0 %v18805_v1  ;;  %965 = vperm.xlu0 %13290, %v683_v36   ;;  %v709_v16 = vld [vmem:[%s18797_s2 + $0x200] sm:$0xff]  ;;  %v13630_v36 = vld [vmem:[%s18795_s0 + $0x118] sm:$0xff]  }
 0x249   :  { %4726 = vmatmul.mubr.bf16.gmra.mrb[4].mxu0 %v13521_v38  ;;  %v13555_v38 = vld [vmem:[%s18796_s1 + $0x2e4] ss:$28 sps:$4 sm:$0xff]  }
 0x24a   :  { %4733 = vmatprep.mubr.bf16.mxu0 %v13522_v39  ;;  %v684_v39 = vld [vmem:[%s18797_s2 + $0x138] sm:$0xff] }
 0x24b   :  { %970 = vperm.xlu1 %13291, %v684_v39   ;;  %v719_v39 = vld [vmem:[%s18797_s2 + $0x250] sm:$0xff] }
 0x24f   :  { %980 = vperm.xlu1 %13291, %v686_v42   ;;  %v13582_v42 = vld [vmem:[%s18796_s1 + $0x4dc] ss:$28 sps:$4 sm:$0xff]  }
 0x251   :  { %4734 = vmatmul.mubr.bf16.gmra.mrb[8].mxu0 %v13524_v40  ;;  %v685_v40 = vld [vmem:[%s18797_s2 + $0x140] sm:$0xff] }
 0x252   :  { %4741 = vmatprep.mubr.bf16.mxu0 %v13525_v41  ;;  %v13604_v41 = vld [vmem:[%s18795_s0 + $0x108] sm:$0xff]   ;;  %975 = vperm.xlu0 %13290, %v685_v40   ;;  %v13581_v40 = vld [vmem:[%s18796_s1 + $0x4a0] ss:$28 sps:$4 sm:$0xff]  }
 0x253   :  { %5233 = vmatpush1.bf16.msra.mxu0 %v13604_v41  ;;  %v15063_v41 = vpop.permute.xlu1 %820 }
 0x254   :  { %5234 = vmatprep.subr.bf16.mxu0 %v18805_v1 }
 0x256   :  { %985 = vperm.xlu0 %13290, %v687_v43  }
 0x257   :  { %5235 = vmatpush1.bf16.msra.mxu0 %v13617_v3  ;;  %v729_v3 = vld [vmem:[%s18797_s2 + $0x2a0] sm:$0xff] }
 0x258   :  { %5236 = vmatprep.subr.bf16.mxu0 %v18805_v1 }
 0x259   :  { %4742 = vmatmul.mubr.bf16.gmra.mrb[12].mxu0 %v13527_v45  ;;  %v13558_v45 = vld [vmem:[%s18796_s1 + $0x31c] ss:$28 sps:$4 sm:$0xff]  }
 0x25a   :  { %4749 = vmatprep.mubr.bf16.mxu0 %v13528_v46  ;;  %v688_v46 = vld [vmem:[%s18797_s2 + $0x158] sm:$0xff]  ;;  %995 = vperm.xlu0 %13290, %v689_v47  }
 0x25b   :  { %990 = vperm.xlu1 %13291, %v688_v46   ;;  %5237 = vmatpush1.bf16.msra.mxu0 %v13630_v36  ;;  %v721_v46 = vld [vmem:[%s18797_s2 + $0x260] sm:$0xff]  ;;  %v13597_v36 = vld [vmem:[%s18796_s1 + $0x5b8] ss:$28 sps:$4 sm:$0xff]  }
 0x25c   :  { %5238 = vmatprep.subr.bf16.mxu0 %v18805_v1 }
 0x25e   :  { %1005 = vperm.xlu0 %13290, %v691_v49   ;;  %v723_v49 = vld [vmem:[%s18797_s2 + $0x270] sm:$0xff] }
 0x25f   :  { %1000 = vperm.xlu1 %13291, %v690_v48   ;;  %v722_v48 = vld [vmem:[%s18797_s2 + $0x268] sm:$0xff] }
 0x261   :  { %4750 = vmatmul.mubr.bf16.gmra.mrb[16].mxu0 %v13530_v51  ;;  %v13561_v51 = vld [vmem:[%s18796_s1 + $0x354] ss:$28 sps:$4 sm:$0xff]  }
 0x262   :  { %4757 = vmatprep.mubr.bf16.mxu0 %v13531_v52  ;;  %v692_v52 = vld [vmem:[%s18797_s2 + $0x178] sm:$0xff]  ;;  %1015 = vperm.xlu0 %13290, %v693_v53  }
 0x263   :  { %1010 = vperm.xlu1 %13291, %v692_v52   ;;  %v13585_v52 = vld [vmem:[%s18796_s1 + $0x514] ss:$28 sps:$4 sm:$0xff]  }
 0x266   :  { %1025 = vperm.xlu0 %13290, %v695_v55   ;;  %v724_v55 = vld [vmem:[%s18797_s2 + $0x278] sm:$0xff] }
 0x267   :  { %1020 = vperm.xlu1 %13291, %v694_v54  }
 0x269   :  { %4758 = vmatmul.mubr.bf16.gmra.mrb[20].mxu0 %v13533_v57  ;;  %v13564_v57 = vld [vmem:[%s18796_s1 + $0x38c] ss:$28 sps:$4 sm:$0xff]  }
 0x26a   :  { %4765 = vmatprep.mubr.bf16.mxu0 %v13534_v58  ;;  %v696_v58 = vld [vmem:[%s18797_s2 + $0x198] sm:$0xff]  ;;  %1035 = vperm.xlu0 %13290, %v697_v59   ;;  %v727_v59 = vld [vmem:[%s18797_s2 + $0x290] sm:$0xff] }
 0x26b   :  { %1030 = vperm.xlu1 %13291, %v696_v58   ;;  %v726_v58 = vld [vmem:[%s18797_s2 + $0x288] sm:$0xff] }
 0x26e   :  { %1045 = vperm.xlu0 %13290, %v699_v61  }
 0x26f   :  { %1040 = vperm.xlu1 %13291, %v698_v60   ;;  %v13587_v60 = vld [vmem:[%s18796_s1 + $0x510] ss:$28 sps:$4 sm:$0xff]  }
 0x271   :  { %4766 = vmatmul.mubr.bf16.gmra.mrb[24].mxu0 %v13536_v63  ;;  %v13567_v63 = vld [vmem:[%s18796_s1 + $0x3c4] ss:$28 sps:$4 sm:$0xff]  }
 0x272   :  { %4773 = vmatprep.mubr.bf16.mxu0 %v13537_v0  ;;  %v700_v0 = vld [vmem:[%s18797_s2 + $0x1b8] sm:$0xff]  ;;  %1055 = vperm.xlu0 %13290, %v701_v2  }
 0x273   :  { %1050 = vperm.xlu1 %13291, %v700_v0   ;;  %v728_v2 = vld [vmem:[%s18797_s2 + $0x298] sm:$0xff] }
 0x276   :  { %1065 = vperm.xlu0 %13290, %v703_v5   ;;  %v730_v5 = vld [vmem:[%s18797_s2 + $0x2a8] sm:$0xff] }
 0x277   :  { %1060 = vperm.xlu1 %13291, %v702_v4  }
 0x279   :  { %4774 = vmatmul.mubr.bf16.gmra.mrb[28].mxu0 %v13539_v6  ;;  %v13569_v6 = vld [vmem:[%s18796_s1 + $0x3c0] ss:$28 sps:$4 sm:$0xff]  }
 0x27a   :  { %4781 = vmatprep.mubr.bf16.mxu0 %v13540_v7  ;;  %v13570_v7 = vld [vmem:[%s18796_s1 + $0x3fc] ss:$28 sps:$4 sm:$0xff]   ;;  %1075 = vperm.xlu0 %13290, %v705_v9   ;;  %v13592_v9 = vld [vmem:[%s18796_s1 + $0x584] ss:$28 sps:$4 sm:$0xff]  }
 0x27b   :  { %1070 = vperm.xlu1 %13291, %v704_v8  }
 0x27e   :  { %1085 = vperm.xlu0 %13290, %v707_v11  }
 0x27f   :  { %1080 = vperm.xlu1 %13291, %v706_v10  }
 0x281   :  { %4782 = vmatmul.mubr.bf16.gmra.mrb[32].mxu0 %v13542_v12  ;;  %v13572_v12 = vld [vmem:[%s18796_s1 + $0x3f8] ss:$28 sps:$4 sm:$0xff]  }
 0x282   :  { %4789 = vmatprep.mubr.bf16.mxu0 %v13543_v13  ;;  %v13573_v13 = vld [vmem:[%s18796_s1 + $0x434] ss:$28 sps:$4 sm:$0xff]   ;;  %1095 = vperm.xlu0 %13290, %v709_v16  }
 0x283   :  { %1090 = vperm.xlu1 %13291, %v708_v15   ;;  %v13643_v15 = vld [vmem:[%s18795_s0 + $0x120] sm:$0xff]  }
 0x284   :  { %5239 = vmatpush1.bf16.msra.mxu0 %v13643_v15  ;;  %v748_v15 = vld [vmem:[%s18797_s2 + $0x338] sm:$0xff] }
 0x285   :  { %5240 = vmatprep.subr.bf16.mxu0 %v18805_v1 }
 0x287   :  { %1100 = vperm.xlu1 %13291, %v710_v18   ;;  %v734_v18 = vld [vmem:[%s18797_s2 + $0x2c8] sm:$0xff] }
 0x289   :  { %4790 = vmatmul.mubr.bf16.gmra.mrb[36].mxu0 %v13545_v19  ;;  %v711_v19 = vld [vmem:[%s18797_s2 + $0x210] sm:$0xff] }
 0x28a   :  { %4797 = vmatprep.mubr.bf16.mxu0 %v13546_v20  ;;  %v13575_v20 = vld [vmem:[%s18796_s1 + $0x430] ss:$28 sps:$4 sm:$0xff]   ;;  %1105 = vperm.xlu0 %13290, %v711_v19  }
 0x28b   :  { %1110 = vperm.xlu1 %13291, %v712_v24   ;;  %v735_v19 = vld [vmem:[%s18797_s2 + $0x2d0] sm:$0xff]  ;;  %v13595_v24 = vld [vmem:[%s18796_s1 + $0x5bc] ss:$28 sps:$4 sm:$0xff]  }
 0x28f   :  { %1120 = vperm.xlu1 %13291, %v714_v27  }
 0x291   :  { %4798 = vmatmul.mubr.bf16.gmra.mrb[40].mxu0 %v13548_v25  ;;  %v713_v25 = vld [vmem:[%s18797_s2 + $0x220] sm:$0xff] }
 0x292   :  { %4805 = vmatprep.mubr.bf16.mxu0 %v13549_v26  ;;  %v15022_v26 = vpop.permute.xlu0 %795  ;;  %1115 = vperm.xlu0 %13290, %v713_v25  }
 0x293   :  { %1130 = vperm.xlu1 %13291, %v716_v34   ;;  %v738_v34 = vld [vmem:[%s18797_s2 + $0x2e8] sm:$0xff] }
 0x296   :  { %1125 = vperm.xlu0 %13290, %v715_v28   ;;  %v736_v28 = vld [vmem:[%s18797_s2 + $0x2d8] sm:$0xff] }
 0x299   :  { %4806 = vmatmul.mubr.bf16.gmra.mrb[44].mxu0 %v13551_v31  ;;  %v13579_v31 = vld [vmem:[%s18796_s1 + $0x4a4] ss:$28 sps:$4 sm:$0xff]  }
 0x29a   :  { %4813 = vmatprep.mubr.bf16.mxu0 %v13552_v32  ;;  %v15038_v32 = vpop.permute.xlu0 %805  ;;  %1135 = vperm.xlu0 %13290, %v717_v35   ;;  %v739_v35 = vld [vmem:[%s18797_s2 + $0x2f0] sm:$0xff] }
 0x29e   :  { %1145 = vperm.xlu0 %13290, %v719_v39   ;;  %v13598_v39 = vld [vmem:[%s18796_s1 + $0x5f4] ss:$28 sps:$4 sm:$0xff]  }
 0x2a1   :  { %4814 = vmatmul.mubr.bf16.gmra.mrb[48].mxu0 %v13554_v37  ;;  %v15051_v37 = vpop.permute.xlu0 %815 }
 0x2a2   :  { %4821 = vmatprep.mubr.bf16.mxu0 %v13555_v38  ;;  %v718_v38 = vld [vmem:[%s18797_s2 + $0x248] sm:$0xff]  ;;  %1155 = vperm.xlu0 %13290, %v721_v46   ;;  %v741_v46 = vld [vmem:[%s18797_s2 + $0x300] sm:$0xff] }
 0x2a3   :  { %1140 = vperm.xlu1 %13291, %v718_v38  }
 0x2a5   :  { %v15068_v43 = vpop.permute.xlu0 %825 }
 0x2a6   :  { %1165 = vperm.xlu0 %13290, %v723_v49   ;;  %v742_v49 = vld [vmem:[%s18797_s2 + $0x308] sm:$0xff] }
 0x2a9   :  { %4822 = vmatmul.mubr.bf16.gmra.mrb[52].mxu0 %v13557_v44  ;;  %v15070_v44 = vpop.permute.xlu1 %830  ;;  %v15078_v47 = vpop.permute.xlu0 %835 }
 0x2aa   :  { %4829 = vmatprep.mubr.bf16.mxu0 %v13558_v45  ;;  %v720_v45 = vld [vmem:[%s18797_s2 + $0x258] sm:$0xff] }
 0x2ab   :  { %1150 = vperm.xlu1 %13291, %v720_v45   ;;  %v740_v45 = vld [vmem:[%s18797_s2 + $0x2f8] sm:$0xff] }
 0x2ad   :  { %v15094_v53 = vpop.permute.xlu0 %845 }
 0x2af   :  { %1160 = vperm.xlu1 %13291, %v722_v48  }
 0x2b1   :  { %4830 = vmatmul.mubr.bf16.gmra.mrb[56].mxu0 %v13560_v50  ;;  %v13584_v50 = vld [vmem:[%s18796_s1 + $0x4d8] ss:$28 sps:$4 sm:$0xff]  }
 0x2b2   :  { %4837 = vmatprep.mubr.bf16.mxu0 %v13561_v51  ;;  %v15089_v51 = vpop.permute.xlu1 %840 }
 0x2b3   :  { %1170 = vperm.xlu1 %13291, %v724_v55  }
 0x2b6   :  { %v15096_v54 = vpop.permute.xlu1 %850 }
 0x2b7   :  { %1180 = vperm.xlu1 %13291, %v726_v58  }
 0x2b9   :  { %4838 = vmatmul.mubr.bf16.gmra.mrb[60].mxu0 %v13563_v56  ;;  %v725_v56 = vld [vmem:[%s18797_s2 + $0x280] sm:$0xff] }
 0x2ba   :  { %4845 = vmatprep.mubr.bf16.mxu0 %v13564_v57  ;;  %v15104_v57 = vpop.permute.xlu0 %855  ;;  %1175 = vperm.xlu0 %13290, %v725_v56   ;;  %v15115_v61 = vpop.permute.xlu1 %860  ;;  %v13601_v56 = vld [vmem:[%s18796_s1 + $0x62c] ss:$28 sps:$4 sm:$0xff]  }
 0x2bb   :  { %1190 = vperm.xlu1 %13291, %v728_v2  }
 0x2be   :  { %1185 = vperm.xlu0 %13290, %v727_v59   ;;  %v15122_v0 = vpop.permute.xlu1 %870 }
 0x2bf   :  { %1200 = vperm.xlu1 %13291, %v730_v5   ;;  %v747_v5 = vld [vmem:[%s18797_s2 + $0x330] sm:$0xff] }
 0x2c1   :  { %4846 = vmatmul.mubr.bf16.gmra.mrb[64].mxu0 %v13566_v62  ;;  %v13588_v62 = vld [vmem:[%s18796_s1 + $0x54c] ss:$28 sps:$4 sm:$0xff]  }
 0x2c2   :  { %4853 = vmatprep.mubr.bf16.mxu0 %v13567_v63  ;;  %v15120_v63 = vpop.permute.xlu0 %865  ;;  %1195 = vperm.xlu0 %13290, %v729_v3   ;;  %v15141_v8 = vpop.permute.xlu1 %880  ;;  %v746_v3 = vld [vmem:[%s18797_s2 + $0x328] sm:$0xff] }
 0x2c6   :  { %v15130_v4 = vpop.permute.xlu0 %875  ;;  %v15148_v11 = vpop.permute.xlu1 %890 }
 0x2c9   :  { %4854 = vmatmul.mubr.bf16.gmra.mrb[68].mxu0 %v13569_v6  ;;  %v731_v6 = vld [vmem:[%s18797_s2 + $0x2b0] sm:$0xff] }
 0x2ca   :  { %4861 = vmatprep.mubr.bf16.mxu0 %v13570_v7  ;;  %v13590_v7 = vld [vmem:[%s18796_s1 + $0x548] ss:$28 sps:$4 sm:$0xff]   ;;  %v15146_v10 = vpop.permute.xlu0 %885  ;;  %1205 = vperm.xlu0 %13290, %v731_v6  }
 0x2cb   :  { %v13603_v6 = vld [vmem:[%s18796_s1 + $0x628] ss:$28 sps:$4 sm:$0xff]  }
 0x2ce   :  { %v15159_v16 = vpop.permute.xlu0 %895 }
 0x2d1   :  { %4862 = vmatmul.mubr.bf16.gmra.mrb[72].mxu0 %v13572_v12  ;;  %v732_v12 = vld [vmem:[%s18797_s2 + $0x2b8] sm:$0xff] }
 0x2d2   :  { %4869 = vmatprep.mubr.bf16.mxu0 %v13573_v13  ;;  %v733_v13 = vld [vmem:[%s18797_s2 + $0x2c0] sm:$0xff]  ;;  %1210 = vperm.xlu1 %13291, %v732_v12   ;;  %v15176_v25 = vpop.permute.xlu0 %905 }
 0x2d3   :  { %1215 = vperm.xlu0 %13290, %v733_v13   ;;  %18808 = vst [vmem:[#allocation7_spill] sm:$0xff] %v15176_v25  ;;  %v13845_v25 = vld [vmem:[%s18796_s1 + $0x634] ss:$28 sps:$4 sm:$0xff]  }
 0x2d6   :  { %1220 = vperm.xlu1 %13291, %v734_v18   ;;  %v749_v18 = vld [vmem:[%s18797_s2 + $0x340] sm:$0xff] }
 0x2d7   :  { %1225 = vperm.xlu0 %13290, %v735_v19   ;;  %v13656_v19 = vld [vmem:[%s18795_s0 + $0x128] sm:$0xff]  }
 0x2d8   :  { %5241 = vmatpush1.bf16.msra.mxu0 %v13656_v19  ;;  %v759_v19 = vld [vmem:[%s18797_s2 + $0x390] sm:$0xff] }
 0x2d9   :  { %4870 = vmatmul.mubr.bf16.gmra.mrb[76].mxu0 %v13575_v20  ;;  %v13594_v20 = vld [vmem:[%s18796_s1 + $0x580] ss:$28 sps:$4 sm:$0xff]   ;;  %5242 = vmatprep.subr.bf16.mxu0 %v18805_v1 }
 0x2da   :  { %4877 = vmatprep.mubr.bf16.mxu0 %v13576_v22  ;;  %v15171_v22 = vpop.permute.xlu1 %900  ;;  %1230 = vperm.xlu1 %13291, %v736_v28   ;;  %v751_v28 = vld [vmem:[%s18797_s2 + $0x350] sm:$0xff] }
 0x2db   :  { %18807 = vst [vmem:[#allocation6_spill] sm:$0xff] %v15171_v22 }
 0x2de   :  { %v15178_v27 = vpop.permute.xlu1 %910  ;;  %1240 = vperm.xlu1 %13291, %v738_v34  }
 0x2df   :  { %18809 = vst [vmem:[#allocation8_spill] sm:$0xff] %v15178_v27  ;;  %v13837_v27 = vld [vmem:[%s18796_s1 + $0x5c0] ss:$28 sps:$4 sm:$0xff]  }
 0x2e1   :  { %4878 = vmatmul.mubr.bf16.gmra.mrb[80].mxu0 %v13578_v29  ;;  %v737_v29 = vld [vmem:[%s18797_s2 + $0x2e0] sm:$0xff] }
 0x2e2   :  { %4885 = vmatprep.mubr.bf16.mxu0 %v13579_v31  ;;  %v15186_v31 = vpop.permute.xlu0 %915  ;;  %1235 = vperm.xlu0 %13290, %v737_v29   ;;  %v15197_v38 = vpop.permute.xlu1 %920  ;;  %v13607_v29 = vld [vmem:[%s18796_s1 + $0x660] ss:$28 sps:$4 sm:$0xff]  }
 0x2e3   :  { %18810 = vst [vmem:[#allocation9_spill] sm:$0xff] %v15186_v31  ;;  %18811 = vst [vmem:[#allocation10_spill] sm:$0xff] %v15197_v38  ;;  %1250 = vperm.xlu1 %13291, %v740_v45   ;;  %v752_v45 = vld [vmem:[%s18797_s2 + $0x358] sm:$0xff]  ;;  %v13827_v38 = vld [vmem:[%s18796_s1 + $0x550] ss:$28 sps:$4 sm:$0xff]  }
 0x2e6   :  { %1245 = vperm.xlu0 %13290, %v739_v35   ;;  %v13608_v35 = vld [vmem:[%s18796_s1 + $0x69c] ss:$28 sps:$4 sm:$0xff]  }
 0x2e7   :  { %1260 = vperm.xlu1 %13291, %v742_v49  }
 0x2e9   :  { %4886 = vmatmul.mubr.bf16.gmra.mrb[84].mxu0 %v13581_v40  ;;  %v15202_v40 = vpop.permute.xlu0 %925 }
 0x2ea   :  { %4893 = vmatprep.mubr.bf16.mxu0 %v13582_v42  ;;  %18812 = vst [vmem:[#allocation11_spill] sm:$0xff] %v15202_v40  ;;  %v15204_v42 = vpop.permute.xlu1 %930  ;;  %1255 = vperm.xlu0 %13290, %v741_v46   ;;  %v753_v46 = vld [vmem:[%s18797_s2 + $0x360] sm:$0xff] }
 0x2eb   :  { %18813 = vst [vmem:[#allocation12_spill] sm:$0xff] %v15204_v42  ;;  %v13899_v42 = vld [vmem:[%s18796_s1 + $0xc90] ss:$28 sps:$4 sm:$0xff]   ;;  %v13903_v40 = vld [vmem:[%s18796_s1 + $0xcc8] ss:$28 sps:$4 sm:$0xff]  }
 0x2ed   :  { %v15212_v48 = vpop.permute.xlu0 %935 }
 0x2ee   :  { %18814 = vst [vmem:[#allocation13_spill] sm:$0xff] %v15212_v48  ;;  %v15223_v55 = vpop.permute.xlu1 %940 }
 0x2ef   :  { %18815 = vst [vmem:[#allocation14_spill] sm:$0xff] %v15223_v55  ;;  %v13817_v55 = vld [vmem:[%s18796_s1 + $0x4e0] ss:$28 sps:$4 sm:$0xff]  }
 0x2f1   :  { %4894 = vmatmul.mubr.bf16.gmra.mrb[88].mxu0 %v13584_v50  ;;  %v743_v50 = vld [vmem:[%s18797_s2 + $0x310] sm:$0xff]  ;;  %v15228_v58 = vpop.permute.xlu0 %945 }
 0x2f2   :  { %4901 = vmatprep.mubr.bf16.mxu0 %v13585_v52  ;;  %v13600_v52 = vld [vmem:[%s18796_s1 + $0x5f0] ss:$28 sps:$4 sm:$0xff]   ;;  %18816 = vst [vmem:[#allocation15_spill] sm:$0xff] %v15228_v58  ;;  %1265 = vperm.xlu0 %13290, %v743_v50   ;;  %v15230_v59 = vpop.permute.xlu1 %950  ;;  %v13893_v58 = vld [vmem:[%s18796_s1 + $0xbe8] ss:$28 sps:$4 sm:$0xff]  }
 0x2f3   :  { %18817 = vst [vmem:[#allocation16_spill] sm:$0xff] %v15230_v59  ;;  %v754_v50 = vld [vmem:[%s18797_s2 + $0x368] sm:$0xff] }
 0x2f4   :  { %v13889_v59 = vld [vmem:[%s18796_s1 + $0xbb0] ss:$28 sps:$4 sm:$0xff]  }
 0x2f5   :  { %v15238_v2 = vpop.permute.xlu0 %955 }
 0x2f6   :  { %18818 = vst [vmem:[#allocation17_spill] sm:$0xff] %v15238_v2 }
 0x2f9   :  { %4902 = vmatmul.mubr.bf16.gmra.mrb[92].mxu0 %v13587_v60  ;;  %v744_v60 = vld [vmem:[%s18797_s2 + $0x318] sm:$0xff]  ;;  %v15254_v12 = vpop.permute.xlu0 %965 }
 0x2fa   :  { %4909 = vmatprep.mubr.bf16.mxu0 %v13588_v62  ;;  %v745_v62 = vld [vmem:[%s18797_s2 + $0x320] sm:$0xff]  ;;  %1270 = vperm.xlu1 %13291, %v744_v60   ;;  %18820 = vst [vmem:[#allocation19_spill] sm:$0xff] %v15254_v12 }
 0x2fb   :  { %1275 = vperm.xlu0 %13290, %v745_v62   ;;  %v13611_v62 = vld [vmem:[%s18796_s1 + $0x6d4] ss:$28 sps:$4 sm:$0xff]   ;;  %v13883_v12 = vld [vmem:[%s18796_s1 + $0xb08] ss:$28 sps:$4 sm:$0xff]  }
 0x2fe   :  { %1280 = vperm.xlu1 %13291, %v746_v3  }
 0x2ff   :  { %1285 = vperm.xlu0 %13290, %v747_v5  }
 0x301   :  { %4910 = vmatmul.mubr.bf16.gmra.mrb[96].mxu0 %v13590_v7  ;;  %v15249_v7 = vpop.permute.xlu1 %960 }
 0x302   :  { %4917 = vmatprep.mubr.bf16.mxu0 %v13592_v9  ;;  %18819 = vst [vmem:[#allocation18_spill] sm:$0xff] %v15249_v7  ;;  %v13605_v9 = vld [vmem:[%s18796_s1 + $0x664] ss:$28 sps:$4 sm:$0xff]   ;;  %1290 = vperm.xlu1 %13291, %v748_v15   ;;  %v13807_v7 = vld [vmem:[%s18796_s1 + $0x470] ss:$28 sps:$4 sm:$0xff]  }
 0x303   :  { %1295 = vperm.xlu0 %13290, %v749_v18   ;;  %v758_v18 = vld [vmem:[%s18797_s2 + $0x388] sm:$0xff] }
 0x305   :  { %v15256_v13 = vpop.permute.xlu1 %970 }
 0x306   :  { %18821 = vst [vmem:[#allocation20_spill] sm:$0xff] %v15256_v13  ;;  %v13879_v13 = vld [vmem:[%s18796_s1 + $0xad0] ss:$28 sps:$4 sm:$0xff]  }
 0x307   :  { %1305 = vperm.xlu0 %13290, %v751_v28  }
 0x309   :  { %4918 = vmatmul.mubr.bf16.gmra.mrb[100].mxu0 %v13594_v20  ;;  %v15267_v20 = vpop.permute.xlu0 %975  ;;  %v15279_v34 = vpop.permute.xlu1 %980 }
 0x30a   :  { %4925 = vmatprep.mubr.bf16.mxu0 %v13595_v24  ;;  %18822 = vst [vmem:[#allocation21_spill] sm:$0xff] %v15267_v20  ;;  %v750_v24 = vld [vmem:[%s18797_s2 + $0x348] sm:$0xff]  ;;  %18823 = vst [vmem:[#allocation22_spill] sm:$0xff] %v15279_v34  ;;  %v13799_v34 = vld [vmem:[%s18796_s1 + $0x400] ss:$28 sps:$4 sm:$0xff]  }
 0x30b   :  { %1300 = vperm.xlu1 %13291, %v750_v24   ;;  %1315 = vperm.xlu0 %13290, %v753_v46   ;;  %v13613_v24 = vld [vmem:[%s18796_s1 + $0x6d0] ss:$28 sps:$4 sm:$0xff]   ;;  %v760_v46 = vld [vmem:[%s18797_s2 + $0x398] sm:$0xff] }
 0x30f   :  { %1310 = vperm.xlu1 %13291, %v752_v45  }
 0x311   :  { %4926 = vmatmul.mubr.bf16.gmra.mrb[104].mxu0 %v13597_v36  ;;  %v15284_v36 = vpop.permute.xlu0 %985 }
 0x312   :  { %4933 = vmatprep.mubr.bf16.mxu0 %v13598_v39  ;;  %18824 = vst [vmem:[#allocation23_spill] sm:$0xff] %v15284_v36  ;;  %v15286_v39 = vpop.permute.xlu1 %990  ;;  %v13873_v36 = vld [vmem:[%s18796_s1 + $0xa28] ss:$28 sps:$4 sm:$0xff]  }
 0x313   :  { %18825 = vst [vmem:[#allocation24_spill] sm:$0xff] %v15286_v39  ;;  %1320 = vperm.xlu1 %13291, %v754_v50   ;;  %v761_v50 = vld [vmem:[%s18797_s2 + $0x3a0] sm:$0xff]  ;;  %v13869_v39 = vld [vmem:[%s18796_s1 + $0x9f0] ss:$28 sps:$4 sm:$0xff]  }
 0x315   :  { %v15294_v49 = vpop.permute.xlu0 %995 }
 0x316   :  { %18826 = vst [vmem:[#allocation25_spill] sm:$0xff] %v15294_v49  ;;  %v15305_v60 = vpop.permute.xlu1 %1000 }
 0x317   :  { %18827 = vst [vmem:[#allocation26_spill] sm:$0xff] %v15305_v60  ;;  %v13791_v60 = vld [vmem:[%s18796_s1 + $0x390] ss:$28 sps:$4 sm:$0xff]  }
 0x319   :  { %4934 = vmatmul.mubr.bf16.gmra.mrb[108].mxu0 %v13600_v52  ;;  %v755_v52 = vld [vmem:[%s18797_s2 + $0x370] sm:$0xff]  ;;  %v15310_v3 = vpop.permute.xlu0 %1005 }
 0x31a   :  { %4941 = vmatprep.mubr.bf16.mxu0 %v13601_v56  ;;  %v13610_v56 = vld [vmem:[%s18796_s1 + $0x698] ss:$28 sps:$4 sm:$0xff]   ;;  %18828 = vst [vmem:[#allocation27_spill] sm:$0xff] %v15310_v3  ;;  %1325 = vperm.xlu0 %13290, %v755_v52   ;;  %v15312_v5 = vpop.permute.xlu1 %1010  ;;  %v13863_v3 = vld [vmem:[%s18796_s1 + $0x948] ss:$28 sps:$4 sm:$0xff]  }
 0x31b   :  { %18829 = vst [vmem:[#allocation28_spill] sm:$0xff] %v15312_v5  ;;  %v13859_v5 = vld [vmem:[%s18796_s1 + $0x910] ss:$28 sps:$4 sm:$0xff]  }
 0x31d   :  { %v15320_v15 = vpop.permute.xlu0 %1015 }
 0x31e   :  { %18830 = vst [vmem:[#allocation29_spill] sm:$0xff] %v15320_v15  ;;  %v15331_v28 = vpop.permute.xlu1 %1020 }
 0x31f   :  { %18831 = vst [vmem:[#allocation30_spill] sm:$0xff] %v15331_v28  ;;  %v13783_v28 = vld [vmem:[%s18796_s1 + $0x320] ss:$28 sps:$4 sm:$0xff]  }
 0x321   :  { %4942 = vmatmul.mubr.bf16.gmra.mrb[112].mxu0 %v13603_v6  ;;  %v756_v6 = vld [vmem:[%s18797_s2 + $0x378] sm:$0xff] }
 0x322   :  { %4949 = vmatprep.mubr.bf16.mxu0 %v13605_v9  ;;  %v757_v9 = vld [vmem:[%s18797_s2 + $0x380] sm:$0xff]  ;;  %1330 = vperm.xlu1 %13291, %v756_v6   ;;  %v15338_v45 = vpop.permute.xlu1 %1030 }
 0x323   :  { %1335 = vperm.xlu0 %13290, %v757_v9   ;;  %18833 = vst [vmem:[#allocation32_spill] sm:$0xff] %v15338_v45  ;;  %v13616_v6 = vld [vmem:[%s18796_s1 + $0x708] ss:$28 sps:$4 sm:$0xff]   ;;  %v13849_v45 = vld [vmem:[%s18796_s1 + $0x830] ss:$28 sps:$4 sm:$0xff]  }
 0x326   :  { %1340 = vperm.xlu1 %13291, %v758_v18   ;;  %v15357_v9 = vpop.permute.xlu1 %1040  ;;  %v13618_v18 = vld [vmem:[%s18796_s1 + $0x744] ss:$28 sps:$4 sm:$0xff]  }
 0x327   :  { %1345 = vperm.xlu0 %13290, %v759_v19   ;;  %18835 = vst [vmem:[#allocation34_spill] sm:$0xff] %v15357_v9 }
 0x329   :  { %4950 = vmatmul.mubr.bf16.gmra.mrb[116].mxu0 %v13607_v29  ;;  %v13614_v29 = vld [vmem:[%s18796_s1 + $0x70c] ss:$28 sps:$4 sm:$0xff]  }
 0x32a   :  { %4957 = vmatprep.mubr.bf16.mxu0 %v13608_v35  ;;  %v15336_v35 = vpop.permute.xlu0 %1025  ;;  %1350 = vperm.xlu1 %13291, %v760_v46   ;;  %v765_v46 = vld [vmem:[%s18797_s2 + $0x3c0] sm:$0xff] }
 0x32b   :  { %18832 = vst [vmem:[#allocation31_spill] sm:$0xff] %v15336_v35  ;;  %1355 = vperm.xlu0 %13290, %v761_v50   ;;  %v13669_v50 = vld [vmem:[%s18795_s0 + $0x130] sm:$0xff]   ;;  %v13853_v35 = vld [vmem:[%s18796_s1 + $0x868] ss:$28 sps:$4 sm:$0xff]  }
 0x32c   :  { %5243 = vmatpush1.bf16.msra.mxu0 %v13669_v50 }
 0x32e   :  { %v15346_v52 = vpop.permute.xlu0 %1035 }
 0x32f   :  { %18834 = vst [vmem:[#allocation33_spill] sm:$0xff] %v15346_v52 }
 0x331   :  { %4958 = vmatmul.mubr.bf16.gmra.mrb[120].mxu0 %v13610_v56  ;;  %v762_v56 = vld [vmem:[%s18797_s2 + $0x3a8] sm:$0xff] }
 0x332   :  { %4965 = vmatprep.mubr.bf16.mxu0 %v13611_v62  ;;  %v763_v62 = vld [vmem:[%s18797_s2 + $0x3b0] sm:$0xff]  ;;  %v15362_v19 = vpop.permute.xlu0 %1045  ;;  %1360 = vperm.xlu1 %13291, %v762_v56   ;;  %v766_v56 = vld [vmem:[%s18797_s2 + $0x3c8] sm:$0xff] }
 0x333   :  { %18836 = vst [vmem:[#allocation35_spill] sm:$0xff] %v15362_v19  ;;  %1365 = vperm.xlu0 %13290, %v763_v62   ;;  %v767_v62 = vld [vmem:[%s18797_s2 + $0x3d0] sm:$0xff]  ;;  %v769_v19 = vld [vmem:[%s18797_s2 + $0x3e0] sm:$0xff] }
 0x336   :  { %v15375_v1 = vpop.permute.xlu0 %1055 }
 0x337   :  { %18838 = vst [vmem:[#allocation37_spill] sm:$0xff] %v15375_v1  ;;  %1375 = vperm.xlu0 %13290, %v765_v46   ;;  %v768_v1 = vld [vmem:[%s18797_s2 + $0x3d8] sm:$0xff] }
 0x339   :  { %4966 = vmatmul.mubr.bf16.gmra.mrb[124].mxu0 %v13613_v24  ;;  %v15364_v24 = vpop.permute.xlu1 %1050 }
 0x33a   :  { %4973 = vmatprep.mubr.bf16.mxu0 %v13614_v29  ;;  %18837 = vst [vmem:[#allocation36_spill] sm:$0xff] %v15364_v24  ;;  %v764_v29 = vld [vmem:[%s18797_s2 + $0x3b8] sm:$0xff]  ;;  %v15392_v46 = vpop.permute.xlu0 %1065 }
 0x33b   :  { %1370 = vperm.xlu1 %13291, %v764_v29   ;;  %v13620_v24 = vld [vmem:[%s18796_s1 + $0x740] ss:$28 sps:$4 sm:$0xff]   ;;  %18841 = vst [vmem:[#allocation39_spill] sm:$0xff] %v15392_v46  ;;  %1385 = vperm.xlu0 %13290, %v767_v62   ;;  %v13623_v62 = vld [vmem:[%s18796_s1 + $0x778] ss:$28 sps:$4 sm:$0xff]  }
 0x33c   :  { %v13621_v29 = vld [vmem:[%s18796_s1 + $0x77c] ss:$28 sps:$4 sm:$0xff]   ;;  %v6784_v46 = vld [vmem:[%s18799_s4 + $0x80] sm:$0xff] }
 0x33f   :  { %1380 = vperm.xlu1 %13291, %v766_v56   ;;  %1395 = vperm.xlu0 %13290, %v769_v19   ;;  %v770_v56 = vld [vmem:[%s18797_s2 + $0x3e8] sm:$0xff] }
 0x341   :  { %4974 = vmatmul.mubr.bf16.gmra.mrb[128].mxu0 %v13616_v6  ;;  %v18839_v6 = vmov 0  }
 0x342   :  { %4981 = vmatprep.mubr.bf16.mxu0 %v13618_v18  ;;  %5244 = vmatprep.subr.bf16.mxu0 %v18839_v6  ;;  %v15387_v18 = vpop.permute.xlu1 %1060 }
 0x343   :  { %18840 = vst [vmem:[#allocation38_spill] sm:$0xff] %v15387_v18  ;;  %v15402_v18 = vpop.permute.xlu0 %1075  ;;  %1390 = vperm.xlu1 %13291, %v768_v1  }
 0x344   :  { %18843 = vst [vmem:[#allocation41_spill] sm:$0xff] %v15402_v18  ;;  %v772_v18 = vld [vmem:[%s18797_s2 + $0x3f8] sm:$0xff] }
 0x346   :  { %v15394_v50 = vpop.permute.xlu1 %1070 }
 0x347   :  { %18842 = vst [vmem:[#allocation40_spill] sm:$0xff] %v15394_v50  ;;  %v15418_v1 = vpop.permute.xlu0 %1085  ;;  %1400 = vperm.xlu1 %13291, %v770_v56   ;;  %v6785_v56 = vld [vmem:[%s18799_s4 + $0x88] sm:$0xff] }
 0x348   :  { %18845 = vst [vmem:[#allocation43_spill] sm:$0xff] %v15418_v1  ;;  %v6786_v1 = vld [vmem:[%s18799_s4 + $0x90] sm:$0xff] }
 0x349   :  { %4982 = vmatmul.mubr.bf16.gmra.mrb[132].mxu0 %v13620_v24  ;;  %v771_v24 = vld [vmem:[%s18797_s2 + $0x3f0] sm:$0xff] }
 0x34a   :  { %4989 = vmatprep.mubr.bf16.mxu0 %v13621_v29  ;;  %v15413_v50 = vpop.permute.xlu1 %1080  ;;  %v13624_v29 = vld [vmem:[%s18796_s1 + $0x7b4] ss:$28 sps:$4 sm:$0xff]   ;;  %1405 = vperm.xlu0 %13290, %v771_v24   ;;  %v6768_v24 = vld [vmem:[%s18799_s4] sm:$0xff] }
 0x34b   :  { %18844 = vst [vmem:[#allocation42_spill] sm:$0xff] %v15413_v50  ;;  %v15428_v50 = vpop.permute.xlu0 %1095  ;;  %1410 = vperm.xlu1 %13291, %v772_v18  }
 0x34c   :  { %18847 = vst [vmem:[#allocation45_spill] sm:$0xff] %v15428_v50  ;;  %v6769_v50 = vld [vmem:[%s18799_s4 + $0x8] sm:$0xff] }
 0x34e   :  { %v15420_v19 = vpop.permute.xlu1 %1090  ;;  %6914 = vperm.xlu0 %13290, %v6784_v46  }
 0x34f   :  { %18846 = vst [vmem:[#allocation44_spill] sm:$0xff] %v15420_v19  ;;  %v15444_v18 = vpop.permute.xlu0 %1105  ;;  %6919 = vperm.xlu1 %13291, %v6785_v56   ;;  %v6787_v56 = vld [vmem:[%s18799_s4 + $0x98] sm:$0xff] }
 0x350   :  { %18849 = vst [vmem:[#allocation47_spill] sm:$0xff] %v15444_v18  ;;  %v6788_v18 = vld [vmem:[%s18799_s4 + $0xa0] sm:$0xff] }
 0x351   :  { %4990 = vmatmul.mubr.bf16.gmra.mrb[136].mxu0 %v13623_v62  ;;  %v13626_v62 = vld [vmem:[%s18796_s1 + $0x7b0] ss:$28 sps:$4 sm:$0xff]  }
 0x352   :  { %4997 = vmatprep.mubr.bf16.mxu0 %v13624_v29  ;;  %v15439_v19 = vpop.permute.xlu1 %1100  ;;  %v13627_v29 = vld [vmem:[%s18796_s1 + $0x7ec] ss:$28 sps:$4 sm:$0xff]   ;;  %6834 = vperm.xlu0 %13290, %v6768_v24   ;;  %v6770_v24 = vld [vmem:[%s18799_s4 + $0x10] sm:$0xff] }
 0x353   :  { %18848 = vst [vmem:[#allocation46_spill] sm:$0xff] %v15439_v19  ;;  %v15454_v19 = vpop.permute.xlu0 %1115  ;;  %6839 = vperm.xlu1 %13291, %v6769_v50  }
 0x354   :  { %18851 = vst [vmem:[#allocation49_spill] sm:$0xff] %v15454_v19  ;;  %v6771_v19 = vld [vmem:[%s18799_s4 + $0x18] sm:$0xff] }
 0x356   :  { %v15446_v46 = vpop.permute.xlu1 %1110  ;;  %6924 = vperm.xlu0 %13290, %v6786_v1  }
 0x357   :  { %18850 = vst [vmem:[#allocation48_spill] sm:$0xff] %v15446_v46  ;;  %v15470_v50 = vpop.permute.xlu0 %1125  ;;  %6929 = vperm.xlu1 %13291, %v6787_v56   ;;  %v6789_v56 = vld [vmem:[%s18799_s4 + $0xa8] sm:$0xff] }
 0x358   :  { %18853 = vst [vmem:[#allocation51_spill] sm:$0xff] %v15470_v50  ;;  %v13775_v50 = vld [vmem:[%s18796_s1 + $0x2b0] ss:$28 sps:$4 sm:$0xff]  }
 0x359   :  { %4998 = vmatmul.mubr.bf16.gmra.mrb[140].mxu0 %v13626_v62  ;;  %v13629_v62 = vld [vmem:[%s18796_s1 + $0x7e8] ss:$28 sps:$4 sm:$0xff]  }
 0x35a   :  { %5005 = vmatprep.mubr.bf16.mxu0 %v13627_v29  ;;  %v15465_v46 = vpop.permute.xlu1 %1120  ;;  %v13631_v29 = vld [vmem:[%s18796_s1 + $0x824] ss:$28 sps:$4 sm:$0xff]   ;;  %6844 = vperm.xlu0 %13290, %v6770_v24  }
 0x35b   :  { %18852 = vst [vmem:[#allocation50_spill] sm:$0xff] %v15465_v46  ;;  %v13682_v46 = vld [vmem:[%s18795_s0 + $0x138] sm:$0xff]   ;;  %v15483_v9 = vpop.permute.xlu0 %1135  ;;  %6849 = vperm.xlu1 %13291, %v6771_v19   ;;  %v6772_v24 = vld [vmem:[%s18799_s4 + $0x20] sm:$0xff] }
 0x35c   :  { %18855 = vst [vmem:[#allocation53_spill] sm:$0xff] %v15483_v9  ;;  %5245 = vmatpush1.bf16.msra.mxu0 %v13682_v46  ;;  %v13634_v19 = vld [vmem:[%s18796_s1 + $0x85c] ss:$28 sps:$4 sm:$0xff]   ;;  %v6773_v9 = vld [vmem:[%s18799_s4 + $0x28] sm:$0xff] }
 0x35d   :  { %5246 = vmatprep.subr.bf16.mxu0 %v18839_v6 }
 0x35e   :  { %v15472_v1 = vpop.permute.xlu1 %1130  ;;  %6934 = vperm.xlu0 %13290, %v6788_v18  }
 0x35f   :  { %18854 = vst [vmem:[#allocation52_spill] sm:$0xff] %v15472_v1  ;;  %v15500_v18 = vpop.permute.xlu0 %1145  ;;  %6939 = vperm.xlu1 %13291, %v6789_v56   ;;  %v6790_v1 = vld [vmem:[%s18799_s4 + $0xb0] sm:$0xff]  ;;  %v6791_v56 = vld [vmem:[%s18799_s4 + $0xb8] sm:$0xff] }
 0x360   :  { %18857 = vst [vmem:[#allocation55_spill] sm:$0xff] %v15500_v18  ;;  %v6792_v18 = vld [vmem:[%s18799_s4 + $0xc0] sm:$0xff] }
 0x361   :  { %5006 = vmatmul.mubr.bf16.gmra.mrb[144].mxu0 %v13629_v62  ;;  %v13633_v62 = vld [vmem:[%s18796_s1 + $0x820] ss:$28 sps:$4 sm:$0xff]  }
 0x362   :  { %5013 = vmatprep.mubr.bf16.mxu0 %v13631_v29  ;;  %v15495_v29 = vpop.permute.xlu1 %1140  ;;  %6854 = vperm.xlu0 %13290, %v6772_v24   ;;  %v6774_v24 = vld [vmem:[%s18799_s4 + $0x30] sm:$0xff] }
 0x363   :  { %18856 = vst [vmem:[#allocation54_spill] sm:$0xff] %v15495_v29  ;;  %v15510_v29 = vpop.permute.xlu0 %1155  ;;  %6859 = vperm.xlu1 %13291, %v6773_v9  }
 0x364   :  { %18859 = vst [vmem:[#allocation57_spill] sm:$0xff] %v15510_v29  ;;  %v6775_v29 = vld [vmem:[%s18799_s4 + $0x38] sm:$0xff] }
 0x366   :  { %v15502_v46 = vpop.permute.xlu1 %1150  ;;  %6944 = vperm.xlu0 %13290, %v6790_v1  }
 0x367   :  { %18858 = vst [vmem:[#allocation56_spill] sm:$0xff] %v15502_v46  ;;  %v15526_v9 = vpop.permute.xlu0 %1165  ;;  %6949 = vperm.xlu1 %13291, %v6791_v56   ;;  %v6793_v56 = vld [vmem:[%s18799_s4 + $0xc8] sm:$0xff] }
 0x368   :  { %18861 = vst [vmem:[#allocation59_spill] sm:$0xff] %v15526_v9  ;;  %v6794_v9 = vld [vmem:[%s18799_s4 + $0xd0] sm:$0xff] }
 0x369   :  { %5014 = vmatmul.mubr.bf16.gmra.mrb[148].mxu0 %v13633_v62  ;;  %v13636_v62 = vld [vmem:[%s18796_s1 + $0x858] ss:$28 sps:$4 sm:$0xff]  }
 0x36a   :  { %5021 = vmatprep.mubr.bf16.mxu0 %v13634_v19  ;;  %v15521_v46 = vpop.permute.xlu1 %1160  ;;  %v13637_v19 = vld [vmem:[%s18796_s1 + $0x894] ss:$28 sps:$4 sm:$0xff]   ;;  %6864 = vperm.xlu0 %13290, %v6774_v24   ;;  %v6776_v24 = vld [vmem:[%s18799_s4 + $0x40] sm:$0xff] }
 0x36b   :  { %18860 = vst [vmem:[#allocation58_spill] sm:$0xff] %v15521_v46  ;;  %v15536_v46 = vpop.permute.xlu0 %1175  ;;  %6869 = vperm.xlu1 %13291, %v6775_v29  }
 0x36c   :  { %18863 = vst [vmem:[#allocation61_spill] sm:$0xff] %v15536_v46  ;;  %v6777_v46 = vld [vmem:[%s18799_s4 + $0x48] sm:$0xff] }
 0x36e   :  { %v15528_v1 = vpop.permute.xlu1 %1170  ;;  %6954 = vperm.xlu0 %13290, %v6792_v18  }
 0x36f   :  { %18862 = vst [vmem:[#allocation60_spill] sm:$0xff] %v15528_v1  ;;  %v15552_v29 = vpop.permute.xlu0 %1185  ;;  %6959 = vperm.xlu1 %13291, %v6793_v56   ;;  %v6795_v56 = vld [vmem:[%s18799_s4 + $0xd8] sm:$0xff] }
 0x370   :  { %18865 = vst [vmem:[#allocation63_spill] sm:$0xff] %v15552_v29  ;;  %v6796_v29 = vld [vmem:[%s18799_s4 + $0xe0] sm:$0xff] }
 0x371   :  { %5022 = vmatmul.mubr.bf16.gmra.mrb[152].mxu0 %v13636_v62  ;;  %v13639_v62 = vld [vmem:[%s18796_s1 + $0x890] ss:$28 sps:$4 sm:$0xff]  }
 0x372   :  { %5029 = vmatprep.mubr.bf16.mxu0 %v13637_v19  ;;  %v15547_v1 = vpop.permute.xlu1 %1180  ;;  %v13640_v19 = vld [vmem:[%s18796_s1 + $0x8cc] ss:$28 sps:$4 sm:$0xff]   ;;  %6874 = vperm.xlu0 %13290, %v6776_v24   ;;  %v6778_v24 = vld [vmem:[%s18799_s4 + $0x50] sm:$0xff] }
 0x373   :  { %18864 = vst [vmem:[#allocation62_spill] sm:$0xff] %v15547_v1  ;;  %v15562_v1 = vpop.permute.xlu0 %1195  ;;  %6879 = vperm.xlu1 %13291, %v6777_v46  }
 0x374   :  { %18867 = vst [vmem:[#allocation65_spill] sm:$0xff] %v15562_v1  ;;  %v6779_v1 = vld [vmem:[%s18799_s4 + $0x58] sm:$0xff] }
 0x376   :  { %v15554_v18 = vpop.permute.xlu1 %1190  ;;  %6964 = vperm.xlu0 %13290, %v6794_v9  }
 0x377   :  { %18866 = vst [vmem:[#allocation64_spill] sm:$0xff] %v15554_v18  ;;  %v15578_v46 = vpop.permute.xlu0 %1205  ;;  %6969 = vperm.xlu1 %13291, %v6795_v56   ;;  %v6797_v56 = vld [vmem:[%s18799_s4 + $0xe8] sm:$0xff] }
 0x378   :  { %18869 = vst [vmem:[#allocation67_spill] sm:$0xff] %v15578_v46 }
 0x379   :  { %5030 = vmatmul.mubr.bf16.gmra.mrb[156].mxu0 %v13639_v62  ;;  %v13642_v62 = vld [vmem:[%s18796_s1 + $0x8c8] ss:$28 sps:$4 sm:$0xff]  }
 0x37a   :  { %5037 = vmatprep.mubr.bf16.mxu0 %v13640_v19  ;;  %v15573_v18 = vpop.permute.xlu1 %1200  ;;  %v13644_v19 = vld [vmem:[%s18796_s1 + $0x904] ss:$28 sps:$4 sm:$0xff]   ;;  %6884 = vperm.xlu0 %13290, %v6778_v24  }
 0x37b   :  { %18868 = vst [vmem:[#allocation66_spill] sm:$0xff] %v15573_v18  ;;  %v13695_v18 = vld [vmem:[%s18795_s0 + $0x140] sm:$0xff]   ;;  %6889 = vperm.xlu1 %13291, %v6779_v1   ;;  %v15591_v46 = vpop.permute.xlu0 %1215  ;;  %v13647_v1 = vld [vmem:[%s18796_s1 + $0x93c] ss:$28 sps:$4 sm:$0xff]  }
 0x37c   :  { %18871 = vst [vmem:[#allocation69_spill] sm:$0xff] %v15591_v46  ;;  %5247 = vmatpush1.bf16.msra.mxu0 %v13695_v18  ;;  %v6780_v24 = vld [vmem:[%s18799_s4 + $0x60] sm:$0xff]  ;;  %v6798_v46 = vld [vmem:[%s18799_s4 + $0xf0] sm:$0xff] }
 0x37d   :  { %5248 = vmatprep.subr.bf16.mxu0 %v18839_v6 }
 0x37e   :  { %v15580_v9 = vpop.permute.xlu1 %1210  ;;  %6974 = vperm.xlu0 %13290, %v6796_v29  }
 0x37f   :  { %18870 = vst [vmem:[#allocation68_spill] sm:$0xff] %v15580_v9  ;;  %6979 = vperm.xlu1 %13291, %v6797_v56   ;;  %v15608_v18 = vpop.permute.xlu0 %1225  ;;  %v6799_v56 = vld [vmem:[%s18799_s4 + $0xf8] sm:$0xff]  ;;  %v13708_v9 = vld [vmem:[%s18795_s0 + $0x148] sm:$0xff]  }
 0x380   :  { %18873 = vst [vmem:[#allocation71_spill] sm:$0xff] %v15608_v18  ;;  %5249 = vmatpush1.bf16.msra.mxu0 %v13708_v9  ;;  %v13660_v9 = vld [vmem:[%s18796_s1 + $0xa1c] ss:$28 sps:$4 sm:$0xff]  }
 0x381   :  { %5038 = vmatmul.mubr.bf16.gmra.mrb[160].mxu0 %v13642_v62  ;;  %v13646_v62 = vld [vmem:[%s18796_s1 + $0x900] ss:$28 sps:$4 sm:$0xff]   ;;  %5250 = vmatprep.subr.bf16.mxu0 %v18839_v6 }
 0x382   :  { %5045 = vmatprep.mubr.bf16.mxu0 %v13644_v19  ;;  %v15606_v29 = vpop.permute.xlu1 %1220  ;;  %6894 = vperm.xlu0 %13290, %v6780_v24   ;;  %v6781_v19 = vld [vmem:[%s18799_s4 + $0x68] sm:$0xff]  ;;  %v6782_v24 = vld [vmem:[%s18799_s4 + $0x70] sm:$0xff] }
 0x383   :  { %18872 = vst [vmem:[#allocation70_spill] sm:$0xff] %v15606_v29  ;;  %6899 = vperm.xlu1 %13291, %v6781_v19   ;;  %v6783_v19 = vld [vmem:[%s18799_s4 + $0x78] sm:$0xff]  ;;  %v6816_v29 = vld [vmem:[%s18799_s4 + $0x180] sm:$0xff] }
 0x386   :  { %6984 = vperm.xlu0 %13290, %v6798_v46   ;;  %v15625_v18 = vpop.permute.xlu1 %1230  ;;  %v15630_v46 = vpop.permute.xlu0 %1235 }
 0x387   :  { %18874 = vst [vmem:[#allocation72_spill] sm:$0xff] %v15625_v18  ;;  %6989 = vperm.xlu1 %13291, %v6799_v56   ;;  %18875 = vst [vmem:[#allocation73_spill] sm:$0xff] %v15630_v46  ;;  %v6817_v56 = vld [vmem:[%s18799_s4 + $0x188] sm:$0xff] }
 0x389   :  { %5046 = vmatmul.mubr.bf16.gmra.mrb[164].mxu0 %v13646_v62  ;;  %v13649_v62 = vld [vmem:[%s18796_s1 + $0x938] ss:$28 sps:$4 sm:$0xff]  }
 0x38a   :  { %5053 = vmatprep.mubr.bf16.mxu0 %v13647_v1  ;;  %v13650_v1 = vld [vmem:[%s18796_s1 + $0x974] ss:$28 sps:$4 sm:$0xff]   ;;  %6904 = vperm.xlu0 %13290, %v6782_v24   ;;  %v15638_v18 = vpop.permute.xlu1 %1240  ;;  %v6800_v24 = vld [vmem:[%s18799_s4 + $0x100] sm:$0xff]  ;;  %v15649_v46 = vpop.permute.xlu0 %1245 }
 0x38b   :  { %6909 = vperm.xlu1 %13291, %v6783_v19   ;;  %18876 = vst [vmem:[#allocation74_spill] sm:$0xff] %v15638_v18  ;;  %18877 = vst [vmem:[#allocation75_spill] sm:$0xff] %v15649_v46  ;;  %v6801_v19 = vld [vmem:[%s18799_s4 + $0x108] sm:$0xff]  ;;  %v6818_v18 = vld [vmem:[%s18799_s4 + $0x190] sm:$0xff] }
 0x38e   :  { %7074 = vperm.xlu0 %13290, %v6816_v29   ;;  %v15654_v29 = vpop.permute.xlu1 %1250  ;;  %v15662_v46 = vpop.permute.xlu0 %1255 }
 0x38f   :  { %7079 = vperm.xlu1 %13291, %v6817_v56   ;;  %18878 = vst [vmem:[#allocation76_spill] sm:$0xff] %v15654_v29  ;;  %18879 = vst [vmem:[#allocation77_spill] sm:$0xff] %v15662_v46  ;;  %v6819_v56 = vld [vmem:[%s18799_s4 + $0x198] sm:$0xff]  ;;  %v6820_v29 = vld [vmem:[%s18799_s4 + $0x1a0] sm:$0xff] }
 0x390   :  { %v6803_v46 = vld [vmem:[%s18799_s4 + $0x118] sm:$0xff] }
 0x391   :  { %5054 = vmatmul.mubr.bf16.gmra.mrb[168].mxu0 %v13649_v62  ;;  %v13652_v62 = vld [vmem:[%s18796_s1 + $0x970] ss:$28 sps:$4 sm:$0xff]  }
 0x392   :  { %5061 = vmatprep.mubr.bf16.mxu0 %v13650_v1  ;;  %v13653_v1 = vld [vmem:[%s18796_s1 + $0x9ac] ss:$28 sps:$4 sm:$0xff]   ;;  %6994 = vperm.xlu0 %13290, %v6800_v24   ;;  %v6802_v24 = vld [vmem:[%s18799_s4 + $0x110] sm:$0xff] }
 0x393   :  { %6999 = vperm.xlu1 %13291, %v6801_v19   ;;  %v15676_v19 = vpop.permute.xlu1 %1260 }
 0x394   :  { %18880 = vst [vmem:[#allocation78_spill] sm:$0xff] %v15676_v19  ;;  %v6824_v19 = vld [vmem:[%s18799_s4 + $0x1c0] sm:$0xff] }
 0x396   :  { %7084 = vperm.xlu0 %13290, %v6818_v18   ;;  %v15678_v18 = vpop.permute.xlu0 %1265 }
 0x397   :  { %7089 = vperm.xlu1 %13291, %v6819_v56   ;;  %18881 = vst [vmem:[#allocation79_spill] sm:$0xff] %v15678_v18  ;;  %v6821_v56 = vld [vmem:[%s18799_s4 + $0x1a8] sm:$0xff]  ;;  %v15699_v18 = vpop.permute.xlu1 %1270 }
 0x398   :  { %18882 = vst [vmem:[#allocation80_spill] sm:$0xff] %v15699_v18  ;;  %v6822_v18 = vld [vmem:[%s18799_s4 + $0x1b0] sm:$0xff] }
 0x399   :  { %5062 = vmatmul.mubr.bf16.gmra.mrb[172].mxu0 %v13652_v62  ;;  %v13655_v62 = vld [vmem:[%s18796_s1 + $0x9a8] ss:$28 sps:$4 sm:$0xff]  }
 0x39a   :  { %5069 = vmatprep.mubr.bf16.mxu0 %v13653_v1  ;;  %v13657_v1 = vld [vmem:[%s18796_s1 + $0x9e4] ss:$28 sps:$4 sm:$0xff]   ;;  %7004 = vperm.xlu0 %13290, %v6802_v24  }
 0x39b   :  { %7009 = vperm.xlu1 %13291, %v6803_v46   ;;  %v6804_v24 = vld [vmem:[%s18799_s4 + $0x120] sm:$0xff]  ;;  %v15704_v46 = vpop.permute.xlu0 %1275 }
 0x39c   :  { %18883 = vst [vmem:[#allocation81_spill] sm:$0xff] %v15704_v46  ;;  %v6806_v46 = vld [vmem:[%s18799_s4 + $0x130] sm:$0xff] }
 0x39e   :  { %7094 = vperm.xlu0 %13290, %v6820_v29   ;;  %v13712_v29 = vld [vmem:[%s18795_s0 + $0x150] sm:$0xff]  }
 0x39f   :  { %7099 = vperm.xlu1 %13291, %v6821_v56   ;;  %5251 = vmatpush1.bf16.msra.mxu0 %v13712_v29  ;;  %v13713_v56 = vld [vmem:[%s18795_s0 + $0x158] sm:$0xff]   ;;  %v15730_v29 = vpop.permute.xlu0 %1285 }
 0x3a0   :  { %5252 = vmatprep.subr.bf16.mxu0 %v18839_v6  ;;  %18885 = vst [vmem:[#allocation83_spill] sm:$0xff] %v15730_v29  ;;  %v6807_v29 = vld [vmem:[%s18799_s4 + $0x138] sm:$0xff] }
 0x3a1   :  { %5070 = vmatmul.mubr.bf16.gmra.mrb[176].mxu0 %v13655_v62  ;;  %v13659_v62 = vld [vmem:[%s18796_s1 + $0x9e0] ss:$28 sps:$4 sm:$0xff]  }
 0x3a2   :  { %5077 = vmatprep.mubr.bf16.mxu0 %v13657_v1  ;;  %7014 = vperm.xlu0 %13290, %v6804_v24   ;;  %v6805_v1 = vld [vmem:[%s18799_s4 + $0x128] sm:$0xff]  ;;  %v15718_v24 = vpop.permute.xlu1 %1280 }
 0x3a3   :  { %18884 = vst [vmem:[#allocation82_spill] sm:$0xff] %v15718_v24  ;;  %7019 = vperm.xlu1 %13291, %v6805_v1   ;;  %5253 = vmatpush1.bf16.msra.mxu0 %v13713_v56  ;;  %v13717_v1 = vld [vmem:[%s18795_s0 + $0x160] sm:$0xff]   ;;  %v15750_v56 = vpop.permute.xlu0 %1295 }
 0x3a4   :  { %5254 = vmatprep.subr.bf16.mxu0 %v18839_v6  ;;  %18887 = vst [vmem:[#allocation85_spill] sm:$0xff] %v15750_v56 }
 0x3a6   :  { %7104 = vperm.xlu0 %13290, %v6822_v18   ;;  %v13663_v18 = vld [vmem:[%s18796_s1 + $0xa54] ss:$28 sps:$4 sm:$0xff]   ;;  %v15739_v24 = vpop.permute.xlu1 %1290 }
 0x3a7   :  { %18886 = vst [vmem:[#allocation84_spill] sm:$0xff] %v15739_v24  ;;  %5255 = vmatpush1.bf16.msra.mxu0 %v13717_v1  ;;  %v13666_v1 = vld [vmem:[%s18796_s1 + $0xa8c] ss:$28 sps:$4 sm:$0xff]   ;;  %v15771_v56 = vpop.permute.xlu0 %1305 }
 0x3a8   :  { %5256 = vmatprep.subr.bf16.mxu0 %v18839_v6  ;;  %18889 = vst [vmem:[#allocation87_spill] sm:$0xff] %v15771_v56  ;;  %v6809_v24 = vld [vmem:[%s18799_s4 + $0x148] sm:$0xff] }
 0x3a9   :  { %5078 = vmatmul.mubr.bf16.gmra.mrb[180].mxu0 %v13659_v62  ;;  %v6823_v62 = vld [vmem:[%s18799_s4 + $0x1b8] sm:$0xff] }
 0x3aa   :  { %5085 = vmatprep.mubr.bf16.mxu0 %v13660_v9  ;;  %v13662_v9 = vld [vmem:[%s18796_s1 + $0xa18] ss:$28 sps:$4 sm:$0xff]   ;;  %7109 = vperm.xlu1 %13291, %v6823_v62   ;;  %v6825_v62 = vld [vmem:[%s18799_s4 + $0x1c8] sm:$0xff] }
 0x3ab   :  { %7024 = vperm.xlu0 %13290, %v6806_v46   ;;  %v13718_v46 = vld [vmem:[%s18795_s0 + $0x168] sm:$0xff]  }
 0x3ac   :  { %5257 = vmatpush1.bf16.msra.mxu0 %v13718_v46  ;;  %v6826_v46 = vld [vmem:[%s18799_s4 + $0x1d0] sm:$0xff] }
 0x3ad   :  { %5258 = vmatprep.subr.bf16.mxu0 %v18839_v6 }
 0x3ae   :  { %7029 = vperm.xlu1 %13291, %v6807_v29   ;;  %v13722_v29 = vld [vmem:[%s18795_s0 + $0x170] sm:$0xff]  }
 0x3af   :  { %7114 = vperm.xlu0 %13290, %v6824_v19   ;;  %v15765_v19 = vpop.permute.xlu1 %1300 }
 0x3b0   :  { %18888 = vst [vmem:[#allocation86_spill] sm:$0xff] %v15765_v19  ;;  %5259 = vmatpush1.bf16.msra.mxu0 %v13722_v29  ;;  %v13668_v29 = vld [vmem:[%s18796_s1 + $0xa88] ss:$28 sps:$4 sm:$0xff]   ;;  %v13728_v19 = vld [vmem:[%s18796_s1 + $0x18] ss:$28 sps:$4 sm:$0xff]  }
 0x3b1   :  { %5086 = vmatmul.mubr.bf16.gmra.mrb[184].mxu0 %v13662_v9  ;;  %v6808_v9 = vld [vmem:[%s18799_s4 + $0x140] sm:$0xff]  ;;  %5260 = vmatprep.subr.bf16.mxu0 %v18839_v6 }
 0x3b2   :  { %5093 = vmatprep.mubr.bf16.mxu0 %v13663_v18  ;;  %v13665_v18 = vld [vmem:[%s18796_s1 + $0xa50] ss:$28 sps:$4 sm:$0xff]   ;;  %7119 = vperm.xlu1 %13291, %v6825_v62   ;;  %v13723_v62 = vld [vmem:[%s18795_s0 + $0x178] sm:$0xff]  }
 0x3b3   :  { %7034 = vperm.xlu0 %13290, %v6808_v9   ;;  %v13724_v9 = vld [vmem:[%s18795_s0 + $0x180] sm:$0xff]   ;;  %v15795_v56 = vpop.permute.xlu1 %1310  ;;  %12072 = vmatprep.mubr.msk.bf16.mxu1 %vm3947_vm0, %v13728_v19 }
 0x3b4   :  { %12070 = vmatprep.subr.bf16.mxu1 %v13724_v9  ;;  %18890 = vst [vmem:[#allocation88_spill] sm:$0xff] %v15795_v56  ;;  %5261 = vmatpush1.bf16.msra.mxu0 %v13723_v62  ;;  %v6811_v62 = vld [vmem:[%s18799_s4 + $0x158] sm:$0xff]  ;;  %v6812_v19 = vld [vmem:[%s18799_s4 + $0x160] sm:$0xff] }
 0x3b5   :  { %12071 = vmatpush3.bf16.msra.mxu1 %v13724_v9  ;;  %v13729_v9 = vld [vmem:[%s18796_s1 + $0x50] ss:$28 sps:$4 sm:$0xff]  }
 0x3b6   :  { %7039 = vperm.xlu1 %13291, %v6809_v24   ;;  %v13670_v24 = vld [vmem:[%s18796_s1 + $0xac4] ss:$28 sps:$4 sm:$0xff]   ;;  %8432 = vmatprep.subr.bf16.mxu1 %v18839_v6 }
 0x3b7   :  { %7124 = vperm.xlu0 %13290, %v6826_v46   ;;  %v15801_v46 = vpop.permute.xlu0 %1315 }
 0x3b8   :  { %18891 = vst [vmem:[#allocation89_spill] sm:$0xff] %v15801_v46  ;;  %12073 = vmatmul.mubr.msk.bf16.vlgmr.msra.gmra.mrb[0].mxu1 %vm3947_vm0, %v13729_v9  ;;  %v13672_v46 = vld [vmem:[%s18796_s1 + $0xac0] ss:$28 sps:$4 sm:$0xff]  }
 0x3b9   :  { %5094 = vmatmul.mubr.bf16.gmra.mrb[188].mxu0 %v13665_v18  ;;  %v6827_v18 = vld [vmem:[%s18799_s4 + $0x1d8] sm:$0xff] }
 0x3ba   :  { %5101 = vmatprep.mubr.bf16.mxu0 %v13666_v1  ;;  %v6810_v1 = vld [vmem:[%s18799_s4 + $0x150] sm:$0xff]  ;;  %7129 = vperm.xlu1 %13291, %v6827_v18   ;;  %v6828_v18 = vld [vmem:[%s18799_s4 + $0x1e0] sm:$0xff] }
 0x3bb   :  { %7044 = vperm.xlu0 %13290, %v6810_v1   ;;  %v15817_v1 = vpop.permute.xlu1 %1320  ;;  %v15828_v56 = vpop.permute.xlu0 %1325 }
 0x3bc   :  { %18892 = vst [vmem:[#allocation90_spill] sm:$0xff] %v15817_v1  ;;  %18893 = vst [vmem:[#allocation91_spill] sm:$0xff] %v15828_v56  ;;  %v6815_v56 = vld [vmem:[%s18799_s4 + $0x178] sm:$0xff] }
 0x3be   :  { %7049 = vperm.xlu1 %13291, %v6811_v62   ;;  %v6813_v62 = vld [vmem:[%s18799_s4 + $0x168] sm:$0xff] }
 0x3bf   :  { %7134 = vperm.xlu0 %13290, %v6828_v18   ;;  %v15833_v9 = vpop.permute.xlu1 %1330  ;;  %v6830_v18 = vld [vmem:[%s18799_s4 + $0x1f0] sm:$0xff]  ;;  %v15841_v1 = vpop.permute.xlu0 %1335 }
 0x3c0   :  { %18894 = vst [vmem:[#allocation92_spill] sm:$0xff] %v15833_v9  ;;  %18895 = vst [vmem:[#allocation93_spill] sm:$0xff] %v15841_v1 }
 0x3c1   :  { %5102 = vmatmul.mubr.bf16.gmra.mrb[192].mxu0 %v13668_v29  ;;  %v6829_v29 = vld [vmem:[%s18799_s4 + $0x1e8] sm:$0xff] }
 0x3c2   :  { %5109 = vmatprep.mubr.bf16.mxu0 %v13670_v24  ;;  %v13673_v24 = vld [vmem:[%s18796_s1 + $0xafc] ss:$28 sps:$4 sm:$0xff]   ;;  %7139 = vperm.xlu1 %13291, %v6829_v29  }
 0x3c3   :  { %7054 = vperm.xlu0 %13290, %v6812_v19   ;;  %v6831_v29 = vld [vmem:[%s18799_s4 + $0x1f8] sm:$0xff]  ;;  %v15855_v9 = vpop.permute.xlu1 %1340  ;;  %v15863_v1 = vpop.permute.xlu0 %1345 }
 0x3c4   :  { %v13675_v19 = vld [vmem:[%s18796_s1 + $0xaf8] ss:$28 sps:$4 sm:$0xff]   ;;  %18896 = vst [vmem:[#allocation94_spill] sm:$0xff] %v15855_v9  ;;  %18897 = vst [vmem:[#allocation95_spill] sm:$0xff] %v15863_v1 }
 0x3c6   :  { %7059 = vperm.xlu1 %13291, %v6813_v62   ;;  %v13736_v62 = vld [vmem:[%s18796_s1 + $0x88] ss:$28 sps:$4 sm:$0xff]  }
 0x3c7   :  { %7144 = vperm.xlu0 %13290, %v6830_v18   ;;  %v13737_v18 = vld [vmem:[%s18796_s1 + $0xc0] ss:$28 sps:$4 sm:$0xff]   ;;  %12076 = vmatprep.mubr.msk.bf16.mxu1 %vm3947_vm0, %v13736_v62  ;;  %v13678_v62 = vld [vmem:[%s18796_s1 + $0xb30] ss:$28 sps:$4 sm:$0xff]   ;;  %v15882_v1 = vpop.permute.xlu1 %1350 }
 0x3c8   :  { %12077 = vmatmul.mubr.msk.bf16.gmra.mrb[4].mxu1 %vm3947_vm0, %v13737_v18  ;;  %18898 = vst [vmem:[#allocation96_spill] sm:$0xff] %v15882_v1  ;;  %v9751_v18 = vld [vmem:[%s18801_s6 + $0x18] sm:$0xff] }
 0x3c9   :  { %5110 = vmatmul.mubr.bf16.gmra.mrb[196].mxu0 %v13672_v46  ;;  %v6814_v46 = vld [vmem:[%s18799_s4 + $0x170] sm:$0xff] }
 0x3ca   :  { %5117 = vmatprep.mubr.bf16.mxu0 %v13673_v24  ;;  %v13676_v24 = vld [vmem:[%s18796_s1 + $0xb34] ss:$28 sps:$4 sm:$0xff]   ;;  %7149 = vperm.xlu1 %13291, %v6831_v29   ;;  %v9748_v29 = vld [vmem:[%s18801_s6] sm:$0xff] }
 0x3cb   :  { %7064 = vperm.xlu0 %13290, %v6814_v46   ;;  %v9749_v46 = vld [vmem:[%s18801_s6 + $0x8] sm:$0xff]  ;;  %v15895_v9 = vpop.permute.xlu1 %1360 }
 0x3cc   :  { %18900 = vst [vmem:[#allocation98_spill] sm:$0xff] %v15895_v9 }
 0x3ce   :  { %7069 = vperm.xlu1 %13291, %v6815_v56   ;;  %v15887_v56 = vpop.permute.xlu0 %1355 }
 0x3cf   :  { %9782 = vperm.xlu0 %13290, %v9748_v29   ;;  %18899 = vst [vmem:[#allocation97_spill] sm:$0xff] %v15887_v56  ;;  %v9752_v29 = vld [vmem:[%s18801_s6 + $0x20] sm:$0xff]  ;;  %v9753_v56 = vld [vmem:[%s18801_s6 + $0x28] sm:$0xff]  ;;  %v15917_v9 = vpop.permute.xlu1 %1370 }
 0x3d0   :  { %18902 = vst [vmem:[#allocation100_spill] sm:$0xff] %v15917_v9  ;;  %v13685_v9 = vld [vmem:[%s18796_s1 + $0xba0] ss:$28 sps:$4 sm:$0xff]  }
 0x3d1   :  { %5118 = vmatmul.mubr.bf16.gmra.mrb[200].mxu0 %v13675_v19  ;;  %v9750_v19 = vld [vmem:[%s18801_s6 + $0x10] sm:$0xff] }
 0x3d2   :  { %5125 = vmatprep.mubr.bf16.mxu0 %v13676_v24  ;;  %v13679_v24 = vld [vmem:[%s18796_s1 + $0xb6c] ss:$28 sps:$4 sm:$0xff]   ;;  %9787 = vperm.xlu1 %13291, %v9749_v46   ;;  %v9754_v46 = vld [vmem:[%s18801_s6 + $0x30] sm:$0xff] }
 0x3d3   :  { %9792 = vperm.xlu0 %13290, %v9750_v19   ;;  %v13681_v19 = vld [vmem:[%s18796_s1 + $0xb68] ss:$28 sps:$4 sm:$0xff]  }
 0x3d6   :  { %9797 = vperm.xlu1 %13291, %v9751_v18   ;;  %v13744_v18 = vld [vmem:[%s18796_s1 + $0xf8] ss:$28 sps:$4 sm:$0xff]  }
 0x3d7   :  { %9802 = vperm.xlu0 %13290, %v9752_v29   ;;  %v13745_v29 = vld [vmem:[%s18796_s1 + $0x130] ss:$28 sps:$4 sm:$0xff]   ;;  %12080 = vmatprep.mubr.msk.bf16.mxu1 %vm3947_vm0, %v13744_v18 }
 0x3d8   :  { %12081 = vmatmul.mubr.msk.bf16.gmra.mrb[8].mxu1 %vm3947_vm0, %v13745_v29  ;;  %v9758_v18 = vld [vmem:[%s18801_s6 + $0x50] sm:$0xff]  ;;  %v15941_v29 = vpop.permute.xlu1 %1380 }
 0x3d9   :  { %5126 = vmatmul.mubr.bf16.gmra.mrb[204].mxu0 %v13678_v62  ;;  %v15906_v62 = vpop.permute.xlu0 %1365  ;;  %18904 = vst [vmem:[#allocation102_spill] sm:$0xff] %v15941_v29  ;;  %v9761_v29 = vld [vmem:[%s18801_s6 + $0x68] sm:$0xff] }
 0x3da   :  { %5133 = vmatprep.mubr.bf16.mxu0 %v13679_v24  ;;  %18901 = vst [vmem:[#allocation99_spill] sm:$0xff] %v15906_v62  ;;  %v13683_v24 = vld [vmem:[%s18796_s1 + $0xba4] ss:$28 sps:$4 sm:$0xff]   ;;  %9807 = vperm.xlu1 %13291, %v9753_v56   ;;  %v9755_v62 = vld [vmem:[%s18801_s6 + $0x38] sm:$0xff] }
 0x3db   :  { %9812 = vperm.xlu0 %13290, %v9754_v46   ;;  %v9756_v56 = vld [vmem:[%s18801_s6 + $0x40] sm:$0xff] }
 0x3dd   :  { %v15927_v46 = vpop.permute.xlu0 %1375 }
 0x3de   :  { %18903 = vst [vmem:[#allocation101_spill] sm:$0xff] %v15927_v46  ;;  %9817 = vperm.xlu1 %13291, %v9755_v62   ;;  %v9760_v46 = vld [vmem:[%s18801_s6 + $0x60] sm:$0xff] }
 0x3df   :  { %9822 = vperm.xlu0 %13290, %v9756_v56   ;;  %v9759_v56 = vld [vmem:[%s18801_s6 + $0x58] sm:$0xff] }
 0x3e1   :  { %5134 = vmatmul.mubr.bf16.gmra.mrb[208].mxu0 %v13681_v19  ;;  %v9757_v19 = vld [vmem:[%s18801_s6 + $0x48] sm:$0xff]  ;;  %v15943_v62 = vpop.permute.xlu0 %1385 }
 0x3e2   :  { %5141 = vmatprep.mubr.bf16.mxu0 %v13683_v24  ;;  %v13686_v24 = vld [vmem:[%s18796_s1 + $0xbdc] ss:$28 sps:$4 sm:$0xff]   ;;  %9827 = vperm.xlu1 %13291, %v9757_v19   ;;  %18905 = vst [vmem:[#allocation103_spill] sm:$0xff] %v15943_v62 }
 0x3e3   :  { %9832 = vperm.xlu0 %13290, %v9758_v18   ;;  %v13688_v19 = vld [vmem:[%s18796_s1 + $0xbd8] ss:$28 sps:$4 sm:$0xff]   ;;  %v15960_v18 = vpop.permute.xlu1 %1390  ;;  %v13753_v62 = vld [vmem:[%s18796_s1 + $0x1a0] ss:$28 sps:$4 sm:$0xff]  }
 0x3e4   :  { %18906 = vst [vmem:[#allocation104_spill] sm:$0xff] %v15960_v18  ;;  %v9763_v18 = vld [vmem:[%s18801_s6 + $0x78] sm:$0xff] }
 0x3e6   :  { %9837 = vperm.xlu1 %13291, %v9759_v56   ;;  %v15965_v56 = vpop.permute.xlu0 %1395 }
 0x3e7   :  { %9842 = vperm.xlu0 %13290, %v9760_v46   ;;  %18907 = vst [vmem:[#allocation105_spill] sm:$0xff] %v15965_v56  ;;  %v13752_v46 = vld [vmem:[%s18796_s1 + $0x168] ss:$28 sps:$4 sm:$0xff]   ;;  %v13691_v56 = vld [vmem:[%s18796_s1 + $0xc10] ss:$28 sps:$4 sm:$0xff]  }
 0x3e8   :  { %12084 = vmatprep.mubr.msk.bf16.mxu1 %vm3947_vm0, %v13752_v46  ;;  %v9766_v46 = vld [vmem:[%s18801_s6 + $0x90] sm:$0xff] }
 0x3e9   :  { %5142 = vmatmul.mubr.bf16.gmra.mrb[212].mxu0 %v13685_v9  ;;  %v9762_v9 = vld [vmem:[%s18801_s6 + $0x70] sm:$0xff]  ;;  %12085 = vmatmul.mubr.msk.bf16.gmra.mrb[12].mxu1 %vm3947_vm0, %v13753_v62  ;;  %v13692_v62 = vld [vmem:[%s18796_s1 + $0xc4c] ss:$28 sps:$4 sm:$0xff]  }
 0x3ea   :  { %5149 = vmatprep.mubr.bf16.mxu0 %v13686_v24  ;;  %v13689_v24 = vld [vmem:[%s18796_s1 + $0xc14] ss:$28 sps:$4 sm:$0xff]   ;;  %9847 = vperm.xlu1 %13291, %v9761_v29   ;;  %v9764_v29 = vld [vmem:[%s18801_s6 + $0x80] sm:$0xff]  ;;  %v15992_v1 = vpop.permute.xlu0 %1405 }
 0x3eb   :  { %9852 = vperm.xlu0 %13290, %v9762_v9   ;;  %v15981_v9 = vpop.permute.xlu1 %1400  ;;  %18909 = vst [vmem:[#allocation107_spill] sm:$0xff] %v15992_v1  ;;  %v10615_v1 = vld [vmem:[%s18802_s7 + $0x8] sm:$0xff] }
 0x3ec   :  { %18908 = vst [vmem:[#allocation106_spill] sm:$0xff] %v15981_v9 }
 0x3ee   :  { %9857 = vperm.xlu1 %13291, %v9763_v18   ;;  %v16005_v9 = vpop.permute.xlu0 %6914 }
 0x3ef   :  { %9862 = vperm.xlu0 %13290, %v9764_v29   ;;  %v15997_v18 = vpop.permute.xlu1 %1410  ;;  %v9768_v29 = vld [vmem:[%s18801_s6 + $0xa0] sm:$0xff]  ;;  %18911 = vst [vmem:[#allocation109_spill] sm:$0xff] %v16005_v9 }
 0x3f0   :  { %18910 = vst [vmem:[#allocation108_spill] sm:$0xff] %v15997_v18 }
 0x3f1   :  { %5150 = vmatmul.mubr.bf16.gmra.mrb[216].mxu0 %v13688_v19  ;;  %v9765_v19 = vld [vmem:[%s18801_s6 + $0x88] sm:$0xff] }
 0x3f2   :  { %5157 = vmatprep.mubr.bf16.mxu0 %v13689_v24  ;;  %9867 = vperm.xlu1 %13291, %v9765_v19   ;;  %v9767_v24 = vld [vmem:[%s18801_s6 + $0x98] sm:$0xff]  ;;  %v9769_v19 = vld [vmem:[%s18801_s6 + $0xa8] sm:$0xff]  ;;  %v16027_v9 = vpop.permute.xlu0 %6834 }
 0x3f3   :  { %9872 = vperm.xlu0 %13290, %v9766_v46   ;;  %v13694_v46 = vld [vmem:[%s18796_s1 + $0xc48] ss:$28 sps:$4 sm:$0xff]   ;;  %v16019_v18 = vpop.permute.xlu1 %6919  ;;  %18913 = vst [vmem:[#allocation111_spill] sm:$0xff] %v16027_v9 }
 0x3f4   :  { %18912 = vst [vmem:[#allocation110_spill] sm:$0xff] %v16019_v18 }
 0x3f6   :  { %9877 = vperm.xlu1 %13291, %v9767_v24   ;;  %v13760_v24 = vld [vmem:[%s18796_s1 + $0x1d8] ss:$28 sps:$4 sm:$0xff]  }
 0x3f7   :  { %9882 = vperm.xlu0 %13290, %v9768_v29   ;;  %v13761_v29 = vld [vmem:[%s18796_s1 + $0x210] ss:$28 sps:$4 sm:$0xff]   ;;  %12088 = vmatprep.mubr.msk.bf16.mxu1 %vm3947_vm0, %v13760_v24  ;;  %v13698_v24 = vld [vmem:[%s18796_s1 + $0xc80] ss:$28 sps:$4 sm:$0xff]   ;;  %v16046_v18 = vpop.permute.xlu1 %6839 }
 0x3f8   :  { %12089 = vmatmul.mubr.msk.bf16.gmra.mrb[16].mxu1 %vm3947_vm0, %v13761_v29  ;;  %18914 = vst [vmem:[#allocation112_spill] sm:$0xff] %v16046_v18  ;;  %v10619_v29 = vld [vmem:[%s18802_s7 + $0x28] sm:$0xff] }
 0x3f9   :  { %5158 = vmatmul.mubr.bf16.gmra.mrb[220].mxu0 %v13691_v56  ;;  %v10614_v56 = vld [vmem:[%s18802_s7] sm:$0xff] }
 0x3fa   :  { %5165 = vmatprep.mubr.bf16.mxu0 %v13692_v62  ;;  %v13696_v62 = vld [vmem:[%s18796_s1 + $0xc84] ss:$28 sps:$4 sm:$0xff]   ;;  %9887 = vperm.xlu1 %13291, %v9769_v19   ;;  %v10616_v19 = vld [vmem:[%s18802_s7 + $0x10] sm:$0xff] }
 0x3fb   :  { %10648 = vperm.xlu0 %13290, %v10614_v56   ;;  %v10617_v56 = vld [vmem:[%s18802_s7 + $0x18] sm:$0xff]  ;;  %v16059_v9 = vpop.permute.xlu1 %6929 }
 0x3fc   :  { %18916 = vst [vmem:[#allocation114_spill] sm:$0xff] %v16059_v9 }
 0x3fe   :  { %10653 = vperm.xlu1 %13291, %v10615_v1   ;;  %v16051_v1 = vpop.permute.xlu0 %6924 }
 0x3ff   :  { %10658 = vperm.xlu0 %13290, %v10616_v19   ;;  %18915 = vst [vmem:[#allocation113_spill] sm:$0xff] %v16051_v1  ;;  %v10620_v19 = vld [vmem:[%s18802_s7 + $0x30] sm:$0xff]  ;;  %v10621_v1 = vld [vmem:[%s18802_s7 + $0x38] sm:$0xff]  ;;  %v16081_v9 = vpop.permute.xlu1 %6849 }
 0x400   :  { %18918 = vst [vmem:[#allocation116_spill] sm:$0xff] %v16081_v9  ;;  %v13704_v9 = vld [vmem:[%s18796_s1 + $0xcf0] ss:$28 sps:$4 sm:$0xff]  }
 0x401   :  { %5166 = vmatmul.mubr.bf16.gmra.mrb[224].mxu0 %v13694_v46  ;;  %v10618_v46 = vld [vmem:[%s18802_s7 + $0x20] sm:$0xff] }
 0x402   :  { %5173 = vmatprep.mubr.bf16.mxu0 %v13696_v62  ;;  %v13699_v62 = vld [vmem:[%s18796_s1 + $0xcbc] ss:$28 sps:$4 sm:$0xff]   ;;  %10663 = vperm.xlu1 %13291, %v10617_v56   ;;  %v10622_v56 = vld [vmem:[%s18802_s7 + $0x40] sm:$0xff] }
 0x403   :  { %10668 = vperm.xlu0 %13290, %v10618_v46   ;;  %v13701_v46 = vld [vmem:[%s18796_s1 + $0xcb8] ss:$28 sps:$4 sm:$0xff]  }
 0x406   :  { %10673 = vperm.xlu1 %13291, %v10619_v29   ;;  %v13768_v29 = vld [vmem:[%s18796_s1 + $0x248] ss:$28 sps:$4 sm:$0xff]  }
 0x407   :  { %10678 = vperm.xlu0 %13290, %v10620_v19   ;;  %v13769_v19 = vld [vmem:[%s18796_s1 + $0x280] ss:$28 sps:$4 sm:$0xff]   ;;  %12092 = vmatprep.mubr.msk.bf16.mxu1 %vm3947_vm0, %v13768_v29 }
 0x408   :  { %12093 = vmatmul.mubr.msk.bf16.gmra.mrb[20].mxu1 %vm3947_vm0, %v13769_v19  ;;  %v10626_v29 = vld [vmem:[%s18802_s7 + $0x60] sm:$0xff]  ;;  %v16105_v19 = vpop.permute.xlu1 %6939 }
 0x409   :  { %5174 = vmatmul.mubr.bf16.gmra.mrb[228].mxu0 %v13698_v24  ;;  %v16070_v24 = vpop.permute.xlu0 %6844  ;;  %18920 = vst [vmem:[#allocation118_spill] sm:$0xff] %v16105_v19  ;;  %v10629_v19 = vld [vmem:[%s18802_s7 + $0x78] sm:$0xff] }
 0x40a   :  { %5181 = vmatprep.mubr.bf16.mxu0 %v13699_v62  ;;  %18917 = vst [vmem:[#allocation115_spill] sm:$0xff] %v16070_v24  ;;  %v13702_v62 = vld [vmem:[%s18796_s1 + $0xcf4] ss:$28 sps:$4 sm:$0xff]   ;;  %10683 = vperm.xlu1 %13291, %v10621_v1   ;;  %v10623_v24 = vld [vmem:[%s18802_s7 + $0x48] sm:$0xff] }
 0x40b   :  { %10688 = vperm.xlu0 %13290, %v10622_v56   ;;  %v10624_v1 = vld [vmem:[%s18802_s7 + $0x50] sm:$0xff] }
 0x40d   :  { %v16091_v56 = vpop.permute.xlu0 %6934 }
 0x40e   :  { %18919 = vst [vmem:[#allocation117_spill] sm:$0xff] %v16091_v56  ;;  %10693 = vperm.xlu1 %13291, %v10623_v24   ;;  %v10628_v56 = vld [vmem:[%s18802_s7 + $0x70] sm:$0xff] }
 0x40f   :  { %10698 = vperm.xlu0 %13290, %v10624_v1   ;;  %v10627_v1 = vld [vmem:[%s18802_s7 + $0x68] sm:$0xff] }
 0x411   :  { %5182 = vmatmul.mubr.bf16.gmra.mrb[232].mxu0 %v13701_v46  ;;  %v10625_v46 = vld [vmem:[%s18802_s7 + $0x58] sm:$0xff]  ;;  %v16107_v24 = vpop.permute.xlu0 %6854 }
 0x412   :  { %5189 = vmatprep.mubr.bf16.mxu0 %v13702_v62  ;;  %v13705_v62 = vld [vmem:[%s18796_s1 + $0xd2c] ss:$28 sps:$4 sm:$0xff]   ;;  %10703 = vperm.xlu1 %13291, %v10625_v46   ;;  %18921 = vst [vmem:[#allocation119_spill] sm:$0xff] %v16107_v24 }
 0x413   :  { %10708 = vperm.xlu0 %13290, %v10626_v29   ;;  %v13707_v46 = vld [vmem:[%s18796_s1 + $0xd28] ss:$28 sps:$4 sm:$0xff]   ;;  %v16124_v29 = vpop.permute.xlu1 %6859  ;;  %v13777_v24 = vld [vmem:[%s18796_s1 + $0x2f0] ss:$28 sps:$4 sm:$0xff]  }
 0x414   :  { %18922 = vst [vmem:[#allocation120_spill] sm:$0xff] %v16124_v29  ;;  %v10631_v29 = vld [vmem:[%s18802_s7 + $0x88] sm:$0xff] }
 0x416   :  { %10713 = vperm.xlu1 %13291, %v10627_v1   ;;  %v16129_v1 = vpop.permute.xlu0 %6944 }
 0x417   :  { %10718 = vperm.xlu0 %13290, %v10628_v56   ;;  %18923 = vst [vmem:[#allocation121_spill] sm:$0xff] %v16129_v1  ;;  %v13776_v56 = vld [vmem:[%s18796_s1 + $0x2b8] ss:$28 sps:$4 sm:$0xff]   ;;  %v13711_v1 = vld [vmem:[%s18796_s1 + $0xd60] ss:$28 sps:$4 sm:$0xff]  }
 0x418   :  { %12096 = vmatprep.mubr.msk.bf16.mxu1 %vm3947_vm0, %v13776_v56  ;;  %v10633_v56 = vld [vmem:[%s18802_s7 + $0x98] sm:$0xff] }
 0x419   :  { %5190 = vmatmul.mubr.bf16.gmra.mrb[236].mxu0 %v13704_v9  ;;  %v10630_v9 = vld [vmem:[%s18802_s7 + $0x80] sm:$0xff]  ;;  %12097 = vmatmul.mubr.msk.bf16.gmra.mrb[24].mxu1 %vm3947_vm0, %v13777_v24  ;;  %v13714_v24 = vld [vmem:[%s18796_s1 + $0xd9c] ss:$28 sps:$4 sm:$0xff]  }
 0x41a   :  { %5197 = vmatprep.mubr.bf16.mxu0 %v13705_v62  ;;  %v13709_v62 = vld [vmem:[%s18796_s1 + $0xd64] ss:$28 sps:$4 sm:$0xff]   ;;  %10723 = vperm.xlu1 %13291, %v10629_v19   ;;  %v10632_v19 = vld [vmem:[%s18802_s7 + $0x90] sm:$0xff]  ;;  %v16156_v18 = vpop.permute.xlu0 %6864 }
 0x41b   :  { %10728 = vperm.xlu0 %13290, %v10630_v9   ;;  %v16145_v9 = vpop.permute.xlu1 %6949  ;;  %18925 = vst [vmem:[#allocation123_spill] sm:$0xff] %v16156_v18  ;;  %v9773_v18 = vld [vmem:[%s18801_s6 + $0xc8] sm:$0xff] }
 0x41c   :  { %18924 = vst [vmem:[#allocation122_spill] sm:$0xff] %v16145_v9 }
 0x41e   :  { %10733 = vperm.xlu1 %13291, %v10631_v29   ;;  %v16169_v9 = vpop.permute.xlu0 %6954 }
 0x41f   :  { %10738 = vperm.xlu0 %13290, %v10632_v19   ;;  %v16161_v29 = vpop.permute.xlu1 %6869  ;;  %v10634_v19 = vld [vmem:[%s18802_s7 + $0xa0] sm:$0xff]  ;;  %18927 = vst [vmem:[#allocation125_spill] sm:$0xff] %v16169_v9 }
 0x420   :  { %18926 = vst [vmem:[#allocation124_spill] sm:$0xff] %v16161_v29 }
 0x421   :  { %5198 = vmatmul.mubr.bf16.gmra.mrb[240].mxu0 %v13707_v46  ;;  %v9770_v46 = vld [vmem:[%s18801_s6 + $0xb0] sm:$0xff] }
 0x422   :  { %5205 = vmatprep.mubr.bf16.mxu0 %v13709_v62  ;;  %9892 = vperm.xlu1 %13291, %v9770_v46   ;;  %v9771_v62 = vld [vmem:[%s18801_s6 + $0xb8] sm:$0xff]  ;;  %v9772_v46 = vld [vmem:[%s18801_s6 + $0xc0] sm:$0xff]  ;;  %v16191_v9 = vpop.permute.xlu0 %6874 }
 0x423   :  { %10743 = vperm.xlu0 %13290, %v10633_v56   ;;  %v13716_v56 = vld [vmem:[%s18796_s1 + $0xd98] ss:$28 sps:$4 sm:$0xff]   ;;  %v16183_v29 = vpop.permute.xlu1 %6959  ;;  %18929 = vst [vmem:[#allocation127_spill] sm:$0xff] %v16191_v9 }
 0x424   :  { %18928 = vst [vmem:[#allocation126_spill] sm:$0xff] %v16183_v29 }
 0x426   :  { %9897 = vperm.xlu1 %13291, %v9771_v62   ;;  %v13784_v62 = vld [vmem:[%s18796_s1 + $0x328] ss:$28 sps:$4 sm:$0xff]  }
 0x427   :  { %10748 = vperm.xlu0 %13290, %v10634_v19   ;;  %v13785_v19 = vld [vmem:[%s18796_s1 + $0x360] ss:$28 sps:$4 sm:$0xff]   ;;  %12100 = vmatprep.mubr.msk.bf16.mxu1 %vm3947_vm0, %v13784_v62  ;;  %v13721_v62 = vld [vmem:[%s18796_s1 + $0xdd0] ss:$28 sps:$4 sm:$0xff]   ;;  %v16210_v29 = vpop.permute.xlu1 %6879 }
 0x428   :  { %12101 = vmatmul.mubr.msk.bf16.gmra.mrb[28].mxu1 %vm3947_vm0, %v13785_v19  ;;  %18930 = vst [vmem:[#allocation128_spill] sm:$0xff] %v16210_v29  ;;  %v9775_v19 = vld [vmem:[%s18801_s6 + $0xd8] sm:$0xff]  ;;  %v13843_v29 = vld [vmem:[%s18796_s1 + $0x788] ss:$28 sps:$4 sm:$0xff]  }
 0x429   :  { %5206 = vmatmul.mubr.bf16.gmra.mrb[244].mxu0 %v13711_v1  ;;  %v10635_v1 = vld [vmem:[%s18802_s7 + $0xa8] sm:$0xff] }
 0x42a   :  { %5213 = vmatprep.mubr.bf16.mxu0 %v13714_v24  ;;  %v13719_v24 = vld [vmem:[%s18796_s1 + $0xdd4] ss:$28 sps:$4 sm:$0xff]   ;;  %9902 = vperm.xlu1 %13291, %v9772_v46  }
 0x42b   :  { %10753 = vperm.xlu0 %13290, %v10635_v1   ;;  %v10636_v46 = vld [vmem:[%s18802_s7 + $0xb0] sm:$0xff]  ;;  %v16223_v9 = vpop.permute.xlu1 %6969 }
 0x42c   :  { %v9774_v1 = vld [vmem:[%s18801_s6 + $0xd0] sm:$0xff]  ;;  %18932 = vst [vmem:[#allocation130_spill] sm:$0xff] %v16223_v9 }
 0x42e   :  { %9907 = vperm.xlu1 %13291, %v9773_v18   ;;  %v16215_v18 = vpop.permute.xlu0 %6964 }
 0x42f   :  { %10758 = vperm.xlu0 %13290, %v10636_v46   ;;  %18931 = vst [vmem:[#allocation129_spill] sm:$0xff] %v16215_v18  ;;  %v10638_v46 = vld [vmem:[%s18802_s7 + $0xc0] sm:$0xff]  ;;  %v16245_v9 = vpop.permute.xlu1 %6889 }
 0x430   :  { %v9776_v18 = vld [vmem:[%s18801_s6 + $0xe0] sm:$0xff]  ;;  %18934 = vst [vmem:[#allocation132_spill] sm:$0xff] %v16245_v9 }
 0x431   :  { %5214 = vmatmul.mubr.bf16.gmra.mrb[248].mxu0 %v13716_v56  ;;  %v10637_v56 = vld [vmem:[%s18802_s7 + $0xb8] sm:$0xff]  ;;  %v13732_v9 = vld [vmem:[%s18796_s1 + $0x48] ss:$28 sps:$4 sm:$0xff]  }
 0x432   :  { %5221 = vmatprep.mubr.bf16.mxu0 %v13719_v24  ;;  %v13727_v24 = vld [vmem:[%s18796_s1 + $0x14] ss:$28 sps:$4 sm:$0xff]   ;;  %9912 = vperm.xlu1 %13291, %v9774_v1   ;;  %v10639_v1 = vld [vmem:[%s18802_s7 + $0xc8] sm:$0xff] }
 0x433   :  { %10763 = vperm.xlu0 %13290, %v10637_v56   ;;  %v13725_v56 = vld [vmem:[%s18796_s1 + $0x10] ss:$28 sps:$4 sm:$0xff]  }
 0x436   :  { %9917 = vperm.xlu1 %13291, %v9775_v19   ;;  %v13792_v19 = vld [vmem:[%s18796_s1 + $0x398] ss:$28 sps:$4 sm:$0xff]  }
 0x437   :  { %10768 = vperm.xlu0 %13290, %v10638_v46   ;;  %v13793_v46 = vld [vmem:[%s18796_s1 + $0x3d0] ss:$28 sps:$4 sm:$0xff]   ;;  %12104 = vmatprep.mubr.msk.bf16.mxu1 %vm3947_vm0, %v13792_v19  ;;  %v10641_v19 = vld [vmem:[%s18802_s7 + $0xd8] sm:$0xff] }
 0x438   :  { %12105 = vmatmul.mubr.msk.bf16.gmra.mrb[32].mxu1 %vm3947_vm0, %v13793_v46  ;;  %v16269_v46 = vpop.permute.xlu1 %6979 }
 0x439   :  { %5222 = vmatmul.mubr.bf16.gmra.mrb[252].mxu0 %v13721_v62  ;;  %v16234_v62 = vpop.permute.xlu0 %6884  ;;  %18936 = vst [vmem:[#allocation134_spill] sm:$0xff] %v16269_v46  ;;  %v10643_v46 = vld [vmem:[%s18802_s7 + $0xe8] sm:$0xff] }
 0x43a   :  { %5262 = vmatprep.mubr.bf16.mxu0 %v13727_v24  ;;  %18933 = vst [vmem:[#allocation131_spill] sm:$0xff] %v16234_v62  ;;  %v13730_v24 = vld [vmem:[%s18796_s1 + $0x4c] ss:$28 sps:$4 sm:$0xff]   ;;  %9922 = vperm.xlu1 %13291, %v9776_v18   ;;  %v10640_v18 = vld [vmem:[%s18802_s7 + $0xd0] sm:$0xff] }
 0x43b   :  { %10773 = vperm.xlu0 %13290, %v10639_v1   ;;  %v9777_v62 = vld [vmem:[%s18801_s6 + $0xe8] sm:$0xff] }
 0x43d   :  { %v16255_v1 = vpop.permute.xlu0 %6974 }
 0x43e   :  { %18935 = vst [vmem:[#allocation133_spill] sm:$0xff] %v16255_v1  ;;  %9927 = vperm.xlu1 %13291, %v9777_v62   ;;  %v10642_v1 = vld [vmem:[%s18802_s7 + $0xe0] sm:$0xff] }
 0x43f   :  { %10778 = vperm.xlu0 %13290, %v10640_v18   ;;  %v9779_v18 = vld [vmem:[%s18801_s6 + $0xf8] sm:$0xff] }
 0x441   :  { %5263 = vmatmul.mubr.bf16.vlgmr.msra.gmra.mrb[0].mxu0 %v13725_v56  ;;  %v9778_v56 = vld [vmem:[%s18801_s6 + $0xf0] sm:$0xff]  ;;  %v16271_v62 = vpop.permute.xlu0 %6894 }
 0x442   :  { %5270 = vmatprep.mubr.bf16.mxu0 %v13730_v24  ;;  %v13733_v24 = vld [vmem:[%s18796_s1 + $0x84] ss:$28 sps:$4 sm:$0xff]   ;;  %9932 = vperm.xlu1 %13291, %v9778_v56   ;;  %18937 = vst [vmem:[#allocation135_spill] sm:$0xff] %v16271_v62 }
 0x443   :  { %10783 = vperm.xlu0 %13290, %v10641_v19   ;;  %v13735_v56 = vld [vmem:[%s18796_s1 + $0x80] ss:$28 sps:$4 sm:$0xff]   ;;  %v16288_v19 = vpop.permute.xlu1 %6899 }
 0x444   :  { %18938 = vst [vmem:[#allocation136_spill] sm:$0xff] %v16288_v19  ;;  %v13801_v62 = vld [vmem:[%s18796_s1 + $0x440] ss:$28 sps:$4 sm:$0xff]  }
 0x445   :  { %v10645_v19 = vld [vmem:[%s18802_s7 + $0xf8] sm:$0xff] }
 0x446   :  { %9937 = vperm.xlu1 %13291, %v9779_v18   ;;  %v16293_v18 = vpop.permute.xlu0 %6984 }
 0x447   :  { %10788 = vperm.xlu0 %13290, %v10642_v1   ;;  %18939 = vst [vmem:[#allocation137_spill] sm:$0xff] %v16293_v18  ;;  %v13800_v1 = vld [vmem:[%s18796_s1 + $0x408] ss:$28 sps:$4 sm:$0xff]  }
 0x448   :  { %12108 = vmatprep.mubr.msk.bf16.mxu1 %vm3947_vm0, %v13800_v1  ;;  %v13743_v1 = vld [vmem:[%s18796_s1 + $0xf0] ss:$28 sps:$4 sm:$0xff]  }
 0x449   :  { %5271 = vmatmul.mubr.bf16.gmra.mrb[4].mxu0 %v13732_v9  ;;  %v10644_v9 = vld [vmem:[%s18802_s7 + $0xf0] sm:$0xff]  ;;  %12109 = vmatmul.mubr.msk.bf16.gmra.mrb[36].mxu1 %vm3947_vm0, %v13801_v62  ;;  %v13746_v62 = vld [vmem:[%s18796_s1 + $0x12c] ss:$28 sps:$4 sm:$0xff]  }
 0x44a   :  { %5278 = vmatprep.mubr.bf16.mxu0 %v13733_v24  ;;  %v13738_v24 = vld [vmem:[%s18796_s1 + $0xbc] ss:$28 sps:$4 sm:$0xff]   ;;  %10793 = vperm.xlu1 %13291, %v10643_v46   ;;  %v16306_v46 = vpop.permute.xlu1 %6989 }
 0x44b   :  { %10798 = vperm.xlu0 %13290, %v10644_v9   ;;  %18940 = vst [vmem:[#allocation138_spill] sm:$0xff] %v16306_v46  ;;  %v13740_v9 = vld [vmem:[%s18796_s1 + $0xb8] ss:$28 sps:$4 sm:$0xff]   ;;  %v13813_v46 = vld [vmem:[%s18796_s1 + $0x4e8] ss:$28 sps:$4 sm:$0xff]  }
 0x44e   :  { %10803 = vperm.xlu1 %13291, %v10645_v19   ;;  %v13808_v19 = vld [vmem:[%s18796_s1 + $0x478] ss:$28 sps:$4 sm:$0xff]  }
 0x44f   :  { %12112 = vmatprep.mubr.msk.bf16.mxu1 %vm3947_vm0, %v13808_v19  ;;  %v13754_v19 = vld [vmem:[%s18796_s1 + $0x19c] ss:$28 sps:$4 sm:$0xff]  }
 0x451   :  { %5279 = vmatmul.mubr.bf16.gmra.mrb[8].mxu0 %v13735_v56  ;;  %v13741_v56 = vld [vmem:[%s18796_s1 + $0xf4] ss:$28 sps:$4 sm:$0xff]  }
 0x452   :  { %5286 = vmatprep.mubr.bf16.mxu0 %v13738_v24  ;;  %v13809_v24 = vld [vmem:[%s18796_s1 + $0x4b0] ss:$28 sps:$4 sm:$0xff]  }
 0x453   :  { %12113 = vmatmul.mubr.msk.bf16.gmra.mrb[40].mxu1 %vm3947_vm0, %v13809_v24  ;;  %v13818_v24 = vld [vmem:[%s18796_s1 + $0x558] ss:$28 sps:$4 sm:$0xff]  }
 0x454   :  { %12116 = vmatprep.mubr.msk.bf16.mxu1 %vm3947_vm0, %v13813_v46  ;;  %v13756_v46 = vld [vmem:[%s18796_s1 + $0x198] ss:$28 sps:$4 sm:$0xff]  }
 0x459   :  { %5287 = vmatmul.mubr.bf16.gmra.mrb[12].mxu0 %v13740_v9  ;;  %v13748_v9 = vld [vmem:[%s18796_s1 + $0x128] ss:$28 sps:$4 sm:$0xff]  }
 0x45a   :  { %5294 = vmatprep.mubr.bf16.mxu0 %v13741_v56  ;;  %v13749_v56 = vld [vmem:[%s18796_s1 + $0x164] ss:$28 sps:$4 sm:$0xff]  }
 0x461   :  { %5295 = vmatmul.mubr.bf16.gmra.mrb[16].mxu0 %v13743_v1  ;;  %v13814_v1 = vld [vmem:[%s18796_s1 + $0x520] ss:$28 sps:$4 sm:$0xff]  }
 0x462   :  { %5302 = vmatprep.mubr.bf16.mxu0 %v13746_v62  ;;  %12117 = vmatmul.mubr.msk.bf16.gmra.mrb[44].mxu1 %vm3947_vm0, %v13814_v1  ;;  %v13751_v62 = vld [vmem:[%s18796_s1 + $0x160] ss:$28 sps:$4 sm:$0xff]   ;;  %v13823_v1 = vld [vmem:[%s18796_s1 + $0x5c8] ss:$28 sps:$4 sm:$0xff]  }
 0x463   :  { %12120 = vmatprep.mubr.msk.bf16.mxu1 %vm3947_vm0, %v13818_v24  ;;  %v13762_v24 = vld [vmem:[%s18796_s1 + $0x20c] ss:$28 sps:$4 sm:$0xff]  }
 0x469   :  { %5303 = vmatmul.mubr.bf16.gmra.mrb[20].mxu0 %v13748_v9  ;;  %v13819_v9 = vld [vmem:[%s18796_s1 + $0x590] ss:$28 sps:$4 sm:$0xff]  }
 0x46a   :  { %5310 = vmatprep.mubr.bf16.mxu0 %v13749_v56  ;;  %12121 = vmatmul.mubr.msk.bf16.gmra.mrb[48].mxu1 %vm3947_vm0, %v13819_v9  ;;  %v13757_v56 = vld [vmem:[%s18796_s1 + $0x1d4] ss:$28 sps:$4 sm:$0xff]  }
 0x46b   :  { %12124 = vmatprep.mubr.msk.bf16.mxu1 %vm3947_vm0, %v13823_v1  ;;  %v13828_v9 = vld [vmem:[%s18796_s1 + $0x638] ss:$28 sps:$4 sm:$0xff]   ;;  %v13765_v1 = vld [vmem:[%s18796_s1 + $0x244] ss:$28 sps:$4 sm:$0xff]  }
 0x471   :  { %5311 = vmatmul.mubr.bf16.gmra.mrb[24].mxu0 %v13751_v62  ;;  %v13824_v62 = vld [vmem:[%s18796_s1 + $0x600] ss:$28 sps:$4 sm:$0xff]  }
 0x472   :  { %5318 = vmatprep.mubr.bf16.mxu0 %v13754_v19  ;;  %12125 = vmatmul.mubr.msk.bf16.gmra.mrb[52].mxu1 %vm3947_vm0, %v13824_v62  ;;  %v13759_v19 = vld [vmem:[%s18796_s1 + $0x1d0] ss:$28 sps:$4 sm:$0xff]   ;;  %v13833_v62 = vld [vmem:[%s18796_s1 + $0x6a8] ss:$28 sps:$4 sm:$0xff]  }
 0x473   :  { %12128 = vmatprep.mubr.msk.bf16.mxu1 %vm3947_vm0, %v13828_v9  ;;  %v13770_v9 = vld [vmem:[%s18796_s1 + $0x27c] ss:$28 sps:$4 sm:$0xff]  }
 0x479   :  { %5319 = vmatmul.mubr.bf16.gmra.mrb[28].mxu0 %v13756_v46  ;;  %v13829_v46 = vld [vmem:[%s18796_s1 + $0x670] ss:$28 sps:$4 sm:$0xff]  }
 0x47a   :  { %5326 = vmatprep.mubr.bf16.mxu0 %v13757_v56  ;;  %12129 = vmatmul.mubr.msk.bf16.gmra.mrb[56].mxu1 %vm3947_vm0, %v13829_v46  ;;  %v13764_v56 = vld [vmem:[%s18796_s1 + $0x208] ss:$28 sps:$4 sm:$0xff]   ;;  %v13838_v46 = vld [vmem:[%s18796_s1 + $0x718] ss:$28 sps:$4 sm:$0xff]  }
 0x47b   :  { %12132 = vmatprep.mubr.msk.bf16.mxu1 %vm3947_vm0, %v13833_v62  ;;  %v13839_v62 = vld [vmem:[%s18796_s1 + $0x750] ss:$28 sps:$4 sm:$0xff]  }
 0x481   :  { %5327 = vmatmul.mubr.bf16.gmra.mrb[32].mxu0 %v13759_v19  ;;  %v13834_v19 = vld [vmem:[%s18796_s1 + $0x6e0] ss:$28 sps:$4 sm:$0xff]  }
 0x482   :  { %5334 = vmatprep.mubr.bf16.mxu0 %v13762_v24  ;;  %12133 = vmatmul.mubr.msk.bf16.gmra.mrb[60].mxu1 %vm3947_vm0, %v13834_v19  ;;  %v13767_v24 = vld [vmem:[%s18796_s1 + $0x240] ss:$28 sps:$4 sm:$0xff]   ;;  %v13773_v19 = vld [vmem:[%s18796_s1 + $0x2b4] ss:$28 sps:$4 sm:$0xff]  }
 0x483   :  { %12136 = vmatprep.mubr.msk.bf16.mxu1 %vm3947_vm0, %v13838_v46  ;;  %v13844_v46 = vld [vmem:[%s18796_s1 + $0x7c0] ss:$28 sps:$4 sm:$0xff]  }
 0x489   :  { %5335 = vmatmul.mubr.bf16.gmra.mrb[36].mxu0 %v13764_v56  ;;  %v13772_v56 = vld [vmem:[%s18796_s1 + $0x278] ss:$28 sps:$4 sm:$0xff]  }
 0x48a   :  { %5342 = vmatprep.mubr.bf16.mxu0 %v13765_v1  ;;  %12137 = vmatmul.mubr.msk.bf16.gmra.mrb[64].mxu1 %vm3947_vm0, %v13839_v62  ;;  %v13778_v62 = vld [vmem:[%s18796_s1 + $0x2ec] ss:$28 sps:$4 sm:$0xff]  }
 0x48b   :  { %v16410_v1 = vpop.f32.mrb[0].mxu1  ;;  %12140 = vmatprep.mubr.msk.bf16.mxu1 %vm3947_vm0, %v13843_v29  ;;  %v13781_v29 = vld [vmem:[%s18796_s1 + $0x324] ss:$28 sps:$4 sm:$0xff]  }
 0x491   :  { %5343 = vmatmul.mubr.bf16.gmra.mrb[40].mxu0 %v13767_v24  ;;  %v16419_v24 = vpop.f32.mrb[1].mxu1 }
 0x492   :  { %5350 = vmatprep.mubr.bf16.mxu0 %v13770_v9  ;;  %v16422_v9 = vpop.f32.mrb[2].mxu1  ;;  %12141 = vmatmul.mubr.msk.bf16.gmra.mrb[68].mxu1 %vm3947_vm0, %v13844_v46 }
 0x493   :  { %v16424_v18 = vpop.f32.mrb[3].mxu1 }
 0x499   :  { %5351 = vmatmul.mubr.bf16.gmra.mrb[44].mxu0 %v13772_v56  ;;  %v13848_v56 = vld [vmem:[%s18796_s1 + $0x7f8] ss:$28 sps:$4 sm:$0xff]  }
 0x49a   :  { %5358 = vmatprep.mubr.bf16.mxu0 %v13773_v19  ;;  %v13780_v19 = vld [vmem:[%s18796_s1 + $0x2e8] ss:$28 sps:$4 sm:$0xff]   ;;  %12144 = vmatprep.mubr.msk.bf16.mxu1 %vm3947_vm0, %v13848_v56  ;;  %v13854_v56 = vld [vmem:[%s18796_s1 + $0x8a0] ss:$28 sps:$4 sm:$0xff]  }
 0x49b   :  { %v16446_v52 = vpop.f32.mrb[4].mxu1  ;;  %12145 = vmatmul.mubr.msk.bf16.gmra.mrb[72].mxu1 %vm3947_vm0, %v13849_v45  ;;  %v13786_v45 = vld [vmem:[%s18796_s1 + $0x35c] ss:$28 sps:$4 sm:$0xff]  }
 0x49c   :  { %12148 = vmatprep.mubr.msk.bf16.mxu1 %vm3947_vm0, %v13853_v35  ;;  %v13789_v35 = vld [vmem:[%s18796_s1 + $0x394] ss:$28 sps:$4 sm:$0xff]  }
 0x4a1   :  { %5359 = vmatmul.mubr.bf16.gmra.mrb[48].mxu0 %v13775_v50  ;;  %v16455_v50 = vpop.f32.mrb[5].mxu1 }
 0x4a2   :  { %5366 = vmatprep.mubr.bf16.mxu0 %v13778_v62  ;;  %v16458_v46 = vpop.f32.mrb[6].mxu1 }
 0x4a3   :  { %v16460_v62 = vpop.f32.mrb[7].mxu1  ;;  %12149 = vmatmul.mubr.msk.bf16.gmra.mrb[76].mxu1 %vm3947_vm0, %v13854_v56 }
 0x4a9   :  { %5367 = vmatmul.mubr.bf16.gmra.mrb[52].mxu0 %v13780_v19  ;;  %v13858_v19 = vld [vmem:[%s18796_s1 + $0x8d8] ss:$28 sps:$4 sm:$0xff]  }
 0x4aa   :  { %5374 = vmatprep.mubr.bf16.mxu0 %v13781_v29  ;;  %v13788_v29 = vld [vmem:[%s18796_s1 + $0x358] ss:$28 sps:$4 sm:$0xff]   ;;  %12152 = vmatprep.mubr.msk.bf16.mxu1 %vm3947_vm0, %v13858_v19  ;;  %v13864_v19 = vld [vmem:[%s18796_s1 + $0x980] ss:$28 sps:$4 sm:$0xff]  }
 0x4ab   :  { %v16482_v15 = vpop.f32.mrb[8].mxu1  ;;  %12153 = vmatmul.mubr.msk.bf16.gmra.mrb[80].mxu1 %vm3947_vm0, %v13859_v5  ;;  %v13794_v5 = vld [vmem:[%s18796_s1 + $0x3cc] ss:$28 sps:$4 sm:$0xff]  }
 0x4ac   :  { %12156 = vmatprep.mubr.msk.bf16.mxu1 %vm3947_vm0, %v13863_v3  ;;  %v13797_v3 = vld [vmem:[%s18796_s1 + $0x404] ss:$28 sps:$4 sm:$0xff]  }
 0x4b1   :  { %5375 = vmatmul.mubr.bf16.gmra.mrb[56].mxu0 %v13783_v28  ;;  %v16491_v28 = vpop.f32.mrb[9].mxu1 }
 0x4b2   :  { %5382 = vmatprep.mubr.bf16.mxu0 %v13786_v45  ;;  %v16494_v56 = vpop.f32.mrb[10].mxu1 }
 0x4b3   :  { %v16496_v45 = vpop.f32.mrb[11].mxu1  ;;  %12157 = vmatmul.mubr.msk.bf16.gmra.mrb[84].mxu1 %vm3947_vm0, %v13864_v19 }
 0x4b9   :  { %5383 = vmatmul.mubr.bf16.gmra.mrb[60].mxu0 %v13788_v29  ;;  %v13868_v29 = vld [vmem:[%s18796_s1 + $0x9b8] ss:$28 sps:$4 sm:$0xff]  }
 0x4ba   :  { %5390 = vmatprep.mubr.bf16.mxu0 %v13789_v35  ;;  %v13796_v35 = vld [vmem:[%s18796_s1 + $0x3c8] ss:$28 sps:$4 sm:$0xff]   ;;  %12160 = vmatprep.mubr.msk.bf16.mxu1 %vm3947_vm0, %v13868_v29  ;;  %v13874_v29 = vld [vmem:[%s18796_s1 + $0xa60] ss:$28 sps:$4 sm:$0xff]  }
 0x4bb   :  { %12161 = vmatmul.mubr.msk.bf16.gmra.mrb[88].mxu1 %vm3947_vm0, %v13869_v39  ;;  %v13802_v39 = vld [vmem:[%s18796_s1 + $0x43c] ss:$28 sps:$4 sm:$0xff]  }
 0x4bc   :  { %v16518_v49 = vpop.f32.mrb[12].mxu1  ;;  %12164 = vmatprep.mubr.msk.bf16.mxu1 %vm3947_vm0, %v13873_v36  ;;  %v13805_v36 = vld [vmem:[%s18796_s1 + $0x474] ss:$28 sps:$4 sm:$0xff]  }
 0x4c1   :  { %5391 = vmatmul.mubr.bf16.gmra.mrb[64].mxu0 %v13791_v60  ;;  %v16527_v60 = vpop.f32.mrb[13].mxu1 }
 0x4c2   :  { %5398 = vmatprep.mubr.bf16.mxu0 %v13794_v5  ;;  %v16530_v19 = vpop.f32.mrb[14].mxu1 }
 0x4c3   :  { %v16532_v5 = vpop.f32.mrb[15].mxu1  ;;  %12165 = vmatmul.mubr.msk.bf16.gmra.mrb[92].mxu1 %vm3947_vm0, %v13874_v29 }
 0x4c9   :  { %5399 = vmatmul.mubr.bf16.gmra.mrb[68].mxu0 %v13796_v35  ;;  %v13878_v35 = vld [vmem:[%s18796_s1 + $0xa98] ss:$28 sps:$4 sm:$0xff]  }
 0x4ca   :  { %5406 = vmatprep.mubr.bf16.mxu0 %v13797_v3  ;;  %v13804_v3 = vld [vmem:[%s18796_s1 + $0x438] ss:$28 sps:$4 sm:$0xff]   ;;  %12168 = vmatprep.mubr.msk.bf16.mxu1 %vm3947_vm0, %v13878_v35  ;;  %v13884_v35 = vld [vmem:[%s18796_s1 + $0xb40] ss:$28 sps:$4 sm:$0xff]  }
 0x4cb   :  { %v16554_v20 = vpop.f32.mrb[16].mxu1  ;;  %12169 = vmatmul.mubr.msk.bf16.gmra.mrb[96].mxu1 %vm3947_vm0, %v13879_v13  ;;  %v13810_v13 = vld [vmem:[%s18796_s1 + $0x4ac] ss:$28 sps:$4 sm:$0xff]  }
 0x4cc   :  { %12172 = vmatprep.mubr.msk.bf16.mxu1 %vm3947_vm0, %v13883_v12  ;;  %v13815_v12 = vld [vmem:[%s18796_s1 + $0x4e4] ss:$28 sps:$4 sm:$0xff]  }
 0x4d1   :  { %5407 = vmatmul.mubr.bf16.gmra.mrb[72].mxu0 %v13799_v34  ;;  %v16562_v34 = vpop.f32.mrb[17].mxu1 }
 0x4d2   :  { %5414 = vmatprep.mubr.bf16.mxu0 %v13802_v39  ;;  %v16565_v29 = vpop.f32.mrb[18].mxu1 }
 0x4d3   :  { %v16568_v39 = vpop.f32.mrb[19].mxu1  ;;  %12173 = vmatmul.mubr.msk.bf16.gmra.mrb[100].mxu1 %vm3947_vm0, %v13884_v35 }
 0x4d9   :  { %5415 = vmatmul.mubr.bf16.gmra.mrb[76].mxu0 %v13804_v3  ;;  %v13888_v3 = vld [vmem:[%s18796_s1 + $0xb78] ss:$28 sps:$4 sm:$0xff]  }
 0x4da   :  { %5422 = vmatprep.mubr.bf16.mxu0 %v13805_v36  ;;  %v13812_v36 = vld [vmem:[%s18796_s1 + $0x4a8] ss:$28 sps:$4 sm:$0xff]   ;;  %12176 = vmatprep.mubr.msk.bf16.mxu1 %vm3947_vm0, %v13888_v3  ;;  %v13894_v3 = vld [vmem:[%s18796_s1 + $0xc20] ss:$28 sps:$4 sm:$0xff]  }
 0x4db   :  { %v16590_v2 = vpop.f32.mrb[20].mxu1  ;;  %12177 = vmatmul.mubr.msk.bf16.gmra.mrb[104].mxu1 %vm3947_vm0, %v13889_v59  ;;  %v13820_v59 = vld [vmem:[%s18796_s1 + $0x51c] ss:$28 sps:$4 sm:$0xff]  }
 0x4dc   :  { %12180 = vmatprep.mubr.msk.bf16.mxu1 %vm3947_vm0, %v13893_v58  ;;  %v13825_v58 = vld [vmem:[%s18796_s1 + $0x554] ss:$28 sps:$4 sm:$0xff]  }
 0x4e1   :  { %5423 = vmatmul.mubr.bf16.gmra.mrb[80].mxu0 %v13807_v7  ;;  %v16598_v7 = vpop.f32.mrb[21].mxu1 }
 0x4e2   :  { %5430 = vmatprep.mubr.bf16.mxu0 %v13810_v13  ;;  %v16601_v35 = vpop.f32.mrb[22].mxu1 }
 0x4e3   :  { %v16604_v13 = vpop.f32.mrb[23].mxu1  ;;  %12181 = vmatmul.mubr.msk.bf16.gmra.mrb[108].mxu1 %vm3947_vm0, %v13894_v3 }
 0x4e9   :  { %5431 = vmatmul.mubr.bf16.gmra.mrb[84].mxu0 %v13812_v36  ;;  %v13898_v36 = vld [vmem:[%s18796_s1 + $0xc58] ss:$28 sps:$4 sm:$0xff]  }
 0x4ea   :  { %5438 = vmatprep.mubr.bf16.mxu0 %v13815_v12  ;;  %v13822_v12 = vld [vmem:[%s18796_s1 + $0x518] ss:$28 sps:$4 sm:$0xff]   ;;  %12184 = vmatprep.mubr.msk.bf16.mxu1 %vm3947_vm0, %v13898_v36  ;;  %v13904_v36 = vld [vmem:[%s18796_s1 + $0xd00] ss:$28 sps:$4 sm:$0xff]  }
 0x4eb   :  { %12185 = vmatmul.mubr.msk.bf16.gmra.mrb[112].mxu1 %vm3947_vm0, %v13899_v42  ;;  %v13830_v42 = vld [vmem:[%s18796_s1 + $0x58c] ss:$28 sps:$4 sm:$0xff]  }
 0x4ec   :  { %v16626_v48 = vpop.f32.mrb[24].mxu1  ;;  %12188 = vmatprep.mubr.msk.bf16.mxu1 %vm3947_vm0, %v13903_v40  ;;  %v13835_v40 = vld [vmem:[%s18796_s1 + $0x5c4] ss:$28 sps:$4 sm:$0xff]  }
 0x4ed   :  { %18941 = vst [vmem:[#allocation139_spill] sm:$0xff] %v16626_v48 }
 0x4f1   :  { %5439 = vmatmul.mubr.bf16.gmra.mrb[88].mxu0 %v13817_v55  ;;  %v16634_v55 = vpop.f32.mrb[25].mxu1 }
 0x4f2   :  { %5446 = vmatprep.mubr.bf16.mxu0 %v13820_v59  ;;  %18942 = vst [vmem:[#allocation140_spill] sm:$0xff] %v16634_v55  ;;  %v16637_v3 = vpop.f32.mrb[26].mxu1 }
 0x4f3   :  { %18943 = vst [vmem:[#allocation141_spill] sm:$0xff] %v16637_v3  ;;  %v16640_v59 = vpop.f32.mrb[27].mxu1  ;;  %12189 = vmatmul.mubr.msk.bf16.gmra.mrb[116].mxu1 %vm3947_vm0, %v13904_v36  ;;  %v13909_v3 = vld [vmem:[%s18796_s1 + $0xd70] ss:$28 sps:$4 sm:$0xff]  }
 0x4f4   :  { %18944 = vst [vmem:[#allocation142_spill] sm:$0xff] %v16640_v59  ;;  %v13850_v59 = vld [vmem:[%s18796_s1 + $0x66c] ss:$28 sps:$4 sm:$0xff]  }
 0x4f9   :  { %5447 = vmatmul.mubr.bf16.gmra.mrb[92].mxu0 %v13822_v12  ;;  %v13908_v12 = vld [vmem:[%s18796_s1 + $0xd38] ss:$28 sps:$4 sm:$0xff]  }
 0x4fa   :  { %5454 = vmatprep.mubr.bf16.mxu0 %v13825_v58  ;;  %v13832_v58 = vld [vmem:[%s18796_s1 + $0x588] ss:$28 sps:$4 sm:$0xff]   ;;  %12192 = vmatprep.mubr.msk.bf16.mxu1 %vm3947_vm0, %v13908_v12  ;;  %v13914_v12 = vld [vmem:[%s18796_s1 + $0xde0] ss:$28 sps:$4 sm:$0xff]  }
 0x4fb   :  { %v16662_v31 = vpop.f32.mrb[28].mxu1  ;;  %12193 = vmatmul.mubr.msk.bf16.gmra.mrb[120].mxu1 %vm3947_vm0, %v13909_v3  ;;  %v13840_v3 = vld [vmem:[%s18796_s1 + $0x5fc] ss:$28 sps:$4 sm:$0xff]  }
 0x4fc   :  { %18945 = vst [vmem:[#allocation143_spill] sm:$0xff] %v16662_v31  ;;  %v13913_v31 = vld [vmem:[%s18796_s1 + $0xda8] ss:$28 sps:$4 sm:$0xff]  }
 0x4fd   :  { %12196 = vmatprep.mubr.msk.bf16.mxu1 %vm3947_vm0, %v13913_v31 }
 0x501   :  { %5455 = vmatmul.mubr.bf16.gmra.mrb[96].mxu0 %v13827_v38  ;;  %v16670_v38 = vpop.f32.mrb[29].mxu1 }
 0x502   :  { %5462 = vmatprep.mubr.bf16.mxu0 %v13830_v42  ;;  %18946 = vst [vmem:[#allocation144_spill] sm:$0xff] %v16670_v38  ;;  %v16673_v36 = vpop.f32.mrb[30].mxu1 }
 0x503   :  { %18947 = vst [vmem:[#allocation145_spill] sm:$0xff] %v16673_v36  ;;  %v16676_v42 = vpop.f32.mrb[31].mxu1  ;;  %12197 = vmatmul.mubr.msk.bf16.gmra.mrb[124].mxu1 %vm3947_vm0, %v13914_v12 }
 0x504   :  { %18948 = vst [vmem:[#allocation146_spill] sm:$0xff] %v16676_v42  ;;  %v13842_v42 = vld [vmem:[%s18796_s1 + $0x5f8] ss:$28 sps:$4 sm:$0xff]  }
 0x509   :  { %5463 = vmatmul.mubr.bf16.gmra.mrb[100].mxu0 %v13832_v58 }
 0x50a   :  { %5470 = vmatprep.mubr.bf16.mxu0 %v13835_v40 }
 0x50b   :  { %v16696_v38 = vpop.f32.mrb[32].mxu1 }
 0x50c   :  { %18949 = vst [vmem:[#allocation147_spill] sm:$0xff] %v16696_v38  ;;  %v16701_v31 = vpop.f32.mrb[33].mxu1 }
 0x50d   :  { %18950 = vst [vmem:[#allocation148_spill] sm:$0xff] %v16701_v31 }
 0x511   :  { %5471 = vmatmul.mubr.bf16.gmra.mrb[104].mxu0 %v13837_v27  ;;  %v16706_v27 = vld [vmem:[%s18798_s3] sm:$0xff] }
 0x512   :  { %5478 = vmatprep.mubr.bf16.mxu0 %v13840_v3 }
 0x514   :  { %v5264_v58 = vpop.f32.mrb[0].mxu0 }
 0x515   :  { %v12200_v40 = vadd.f32 %v5264_v58, %v14990_v14  ;;  %v5266_v36 = vpop.f32.mrb[1].mxu0  ;;  %v16711_v14 = vld [vmem:[%s18798_s3 + $0x20] sm:$0xff]  ;;  %v16715_v58 = vpop.f32.mrb[34].mxu1 }
 0x516   :  { %v5267_v48 = vpop.f32.mrb[2].mxu0  ;;  %18951 = vst [vmem:[#allocation149_spill] sm:$0xff] %v16715_v58  ;;  %v11461_v38 = vcombine.high %v16706_v27, %v16711_v14  ;;  %v16719_v31 = vpop.f32.mrb[35].mxu1  ;;  %v13847_v58 = vld [vmem:[%s18796_s1 + $0x630] ss:$28 sps:$4 sm:$0xff]  }
 0x517   :  { %v12201_v36 = vadd.f32 %v5267_v48, %v15009_v21  ;;  %v5810_v12 = vadd.f32 %v12200_v40, %v16419_v24  ;;  %v5269_v3 = vpop.f32.mrb[3].mxu0  ;;  %18952 = vst [vmem:[#allocation150_spill] sm:$0xff] %v16719_v31 }
 0x518   :  { %8464 = vmatprep.mubr.bf16.mxu1 %v11461_v38 }
 0x519   :  { %v5813_v55 = vadd.f32 %v12201_v36, %v16424_v18  ;;  %5479 = vmatmul.mubr.bf16.gmra.mrb[108].mxu0 %v13842_v42  ;;  %v6320_v22 = vmax.f32 %v5810_v12, 0.0 }
 0x51a   :  { %5486 = vmatprep.mubr.bf16.mxu0 %v13845_v25 }
 0x51b   :  { %v6321_v21 = vmax.f32 %v5813_v55, 0.0 }
 0x51c   :  { %v5272_v48 = vpop.f32.mrb[4].mxu0 }
 0x51d   :  { %v6704_v24 = vpack.c.bf16 %v6321_v21, %v6320_v22  ;;  %v12202_v40 = vadd.f32 %v5272_v48, %v14998_v17  ;;  %v5274_v3 = vpop.f32.mrb[5].mxu0 }
 0x51e   :  { %v5275_v31 = vpop.f32.mrb[6].mxu0 }
 0x51f   :  { %v5818_v18 = vadd.f32 %v12202_v40, %v16410_v1  ;;  %v12203_v25 = vadd.f32 %v5275_v31, %v15014_v23  ;;  %v5277_v38 = vpop.f32.mrb[7].mxu0  ;;  %8433 = vmatpush1.bf16.msra.mxu1 %v6704_v24  ;;  %v13852_v1 = vld [vmem:[%s18796_s1 + $0x668] ss:$28 sps:$4 sm:$0xff]   ;;  %v16739_v23 = vpop.f32.mrb[36].mxu1 }
 0x520   :  { %8434 = vmatprep.subr.bf16.mxu1 %v18839_v6 }
 0x521   :  { %v5821_v17 = vadd.f32 %v12203_v25, %v16422_v9  ;;  %5487 = vmatmul.mubr.bf16.gmra.mrb[112].mxu0 %v13847_v58  ;;  %v6322_v22 = vmax.f32 %v5818_v18, 0.0  ;;  %v13855_v9 = vld [vmem:[%s18796_s1 + $0x6a4] ss:$28 sps:$4 sm:$0xff]   ;;  %v16744_v58 = vpop.f32.mrb[37].mxu1 }
 0x522   :  { %5494 = vmatprep.mubr.bf16.mxu0 %v13850_v59 }
 0x523   :  { %v6323_v55 = vmax.f32 %v5821_v17, 0.0 }
 0x524   :  { %v5280_v42 = vpop.f32.mrb[8].mxu0 }
 0x525   :  { %v6705_v36 = vpack.c.bf16 %v6323_v55, %v6322_v22  ;;  %v12204_v12 = vadd.f32 %v5280_v42, %v15022_v26  ;;  %v5282_v21 = vpop.f32.mrb[9].mxu0  ;;  %v16748_v26 = vpop.f32.mrb[38].mxu1  ;;  %v13860_v42 = vld [vmem:[%s18796_s1 + $0x6dc] ss:$28 sps:$4 sm:$0xff]  }
 0x526   :  { %v5283_v31 = vpop.f32.mrb[10].mxu0  ;;  %v16751_v40 = vpop.f32.mrb[39].mxu1 }
 0x527   :  { %v12205_v59 = vadd.f32 %v5283_v31, %v15033_v30  ;;  %v5826_v48 = vadd.f32 %v12204_v12, %v16455_v50  ;;  %v5285_v24 = vpop.f32.mrb[11].mxu0  ;;  %8435 = vmatpush1.bf16.msra.mxu1 %v6705_v36  ;;  %v13857_v50 = vld [vmem:[%s18796_s1 + $0x6a0] ss:$28 sps:$4 sm:$0xff]  }
 0x528   :  { %8436 = vmatprep.subr.bf16.mxu1 %v18839_v6 }
 0x529   :  { %v5829_v3 = vadd.f32 %v12205_v59, %v16460_v62  ;;  %5495 = vmatmul.mubr.bf16.gmra.mrb[116].mxu0 %v13852_v1  ;;  %v6324_v18 = vmax.f32 %v5826_v48, 0.0 }
 0x52a   :  { %5502 = vmatprep.mubr.bf16.mxu0 %v13855_v9 }
 0x52b   :  { %v6325_v25 = vmax.f32 %v5829_v3, 0.0 }
 0x52c   :  { %v5288_v38 = vpop.f32.mrb[12].mxu0 }
 0x52d   :  { %v6706_v17 = vpack.c.bf16 %v6325_v25, %v6324_v18  ;;  %v12206_v30 = vadd.f32 %v5288_v38, %v15038_v32  ;;  %v5290_v22 = vpop.f32.mrb[13].mxu0 }
 0x52e   :  { %v5291_v55 = vpop.f32.mrb[14].mxu0 }
 0x52f   :  { %v5834_v62 = vadd.f32 %v12206_v30, %v16446_v52  ;;  %v12207_v36 = vadd.f32 %v5291_v55, %v15040_v33  ;;  %v5293_v12 = vpop.f32.mrb[15].mxu0  ;;  %8437 = vmatpush1.bf16.msra.mxu1 %v6706_v17  ;;  %v13862_v52 = vld [vmem:[%s18796_s1 + $0x6d8] ss:$28 sps:$4 sm:$0xff]   ;;  %v16769_v33 = vpop.f32.mrb[40].mxu1 }
 0x530   :  { %8438 = vmatprep.subr.bf16.mxu1 %v18839_v6  ;;  %v16774_v3 = vpop.f32.mrb[41].mxu1  ;;  %v13870_v12 = vld [vmem:[%s18796_s1 + $0x74c] ss:$28 sps:$4 sm:$0xff]  }
 0x531   :  { %v5837_v32 = vadd.f32 %v12207_v36, %v16458_v46  ;;  %5503 = vmatmul.mubr.bf16.gmra.mrb[120].mxu0 %v13857_v50  ;;  %v6326_v21 = vmax.f32 %v5834_v62, 0.0  ;;  %v13865_v46 = vld [vmem:[%s18796_s1 + $0x714] ss:$28 sps:$4 sm:$0xff]  }
 0x532   :  { %5510 = vmatprep.mubr.bf16.mxu0 %v13860_v42 }
 0x533   :  { %v6327_v1 = vmax.f32 %v5837_v32, 0.0 }
 0x534   :  { %v5296_v31 = vpop.f32.mrb[16].mxu0 }
 0x535   :  { %v6707_v9 = vpack.c.bf16 %v6327_v1, %v6326_v21  ;;  %v12208_v59 = vadd.f32 %v5296_v31, %v15051_v37  ;;  %v5298_v48 = vpop.f32.mrb[17].mxu0  ;;  %v16778_v37 = vpop.f32.mrb[42].mxu1 }
 0x536   :  { %v5299_v24 = vpop.f32.mrb[18].mxu0  ;;  %v16781_v17 = vpop.f32.mrb[43].mxu1 }
 0x537   :  { %v12209_v18 = vadd.f32 %v5299_v24, %v15063_v41  ;;  %v5842_v25 = vadd.f32 %v12208_v59, %v16491_v28  ;;  %v5301_v38 = vpop.f32.mrb[19].mxu0  ;;  %8439 = vmatpush1.bf16.msra.mxu1 %v6707_v9  ;;  %v13867_v28 = vld [vmem:[%s18796_s1 + $0x710] ss:$28 sps:$4 sm:$0xff]   ;;  %v16795_v1 = vpop.f32.mrb[44].mxu1 }
 0x538   :  { %8440 = vmatprep.subr.bf16.mxu1 %v18839_v6  ;;  %v16797_v59 = vpop.f32.mrb[45].mxu1 }
 0x539   :  { %v5845_v30 = vadd.f32 %v12209_v18, %v16496_v45  ;;  %5511 = vmatmul.mubr.bf16.gmra.mrb[124].mxu0 %v13862_v52  ;;  %v6328_v22 = vmax.f32 %v5842_v25, 0.0  ;;  %v16799_v52 = vpop.f32.mrb[46].mxu1  ;;  %v13875_v25 = vld [vmem:[%s18796_s1 + $0x784] ss:$28 sps:$4 sm:$0xff]  }
 0x53a   :  { %5518 = vmatprep.mubr.bf16.mxu0 %v13865_v46  ;;  %v13872_v46 = vld [vmem:[%s18796_s1 + $0x748] ss:$28 sps:$4 sm:$0xff]  }
 0x53b   :  { %v6329_v50 = vmax.f32 %v5845_v30, 0.0 }
 0x53c   :  { %v5304_v55 = vpop.f32.mrb[20].mxu0 }
 0x53d   :  { %v6708_v42 = vpack.c.bf16 %v6329_v50, %v6328_v22  ;;  %v12210_v41 = vadd.f32 %v5304_v55, %v15068_v43  ;;  %v5306_v62 = vpop.f32.mrb[21].mxu0 }
 0x53e   :  { %v5307_v36 = vpop.f32.mrb[22].mxu0 }
 0x53f   :  { %v5850_v45 = vadd.f32 %v12210_v41, %v16482_v15  ;;  %v12211_v32 = vadd.f32 %v5307_v36, %v15070_v44  ;;  %v5309_v21 = vpop.f32.mrb[23].mxu0  ;;  %8441 = vmatpush1.bf16.msra.mxu1 %v6708_v42 }
 0x540   :  { %8442 = vmatprep.subr.bf16.mxu1 %v18839_v6 }
 0x541   :  { %v5853_v43 = vadd.f32 %v12211_v32, %v16494_v56  ;;  %5519 = vmatmul.mubr.bf16.gmra.mrb[128].mxu0 %v13867_v28  ;;  %v6330_v31 = vmax.f32 %v5850_v45, 0.0  ;;  %v16805_v56 = vpop.f32.mrb[47].mxu1  ;;  %v13880_v32 = vld [vmem:[%s18796_s1 + $0x7bc] ss:$28 sps:$4 sm:$0xff]  }
 0x542   :  { %5526 = vmatprep.mubr.bf16.mxu0 %v13870_v12  ;;  %v16814_v50 = vpop.f32.mrb[48].mxu1  ;;  %v13877_v12 = vld [vmem:[%s18796_s1 + $0x780] ss:$28 sps:$4 sm:$0xff]  }
 0x543   :  { %v6331_v9 = vmax.f32 %v5853_v43, 0.0  ;;  %v16816_v41 = vpop.f32.mrb[49].mxu1 }
 0x544   :  { %v5312_v48 = vpop.f32.mrb[24].mxu0  ;;  %v16818_v28 = vpop.f32.mrb[50].mxu1 }
 0x545   :  { %v6709_v15 = vpack.c.bf16 %v6331_v9, %v6330_v31  ;;  %v12212_v44 = vadd.f32 %v5312_v48, %v15078_v47  ;;  %v5314_v24 = vpop.f32.mrb[25].mxu0 }
 0x546   :  { %v5315_v18 = vpop.f32.mrb[26].mxu0 }
 0x547   :  { %v12213_v38 = vadd.f32 %v5315_v18, %v15089_v51  ;;  %v5858_v30 = vadd.f32 %v12212_v44, %v16527_v60  ;;  %v5317_v22 = vpop.f32.mrb[27].mxu0  ;;  %8443 = vmatpush1.bf16.msra.mxu1 %v6709_v15 }
 0x548   :  { %8444 = vmatprep.subr.bf16.mxu1 %v18839_v6 }
 0x549   :  { %v5861_v47 = vadd.f32 %v12213_v38, %v16532_v5  ;;  %5527 = vmatmul.mubr.bf16.gmra.mrb[132].mxu0 %v13872_v46  ;;  %v6332_v55 = vmax.f32 %v5858_v30, 0.0  ;;  %v16824_v5 = vpop.f32.mrb[51].mxu1  ;;  %v13885_v30 = vld [vmem:[%s18796_s1 + $0x7f4] ss:$28 sps:$4 sm:$0xff]  }
 0x54a   :  { %5534 = vmatprep.mubr.bf16.mxu0 %v13875_v25  ;;  %v16833_v9 = vpop.f32.mrb[52].mxu1  ;;  %v13882_v25 = vld [vmem:[%s18796_s1 + $0x7b8] ss:$28 sps:$4 sm:$0xff]  }
 0x54b   :  { %v6333_v42 = vmax.f32 %v5861_v47, 0.0  ;;  %v16835_v44 = vpop.f32.mrb[53].mxu1 }
 0x54c   :  { %v5320_v62 = vpop.f32.mrb[28].mxu0  ;;  %v16837_v46 = vpop.f32.mrb[54].mxu1 }
 0x54d   :  { %v6710_v51 = vpack.c.bf16 %v6333_v42, %v6332_v55  ;;  %v12214_v60 = vadd.f32 %v5320_v62, %v15094_v53  ;;  %v5322_v36 = vpop.f32.mrb[29].mxu0 }
 0x54e   :  { %v5323_v45 = vpop.f32.mrb[30].mxu0 }
 0x54f   :  { %v5866_v21 = vadd.f32 %v12214_v60, %v16518_v49  ;;  %v12215_v43 = vadd.f32 %v5323_v45, %v15096_v54  ;;  %v5325_v31 = vpop.f32.mrb[31].mxu0  ;;  %8445 = vmatpush1.bf16.msra.mxu1 %v6710_v51 }
 0x550   :  { %8446 = vmatprep.subr.bf16.mxu1 %v18839_v6 }
 0x551   :  { %v5869_v53 = vadd.f32 %v12215_v43, %v16530_v19  ;;  %5535 = vmatmul.mubr.bf16.gmra.mrb[136].mxu0 %v13877_v12  ;;  %v6334_v48 = vmax.f32 %v5866_v21, 0.0  ;;  %v16843_v19 = vpop.f32.mrb[55].mxu1  ;;  %v13890_v43 = vld [vmem:[%s18796_s1 + $0x82c] ss:$28 sps:$4 sm:$0xff]  }
 0x552   :  { %5542 = vmatprep.mubr.bf16.mxu0 %v13880_v32  ;;  %v16852_v42 = vpop.f32.mrb[56].mxu1  ;;  %v13887_v32 = vld [vmem:[%s18796_s1 + $0x7f0] ss:$28 sps:$4 sm:$0xff]  }
 0x553   :  { %v6335_v15 = vmax.f32 %v5869_v53, 0.0  ;;  %v16854_v60 = vpop.f32.mrb[57].mxu1 }
 0x554   :  { %v5328_v24 = vpop.f32.mrb[32].mxu0  ;;  %v16856_v12 = vpop.f32.mrb[58].mxu1 }
 0x555   :  { %v6711_v49 = vpack.c.bf16 %v6335_v15, %v6334_v48  ;;  %v12216_v54 = vadd.f32 %v5328_v24, %v15104_v57  ;;  %v5330_v18 = vpop.f32.mrb[33].mxu0 }
 0x556   :  { %v5331_v38 = vpop.f32.mrb[34].mxu0 }
 0x557   :  { %v12217_v22 = vadd.f32 %v5331_v38, %v15115_v61  ;;  %v5874_v47 = vadd.f32 %v12216_v54, %v16562_v34  ;;  %v5333_v55 = vpop.f32.mrb[35].mxu0  ;;  %8447 = vmatpush1.bf16.msra.mxu1 %v6711_v49 }
 0x558   :  { %8448 = vmatprep.subr.bf16.mxu1 %v18839_v6 }
 0x559   :  { %v5877_v57 = vadd.f32 %v12217_v22, %v16568_v39  ;;  %5543 = vmatmul.mubr.bf16.gmra.mrb[140].mxu0 %v13882_v25  ;;  %v6336_v62 = vmax.f32 %v5874_v47, 0.0  ;;  %v16862_v39 = vpop.f32.mrb[59].mxu1  ;;  %v13895_v47 = vld [vmem:[%s18796_s1 + $0x864] ss:$28 sps:$4 sm:$0xff]  }
 0x55a   :  { %5550 = vmatprep.mubr.bf16.mxu0 %v13885_v30  ;;  %v16871_v15 = vpop.f32.mrb[60].mxu1  ;;  %v13892_v30 = vld [vmem:[%s18796_s1 + $0x828] ss:$28 sps:$4 sm:$0xff]  }
 0x55b   :  { %v6337_v51 = vmax.f32 %v5877_v57, 0.0  ;;  %v16873_v54 = vpop.f32.mrb[61].mxu1 }
 0x55c   :  { %v5336_v36 = vpop.f32.mrb[36].mxu0  ;;  %v16875_v25 = vpop.f32.mrb[62].mxu1 }
 0x55d   :  { %v6712_v61 = vpack.c.bf16 %v6337_v51, %v6336_v62  ;;  %v12218_v34 = vadd.f32 %v5336_v36, %v15120_v63  ;;  %v5338_v45 = vpop.f32.mrb[37].mxu0 }
 0x55e   :  { %v5339_v21 = vpop.f32.mrb[38].mxu0 }
 0x55f   :  { %v5882_v31 = vadd.f32 %v12218_v34, %v16554_v20  ;;  %v12219_v53 = vadd.f32 %v5339_v21, %v15122_v0  ;;  %v5341_v48 = vpop.f32.mrb[39].mxu0  ;;  %8449 = vmatpush1.bf16.msra.mxu1 %v6712_v61 }
 0x560   :  { %8450 = vmatprep.subr.bf16.mxu1 %v18839_v6 }
 0x561   :  { %v5885_v63 = vadd.f32 %v12219_v53, %v16565_v29  ;;  %5551 = vmatmul.mubr.bf16.gmra.mrb[144].mxu0 %v13887_v32  ;;  %v6338_v24 = vmax.f32 %v5882_v31, 0.0  ;;  %v16881_v29 = vpop.f32.mrb[63].mxu1  ;;  %v13900_v53 = vld [vmem:[%s18796_s1 + $0x89c] ss:$28 sps:$4 sm:$0xff]  }
 0x562   :  { %5558 = vmatprep.mubr.bf16.mxu0 %v13890_v43  ;;  %v16890_v51 = vpop.f32.mrb[64].mxu1  ;;  %v13897_v43 = vld [vmem:[%s18796_s1 + $0x860] ss:$28 sps:$4 sm:$0xff]  }
 0x563   :  { %v6339_v49 = vmax.f32 %v5885_v63, 0.0  ;;  %v16892_v34 = vpop.f32.mrb[65].mxu1 }
 0x564   :  { %v5344_v18 = vpop.f32.mrb[40].mxu0  ;;  %v16894_v32 = vpop.f32.mrb[66].mxu1 }
 0x565   :  { %v6713_v20 = vpack.c.bf16 %v6339_v49, %v6338_v24  ;;  %v12220_v0 = vadd.f32 %v5344_v18, %v15130_v4  ;;  %v5346_v38 = vpop.f32.mrb[41].mxu0 }
 0x566   :  { %v5347_v22 = vpop.f32.mrb[42].mxu0 }
 0x567   :  { %v12221_v55 = vadd.f32 %v5347_v22, %v15141_v8  ;;  %v5890_v57 = vadd.f32 %v12220_v0, %v16598_v7  ;;  %v5349_v62 = vpop.f32.mrb[43].mxu0  ;;  %8451 = vmatpush1.bf16.msra.mxu1 %v6713_v20 }
 0x568   :  { %8452 = vmatprep.subr.bf16.mxu1 %v18839_v6  ;;  %v18953_v62 = vld [vmem:[#allocation6_spill] sm:$0xff] }
 0x569   :  { %v5893_v4 = vadd.f32 %v12221_v55, %v16604_v13  ;;  %5559 = vmatmul.mubr.bf16.gmra.mrb[148].mxu0 %v13892_v30  ;;  %v6340_v36 = vmax.f32 %v5890_v57, 0.0  ;;  %v16900_v13 = vpop.f32.mrb[67].mxu1  ;;  %v13905_v57 = vld [vmem:[%s18796_s1 + $0x8d4] ss:$28 sps:$4 sm:$0xff]  }
 0x56a   :  { %5566 = vmatprep.mubr.bf16.mxu0 %v13895_v47  ;;  %v16909_v49 = vpop.f32.mrb[68].mxu1  ;;  %v13902_v47 = vld [vmem:[%s18796_s1 + $0x898] ss:$28 sps:$4 sm:$0xff]  }
 0x56b   :  { %v6341_v61 = vmax.f32 %v5893_v4, 0.0  ;;  %v16911_v0 = vpop.f32.mrb[69].mxu1 }
 0x56c   :  { %v5352_v45 = vpop.f32.mrb[44].mxu0  ;;  %v16913_v30 = vpop.f32.mrb[70].mxu1 }
 0x56d   :  { %v6714_v8 = vpack.c.bf16 %v6341_v61, %v6340_v36  ;;  %v12222_v7 = vadd.f32 %v5352_v45, %v15146_v10  ;;  %v5354_v21 = vpop.f32.mrb[45].mxu0  ;;  %v18954_v36 = vld [vmem:[#allocation140_spill] sm:$0xff] }
 0x56e   :  { %v5355_v31 = vpop.f32.mrb[46].mxu0 }
 0x56f   :  { %v5898_v48 = vadd.f32 %v12222_v7, %v16590_v2  ;;  %v12223_v63 = vadd.f32 %v5355_v31, %v15148_v11  ;;  %v5357_v24 = vpop.f32.mrb[47].mxu0  ;;  %8453 = vmatpush1.bf16.msra.mxu1 %v6714_v8 }
 0x570   :  { %8454 = vmatprep.subr.bf16.mxu1 %v18839_v6  ;;  %v18956_v24 = vld [vmem:[#allocation7_spill] sm:$0xff] }
 0x571   :  { %v5901_v10 = vadd.f32 %v12223_v63, %v16601_v35  ;;  %5567 = vmatmul.mubr.bf16.gmra.mrb[152].mxu0 %v13897_v43  ;;  %v6342_v18 = vmax.f32 %v5898_v48, 0.0  ;;  %v16919_v35 = vpop.f32.mrb[71].mxu1 }
 0x572   :  { %5574 = vmatprep.mubr.bf16.mxu0 %v13900_v53  ;;  %v16928_v7 = vpop.f32.mrb[72].mxu1 }
 0x573   :  { %v6343_v20 = vmax.f32 %v5901_v10, 0.0  ;;  %v16930_v31 = vpop.f32.mrb[73].mxu1 }
 0x574   :  { %v5360_v38 = vpop.f32.mrb[48].mxu0  ;;  %v16932_v48 = vpop.f32.mrb[74].mxu1 }
 0x575   :  { %v6715_v2 = vpack.c.bf16 %v6343_v20, %v6342_v18  ;;  %v12224_v11 = vadd.f32 %v5360_v38, %v15159_v16  ;;  %v5362_v22 = vpop.f32.mrb[49].mxu0  ;;  %v18955_v16 = vld [vmem:[#allocation142_spill] sm:$0xff]  ;;  %v13907_v20 = vld [vmem:[%s18796_s1 + $0x8d0] ss:$28 sps:$4 sm:$0xff]   ;;  %v16938_v38 = vpop.f32.mrb[75].mxu1 }
 0x576   :  { %v5363_v55 = vpop.f32.mrb[50].mxu0  ;;  %v18957_v22 = vld [vmem:[#allocation139_spill] sm:$0xff] }
 0x577   :  { %v12225_v4 = vadd.f32 %v5363_v55, %v18953_v62  ;;  %v5906_v61 = vadd.f32 %v12224_v11, %v18954_v36  ;;  %v5365_v45 = vpop.f32.mrb[51].mxu0  ;;  %8455 = vmatpush1.bf16.msra.mxu1 %v6715_v2  ;;  %v13910_v11 = vld [vmem:[%s18796_s1 + $0x90c] ss:$28 sps:$4 sm:$0xff]   ;;  %v18958_v55 = vld [vmem:[#allocation8_spill] sm:$0xff] }
 0x578   :  { %8456 = vmatprep.subr.bf16.mxu1 %v18839_v6 }
 0x579   :  { %v5909_v8 = vadd.f32 %v12225_v4, %v18955_v16  ;;  %5575 = vmatmul.mubr.bf16.gmra.mrb[156].mxu0 %v13902_v47  ;;  %v6344_v21 = vmax.f32 %v5906_v61, 0.0  ;;  %v18959_v4 = vld [vmem:[#allocation141_spill] sm:$0xff]  ;;  %v16947_v61 = vpop.f32.mrb[76].mxu1 }
 0x57a   :  { %5582 = vmatprep.mubr.bf16.mxu0 %v13905_v57  ;;  %18960 = vst [vmem:[#allocation6_spill] sm:$0xff] %v16947_v61 }
 0x57b   :  { %v6345_v43 = vmax.f32 %v5909_v8, 0.0  ;;  %v16949_v8 = vpop.f32.mrb[77].mxu1 }
 0x57c   :  { %v5368_v53 = vpop.f32.mrb[52].mxu0 }
 0x57d   :  { %v6716_v63 = vpack.c.bf16 %v6345_v43, %v6344_v21  ;;  %v12226_v10 = vadd.f32 %v5368_v53, %v18956_v24  ;;  %v5370_v18 = vpop.f32.mrb[53].mxu0  ;;  %v16951_v43 = vpop.f32.mrb[78].mxu1  ;;  %v18962_v24 = vld [vmem:[#allocation9_spill] sm:$0xff] }
 0x57e   :  { %v5371_v2 = vpop.f32.mrb[54].mxu0  ;;  %18961 = vst [vmem:[#allocation140_spill] sm:$0xff] %v16951_v43 }
 0x57f   :  { %v5914_v47 = vadd.f32 %v12226_v10, %v18957_v22  ;;  %v12227_v57 = vadd.f32 %v5371_v2, %v18958_v55  ;;  %v5373_v62 = vpop.f32.mrb[55].mxu0  ;;  %8457 = vmatpush1.bf16.msra.mxu1 %v6716_v63  ;;  %v13912_v63 = vld [vmem:[%s18796_s1 + $0x908] ss:$28 sps:$4 sm:$0xff]   ;;  %v16957_v2 = vpop.f32.mrb[79].mxu1  ;;  %v18964_v55 = vld [vmem:[#allocation144_spill] sm:$0xff] }
 0x580   :  { %8458 = vmatprep.subr.bf16.mxu1 %v18839_v6  ;;  %v18963_v22 = vld [vmem:[#allocation10_spill] sm:$0xff] }
 0x581   :  { %v5917_v36 = vadd.f32 %v12227_v57, %v18959_v4  ;;  %5583 = vmatmul.mubr.bf16.gmra.mrb[160].mxu0 %v13907_v20  ;;  %v6346_v45 = vmax.f32 %v5914_v47, 0.0  ;;  %v18965_v4 = vld [vmem:[#allocation146_spill] sm:$0xff] }
 0x582   :  { %5590 = vmatprep.mubr.bf16.mxu0 %v13910_v11  ;;  %v13915_v11 = vld [vmem:[%s18796_s1 + $0x944] ss:$28 sps:$4 sm:$0xff]  }
 0x583   :  { %v6347_v16 = vmax.f32 %v5917_v36, 0.0 }
 0x584   :  { %v5376_v21 = vpop.f32.mrb[56].mxu0 }
 0x585   :  { %v6717_v53 = vpack.c.bf16 %v6347_v16, %v6346_v45  ;;  %v12228_v10 = vadd.f32 %v5376_v21, %v18962_v24  ;;  %v5378_v18 = vpop.f32.mrb[57].mxu0  ;;  %v16966_v45 = vpop.f32.mrb[80].mxu1 }
 0x586   :  { %v5379_v20 = vpop.f32.mrb[58].mxu0  ;;  %18966 = vst [vmem:[#allocation142_spill] sm:$0xff] %v16966_v45  ;;  %v16968_v24 = vpop.f32.mrb[81].mxu1 }
 0x587   :  { %v12229_v47 = vadd.f32 %v5379_v20, %v18963_v22  ;;  %v5922_v57 = vadd.f32 %v12228_v10, %v18964_v55  ;;  %v5381_v62 = vpop.f32.mrb[59].mxu0  ;;  %8459 = vmatpush1.bf16.msra.mxu1 %v6717_v53  ;;  %18967 = vst [vmem:[#allocation7_spill] sm:$0xff] %v16968_v24  ;;  %v16970_v43 = vpop.f32.mrb[82].mxu1  ;;  %v18969_v22 = vld [vmem:[#allocation11_spill] sm:$0xff]  ;;  %v13917_v53 = vld [vmem:[%s18796_s1 + $0x940] ss:$28 sps:$4 sm:$0xff]  }
 0x588   :  { %8460 = vmatprep.subr.bf16.mxu1 %v18839_v6  ;;  %18968 = vst [vmem:[#allocation139_spill] sm:$0xff] %v16970_v43 }
 0x589   :  { %v5925_v36 = vadd.f32 %v12229_v47, %v18965_v4  ;;  %5591 = vmatmul.mubr.bf16.gmra.mrb[164].mxu0 %v13912_v63  ;;  %v6348_v16 = vmax.f32 %v5922_v57, 0.0  ;;  %v16976_v47 = vpop.f32.mrb[83].mxu1  ;;  %v18971_v57 = vld [vmem:[#allocation143_spill] sm:$0xff]  ;;  %v18972_v4 = vld [vmem:[#allocation12_spill] sm:$0xff] }
 0x58a   :  { %5598 = vmatprep.mubr.bf16.mxu0 %v13915_v11  ;;  %18970 = vst [vmem:[#allocation8_spill] sm:$0xff] %v16976_v47  ;;  %v13918_v11 = vld [vmem:[%s18796_s1 + $0x97c] ss:$28 sps:$4 sm:$0xff]  }
 0x58b   :  { %v6349_v21 = vmax.f32 %v5925_v36, 0.0 }
 0x58c   :  { %v5384_v18 = vpop.f32.mrb[60].mxu0 }
 0x58d   :  { %v6718_v20 = vpack.c.bf16 %v6349_v21, %v6348_v16  ;;  %v12230_v10 = vadd.f32 %v5384_v18, %v18969_v22  ;;  %v5386_v55 = vpop.f32.mrb[61].mxu0  ;;  %v18973_v16 = vld [vmem:[#allocation145_spill] sm:$0xff]  ;;  %v16985_v18 = vpop.f32.mrb[84].mxu1 }
 0x58e   :  { %v5387_v63 = vpop.f32.mrb[62].mxu0  ;;  %18974 = vst [vmem:[#allocation141_spill] sm:$0xff] %v16985_v18  ;;  %v16987_v45 = vpop.f32.mrb[85].mxu1 }
 0x58f   :  { %v5930_v62 = vadd.f32 %v12230_v10, %v18971_v57  ;;  %v12231_v36 = vadd.f32 %v5387_v63, %v18972_v4  ;;  %v5389_v43 = vpop.f32.mrb[63].mxu0  ;;  %8461 = vmatpush1.bf16.msra.mxu1 %v6718_v20  ;;  %18975 = vst [vmem:[#allocation9_spill] sm:$0xff] %v16987_v45  ;;  %v6456_v10 = vld [vmem:[%s18798_s3 + $0x40] sm:$0xff]  ;;  %v16995_v20 = vpop.f32.mrb[86].mxu1  ;;  %v18980_v45 = vld [vmem:[#allocation148_spill] sm:$0xff] }
 0x590   :  { %8462 = vmatprep.subr.bf16.mxu1 %v18839_v6  ;;  %v6460_v43 = vld [vmem:[%s18798_s3 + $0x60] sm:$0xff]  ;;  %18976 = vst [vmem:[#allocation10_spill] sm:$0xff] %v16995_v20  ;;  %v17001_v4 = vpop.f32.mrb[87].mxu1 }
 0x591   :  { %v5933_v21 = vadd.f32 %v12231_v36, %v18973_v16  ;;  %5599 = vmatmul.mubr.bf16.gmra.mrb[168].mxu0 %v13917_v53  ;;  %v6350_v22 = vmax.f32 %v5930_v62, 0.0  ;;  %v18977_v53 = vld [vmem:[#allocation13_spill] sm:$0xff]  ;;  %18978 = vst [vmem:[#allocation144_spill] sm:$0xff] %v17001_v4  ;;  %v13921_v16 = vld [vmem:[%s18796_s1 + $0x9b4] ss:$28 sps:$4 sm:$0xff]  }
 0x592   :  { %5606 = vmatprep.mubr.bf16.mxu0 %v13918_v11  ;;  %v13920_v62 = vld [vmem:[%s18796_s1 + $0x978] ss:$28 sps:$4 sm:$0xff]  }
 0x593   :  { %v6351_v55 = vmax.f32 %v5933_v21, 0.0  ;;  %v18979_v21 = vld [vmem:[#allocation14_spill] sm:$0xff] }
 0x594   :  { %v5392_v47 = vpop.f32.mrb[64].mxu0 }
 0x595   :  { %v6719_v63 = vpack.c.bf16 %v6351_v55, %v6350_v22  ;;  %v12232_v11 = vadd.f32 %v5392_v47, %v18977_v53  ;;  %v5394_v57 = vpop.f32.mrb[65].mxu0  ;;  %v11469_v22 = vcombine.high %v6456_v10, %v6460_v43  ;;  %v18981_v47 = vld [vmem:[#allocation150_spill] sm:$0xff]  ;;  %v18982_v53 = vcombine.low %v16706_v27, %v16711_v14  ;;  %v18985_v14 = vld [vmem:[#allocation15_spill] sm:$0xff] }
 0x596   :  { %v5395_v36 = vpop.f32.mrb[66].mxu0  ;;  %v17013_v57 = vpop.f32.mrb[88].mxu1 }
 0x597   :  { %v12233_v18 = vadd.f32 %v5395_v36, %v18979_v21  ;;  %v5938_v24 = vadd.f32 %v12232_v11, %v18980_v45  ;;  %v5397_v20 = vpop.f32.mrb[67].mxu0  ;;  %8463 = vmatpush1.bf16.msra.mxu1 %v6719_v63  ;;  %18983 = vst [vmem:[#allocation146_spill] sm:$0xff] %v17013_v57  ;;  %v17015_v36 = vpop.f32.mrb[89].mxu1  ;;  %v18988_v57 = vld [vmem:[#allocation16_spill] sm:$0xff] }
 0x598   :  { %8721 = vmatprep.subr.bf16.mxu1 %v18839_v6  ;;  %v6464_v20 = vld [vmem:[%s18798_s3 + $0x80] sm:$0xff]  ;;  %v17023_v63 = vpop.f32.mrb[90].mxu1 }
 0x599   :  { %v5941_v55 = vadd.f32 %v12233_v18, %v18981_v47  ;;  %5607 = vmatmul.mubr.bf16.gmra.mrb[172].mxu0 %v13920_v62  ;;  %v6352_v4 = vmax.f32 %v5938_v24, 0.0  ;;  %v6468_v18 = vld [vmem:[%s18798_s3 + $0xa0] sm:$0xff]  ;;  %18984 = vst [vmem:[#allocation11_spill] sm:$0xff] %v17023_v63  ;;  %v13923_v24 = vld [vmem:[%s18796_s1 + $0x9b0] ss:$28 sps:$4 sm:$0xff]  }
 0x59a   :  { %8465 = vmatmul.mubr.bf16.vlgmr.msra.gmra.mrb[128].mxu1 %v18982_v53  ;;  %5614 = vmatprep.mubr.bf16.mxu0 %v13921_v16  ;;  %v17029_v16 = vpop.f32.mrb[91].mxu1  ;;  %v13924_v47 = vld [vmem:[%s18796_s1 + $0x9ec] ss:$28 sps:$4 sm:$0xff]  }
 0x59b   :  { %v6353_v61 = vmax.f32 %v5941_v55, 0.0  ;;  %8472 = vmatprep.mubr.bf16.mxu1 %v11469_v22  ;;  %18986 = vst [vmem:[#allocation143_spill] sm:$0xff] %v17029_v16  ;;  %v11468_v22 = vcombine.low %v6456_v10, %v6460_v43  ;;  %v18987_v55 = vld [vmem:[#allocation147_spill] sm:$0xff] }
 0x59c   :  { %v5400_v45 = vpop.f32.mrb[68].mxu0 }
 0x59d   :  { %v6720_v27 = vpack.c.bf16 %v6353_v61, %v6352_v4  ;;  %v12234_v11 = vadd.f32 %v5400_v45, %v18985_v14  ;;  %v5402_v62 = vpop.f32.mrb[69].mxu0  ;;  %v11477_v4 = vcombine.high %v6464_v20, %v6468_v18  ;;  %v18989_v45 = vld [vmem:[#allocation149_spill] sm:$0xff] }
 0x59e   :  { %v5403_v21 = vpop.f32.mrb[70].mxu0  ;;  %v17038_v62 = vpop.f32.mrb[92].mxu1 }
 0x59f   :  { %v5946_v53 = vadd.f32 %v12234_v11, %v18987_v55  ;;  %v12235_v63 = vadd.f32 %v5403_v21, %v18988_v57  ;;  %v5405_v61 = vpop.f32.mrb[71].mxu0  ;;  %8722 = vmatpush1.bf16.msra.mxu1 %v6720_v27  ;;  %18990 = vst [vmem:[#allocation12_spill] sm:$0xff] %v17038_v62  ;;  %v17040_v16 = vpop.f32.mrb[93].mxu1  ;;  %v6472_v57 = vld [vmem:[%s18798_s3 + $0xc0] sm:$0xff] }
 0x5a0   :  { %8723 = vmatprep.subr.bf16.mxu1 %v18839_v6  ;;  %v6476_v27 = vld [vmem:[%s18798_s3 + $0xe0] sm:$0xff] }
 0x5a1   :  { %v5949_v14 = vadd.f32 %v12235_v63, %v18989_v45  ;;  %5615 = vmatmul.mubr.bf16.gmra.mrb[176].mxu0 %v13923_v24  ;;  %v6354_v10 = vmax.f32 %v5946_v53, 0.0  ;;  %v17048_v63 = vpop.f32.mrb[94].mxu1  ;;  %v18992_v21 = vld [vmem:[#allocation17_spill] sm:$0xff]  ;;  %v13926_v55 = vld [vmem:[%s18796_s1 + $0x9e8] ss:$28 sps:$4 sm:$0xff]  }
 0x5a2   :  { %8473 = vmatmul.mubr.bf16.gmra.mrb[132].mxu1 %v11468_v22  ;;  %5622 = vmatprep.mubr.bf16.mxu0 %v13924_v47  ;;  %18991 = vst [vmem:[#allocation145_spill] sm:$0xff] %v17048_v63  ;;  %v17054_v53 = vpop.f32.mrb[95].mxu1  ;;  %v13927_v45 = vld [vmem:[%s18796_s1 + $0xa24] ss:$28 sps:$4 sm:$0xff]  }
 0x5a3   :  { %v6355_v43 = vmax.f32 %v5949_v14, 0.0  ;;  %8480 = vmatprep.mubr.bf16.mxu1 %v11477_v4  ;;  %v11476_v4 = vcombine.low %v6464_v20, %v6468_v18  ;;  %v18993_v14 = vld [vmem:[#allocation18_spill] sm:$0xff] }
 0x5a4   :  { %v5408_v11 = vpop.f32.mrb[72].mxu0 }
 0x5a5   :  { %v6721_v24 = vpack.c.bf16 %v6355_v43, %v6354_v10  ;;  %v12236_v22 = vadd.f32 %v5408_v11, %v18992_v21  ;;  %v5410_v47 = vpop.f32.mrb[73].mxu0  ;;  %v11485_v43 = vcombine.high %v6472_v57, %v6476_v27  ;;  %v17063_v21 = vpop.f32.mrb[96].mxu1 }
 0x5a6   :  { %v5411_v61 = vpop.f32.mrb[74].mxu0  ;;  %18994 = vst [vmem:[#allocation13_spill] sm:$0xff] %v17063_v21  ;;  %v17065_v47 = vpop.f32.mrb[97].mxu1  ;;  %v18997_v21 = vld [vmem:[#allocation20_spill] sm:$0xff] }
 0x5a7   :  { %v12237_v62 = vadd.f32 %v5411_v61, %v18993_v14  ;;  %v5954_v63 = vadd.f32 %v12236_v22, %v16744_v58  ;;  %v5413_v10 = vpop.f32.mrb[75].mxu0  ;;  %8724 = vmatpush1.bf16.msra.mxu1 %v6721_v24  ;;  %v6480_v58 = vld [vmem:[%s18798_s3 + $0x100] sm:$0xff]  ;;  %v18996_v22 = vld [vmem:[#allocation19_spill] sm:$0xff] }
 0x5a8   :  { %8725 = vmatprep.subr.bf16.mxu1 %v18839_v6  ;;  %v6484_v24 = vld [vmem:[%s18798_s3 + $0x120] sm:$0xff]  ;;  %v11484_v10 = vcombine.low %v6472_v57, %v6476_v27 }
 0x5a9   :  { %v5957_v11 = vadd.f32 %v12237_v62, %v16751_v40  ;;  %5623 = vmatmul.mubr.bf16.gmra.mrb[180].mxu0 %v13926_v55  ;;  %v6356_v20 = vmax.f32 %v5954_v63, 0.0  ;;  %v17073_v40 = vpop.f32.mrb[98].mxu1  ;;  %v13929_v63 = vld [vmem:[%s18796_s1 + $0xa20] ss:$28 sps:$4 sm:$0xff]  }
 0x5aa   :  { %8481 = vmatmul.mubr.bf16.gmra.mrb[136].mxu1 %v11476_v4  ;;  %5630 = vmatprep.mubr.bf16.mxu0 %v13927_v45  ;;  %18995 = vst [vmem:[#allocation14_spill] sm:$0xff] %v17073_v40  ;;  %v17079_v45 = vpop.f32.mrb[99].mxu1 }
 0x5ab   :  { %v6357_v18 = vmax.f32 %v5957_v11, 0.0  ;;  %8488 = vmatprep.mubr.bf16.mxu1 %v11485_v43  ;;  %v13930_v43 = vld [vmem:[%s18796_s1 + $0xa5c] ss:$28 sps:$4 sm:$0xff]  }
 0x5ac   :  { %v5416_v61 = vpop.f32.mrb[76].mxu0 }
 0x5ad   :  { %v6722_v62 = vpack.c.bf16 %v6357_v18, %v6356_v20  ;;  %v12238_v55 = vadd.f32 %v5416_v61, %v18996_v22  ;;  %v5418_v4 = vpop.f32.mrb[77].mxu0  ;;  %v11493_v18 = vcombine.high %v6480_v58, %v6484_v24  ;;  %v17088_v22 = vpop.f32.mrb[100].mxu1 }
 0x5ae   :  { %v5419_v14 = vpop.f32.mrb[78].mxu0  ;;  %18998 = vst [vmem:[#allocation148_spill] sm:$0xff] %v17088_v22  ;;  %v17090_v4 = vpop.f32.mrb[101].mxu1 }
 0x5af   :  { %v5962_v11 = vadd.f32 %v12238_v55, %v16739_v23  ;;  %v12239_v40 = vadd.f32 %v5419_v14, %v18997_v21  ;;  %v5421_v20 = vpop.f32.mrb[79].mxu0  ;;  %8726 = vmatpush1.bf16.msra.mxu1 %v6722_v62  ;;  %v6488_v21 = vld [vmem:[%s18798_s3 + $0x140] sm:$0xff] }
 0x5b0   :  { %8727 = vmatprep.subr.bf16.mxu1 %v18839_v6  ;;  %v6492_v62 = vld [vmem:[%s18798_s3 + $0x160] sm:$0xff]  ;;  %v11492_v20 = vcombine.low %v6480_v58, %v6484_v24 }
 0x5b1   :  { %v5965_v61 = vadd.f32 %v12239_v40, %v16748_v26  ;;  %5631 = vmatmul.mubr.bf16.gmra.mrb[184].mxu0 %v13929_v63  ;;  %v6358_v57 = vmax.f32 %v5962_v11, 0.0  ;;  %v17098_v26 = vpop.f32.mrb[102].mxu1  ;;  %v19000_v55 = vld [vmem:[#allocation21_spill] sm:$0xff] }
 0x5b2   :  { %8489 = vmatmul.mubr.bf16.gmra.mrb[140].mxu1 %v11484_v10  ;;  %5638 = vmatprep.mubr.bf16.mxu0 %v13930_v43  ;;  %18999 = vst [vmem:[#allocation150_spill] sm:$0xff] %v17098_v26  ;;  %v13932_v10 = vld [vmem:[%s18796_s1 + $0xa58] ss:$28 sps:$4 sm:$0xff]   ;;  %v17104_v43 = vpop.f32.mrb[103].mxu1 }
 0x5b3   :  { %v6359_v27 = vmax.f32 %v5965_v61, 0.0  ;;  %8496 = vmatprep.mubr.bf16.mxu1 %v11493_v18  ;;  %v13933_v18 = vld [vmem:[%s18796_s1 + $0xa94] ss:$28 sps:$4 sm:$0xff]   ;;  %v19001_v61 = vld [vmem:[#allocation22_spill] sm:$0xff] }
 0x5b4   :  { %v5424_v23 = vpop.f32.mrb[80].mxu0 }
 0x5b5   :  { %v6723_v40 = vpack.c.bf16 %v6359_v27, %v6358_v57  ;;  %v12240_v63 = vadd.f32 %v5424_v23, %v19000_v55  ;;  %v5426_v14 = vpop.f32.mrb[81].mxu0  ;;  %v11501_v27 = vcombine.high %v6488_v21, %v6492_v62  ;;  %v17113_v55 = vpop.f32.mrb[104].mxu1 }
 0x5b6   :  { %v5427_v11 = vpop.f32.mrb[82].mxu0  ;;  %19002 = vst [vmem:[#allocation15_spill] sm:$0xff] %v17113_v55  ;;  %v17115_v14 = vpop.f32.mrb[105].mxu1  ;;  %v19005_v55 = vld [vmem:[#allocation24_spill] sm:$0xff] }
 0x5b7   :  { %v12241_v22 = vadd.f32 %v5427_v11, %v19001_v61  ;;  %v5970_v26 = vadd.f32 %v12240_v63, %v16774_v3  ;;  %v5429_v57 = vpop.f32.mrb[83].mxu0  ;;  %8728 = vmatpush1.bf16.msra.mxu1 %v6723_v40  ;;  %v6496_v3 = vld [vmem:[%s18798_s3 + $0x180] sm:$0xff]  ;;  %v19004_v63 = vld [vmem:[#allocation23_spill] sm:$0xff] }
 0x5b8   :  { %8729 = vmatprep.subr.bf16.mxu1 %v18839_v6  ;;  %v6500_v40 = vld [vmem:[%s18798_s3 + $0x1a0] sm:$0xff]  ;;  %v11500_v57 = vcombine.low %v6488_v21, %v6492_v62 }
 0x5b9   :  { %v5973_v23 = vadd.f32 %v12241_v22, %v16781_v17  ;;  %5639 = vmatmul.mubr.bf16.gmra.mrb[188].mxu0 %v13932_v10  ;;  %v6360_v58 = vmax.f32 %v5970_v26, 0.0  ;;  %v17123_v17 = vpop.f32.mrb[106].mxu1  ;;  %v13935_v26 = vld [vmem:[%s18796_s1 + $0xa90] ss:$28 sps:$4 sm:$0xff]  }
 0x5ba   :  { %8497 = vmatmul.mubr.bf16.gmra.mrb[144].mxu1 %v11492_v20  ;;  %5646 = vmatprep.mubr.bf16.mxu0 %v13933_v18  ;;  %19003 = vst [vmem:[#allocation147_spill] sm:$0xff] %v17123_v17  ;;  %v17129_v18 = vpop.f32.mrb[107].mxu1 }
 0x5bb   :  { %v6361_v24 = vmax.f32 %v5973_v23, 0.0  ;;  %8504 = vmatprep.mubr.bf16.mxu1 %v11501_v27  ;;  %v13936_v27 = vld [vmem:[%s18796_s1 + $0xacc] ss:$28 sps:$4 sm:$0xff]  }
 0x5bc   :  { %v5432_v11 = vpop.f32.mrb[84].mxu0 }
 0x5bd   :  { %v6724_v22 = vpack.c.bf16 %v6361_v24, %v6360_v58  ;;  %v12242_v10 = vadd.f32 %v5432_v11, %v19004_v63  ;;  %v5434_v20 = vpop.f32.mrb[85].mxu0  ;;  %v11509_v24 = vcombine.high %v6496_v3, %v6500_v40  ;;  %v17138_v63 = vpop.f32.mrb[108].mxu1 }
 0x5be   :  { %v5435_v61 = vpop.f32.mrb[86].mxu0  ;;  %19006 = vst [vmem:[#allocation16_spill] sm:$0xff] %v17138_v63  ;;  %v17140_v20 = vpop.f32.mrb[109].mxu1  ;;  %v19009_v63 = vld [vmem:[#allocation26_spill] sm:$0xff] }
 0x5bf   :  { %v5978_v23 = vadd.f32 %v12242_v10, %v16769_v33  ;;  %v12243_v17 = vadd.f32 %v5435_v61, %v19005_v55  ;;  %v5437_v58 = vpop.f32.mrb[87].mxu0  ;;  %8730 = vmatpush1.bf16.msra.mxu1 %v6724_v22  ;;  %v6504_v55 = vld [vmem:[%s18798_s3 + $0x1c0] sm:$0xff] }
 0x5c0   :  { %8731 = vmatprep.subr.bf16.mxu1 %v18839_v6  ;;  %v6508_v22 = vld [vmem:[%s18798_s3 + $0x1e0] sm:$0xff]  ;;  %v11508_v58 = vcombine.low %v6496_v3, %v6500_v40 }
 0x5c1   :  { %v5981_v11 = vadd.f32 %v12243_v17, %v16778_v37  ;;  %5647 = vmatmul.mubr.bf16.gmra.mrb[192].mxu0 %v13935_v26  ;;  %v6362_v21 = vmax.f32 %v5978_v23, 0.0  ;;  %v17148_v37 = vpop.f32.mrb[110].mxu1  ;;  %v19008_v10 = vld [vmem:[#allocation25_spill] sm:$0xff] }
 0x5c2   :  { %8505 = vmatmul.mubr.bf16.gmra.mrb[148].mxu1 %v11500_v57  ;;  %5654 = vmatprep.mubr.bf16.mxu0 %v13936_v27  ;;  %19007 = vst [vmem:[#allocation149_spill] sm:$0xff] %v17148_v37  ;;  %v13938_v57 = vld [vmem:[%s18796_s1 + $0xac8] ss:$28 sps:$4 sm:$0xff]   ;;  %v17154_v27 = vpop.f32.mrb[111].mxu1 }
 0x5c3   :  { %v6363_v62 = vmax.f32 %v5981_v11, 0.0  ;;  %8512 = vmatprep.mubr.bf16.mxu1 %v11509_v24  ;;  %v13939_v24 = vld [vmem:[%s18796_s1 + $0xb04] ss:$28 sps:$4 sm:$0xff]  }
 0x5c4   :  { %v5440_v33 = vpop.f32.mrb[88].mxu0 }
 0x5c5   :  { %v6725_v17 = vpack.c.bf16 %v6363_v62, %v6362_v21  ;;  %v12244_v26 = vadd.f32 %v5440_v33, %v19008_v10  ;;  %v5442_v61 = vpop.f32.mrb[89].mxu0  ;;  %v11517_v62 = vcombine.high %v6504_v55, %v6508_v22  ;;  %v17163_v10 = vpop.f32.mrb[112].mxu1 }
 0x5c6   :  { %v5443_v23 = vpop.f32.mrb[90].mxu0  ;;  %19010 = vst [vmem:[#allocation17_spill] sm:$0xff] %v17163_v10  ;;  %v17165_v61 = vpop.f32.mrb[113].mxu1  ;;  %v19013_v10 = vld [vmem:[#allocation28_spill] sm:$0xff] }
 0x5c7   :  { %v5986_v11 = vadd.f32 %v12244_v26, %v16797_v59  ;;  %v12245_v37 = vadd.f32 %v5443_v23, %v19009_v63  ;;  %v5445_v21 = vpop.f32.mrb[91].mxu0  ;;  %8732 = vmatpush1.bf16.msra.mxu1 %v6725_v17  ;;  %v6512_v63 = vld [vmem:[%s18798_s3 + $0x200] sm:$0xff]  ;;  %v19012_v26 = vld [vmem:[#allocation27_spill] sm:$0xff] }
 0x5c8   :  { %8733 = vmatprep.subr.bf16.mxu1 %v18839_v6  ;;  %v6516_v17 = vld [vmem:[%s18798_s3 + $0x220] sm:$0xff]  ;;  %v11516_v21 = vcombine.low %v6504_v55, %v6508_v22 }
 0x5c9   :  { %v5989_v33 = vadd.f32 %v12245_v37, %v16805_v56  ;;  %5655 = vmatmul.mubr.bf16.gmra.mrb[196].mxu0 %v13938_v57  ;;  %v6364_v3 = vmax.f32 %v5986_v11, 0.0  ;;  %v17173_v56 = vpop.f32.mrb[114].mxu1 }
 0x5ca   :  { %8513 = vmatmul.mubr.bf16.gmra.mrb[152].mxu1 %v11508_v58  ;;  %5662 = vmatprep.mubr.bf16.mxu0 %v13939_v24  ;;  %19011 = vst [vmem:[#allocation18_spill] sm:$0xff] %v17173_v56  ;;  %v13941_v58 = vld [vmem:[%s18796_s1 + $0xb00] ss:$28 sps:$4 sm:$0xff]   ;;  %v17179_v24 = vpop.f32.mrb[115].mxu1 }
 0x5cb   :  { %v6365_v40 = vmax.f32 %v5989_v33, 0.0  ;;  %8520 = vmatprep.mubr.bf16.mxu1 %v11517_v62  ;;  %v13942_v62 = vld [vmem:[%s18796_s1 + $0xb3c] ss:$28 sps:$4 sm:$0xff]  }
 0x5cc   :  { %v5448_v59 = vpop.f32.mrb[92].mxu0 }
 0x5cd   :  { %v6726_v37 = vpack.c.bf16 %v6365_v40, %v6364_v3  ;;  %v12246_v57 = vadd.f32 %v5448_v59, %v19012_v26  ;;  %v5450_v23 = vpop.f32.mrb[93].mxu0  ;;  %v11525_v40 = vcombine.high %v6512_v63, %v6516_v17  ;;  %v17188_v26 = vpop.f32.mrb[116].mxu1 }
 0x5ce   :  { %v5451_v11 = vpop.f32.mrb[94].mxu0  ;;  %19014 = vst [vmem:[#allocation19_spill] sm:$0xff] %v17188_v26  ;;  %v17190_v23 = vpop.f32.mrb[117].mxu1  ;;  %v19017_v26 = vld [vmem:[#allocation30_spill] sm:$0xff] }
 0x5cf   :  { %v5994_v33 = vadd.f32 %v12246_v57, %v16795_v1  ;;  %v12247_v56 = vadd.f32 %v5451_v11, %v19013_v10  ;;  %v5453_v3 = vpop.f32.mrb[95].mxu0  ;;  %8734 = vmatpush1.bf16.msra.mxu1 %v6726_v37  ;;  %v6520_v10 = vld [vmem:[%s18798_s3 + $0x240] sm:$0xff] }
 0x5d0   :  { %8735 = vmatprep.subr.bf16.mxu1 %v18839_v6  ;;  %v6524_v37 = vld [vmem:[%s18798_s3 + $0x260] sm:$0xff]  ;;  %v11524_v3 = vcombine.low %v6512_v63, %v6516_v17 }
 0x5d1   :  { %v5997_v59 = vadd.f32 %v12247_v56, %v16799_v52  ;;  %5663 = vmatmul.mubr.bf16.gmra.mrb[200].mxu0 %v13941_v58  ;;  %v6366_v55 = vmax.f32 %v5994_v33, 0.0  ;;  %v17198_v52 = vpop.f32.mrb[118].mxu1  ;;  %v19016_v57 = vld [vmem:[#allocation29_spill] sm:$0xff] }
 0x5d2   :  { %8521 = vmatmul.mubr.bf16.gmra.mrb[156].mxu1 %v11516_v21  ;;  %5670 = vmatprep.mubr.bf16.mxu0 %v13942_v62  ;;  %19015 = vst [vmem:[#allocation20_spill] sm:$0xff] %v17198_v52  ;;  %v13944_v21 = vld [vmem:[%s18796_s1 + $0xb38] ss:$28 sps:$4 sm:$0xff]   ;;  %v17204_v62 = vpop.f32.mrb[119].mxu1 }
 0x5d3   :  { %v6367_v22 = vmax.f32 %v5997_v59, 0.0  ;;  %8528 = vmatprep.mubr.bf16.mxu1 %v11525_v40  ;;  %v13945_v40 = vld [vmem:[%s18796_s1 + $0xb74] ss:$28 sps:$4 sm:$0xff]  }
 0x5d4   :  { %v5456_v1 = vpop.f32.mrb[96].mxu0 }
 0x5d5   :  { %v6727_v56 = vpack.c.bf16 %v6367_v22, %v6366_v55  ;;  %v12248_v58 = vadd.f32 %v5456_v1, %v19016_v57  ;;  %v5458_v11 = vpop.f32.mrb[97].mxu0  ;;  %v11533_v22 = vcombine.high %v6520_v10, %v6524_v37  ;;  %v17213_v57 = vpop.f32.mrb[120].mxu1 }
 0x5d6   :  { %v5459_v33 = vpop.f32.mrb[98].mxu0  ;;  %19018 = vst [vmem:[#allocation21_spill] sm:$0xff] %v17213_v57  ;;  %v17215_v11 = vpop.f32.mrb[121].mxu1  ;;  %v19021_v57 = vld [vmem:[#allocation32_spill] sm:$0xff] }
 0x5d7   :  { %v6002_v59 = vadd.f32 %v12248_v58, %v16816_v41  ;;  %v12249_v52 = vadd.f32 %v5459_v33, %v19017_v26  ;;  %v5461_v55 = vpop.f32.mrb[99].mxu0  ;;  %8736 = vmatpush1.bf16.msra.mxu1 %v6727_v56  ;;  %v6528_v26 = vld [vmem:[%s18798_s3 + $0x280] sm:$0xff]  ;;  %v19020_v58 = vld [vmem:[#allocation31_spill] sm:$0xff] }
 0x5d8   :  { %8737 = vmatprep.subr.bf16.mxu1 %v18839_v6  ;;  %v6532_v56 = vld [vmem:[%s18798_s3 + $0x2a0] sm:$0xff]  ;;  %v11532_v55 = vcombine.low %v6520_v10, %v6524_v37 }
 0x5d9   :  { %v6005_v1 = vadd.f32 %v12249_v52, %v16824_v5  ;;  %5671 = vmatmul.mubr.bf16.gmra.mrb[204].mxu0 %v13944_v21  ;;  %v6368_v63 = vmax.f32 %v6002_v59, 0.0  ;;  %v17223_v5 = vpop.f32.mrb[122].mxu1 }
 0x5da   :  { %8529 = vmatmul.mubr.bf16.gmra.mrb[160].mxu1 %v11524_v3  ;;  %5678 = vmatprep.mubr.bf16.mxu0 %v13945_v40  ;;  %19019 = vst [vmem:[#allocation22_spill] sm:$0xff] %v17223_v5  ;;  %v13947_v3 = vld [vmem:[%s18796_s1 + $0xb70] ss:$28 sps:$4 sm:$0xff]   ;;  %v17229_v40 = vpop.f32.mrb[123].mxu1 }
 0x5db   :  { %v6369_v17 = vmax.f32 %v6005_v1, 0.0  ;;  %8536 = vmatprep.mubr.bf16.mxu1 %v11533_v22  ;;  %v13948_v22 = vld [vmem:[%s18796_s1 + $0xbac] ss:$28 sps:$4 sm:$0xff]  }
 0x5dc   :  { %v5464_v41 = vpop.f32.mrb[100].mxu0 }
 0x5dd   :  { %v6728_v52 = vpack.c.bf16 %v6369_v17, %v6368_v63  ;;  %v12250_v21 = vadd.f32 %v5464_v41, %v19020_v58  ;;  %v5466_v33 = vpop.f32.mrb[101].mxu0  ;;  %v11541_v17 = vcombine.high %v6528_v26, %v6532_v56  ;;  %v17238_v58 = vpop.f32.mrb[124].mxu1 }
 0x5de   :  { %v5467_v59 = vpop.f32.mrb[102].mxu0  ;;  %19022 = vst [vmem:[#allocation23_spill] sm:$0xff] %v17238_v58  ;;  %v17240_v33 = vpop.f32.mrb[125].mxu1  ;;  %v19025_v58 = vld [vmem:[#allocation34_spill] sm:$0xff] }
 0x5df   :  { %v6010_v1 = vadd.f32 %v12250_v21, %v16814_v50  ;;  %v12251_v5 = vadd.f32 %v5467_v59, %v19021_v57  ;;  %v5469_v63 = vpop.f32.mrb[103].mxu0  ;;  %8738 = vmatpush1.bf16.msra.mxu1 %v6728_v52  ;;  %v6536_v57 = vld [vmem:[%s18798_s3 + $0x2c0] sm:$0xff] }
 0x5e0   :  { %8739 = vmatprep.subr.bf16.mxu1 %v18839_v6  ;;  %v6540_v52 = vld [vmem:[%s18798_s3 + $0x2e0] sm:$0xff]  ;;  %v11540_v63 = vcombine.low %v6528_v26, %v6532_v56 }
 0x5e1   :  { %v6013_v41 = vadd.f32 %v12251_v5, %v16818_v28  ;;  %5679 = vmatmul.mubr.bf16.gmra.mrb[208].mxu0 %v13947_v3  ;;  %v6370_v10 = vmax.f32 %v6010_v1, 0.0  ;;  %v17248_v28 = vpop.f32.mrb[126].mxu1  ;;  %v19024_v21 = vld [vmem:[#allocation33_spill] sm:$0xff] }
 0x5e2   :  { %8537 = vmatmul.mubr.bf16.gmra.mrb[164].mxu1 %v11532_v55  ;;  %5686 = vmatprep.mubr.bf16.mxu0 %v13948_v22  ;;  %19023 = vst [vmem:[#allocation24_spill] sm:$0xff] %v17248_v28  ;;  %v13950_v55 = vld [vmem:[%s18796_s1 + $0xba8] ss:$28 sps:$4 sm:$0xff]   ;;  %v17254_v22 = vpop.f32.mrb[127].mxu1 }
 0x5e3   :  { %v6371_v37 = vmax.f32 %v6013_v41, 0.0  ;;  %8544 = vmatprep.mubr.bf16.mxu1 %v11541_v17  ;;  %v13951_v17 = vld [vmem:[%s18796_s1 + $0xbe4] ss:$28 sps:$4 sm:$0xff]  }
 0x5e4   :  { %v5472_v50 = vpop.f32.mrb[104].mxu0 }
 0x5e5   :  { %v6729_v5 = vpack.c.bf16 %v6371_v37, %v6370_v10  ;;  %v12252_v3 = vadd.f32 %v5472_v50, %v19024_v21  ;;  %v5474_v59 = vpop.f32.mrb[105].mxu0  ;;  %v11549_v37 = vcombine.high %v6536_v57, %v6540_v52 }
 0x5e6   :  { %v5475_v1 = vpop.f32.mrb[106].mxu0 }
 0x5e7   :  { %v6018_v41 = vadd.f32 %v12252_v3, %v16835_v44  ;;  %v12253_v28 = vadd.f32 %v5475_v1, %v19025_v58  ;;  %v5477_v10 = vpop.f32.mrb[107].mxu0  ;;  %8740 = vmatpush1.bf16.msra.mxu1 %v6729_v5  ;;  %v6544_v44 = vld [vmem:[%s18798_s3 + $0x300] sm:$0xff]  ;;  %v19026_v3 = vld [vmem:[#allocation35_spill] sm:$0xff] }
 0x5e8   :  { %8741 = vmatprep.subr.bf16.mxu1 %v18839_v6  ;;  %v6548_v58 = vld [vmem:[%s18798_s3 + $0x320] sm:$0xff] }
 0x5e9   :  { %v6021_v50 = vadd.f32 %v12253_v28, %v16843_v19  ;;  %5687 = vmatmul.mubr.bf16.gmra.mrb[212].mxu0 %v13950_v55  ;;  %v6372_v21 = vmax.f32 %v6018_v41, 0.0  ;;  %v13953_v19 = vld [vmem:[%s18796_s1 + $0xbe0] ss:$28 sps:$4 sm:$0xff]   ;;  %v11548_v55 = vcombine.low %v6536_v57, %v6540_v52  ;;  %v19027_v41 = vld [vmem:[#allocation36_spill] sm:$0xff] }
 0x5ea   :  { %8545 = vmatmul.mubr.bf16.gmra.mrb[168].mxu1 %v11540_v63  ;;  %5694 = vmatprep.mubr.bf16.mxu0 %v13951_v17  ;;  %v13954_v63 = vld [vmem:[%s18796_s1 + $0xc1c] ss:$28 sps:$4 sm:$0xff]  }
 0x5eb   :  { %v6373_v26 = vmax.f32 %v6021_v50, 0.0  ;;  %8552 = vmatprep.mubr.bf16.mxu1 %v11549_v37  ;;  %v11557_v50 = vcombine.high %v6544_v44, %v6548_v58 }
 0x5ec   :  { %v5480_v56 = vpop.f32.mrb[108].mxu0 }
 0x5ed   :  { %v6730_v5 = vpack.c.bf16 %v6373_v26, %v6372_v21  ;;  %v12254_v59 = vadd.f32 %v5480_v56, %v19026_v3  ;;  %v5482_v1 = vpop.f32.mrb[109].mxu0  ;;  %v6556_v56 = vld [vmem:[%s18798_s3 + $0x360] sm:$0xff] }
 0x5ee   :  { %v5483_v28 = vpop.f32.mrb[110].mxu0  ;;  %v19028_v3 = vld [vmem:[#allocation37_spill] sm:$0xff] }
 0x5ef   :  { %v6026_v17 = vadd.f32 %v12254_v59, %v16833_v9  ;;  %v12255_v10 = vadd.f32 %v5483_v28, %v19027_v41  ;;  %v5485_v37 = vpop.f32.mrb[111].mxu0  ;;  %8742 = vmatpush1.bf16.msra.mxu1 %v6730_v5  ;;  %v6552_v9 = vld [vmem:[%s18798_s3 + $0x340] sm:$0xff]  ;;  %v11556_v28 = vcombine.low %v6544_v44, %v6548_v58 }
 0x5f0   :  { %8743 = vmatprep.subr.bf16.mxu1 %v18839_v6  ;;  %v11565_v37 = vcombine.high %v6552_v9, %v6556_v56 }
 0x5f1   :  { %v6029_v21 = vadd.f32 %v12255_v10, %v16837_v46  ;;  %5695 = vmatmul.mubr.bf16.gmra.mrb[216].mxu0 %v13953_v19  ;;  %v6374_v26 = vmax.f32 %v6026_v17, 0.0  ;;  %v13956_v46 = vld [vmem:[%s18796_s1 + $0xc18] ss:$28 sps:$4 sm:$0xff]   ;;  %v19029_v17 = vld [vmem:[#allocation38_spill] sm:$0xff] }
 0x5f2   :  { %8553 = vmatmul.mubr.bf16.gmra.mrb[172].mxu1 %v11548_v55  ;;  %5702 = vmatprep.mubr.bf16.mxu0 %v13954_v63  ;;  %v13957_v55 = vld [vmem:[%s18796_s1 + $0xc54] ss:$28 sps:$4 sm:$0xff]  }
 0x5f3   :  { %v6375_v57 = vmax.f32 %v6029_v21, 0.0  ;;  %8560 = vmatprep.mubr.bf16.mxu1 %v11557_v50 }
 0x5f4   :  { %v5488_v52 = vpop.f32.mrb[112].mxu0 }
 0x5f5   :  { %v6731_v5 = vpack.c.bf16 %v6375_v57, %v6374_v26  ;;  %v12256_v59 = vadd.f32 %v5488_v52, %v19028_v3  ;;  %v5490_v1 = vpop.f32.mrb[113].mxu0  ;;  %v6564_v26 = vld [vmem:[%s18798_s3 + $0x3a0] sm:$0xff]  ;;  %v19030_v52 = vld [vmem:[#allocation39_spill] sm:$0xff] }
 0x5f6   :  { %v5491_v19 = vpop.f32.mrb[114].mxu0  ;;  %v11564_v1 = vcombine.low %v6552_v9, %v6556_v56 }
 0x5f7   :  { %v6034_v63 = vadd.f32 %v12256_v59, %v16854_v60  ;;  %v12257_v41 = vadd.f32 %v5491_v19, %v19029_v17  ;;  %v5493_v10 = vpop.f32.mrb[115].mxu0  ;;  %8744 = vmatpush1.bf16.msra.mxu1 %v6731_v5  ;;  %v6560_v60 = vld [vmem:[%s18798_s3 + $0x380] sm:$0xff] }
 0x5f8   :  { %8745 = vmatprep.subr.bf16.mxu1 %v18839_v6  ;;  %v11573_v17 = vcombine.high %v6560_v60, %v6564_v26 }
 0x5f9   :  { %v6037_v50 = vadd.f32 %v12257_v41, %v16862_v39  ;;  %5703 = vmatmul.mubr.bf16.gmra.mrb[220].mxu0 %v13956_v46  ;;  %v6376_v21 = vmax.f32 %v6034_v63, 0.0  ;;  %v13959_v39 = vld [vmem:[%s18796_s1 + $0xc50] ss:$28 sps:$4 sm:$0xff]  }
 0x5fa   :  { %8561 = vmatmul.mubr.bf16.gmra.mrb[176].mxu1 %v11556_v28  ;;  %5710 = vmatprep.mubr.bf16.mxu0 %v13957_v55  ;;  %v13960_v46 = vld [vmem:[%s18796_s1 + $0xc8c] ss:$28 sps:$4 sm:$0xff]   ;;  %v19031_v28 = vld [vmem:[#allocation40_spill] sm:$0xff] }
 0x5fb   :  { %v6377_v44 = vmax.f32 %v6037_v50, 0.0  ;;  %8568 = vmatprep.mubr.bf16.mxu1 %v11565_v37  ;;  %v6572_v37 = vld [vmem:[%s18798_s3 + $0x3e0] sm:$0xff] }
 0x5fc   :  { %v5496_v58 = vpop.f32.mrb[116].mxu0 }
 0x5fd   :  { %v6732_v57 = vpack.c.bf16 %v6377_v44, %v6376_v21  ;;  %v12258_v5 = vadd.f32 %v5496_v58, %v19030_v52  ;;  %v5498_v3 = vpop.f32.mrb[117].mxu0  ;;  %v19032_v21 = vld [vmem:[#allocation41_spill] sm:$0xff]  ;;  %v11572_v52 = vcombine.low %v6560_v60, %v6564_v26 }
 0x5fe   :  { %v5499_v59 = vpop.f32.mrb[118].mxu0 }
 0x5ff   :  { %v6042_v19 = vadd.f32 %v12258_v5, %v16852_v42  ;;  %v12259_v55 = vadd.f32 %v5499_v59, %v19031_v28  ;;  %v5501_v63 = vpop.f32.mrb[119].mxu0  ;;  %8746 = vmatpush1.bf16.msra.mxu1 %v6732_v57  ;;  %v6568_v42 = vld [vmem:[%s18798_s3 + $0x3c0] sm:$0xff] }
 0x600   :  { %8747 = vmatprep.subr.bf16.mxu1 %v18839_v6  ;;  %v13963_v5 = vld [vmem:[%s18796_s1 + $0xcc4] ss:$28 sps:$4 sm:$0xff]  }
 0x601   :  { %v6045_v41 = vadd.f32 %v12259_v55, %v16856_v12  ;;  %5711 = vmatmul.mubr.bf16.gmra.mrb[224].mxu0 %v13959_v39  ;;  %v6378_v10 = vmax.f32 %v6042_v19, 0.0  ;;  %v13962_v12 = vld [vmem:[%s18796_s1 + $0xc88] ss:$28 sps:$4 sm:$0xff]  }
 0x602   :  { %8569 = vmatmul.mubr.bf16.gmra.mrb[180].mxu1 %v11564_v1  ;;  %5718 = vmatprep.mubr.bf16.mxu0 %v13960_v46  ;;  %v19033_v39 = vld [vmem:[#allocation42_spill] sm:$0xff]  ;;  %v11581_v46 = vcombine.high %v6568_v42, %v6572_v37 }
 0x603   :  { %v6379_v9 = vmax.f32 %v6045_v41, 0.0  ;;  %8576 = vmatprep.mubr.bf16.mxu1 %v11573_v17  ;;  %v6580_v55 = vld [vmem:[%s18798_s3 + $0x420] sm:$0xff]  ;;  %v19034_v17 = vld [vmem:[#allocation43_spill] sm:$0xff] }
 0x604   :  { %v5504_v56 = vpop.f32.mrb[120].mxu0 }
 0x605   :  { %v6733_v50 = vpack.c.bf16 %v6379_v9, %v6378_v10  ;;  %v12260_v44 = vadd.f32 %v5504_v56, %v19032_v21  ;;  %v5506_v58 = vpop.f32.mrb[121].mxu0  ;;  %v11580_v56 = vcombine.low %v6568_v42, %v6572_v37 }
 0x606   :  { %v5507_v57 = vpop.f32.mrb[122].mxu0 }
 0x607   :  { %v6050_v3 = vadd.f32 %v12260_v44, %v16873_v54  ;;  %v12261_v59 = vadd.f32 %v5507_v57, %v19033_v39  ;;  %v5509_v1 = vpop.f32.mrb[123].mxu0  ;;  %8748 = vmatpush1.bf16.msra.mxu1 %v6733_v50  ;;  %v6576_v54 = vld [vmem:[%s18798_s3 + $0x400] sm:$0xff]  ;;  %v13966_v50 = vld [vmem:[%s18796_s1 + $0xcfc] ss:$28 sps:$4 sm:$0xff]  }
 0x608   :  { %8749 = vmatprep.subr.bf16.mxu1 %v18839_v6  ;;  %v19035_v44 = vld [vmem:[#allocation44_spill] sm:$0xff]  ;;  %v11589_v57 = vcombine.high %v6576_v54, %v6580_v55 }
 0x609   :  { %v6053_v19 = vadd.f32 %v12261_v59, %v16881_v29  ;;  %5719 = vmatmul.mubr.bf16.gmra.mrb[228].mxu0 %v13962_v12  ;;  %v6380_v28 = vmax.f32 %v6050_v3, 0.0  ;;  %v13965_v29 = vld [vmem:[%s18796_s1 + $0xcc0] ss:$28 sps:$4 sm:$0xff]  }
 0x60a   :  { %8577 = vmatmul.mubr.bf16.gmra.mrb[184].mxu1 %v11572_v52  ;;  %5726 = vmatprep.mubr.bf16.mxu0 %v13963_v5  ;;  %v6588_v3 = vld [vmem:[%s18798_s3 + $0x460] sm:$0xff] }
 0x60b   :  { %v6381_v60 = vmax.f32 %v6053_v19, 0.0  ;;  %8584 = vmatprep.mubr.bf16.mxu1 %v11581_v46  ;;  %v19036_v59 = vld [vmem:[#allocation45_spill] sm:$0xff] }
 0x60c   :  { %v5512_v26 = vpop.f32.mrb[124].mxu0 }
 0x60d   :  { %v6734_v63 = vpack.c.bf16 %v6381_v60, %v6380_v28  ;;  %v12262_v41 = vadd.f32 %v5512_v26, %v19034_v17  ;;  %v5514_v10 = vpop.f32.mrb[125].mxu0  ;;  %v11588_v28 = vcombine.low %v6576_v54, %v6580_v55  ;;  %v13969_v60 = vld [vmem:[%s18796_s1 + $0xd34] ss:$28 sps:$4 sm:$0xff]  }
 0x60e   :  { %v5515_v9 = vpop.f32.mrb[126].mxu0 }
 0x60f   :  { %v6058_v21 = vadd.f32 %v12262_v41, %v16871_v15  ;;  %v12263_v58 = vadd.f32 %v5515_v9, %v19035_v44  ;;  %v5517_v12 = vpop.f32.mrb[127].mxu0  ;;  %8750 = vmatpush1.bf16.msra.mxu1 %v6734_v63  ;;  %v6584_v15 = vld [vmem:[%s18798_s3 + $0x440] sm:$0xff] }
 0x610   :  { %8751 = vmatprep.subr.bf16.mxu1 %v18839_v6  ;;  %v19037_v63 = vld [vmem:[#allocation46_spill] sm:$0xff]  ;;  %v11597_v10 = vcombine.high %v6584_v15, %v6588_v3 }
 0x611   :  { %v6061_v52 = vadd.f32 %v12263_v58, %v16875_v25  ;;  %5727 = vmatmul.mubr.bf16.gmra.mrb[232].mxu0 %v13965_v29  ;;  %v6382_v5 = vmax.f32 %v6058_v21, 0.0  ;;  %v13968_v25 = vld [vmem:[%s18796_s1 + $0xcf8] ss:$28 sps:$4 sm:$0xff]   ;;  %v19038_v21 = vld [vmem:[#allocation47_spill] sm:$0xff] }
 0x612   :  { %8585 = vmatmul.mubr.bf16.gmra.mrb[188].mxu1 %v11580_v56  ;;  %5734 = vmatprep.mubr.bf16.mxu0 %v13966_v50  ;;  %v6596_v56 = vld [vmem:[%s18798_s3 + $0x4a0] sm:$0xff]  ;;  %v13971_v58 = vld [vmem:[%s18796_s1 + $0xd30] ss:$28 sps:$4 sm:$0xff]  }
 0x613   :  { %v6383_v42 = vmax.f32 %v6061_v52, 0.0  ;;  %8592 = vmatprep.mubr.bf16.mxu1 %v11589_v57  ;;  %v11596_v57 = vcombine.low %v6584_v15, %v6588_v3  ;;  %v13972_v52 = vld [vmem:[%s18796_s1 + $0xd6c] ss:$28 sps:$4 sm:$0xff]   ;;  %v6600_v15 = vld [vmem:[%s18798_s3 + $0x4c0] sm:$0xff] }
 0x614   :  { %v5520_v37 = vpop.f32.mrb[128].mxu0 }
 0x615   :  { %v6735_v39 = vpack.c.bf16 %v6383_v42, %v6382_v5  ;;  %v12264_v1 = vadd.f32 %v5520_v37, %v19036_v59  ;;  %v5522_v46 = vpop.f32.mrb[129].mxu0  ;;  %v19039_v42 = vld [vmem:[#allocation48_spill] sm:$0xff] }
 0x616   :  { %v5523_v19 = vpop.f32.mrb[130].mxu0 }
 0x617   :  { %v6066_v26 = vadd.f32 %v12264_v1, %v16892_v34  ;;  %v12265_v17 = vadd.f32 %v5523_v19, %v19037_v63  ;;  %v5525_v41 = vpop.f32.mrb[131].mxu0  ;;  %8752 = vmatpush1.bf16.msra.mxu1 %v6735_v39  ;;  %v6592_v34 = vld [vmem:[%s18798_s3 + $0x480] sm:$0xff] }
 0x618   :  { %9010 = vmatprep.subr.bf16.mxu1 %v18839_v6  ;;  %v11605_v59 = vcombine.high %v6592_v34, %v6596_v56  ;;  %v13975_v41 = vld [vmem:[%s18796_s1 + $0xda4] ss:$28 sps:$4 sm:$0xff]  }
 0x619   :  { %v6069_v29 = vadd.f32 %v12265_v17, %v16900_v13  ;;  %5735 = vmatmul.mubr.bf16.gmra.mrb[236].mxu0 %v13968_v25  ;;  %v6384_v9 = vmax.f32 %v6066_v26, 0.0  ;;  %v13974_v26 = vld [vmem:[%s18796_s1 + $0xd68] ss:$28 sps:$4 sm:$0xff]   ;;  %v11604_v17 = vcombine.low %v6592_v34, %v6596_v56 }
 0x61a   :  { %8593 = vmatmul.mubr.bf16.gmra.mrb[192].mxu1 %v11588_v28  ;;  %5742 = vmatprep.mubr.bf16.mxu0 %v13969_v60  ;;  %v19040_v28 = vld [vmem:[#allocation49_spill] sm:$0xff] }
 0x61b   :  { %v6385_v54 = vmax.f32 %v6069_v29, 0.0  ;;  %8600 = vmatprep.mubr.bf16.mxu1 %v11597_v10  ;;  %v19041_v29 = vld [vmem:[#allocation50_spill] sm:$0xff] }
 0x61c   :  { %v5528_v55 = vpop.f32.mrb[132].mxu0  ;;  %v6608_v34 = vld [vmem:[%s18798_s3 + $0x500] sm:$0xff] }
 0x61d   :  { %v17371_v50 = vpack.c.bf16 %v6385_v54, %v6384_v9  ;;  %v12266_v44 = vadd.f32 %v5528_v55, %v19038_v21  ;;  %v5530_v13 = vpop.f32.mrb[133].mxu0 }
 0x61e   :  { %v5531_v12 = vpop.f32.mrb[134].mxu0 }
 0x61f   :  { %v6074_v5 = vadd.f32 %v12266_v44, %v16890_v51  ;;  %v12267_v37 = vadd.f32 %v5531_v12, %v19039_v42  ;;  %v5533_v39 = vpop.f32.mrb[135].mxu0  ;;  %v6604_v51 = vld [vmem:[%s18798_s3 + $0x4e0] sm:$0xff]  ;;  %v19042_v12 = vld [vmem:[#allocation51_spill] sm:$0xff] }
 0x620   :  { %v11613_v55 = vcombine.high %v6600_v15, %v6604_v51  ;;  %v11612_v42 = vcombine.low %v6600_v15, %v6604_v51  ;;  %v6616_v15 = vld [vmem:[%s18798_s3 + $0x540] sm:$0xff] }
 0x621   :  { %v6077_v1 = vadd.f32 %v12267_v37, %v16894_v32  ;;  %5743 = vmatmul.mubr.bf16.gmra.mrb[240].mxu0 %v13971_v58  ;;  %v6386_v46 = vmax.f32 %v6074_v5, 0.0  ;;  %v13978_v37 = vld [vmem:[%s18796_s1 + $0xddc] ss:$28 sps:$4 sm:$0xff]  }
 0x622   :  { %8601 = vmatmul.mubr.bf16.gmra.mrb[196].mxu1 %v11596_v57  ;;  %5750 = vmatprep.mubr.bf16.mxu0 %v13972_v52  ;;  %v13977_v52 = vld [vmem:[%s18796_s1 + $0xda0] ss:$28 sps:$4 sm:$0xff]  }
 0x623   :  { %v6387_v25 = vmax.f32 %v6077_v1, 0.0  ;;  %8608 = vmatprep.mubr.bf16.mxu1 %v11605_v59  ;;  %v19043_v59 = vld [vmem:[#allocation52_spill] sm:$0xff] }
 0x624   :  { %v5536_v19 = vpop.f32.mrb[136].mxu0 }
 0x625   :  { %v17389_v3 = vpack.c.bf16 %v6387_v25, %v6386_v46  ;;  %v12268_v60 = vadd.f32 %v5536_v19, %v19040_v28  ;;  %v5538_v32 = vpop.f32.mrb[137].mxu0 }
 0x626   :  { %v5539_v63 = vpop.f32.mrb[138].mxu0 }
 0x627   :  { %v6082_v10 = vadd.f32 %v12268_v60, %v16911_v0  ;;  %v12269_v9 = vadd.f32 %v5539_v63, %v19041_v29  ;;  %v5541_v54 = vpop.f32.mrb[139].mxu0  ;;  %v6612_v0 = vld [vmem:[%s18798_s3 + $0x520] sm:$0xff] }
 0x628   :  { %v11621_v25 = vcombine.high %v6608_v34, %v6612_v0 }
 0x629   :  { %v6085_v21 = vadd.f32 %v12269_v9, %v16919_v35  ;;  %5751 = vmatmul.mubr.bf16.gmra.mrb[244].mxu0 %v13974_v26  ;;  %v6388_v44 = vmax.f32 %v6082_v10, 0.0  ;;  %v19044_v26 = vld [vmem:[#allocation53_spill] sm:$0xff]  ;;  %v11620_v10 = vcombine.low %v6608_v34, %v6612_v0  ;;  %v19045_v9 = vld [vmem:[#allocation54_spill] sm:$0xff]  ;;  %v19046_v0 = vld [vmem:[#allocation55_spill] sm:$0xff] }
 0x62a   :  { %8609 = vmatmul.mubr.bf16.gmra.mrb[200].mxu1 %v11604_v17  ;;  %5758 = vmatprep.mubr.bf16.mxu0 %v13975_v41  ;;  %v13980_v17 = vld [vmem:[%s18796_s1 + $0xdd8] ss:$28 sps:$4 sm:$0xff]  }
 0x62b   :  { %v6389_v13 = vmax.f32 %v6085_v21, 0.0  ;;  %8616 = vmatprep.mubr.bf16.mxu1 %v11613_v55 }
 0x62c   :  { %v5544_v58 = vpop.f32.mrb[140].mxu0 }
 0x62d   :  { %v17407_v56 = vpack.c.bf16 %v6389_v13, %v6388_v44  ;;  %v12270_v57 = vadd.f32 %v5544_v58, %v19042_v12  ;;  %v5546_v35 = vpop.f32.mrb[141].mxu0 }
 0x62e   :  { %v5547_v5 = vpop.f32.mrb[142].mxu0 }
 0x62f   :  { %v6090_v39 = vadd.f32 %v12270_v57, %v16909_v49  ;;  %v12271_v1 = vadd.f32 %v5547_v5, %v19043_v59  ;;  %v5549_v46 = vpop.f32.mrb[143].mxu0  ;;  %v6620_v49 = vld [vmem:[%s18798_s3 + $0x560] sm:$0xff] }
 0x630   :  { %v11629_v21 = vcombine.high %v6616_v15, %v6620_v49  ;;  %v6624_v57 = vld [vmem:[%s18798_s3 + $0x580] sm:$0xff]  ;;  %v11628_v5 = vcombine.low %v6616_v15, %v6620_v49 }
 0x631   :  { %v6093_v19 = vadd.f32 %v12271_v1, %v16913_v30  ;;  %5759 = vmatmul.mubr.bf16.gmra.mrb[248].mxu0 %v13977_v52  ;;  %v6390_v28 = vmax.f32 %v6090_v39, 0.0  ;;  %v19048_v15 = vld [vmem:[#allocation57_spill] sm:$0xff] }
 0x632   :  { %8617 = vmatmul.mubr.bf16.gmra.mrb[204].mxu1 %v11612_v42  ;;  %5766 = vmatprep.mubr.bf16.mxu0 %v13978_v37  ;;  %v19047_v37 = vld [vmem:[#allocation56_spill] sm:$0xff] }
 0x633   :  { %v6391_v60 = vmax.f32 %v6093_v19, 0.0  ;;  %8624 = vmatprep.mubr.bf16.mxu1 %v11621_v25 }
 0x634   :  { %v5552_v32 = vpop.f32.mrb[144].mxu0 }
 0x635   :  { %v17425_v51 = vpack.c.bf16 %v6391_v60, %v6390_v28  ;;  %v12272_v63 = vadd.f32 %v5552_v32, %v19044_v26  ;;  %v5554_v30 = vpop.f32.mrb[145].mxu0  ;;  %v6632_v60 = vld [vmem:[%s18798_s3 + $0x5c0] sm:$0xff] }
 0x636   :  { %v5555_v41 = vpop.f32.mrb[146].mxu0  ;;  %v6636_v32 = vld [vmem:[%s18798_s3 + $0x5e0] sm:$0xff] }
 0x637   :  { %v6098_v29 = vadd.f32 %v12272_v63, %v16930_v31  ;;  %v12273_v54 = vadd.f32 %v5555_v41, %v19045_v9  ;;  %v5557_v55 = vpop.f32.mrb[147].mxu0  ;;  %v6628_v31 = vld [vmem:[%s18798_s3 + $0x5a0] sm:$0xff] }
 0x638   :  { %v11637_v1 = vcombine.high %v6624_v57, %v6628_v31 }
 0x639   :  { %v6101_v44 = vadd.f32 %v12273_v54, %v16938_v38  ;;  %5767 = vmatmul.mubr.bf16.gmra.mrb[252].mxu0 %v13980_v17  ;;  %v6392_v13 = vmax.f32 %v6098_v29, 0.0  ;;  %v19049_v17 = vld [vmem:[#allocation58_spill] sm:$0xff]  ;;  %v11645_v29 = vcombine.high %v6632_v60, %v6636_v32 }
 0x63a   :  { %8625 = vmatmul.mubr.bf16.gmra.mrb[208].mxu1 %v11620_v10 }
 0x63b   :  { %v6393_v58 = vmax.f32 %v6101_v44, 0.0  ;;  %8632 = vmatprep.mubr.bf16.mxu1 %v11629_v21  ;;  %v6640_v44 = vld [vmem:[%s18798_s3 + $0x600] sm:$0xff] }
 0x63c   :  { %v5560_v12 = vpop.f32.mrb[148].mxu0 }
 0x63d   :  { %v17440_v34 = vpack.c.bf16 %v6393_v58, %v6392_v13  ;;  %v12274_v35 = vadd.f32 %v5560_v12, %v19046_v0  ;;  %v5562_v52 = vpop.f32.mrb[149].mxu0  ;;  %v6644_v13 = vld [vmem:[%s18798_s3 + $0x620] sm:$0xff]  ;;  %v19050_v58 = vld [vmem:[#allocation59_spill] sm:$0xff] }
 0x63e   :  { %v5563_v38 = vpop.f32.mrb[150].mxu0  ;;  %v19051_v0 = vld [vmem:[#allocation6_spill] sm:$0xff]  ;;  %v19052_v52 = vld [vmem:[#allocation60_spill] sm:$0xff] }
 0x63f   :  { %v6106_v42 = vadd.f32 %v12274_v35, %v16928_v7  ;;  %v12275_v39 = vadd.f32 %v5563_v38, %v19047_v37  ;;  %v5565_v59 = vpop.f32.mrb[151].mxu0  ;;  %v19053_v37 = vld [vmem:[#allocation140_spill] sm:$0xff] }
 0x641   :  { %v6109_v46 = vadd.f32 %v12275_v39, %v16932_v48  ;;  %v6394_v25 = vmax.f32 %v6106_v42, 0.0  ;;  %v11636_v48 = vcombine.low %v6624_v57, %v6628_v31  ;;  %v11653_v42 = vcombine.high %v6640_v44, %v6644_v13 }
 0x642   :  { %8633 = vmatmul.mubr.bf16.gmra.mrb[212].mxu1 %v11628_v5 }
 0x643   :  { %v6395_v19 = vmax.f32 %v6109_v46, 0.0  ;;  %8640 = vmatprep.mubr.bf16.mxu1 %v11637_v1 }
 0x644   :  { %v5568_v28 = vpop.f32.mrb[152].mxu0 }
 0x645   :  { %v17452_v7 = vpack.c.bf16 %v6395_v19, %v6394_v25  ;;  %v12276_v49 = vadd.f32 %v5568_v28, %v19048_v15  ;;  %v5570_v26 = vpop.f32.mrb[153].mxu0  ;;  %v6648_v25 = vld [vmem:[%s18798_s3 + $0x640] sm:$0xff] }
 0x646   :  { %v5571_v63 = vpop.f32.mrb[154].mxu0  ;;  %v6652_v19 = vld [vmem:[%s18798_s3 + $0x660] sm:$0xff]  ;;  %v11652_v26 = vcombine.low %v6640_v44, %v6644_v13 }
 0x647   :  { %v6114_v30 = vadd.f32 %v12276_v49, %v16949_v8  ;;  %v12277_v41 = vadd.f32 %v5571_v63, %v19049_v17  ;;  %v5573_v10 = vpop.f32.mrb[155].mxu0  ;;  %v19055_v63 = vld [vmem:[#allocation7_spill] sm:$0xff]  ;;  %v6660_v44 = vld [vmem:[%s18798_s3 + $0x6a0] sm:$0xff] }
 0x648   :  { %v11661_v10 = vcombine.high %v6648_v25, %v6652_v19 }
 0x649   :  { %v6117_v9 = vadd.f32 %v12277_v41, %v16957_v2  ;;  %v6396_v54 = vmax.f32 %v6114_v30, 0.0  ;;  %v11644_v2 = vcombine.low %v6632_v60, %v6636_v32  ;;  %v19054_v60 = vld [vmem:[#allocation61_spill] sm:$0xff]  ;;  %v19056_v30 = vld [vmem:[#allocation62_spill] sm:$0xff] }
 0x64a   :  { %8641 = vmatmul.mubr.bf16.gmra.mrb[216].mxu1 %v11636_v48 }
 0x64b   :  { %v6397_v55 = vmax.f32 %v6117_v9, 0.0  ;;  %8648 = vmatprep.mubr.bf16.mxu1 %v11645_v29  ;;  %v19057_v29 = vld [vmem:[#allocation8_spill] sm:$0xff] }
 0x64c   :  { %v5576_v21 = vpop.f32.mrb[156].mxu0 }
 0x64d   :  { %v17464_v8 = vpack.c.bf16 %v6397_v55, %v6396_v54  ;;  %v12278_v12 = vadd.f32 %v5576_v21, %v19050_v58  ;;  %v5578_v57 = vpop.f32.mrb[157].mxu0  ;;  %v6656_v58 = vld [vmem:[%s18798_s3 + $0x680] sm:$0xff] }
 0x64e   :  { %v5579_v31 = vpop.f32.mrb[158].mxu0 }
 0x64f   :  { %v6122_v35 = vadd.f32 %v12278_v12, %v19051_v0  ;;  %v12279_v38 = vadd.f32 %v5579_v31, %v19052_v52  ;;  %v5581_v5 = vpop.f32.mrb[159].mxu0  ;;  %v19058_v12 = vld [vmem:[#allocation63_spill] sm:$0xff]  ;;  %v11660_v0 = vcombine.low %v6648_v25, %v6652_v19  ;;  %v6668_v25 = vld [vmem:[%s18798_s3 + $0x6e0] sm:$0xff] }
 0x651   :  { %v6125_v39 = vadd.f32 %v12279_v38, %v19053_v37  ;;  %v6398_v59 = vmax.f32 %v6122_v35, 0.0  ;;  %v19059_v35 = vld [vmem:[#allocation142_spill] sm:$0xff]  ;;  %v19060_v38 = vld [vmem:[#allocation64_spill] sm:$0xff]  ;;  %v11669_v37 = vcombine.high %v6656_v58, %v6660_v44 }
 0x652   :  { %8649 = vmatmul.mubr.bf16.gmra.mrb[220].mxu1 %v11644_v2 }
 0x653   :  { %v6399_v1 = vmax.f32 %v6125_v39, 0.0  ;;  %8656 = vmatprep.mubr.bf16.mxu1 %v11653_v42  ;;  %v19061_v39 = vld [vmem:[#allocation139_spill] sm:$0xff] }
 0x654   :  { %v5584_v46 = vpop.f32.mrb[160].mxu0 }
 0x655   :  { %v17476_v28 = vpack.c.bf16 %v6399_v1, %v6398_v59  ;;  %v12280_v32 = vadd.f32 %v5584_v46, %v19054_v60  ;;  %v5586_v15 = vpop.f32.mrb[161].mxu0 }
 0x656   :  { %v5587_v49 = vpop.f32.mrb[162].mxu0  ;;  %v19062_v15 = vld [vmem:[#allocation65_spill] sm:$0xff] }
 0x657   :  { %v6130_v48 = vadd.f32 %v12280_v32, %v19055_v63  ;;  %v12281_v17 = vadd.f32 %v5587_v49, %v19056_v30  ;;  %v5589_v41 = vpop.f32.mrb[163].mxu0  ;;  %v6664_v32 = vld [vmem:[%s18798_s3 + $0x6c0] sm:$0xff] }
 0x658   :  { %v19063_v30 = vld [vmem:[#allocation9_spill] sm:$0xff]  ;;  %v19064_v41 = vld [vmem:[#allocation66_spill] sm:$0xff] }
 0x659   :  { %v6133_v9 = vadd.f32 %v12281_v17, %v19057_v29  ;;  %v6400_v54 = vmax.f32 %v6130_v48, 0.0  ;;  %v11668_v48 = vcombine.low %v6656_v58, %v6660_v44  ;;  %v6676_v58 = vld [vmem:[%s18798_s3 + $0x720] sm:$0xff] }
 0x65a   :  { %8657 = vmatmul.mubr.bf16.gmra.mrb[224].mxu1 %v11652_v26 }
 0x65b   :  { %v6401_v55 = vmax.f32 %v6133_v9, 0.0  ;;  %8664 = vmatprep.mubr.bf16.mxu1 %v11661_v10  ;;  %v11677_v9 = vcombine.high %v6664_v32, %v6668_v25 }
 0x65c   :  { %v5592_v21 = vpop.f32.mrb[164].mxu0 }
 0x65d   :  { %v17488_v13 = vpack.c.bf16 %v6401_v55, %v6400_v54  ;;  %v12282_v57 = vadd.f32 %v5592_v21, %v19058_v12  ;;  %v5594_v31 = vpop.f32.mrb[165].mxu0  ;;  %v19065_v54 = vld [vmem:[#allocation144_spill] sm:$0xff] }
 0x65e   :  { %v5595_v2 = vpop.f32.mrb[166].mxu0  ;;  %v6672_v31 = vld [vmem:[%s18798_s3 + $0x700] sm:$0xff] }
 0x65f   :  { %v6138_v52 = vadd.f32 %v12282_v57, %v19059_v35  ;;  %v12283_v5 = vadd.f32 %v5595_v2, %v19060_v38  ;;  %v5597_v42 = vpop.f32.mrb[167].mxu0  ;;  %v19066_v2 = vld [vmem:[#allocation67_spill] sm:$0xff]  ;;  %v11676_v38 = vcombine.low %v6664_v32, %v6668_v25  ;;  %v6684_v32 = vld [vmem:[%s18798_s3 + $0x760] sm:$0xff] }
 0x661   :  { %v6141_v59 = vadd.f32 %v12283_v5, %v19061_v39  ;;  %v6402_v1 = vmax.f32 %v6138_v52, 0.0  ;;  %v19067_v5 = vld [vmem:[#allocation141_spill] sm:$0xff] }
 0x662   :  { %8665 = vmatmul.mubr.bf16.gmra.mrb[228].mxu1 %v11660_v0 }
 0x663   :  { %v6403_v46 = vmax.f32 %v6141_v59, 0.0  ;;  %8672 = vmatprep.mubr.bf16.mxu1 %v11669_v37  ;;  %v19068_v37 = vld [vmem:[#allocation68_spill] sm:$0xff] }
 0x664   :  { %v5600_v60 = vpop.f32.mrb[168].mxu0 }
 0x665   :  { %v17500_v19 = vpack.c.bf16 %v6403_v46, %v6402_v1  ;;  %v12284_v49 = vadd.f32 %v5600_v60, %v19062_v15  ;;  %v5602_v26 = vpop.f32.mrb[169].mxu0  ;;  %v11685_v1 = vcombine.high %v6672_v31, %v6676_v58  ;;  %v19069_v46 = vld [vmem:[#allocation10_spill] sm:$0xff] }
 0x666   :  { %v5603_v63 = vpop.f32.mrb[170].mxu0 }
 0x667   :  { %v6146_v17 = vadd.f32 %v12284_v49, %v19063_v30  ;;  %v12285_v10 = vadd.f32 %v5603_v63, %v19064_v41  ;;  %v5605_v29 = vpop.f32.mrb[171].mxu0  ;;  %v6680_v63 = vld [vmem:[%s18798_s3 + $0x740] sm:$0xff] }
 0x669   :  { %v6149_v55 = vadd.f32 %v12285_v10, %v19065_v54  ;;  %v6404_v21 = vmax.f32 %v6146_v17, 0.0  ;;  %v11684_v10 = vcombine.low %v6672_v31, %v6676_v58  ;;  %v6692_v31 = vld [vmem:[%s18798_s3 + $0x7a0] sm:$0xff]  ;;  %v19073_v58 = vld [vmem:[#allocation71_spill] sm:$0xff] }
 0x66a   :  { %8673 = vmatmul.mubr.bf16.gmra.mrb[232].mxu1 %v11668_v48  ;;  %v19070_v48 = vld [vmem:[#allocation69_spill] sm:$0xff] }
 0x66b   :  { %v6405_v12 = vmax.f32 %v6149_v55, 0.0  ;;  %8680 = vmatprep.mubr.bf16.mxu1 %v11677_v9  ;;  %v19071_v9 = vld [vmem:[#allocation70_spill] sm:$0xff] }
 0x66c   :  { %v5608_v57 = vpop.f32.mrb[172].mxu0 }
 0x66d   :  { %v17512_v44 = vpack.c.bf16 %v6405_v12, %v6404_v21  ;;  %v12286_v0 = vadd.f32 %v5608_v57, %v19066_v2  ;;  %v5610_v35 = vpop.f32.mrb[173].mxu0  ;;  %v11693_v21 = vcombine.high %v6680_v63, %v6684_v32  ;;  %v19072_v12 = vld [vmem:[#allocation143_spill] sm:$0xff] }
 0x66e   :  { %v5611_v52 = vpop.f32.mrb[174].mxu0 }
 0x66f   :  { %v6154_v42 = vadd.f32 %v12286_v0, %v19067_v5  ;;  %v12287_v39 = vadd.f32 %v5611_v52, %v19068_v37  ;;  %v5613_v59 = vpop.f32.mrb[175].mxu0  ;;  %v6688_v52 = vld [vmem:[%s18798_s3 + $0x780] sm:$0xff]  ;;  %v11692_v37 = vcombine.low %v6680_v63, %v6684_v32 }
 0x670   :  { %v6700_v63 = vld [vmem:[%s18798_s3 + $0x7e0] sm:$0xff] }
 0x671   :  { %v6157_v60 = vadd.f32 %v12287_v39, %v19069_v46  ;;  %v6406_v15 = vmax.f32 %v6154_v42, 0.0  ;;  %v19074_v39 = vld [vmem:[#allocation146_spill] sm:$0xff] }
 0x672   :  { %8681 = vmatmul.mubr.bf16.gmra.mrb[236].mxu1 %v11676_v38 }
 0x673   :  { %v6407_v49 = vmax.f32 %v6157_v60, 0.0  ;;  %8688 = vmatprep.mubr.bf16.mxu1 %v11685_v1  ;;  %v19075_v1 = vld [vmem:[#allocation72_spill] sm:$0xff] }
 0x674   :  { %v5616_v26 = vpop.f32.mrb[176].mxu0 }
 0x675   :  { %v17524_v25 = vpack.c.bf16 %v6407_v49, %v6406_v15  ;;  %v12288_v30 = vadd.f32 %v5616_v26, %v19070_v48  ;;  %v5618_v17 = vpop.f32.mrb[177].mxu0  ;;  %v11701_v15 = vcombine.high %v6688_v52, %v6692_v31  ;;  %v19076_v49 = vld [vmem:[#allocation11_spill] sm:$0xff] }
 0x676   :  { %v5619_v41 = vpop.f32.mrb[178].mxu0 }
 0x677   :  { %v6162_v29 = vadd.f32 %v12288_v30, %v17015_v36  ;;  %v12289_v54 = vadd.f32 %v5619_v41, %v19071_v9  ;;  %v5621_v55 = vpop.f32.mrb[179].mxu0  ;;  %v6696_v41 = vld [vmem:[%s18798_s3 + $0x7c0] sm:$0xff] }
 0x678   :  { %v11700_v55 = vcombine.low %v6688_v52, %v6692_v31  ;;  %v6453_v52 = vld [vmem:[%s18798_s3 + $0x28] sm:$0xff] }
 0x679   :  { %v6165_v57 = vadd.f32 %v12289_v54, %v19072_v12  ;;  %v6408_v2 = vmax.f32 %v6162_v29, 0.0  ;;  %v19078_v12 = vld [vmem:[#allocation74_spill] sm:$0xff]  ;;  %v19079_v31 = vld [vmem:[#allocation75_spill] sm:$0xff] }
 0x67a   :  { %8689 = vmatmul.mubr.bf16.gmra.mrb[240].mxu1 %v11684_v10  ;;  %v19077_v10 = vld [vmem:[#allocation73_spill] sm:$0xff] }
 0x67b   :  { %v6409_v0 = vmax.f32 %v6165_v57, 0.0  ;;  %8696 = vmatprep.mubr.bf16.mxu1 %v11693_v21 }
 0x67c   :  { %v5624_v35 = vpop.f32.mrb[180].mxu0 }
 0x67d   :  { %v17536_v36 = vpack.c.bf16 %v6409_v0, %v6408_v2  ;;  %v12290_v38 = vadd.f32 %v5624_v35, %v19073_v58  ;;  %v5626_v5 = vpop.f32.mrb[181].mxu0  ;;  %v11709_v0 = vcombine.high %v6696_v41, %v6700_v63 }
 0x67e   :  { %v5627_v42 = vpop.f32.mrb[182].mxu0 }
 0x67f   :  { %v6170_v59 = vadd.f32 %v12290_v38, %v19074_v39  ;;  %v12291_v46 = vadd.f32 %v5627_v42, %v19075_v1  ;;  %v5629_v60 = vpop.f32.mrb[183].mxu0  ;;  %v6449_v42 = vld [vmem:[%s18798_s3 + $0x8] sm:$0xff]  ;;  %v19080_v1 = vld [vmem:[#allocation12_spill] sm:$0xff] }
 0x680   :  { %v19081_v60 = vld [vmem:[#allocation76_spill] sm:$0xff] }
 0x681   :  { %v6173_v26 = vadd.f32 %v12291_v46, %v19076_v49  ;;  %v6410_v48 = vmax.f32 %v6170_v59, 0.0 }
 0x682   :  { %8697 = vmatmul.mubr.bf16.gmra.mrb[244].mxu1 %v11692_v37 }
 0x683   :  { %v6411_v30 = vmax.f32 %v6173_v26, 0.0  ;;  %8704 = vmatprep.mubr.bf16.mxu1 %v11701_v15  ;;  %v11463_v26 = vcombine.high %v6449_v42, %v6453_v52 }
 0x684   :  { %v5632_v17 = vpop.f32.mrb[184].mxu0 }
 0x685   :  { %v17548_v32 = vpack.c.bf16 %v6411_v30, %v6410_v48  ;;  %v12292_v29 = vadd.f32 %v5632_v17, %v19077_v10  ;;  %v5634_v9 = vpop.f32.mrb[185].mxu0  ;;  %v19082_v48 = vld [vmem:[#allocation145_spill] sm:$0xff] }
 0x686   :  { %v5635_v54 = vpop.f32.mrb[186].mxu0  ;;  %v6457_v9 = vld [vmem:[%s18798_s3 + $0x48] sm:$0xff] }
 0x687   :  { %v6178_v21 = vadd.f32 %v12292_v29, %v17040_v16  ;;  %v12293_v57 = vadd.f32 %v5635_v54, %v19078_v12  ;;  %v5637_v2 = vpop.f32.mrb[187].mxu0  ;;  %v19083_v54 = vld [vmem:[#allocation77_spill] sm:$0xff] }
 0x689   :  { %v6181_v35 = vadd.f32 %v12293_v57, %v17054_v53  ;;  %v6412_v58 = vmax.f32 %v6178_v21, 0.0  ;;  %v11708_v53 = vcombine.low %v6696_v41, %v6700_v63  ;;  %v6461_v41 = vld [vmem:[%s18798_s3 + $0x68] sm:$0xff]  ;;  %v11462_v57 = vcombine.low %v6449_v42, %v6453_v52 }
 0x68a   :  { %8705 = vmatmul.mubr.bf16.gmra.mrb[248].mxu1 %v11700_v55  ;;  %v6465_v42 = vld [vmem:[%s18798_s3 + $0x88] sm:$0xff] }
 0x68b   :  { %v6413_v38 = vmax.f32 %v6181_v35, 0.0  ;;  %8712 = vmatprep.mubr.bf16.mxu1 %v11709_v0  ;;  %v19084_v0 = vld [vmem:[#allocation78_spill] sm:$0xff] }
 0x68c   :  { %v5640_v5 = vpop.f32.mrb[188].mxu0 }
 0x68d   :  { %v17560_v16 = vpack.c.bf16 %v6413_v38, %v6412_v58  ;;  %v12294_v37 = vadd.f32 %v5640_v5, %v19079_v31  ;;  %v5642_v39 = vpop.f32.mrb[189].mxu0  ;;  %v11471_v38 = vcombine.high %v6457_v9, %v6461_v41 }
 0x68e   :  { %v5643_v59 = vpop.f32.mrb[190].mxu0 }
 0x68f   :  { %v6186_v46 = vadd.f32 %v12294_v37, %v19080_v1  ;;  %v12295_v15 = vadd.f32 %v5643_v59, %v19081_v60  ;;  %v5645_v49 = vpop.f32.mrb[191].mxu0 }
 0x691   :  { %v6189_v30 = vadd.f32 %v12295_v15, %v19082_v48  ;;  %v6414_v17 = vmax.f32 %v6186_v46, 0.0  ;;  %v11470_v46 = vcombine.low %v6457_v9, %v6461_v41  ;;  %v19087_v15 = vld [vmem:[#allocation80_spill] sm:$0xff]  ;;  %v6473_v9 = vld [vmem:[%s18798_s3 + $0xc8] sm:$0xff] }
 0x692   :  { %8713 = vmatmul.mubr.bf16.gmra.mrb[252].mxu1 %v11708_v53 }
 0x693   :  { %v6415_v10 = vmax.f32 %v6189_v30, 0.0  ;;  %8753 = vmatprep.mubr.bf16.mxu1 %v11463_v26  ;;  %v19088_v30 = vld [vmem:[#allocation14_spill] sm:$0xff] }
 0x694   :  { %v5648_v29 = vpop.f32.mrb[192].mxu0 }
 0x695   :  { %v17572_v63 = vpack.c.bf16 %v6415_v10, %v6414_v17  ;;  %v12296_v55 = vadd.f32 %v5648_v29, %v19083_v54  ;;  %v5650_v21 = vpop.f32.mrb[193].mxu0 }
 0x696   :  { %v5651_v12 = vpop.f32.mrb[194].mxu0 }
 0x697   :  { %v6194_v2 = vadd.f32 %v12296_v55, %v17065_v47  ;;  %v12297_v35 = vadd.f32 %v5651_v12, %v19084_v0  ;;  %v5653_v58 = vpop.f32.mrb[195].mxu0  ;;  %v6469_v47 = vld [vmem:[%s18798_s3 + $0xa8] sm:$0xff]  ;;  %v19089_v55 = vld [vmem:[#allocation81_spill] sm:$0xff] }
 0x698   :  { %v11479_v48 = vcombine.high %v6465_v42, %v6469_v47  ;;  %v19090_v0 = vld [vmem:[#allocation82_spill] sm:$0xff] }
 0x699   :  { %v6197_v5 = vadd.f32 %v12297_v35, %v17079_v45  ;;  %v6416_v31 = vmax.f32 %v6194_v2, 0.0  ;;  %v19085_v45 = vld [vmem:[#allocation79_spill] sm:$0xff]  ;;  %v11478_v2 = vcombine.low %v6465_v42, %v6469_v47 }
 0x69a   :  { %8754 = vmatmul.mubr.bf16.vlgmr.msra.gmra.mrb[128].mxu1 %v11462_v57 }
 0x69b   :  { %v6417_v37 = vmax.f32 %v6197_v5, 0.0  ;;  %9011 = vmatpush1.bf16.msra.mxu1 %v17371_v50  ;;  %8761 = vmatprep.mubr.bf16.mxu1 %v11471_v38  ;;  %v19086_v50 = vld [vmem:[#allocation13_spill] sm:$0xff] }
 0x69c   :  { %v5656_v39 = vpop.f32.mrb[196].mxu0  ;;  %9012 = vmatprep.subr.bf16.mxu1 %v18839_v6 }
 0x69d   :  { %v17586_v52 = vpack.c.bf16 %v6417_v37, %v6416_v31  ;;  %v12298_v59 = vadd.f32 %v5656_v39, %v19085_v45  ;;  %v5658_v53 = vpop.f32.mrb[197].mxu0 }
 0x69e   :  { %v5659_v1 = vpop.f32.mrb[198].mxu0 }
 0x69f   :  { %v6202_v60 = vadd.f32 %v12298_v59, %v19086_v50  ;;  %v12299_v49 = vadd.f32 %v5659_v1, %v19087_v15  ;;  %9013 = vmatpush1.bf16.msra.mxu1 %v17389_v3  ;;  %v5661_v26 = vpop.f32.mrb[199].mxu0  ;;  %v6477_v3 = vld [vmem:[%s18798_s3 + $0xe8] sm:$0xff] }
 0x6a0   :  { %9014 = vmatprep.subr.bf16.mxu1 %v18839_v6  ;;  %v11487_v38 = vcombine.high %v6473_v9, %v6477_v3  ;;  %v11486_v53 = vcombine.low %v6473_v9, %v6477_v3 }
 0x6a1   :  { %v6205_v17 = vadd.f32 %v12299_v49, %v19088_v30  ;;  %v6418_v10 = vmax.f32 %v6202_v60, 0.0  ;;  %v19094_v49 = vld [vmem:[#allocation150_spill] sm:$0xff] }
 0x6a2   :  { %8762 = vmatmul.mubr.bf16.gmra.mrb[132].mxu1 %v11470_v46  ;;  %v19093_v46 = vld [vmem:[#allocation84_spill] sm:$0xff] }
 0x6a3   :  { %v6419_v29 = vmax.f32 %v6205_v17, 0.0  ;;  %9015 = vmatpush1.bf16.msra.mxu1 %v17407_v56  ;;  %8769 = vmatprep.mubr.bf16.mxu1 %v11479_v48 }
 0x6a4   :  { %v5664_v54 = vpop.f32.mrb[200].mxu0  ;;  %9016 = vmatprep.subr.bf16.mxu1 %v18839_v6 }
 0x6a5   :  { %v17602_v41 = vpack.c.bf16 %v6419_v29, %v6418_v10  ;;  %v12300_v21 = vadd.f32 %v5664_v54, %v19089_v55  ;;  %v5666_v12 = vpop.f32.mrb[201].mxu0  ;;  %v6489_v10 = vld [vmem:[%s18798_s3 + $0x148] sm:$0xff]  ;;  %v19095_v54 = vld [vmem:[#allocation85_spill] sm:$0xff] }
 0x6a6   :  { %v5667_v57 = vpop.f32.mrb[202].mxu0  ;;  %v19096_v12 = vld [vmem:[#allocation86_spill] sm:$0xff] }
 0x6a7   :  { %v6210_v56 = vadd.f32 %v12300_v21, %v17090_v4  ;;  %v12301_v35 = vadd.f32 %v5667_v57, %v19090_v0  ;;  %9017 = vmatpush1.bf16.msra.mxu1 %v17425_v51  ;;  %v5669_v58 = vpop.f32.mrb[203].mxu0  ;;  %v6481_v4 = vld [vmem:[%s18798_s3 + $0x108] sm:$0xff] }
 0x6a8   :  { %9018 = vmatprep.subr.bf16.mxu1 %v18839_v6  ;;  %v6485_v51 = vld [vmem:[%s18798_s3 + $0x128] sm:$0xff] }
 0x6a9   :  { %v6213_v5 = vadd.f32 %v12301_v35, %v17104_v43  ;;  %v6420_v31 = vmax.f32 %v6210_v56, 0.0  ;;  %v19091_v43 = vld [vmem:[#allocation83_spill] sm:$0xff]  ;;  %v11495_v15 = vcombine.high %v6481_v4, %v6485_v51  ;;  %v11494_v21 = vcombine.low %v6481_v4, %v6485_v51 }
 0x6aa   :  { %8770 = vmatmul.mubr.bf16.gmra.mrb[136].mxu1 %v11478_v2 }
 0x6ab   :  { %v6421_v37 = vmax.f32 %v6213_v5, 0.0  ;;  %9019 = vmatpush1.bf16.msra.mxu1 %v17440_v34  ;;  %8777 = vmatprep.mubr.bf16.mxu1 %v11487_v38  ;;  %v19092_v34 = vld [vmem:[#allocation148_spill] sm:$0xff] }
 0x6ac   :  { %v5672_v39 = vpop.f32.mrb[204].mxu0  ;;  %9020 = vmatprep.subr.bf16.mxu1 %v18839_v6 }
 0x6ad   :  { %v17618_v42 = vpack.c.bf16 %v6421_v37, %v6420_v31  ;;  %v12302_v47 = vadd.f32 %v5672_v39, %v19091_v43  ;;  %v5674_v45 = vpop.f32.mrb[205].mxu0  ;;  %v19099_v43 = vld [vmem:[#allocation88_spill] sm:$0xff] }
 0x6ae   :  { %v5675_v59 = vpop.f32.mrb[206].mxu0 }
 0x6af   :  { %v6218_v1 = vadd.f32 %v12302_v47, %v19092_v34  ;;  %v12303_v50 = vadd.f32 %v5675_v59, %v19093_v46  ;;  %9021 = vmatpush1.bf16.msra.mxu1 %v17452_v7  ;;  %v5677_v60 = vpop.f32.mrb[207].mxu0  ;;  %v6493_v7 = vld [vmem:[%s18798_s3 + $0x168] sm:$0xff] }
 0x6b0   :  { %9022 = vmatprep.subr.bf16.mxu1 %v18839_v6  ;;  %v11503_v56 = vcombine.high %v6489_v10, %v6493_v7  ;;  %v11502_v4 = vcombine.low %v6489_v10, %v6493_v7  ;;  %v6505_v60 = vld [vmem:[%s18798_s3 + $0x1c8] sm:$0xff] }
 0x6b1   :  { %v6221_v26 = vadd.f32 %v12303_v50, %v19094_v49  ;;  %v6422_v48 = vmax.f32 %v6218_v1, 0.0  ;;  %v19101_v49 = vld [vmem:[#allocation89_spill] sm:$0xff]  ;;  %v19102_v10 = vld [vmem:[#allocation90_spill] sm:$0xff] }
 0x6b2   :  { %8778 = vmatmul.mubr.bf16.gmra.mrb[140].mxu1 %v11486_v53  ;;  %v19100_v53 = vld [vmem:[#allocation147_spill] sm:$0xff] }
 0x6b3   :  { %v6423_v30 = vmax.f32 %v6221_v26, 0.0  ;;  %9023 = vmatpush1.bf16.msra.mxu1 %v17464_v8  ;;  %8785 = vmatprep.mubr.bf16.mxu1 %v11495_v15 }
 0x6b4   :  { %v5680_v17 = vpop.f32.mrb[208].mxu0  ;;  %9024 = vmatprep.subr.bf16.mxu1 %v18839_v6 }
 0x6b5   :  { %v17634_v29 = vpack.c.bf16 %v6423_v30, %v6422_v48  ;;  %v12304_v9 = vadd.f32 %v5680_v17, %v19095_v54  ;;  %v5682_v3 = vpop.f32.mrb[209].mxu0 }
 0x6b6   :  { %v5683_v55 = vpop.f32.mrb[210].mxu0 }
 0x6b7   :  { %v6226_v8 = vadd.f32 %v12304_v9, %v17115_v14  ;;  %v12305_v57 = vadd.f32 %v5683_v55, %v19096_v12  ;;  %9025 = vmatpush1.bf16.msra.mxu1 %v17476_v28  ;;  %v5685_v2 = vpop.f32.mrb[211].mxu0  ;;  %v6497_v14 = vld [vmem:[%s18798_s3 + $0x188] sm:$0xff] }
 0x6b8   :  { %9026 = vmatprep.subr.bf16.mxu1 %v18839_v6  ;;  %v6501_v28 = vld [vmem:[%s18798_s3 + $0x1a8] sm:$0xff] }
 0x6b9   :  { %v6229_v0 = vadd.f32 %v12305_v57, %v17129_v18  ;;  %v6424_v35 = vmax.f32 %v6226_v8, 0.0  ;;  %v19097_v18 = vld [vmem:[#allocation87_spill] sm:$0xff]  ;;  %v11511_v59 = vcombine.high %v6497_v14, %v6501_v28  ;;  %v11510_v17 = vcombine.low %v6497_v14, %v6501_v28 }
 0x6ba   :  { %8786 = vmatmul.mubr.bf16.gmra.mrb[144].mxu1 %v11494_v21 }
 0x6bb   :  { %v6425_v58 = vmax.f32 %v6229_v0, 0.0  ;;  %9027 = vmatpush1.bf16.msra.mxu1 %v17488_v13  ;;  %8793 = vmatprep.mubr.bf16.mxu1 %v11503_v56  ;;  %v19098_v13 = vld [vmem:[#allocation15_spill] sm:$0xff] }
 0x6bc   :  { %v5688_v38 = vpop.f32.mrb[212].mxu0  ;;  %9028 = vmatprep.subr.bf16.mxu1 %v18839_v6 }
 0x6bd   :  { %v17650_v5 = vpack.c.bf16 %v6425_v58, %v6424_v35  ;;  %v12306_v31 = vadd.f32 %v5688_v38, %v19097_v18  ;;  %v5690_v37 = vpop.f32.mrb[213].mxu0  ;;  %v19105_v58 = vld [vmem:[#allocation92_spill] sm:$0xff]  ;;  %v19106_v18 = vld [vmem:[#allocation149_spill] sm:$0xff] }
 0x6be   :  { %v5691_v39 = vpop.f32.mrb[214].mxu0 }
 0x6bf   :  { %v6234_v51 = vadd.f32 %v12306_v31, %v19098_v13  ;;  %v12307_v47 = vadd.f32 %v5691_v39, %v19099_v43  ;;  %9029 = vmatpush1.bf16.msra.mxu1 %v17500_v19  ;;  %v5693_v45 = vpop.f32.mrb[215].mxu0  ;;  %v6509_v19 = vld [vmem:[%s18798_s3 + $0x1e8] sm:$0xff]  ;;  %v19107_v43 = vld [vmem:[#allocation93_spill] sm:$0xff] }
 0x6c0   :  { %9030 = vmatprep.subr.bf16.mxu1 %v18839_v6  ;;  %v11519_v9 = vcombine.high %v6505_v60, %v6509_v19  ;;  %v11518_v0 = vcombine.low %v6505_v60, %v6509_v19  ;;  %v6521_v13 = vld [vmem:[%s18798_s3 + $0x248] sm:$0xff] }
 0x6c1   :  { %v6237_v34 = vadd.f32 %v12307_v47, %v19100_v53  ;;  %v6426_v1 = vmax.f32 %v6234_v51, 0.0 }
 0x6c2   :  { %8794 = vmatmul.mubr.bf16.gmra.mrb[148].mxu1 %v11502_v4 }
 0x6c3   :  { %v6427_v46 = vmax.f32 %v6237_v34, 0.0  ;;  %9031 = vmatpush1.bf16.msra.mxu1 %v17512_v44  ;;  %8801 = vmatprep.mubr.bf16.mxu1 %v11511_v59  ;;  %v19108_v34 = vld [vmem:[#allocation94_spill] sm:$0xff] }
 0x6c4   :  { %v5696_v50 = vpop.f32.mrb[216].mxu0  ;;  %9032 = vmatprep.subr.bf16.mxu1 %v18839_v6 }
 0x6c5   :  { %v17666_v15 = vpack.c.bf16 %v6427_v46, %v6426_v1  ;;  %v12308_v26 = vadd.f32 %v5696_v50, %v19101_v49  ;;  %v5698_v48 = vpop.f32.mrb[217].mxu0 }
 0x6c6   :  { %v5699_v30 = vpop.f32.mrb[218].mxu0  ;;  %v6529_v48 = vld [vmem:[%s18798_s3 + $0x288] sm:$0xff] }
 0x6c7   :  { %v6242_v44 = vadd.f32 %v12308_v26, %v17140_v20  ;;  %v12309_v7 = vadd.f32 %v5699_v30, %v19102_v10  ;;  %9033 = vmatpush1.bf16.msra.mxu1 %v17524_v25  ;;  %v5701_v54 = vpop.f32.mrb[219].mxu0  ;;  %v6513_v20 = vld [vmem:[%s18798_s3 + $0x208] sm:$0xff] }
 0x6c8   :  { %9034 = vmatprep.subr.bf16.mxu1 %v18839_v6  ;;  %v6517_v25 = vld [vmem:[%s18798_s3 + $0x228] sm:$0xff] }
 0x6c9   :  { %v6245_v3 = vadd.f32 %v12309_v7, %v17154_v27  ;;  %v6428_v55 = vmax.f32 %v6242_v44, 0.0  ;;  %v19103_v27 = vld [vmem:[#allocation91_spill] sm:$0xff]  ;;  %v11527_v28 = vcombine.high %v6513_v20, %v6517_v25  ;;  %v11526_v53 = vcombine.low %v6513_v20, %v6517_v25  ;;  %v19110_v7 = vld [vmem:[#allocation17_spill] sm:$0xff] }
 0x6ca   :  { %8802 = vmatmul.mubr.bf16.gmra.mrb[152].mxu1 %v11510_v17  ;;  %v19109_v30 = vld [vmem:[#allocation95_spill] sm:$0xff] }
 0x6cb   :  { %v6429_v21 = vmax.f32 %v6245_v3, 0.0  ;;  %9035 = vmatpush1.bf16.msra.mxu1 %v17536_v36  ;;  %8809 = vmatprep.mubr.bf16.mxu1 %v11519_v9  ;;  %v19104_v36 = vld [vmem:[#allocation16_spill] sm:$0xff] }
 0x6cc   :  { %v5704_v8 = vpop.f32.mrb[220].mxu0  ;;  %9036 = vmatprep.subr.bf16.mxu1 %v18839_v6  ;;  %v19111_v9 = vld [vmem:[#allocation96_spill] sm:$0xff] }
 0x6cd   :  { %v17682_v12 = vpack.c.bf16 %v6429_v21, %v6428_v55  ;;  %v12310_v57 = vadd.f32 %v5704_v8, %v19103_v27  ;;  %v5706_v2 = vpop.f32.mrb[221].mxu0  ;;  %v19112_v8 = vld [vmem:[#allocation18_spill] sm:$0xff] }
 0x6ce   :  { %v5707_v56 = vpop.f32.mrb[222].mxu0  ;;  %v6537_v2 = vld [vmem:[%s18798_s3 + $0x2c8] sm:$0xff] }
 0x6cf   :  { %v6250_v35 = vadd.f32 %v12310_v57, %v19104_v36  ;;  %v12311_v38 = vadd.f32 %v5707_v56, %v19105_v58  ;;  %9037 = vmatpush1.bf16.msra.mxu1 %v17548_v32  ;;  %v5709_v14 = vpop.f32.mrb[223].mxu0  ;;  %v6525_v32 = vld [vmem:[%s18798_s3 + $0x268] sm:$0xff]  ;;  %v19113_v36 = vld [vmem:[#allocation97_spill] sm:$0xff] }
 0x6d0   :  { %9038 = vmatprep.subr.bf16.mxu1 %v18839_v6  ;;  %v11535_v50 = vcombine.high %v6521_v13, %v6525_v32  ;;  %v6541_v56 = vld [vmem:[%s18798_s3 + $0x2e8] sm:$0xff] }
 0x6d1   :  { %v6253_v31 = vadd.f32 %v12311_v38, %v19106_v18  ;;  %v6430_v37 = vmax.f32 %v6250_v35, 0.0  ;;  %v19114_v18 = vld [vmem:[#allocation98_spill] sm:$0xff] }
 0x6d2   :  { %8810 = vmatmul.mubr.bf16.gmra.mrb[156].mxu1 %v11518_v0 }
 0x6d3   :  { %v6431_v39 = vmax.f32 %v6253_v31, 0.0  ;;  %9039 = vmatpush1.bf16.msra.mxu1 %v17560_v16  ;;  %8817 = vmatprep.mubr.bf16.mxu1 %v11527_v28 }
 0x6d4   :  { %v5712_v4 = vpop.f32.mrb[224].mxu0  ;;  %9040 = vmatprep.subr.bf16.mxu1 %v18839_v6 }
 0x6d5   :  { %v17698_v51 = vpack.c.bf16 %v6431_v39, %v6430_v37  ;;  %v12312_v47 = vadd.f32 %v5712_v4, %v19107_v43  ;;  %v5714_v45 = vpop.f32.mrb[225].mxu0  ;;  %v11551_v39 = vcombine.high %v6537_v2, %v6541_v56 }
 0x6d6   :  { %v5715_v59 = vpop.f32.mrb[226].mxu0  ;;  %v6549_v45 = vld [vmem:[%s18798_s3 + $0x328] sm:$0xff] }
 0x6d7   :  { %v6258_v16 = vadd.f32 %v12312_v47, %v17165_v61  ;;  %v12313_v1 = vadd.f32 %v5715_v59, %v19108_v34  ;;  %9041 = vmatpush1.bf16.msra.mxu1 %v17572_v63  ;;  %v5717_v46 = vpop.f32.mrb[227].mxu0  ;;  %v6533_v61 = vld [vmem:[%s18798_s3 + $0x2a8] sm:$0xff] }
 0x6d8   :  { %9299 = vmatprep.subr.bf16.mxu1 %v18839_v6  ;;  %v11543_v21 = vcombine.high %v6529_v48, %v6533_v61  ;;  %v11542_v14 = vcombine.low %v6529_v48, %v6533_v61  ;;  %v6545_v47 = vld [vmem:[%s18798_s3 + $0x308] sm:$0xff] }
 0x6d9   :  { %v6261_v60 = vadd.f32 %v12313_v1, %v17179_v24  ;;  %v6432_v19 = vmax.f32 %v6258_v16, 0.0  ;;  %v11534_v24 = vcombine.low %v6521_v13, %v6525_v32  ;;  %v19115_v59 = vld [vmem:[#allocation99_spill] sm:$0xff] }
 0x6da   :  { %8818 = vmatmul.mubr.bf16.gmra.mrb[160].mxu1 %v11526_v53  ;;  %v19116_v1 = vld [vmem:[#allocation19_spill] sm:$0xff] }
 0x6db   :  { %v6433_v49 = vmax.f32 %v6261_v60, 0.0  ;;  %8825 = vmatprep.mubr.bf16.mxu1 %v11535_v50  ;;  %v19117_v50 = vld [vmem:[#allocation100_spill] sm:$0xff] }
 0x6dc   :  { %v5720_v26 = vpop.f32.mrb[228].mxu0 }
 0x6dd   :  { %v17712_v63 = vpack.c.bf16 %v6433_v49, %v6432_v19  ;;  %v12314_v17 = vadd.f32 %v5720_v26, %v19109_v30  ;;  %v5722_v44 = vpop.f32.mrb[229].mxu0  ;;  %v11559_v49 = vcombine.high %v6545_v47, %v6549_v45  ;;  %v19118_v26 = vld [vmem:[#allocation20_spill] sm:$0xff] }
 0x6de   :  { %v5723_v10 = vpop.f32.mrb[230].mxu0  ;;  %v6553_v44 = vld [vmem:[%s18798_s3 + $0x348] sm:$0xff] }
 0x6df   :  { %v6266_v54 = vadd.f32 %v12314_v17, %v19110_v7  ;;  %v12315_v3 = vadd.f32 %v5723_v10, %v19111_v9  ;;  %v5725_v55 = vpop.f32.mrb[231].mxu0  ;;  %v6557_v10 = vld [vmem:[%s18798_s3 + $0x368] sm:$0xff]  ;;  %v19119_v7 = vld [vmem:[#allocation101_spill] sm:$0xff] }
 0x6e0   :  { %v11558_v55 = vcombine.low %v6545_v47, %v6549_v45 }
 0x6e1   :  { %v6269_v20 = vadd.f32 %v12315_v3, %v19112_v8  ;;  %v6434_v25 = vmax.f32 %v6266_v54, 0.0  ;;  %v19120_v8 = vld [vmem:[#allocation102_spill] sm:$0xff] }
 0x6e2   :  { %8826 = vmatmul.mubr.bf16.gmra.mrb[164].mxu1 %v11534_v24 }
 0x6e3   :  { %v6435_v27 = vmax.f32 %v6269_v20, 0.0  ;;  %8833 = vmatprep.mubr.bf16.mxu1 %v11543_v21 }
 0x6e4   :  { %v5728_v57 = vpop.f32.mrb[232].mxu0 }
 0x6e5   :  { %v17724_v0 = vpack.c.bf16 %v6435_v27, %v6434_v25  ;;  %v12316_v35 = vadd.f32 %v5728_v57, %v19113_v36  ;;  %v5730_v58 = vpop.f32.mrb[233].mxu0  ;;  %v11567_v27 = vcombine.high %v6553_v44, %v6557_v10 }
 0x6e6   :  { %v5731_v38 = vpop.f32.mrb[234].mxu0  ;;  %v6565_v58 = vld [vmem:[%s18798_s3 + $0x3a8] sm:$0xff] }
 0x6e7   :  { %v6274_v28 = vadd.f32 %v12316_v35, %v17190_v23  ;;  %v12317_v31 = vadd.f32 %v5731_v38, %v19114_v18  ;;  %v5733_v37 = vpop.f32.mrb[235].mxu0  ;;  %v6561_v35 = vld [vmem:[%s18798_s3 + $0x388] sm:$0xff] }
 0x6e8   :  { %v19121_v38 = vld [vmem:[#allocation103_spill] sm:$0xff] }
 0x6e9   :  { %v6277_v4 = vadd.f32 %v12317_v31, %v17204_v62  ;;  %v6436_v13 = vmax.f32 %v6274_v28, 0.0  ;;  %v11550_v62 = vcombine.low %v6537_v2, %v6541_v56  ;;  %v19122_v31 = vld [vmem:[#allocation21_spill] sm:$0xff] }
 0x6ea   :  { %8834 = vmatmul.mubr.bf16.gmra.mrb[168].mxu1 %v11542_v14 }
 0x6eb   :  { %v6437_v32 = vmax.f32 %v6277_v4, 0.0  ;;  %8841 = vmatprep.mubr.bf16.mxu1 %v11551_v39  ;;  %v19123_v39 = vld [vmem:[#allocation104_spill] sm:$0xff] }
 0x6ec   :  { %v5736_v43 = vpop.f32.mrb[236].mxu0 }
 0x6ed   :  { %v17736_v23 = vpack.c.bf16 %v6437_v32, %v6436_v13  ;;  %v12318_v53 = vadd.f32 %v5736_v43, %v19115_v59  ;;  %v5738_v16 = vpop.f32.mrb[237].mxu0  ;;  %v11575_v32 = vcombine.high %v6561_v35, %v6565_v58  ;;  %v19124_v43 = vld [vmem:[#allocation22_spill] sm:$0xff] }
 0x6ee   :  { %v5739_v34 = vpop.f32.mrb[238].mxu0  ;;  %v6569_v16 = vld [vmem:[%s18798_s3 + $0x3c8] sm:$0xff] }
 0x6ef   :  { %v6282_v46 = vadd.f32 %v12318_v53, %v19116_v1  ;;  %v12319_v60 = vadd.f32 %v5739_v34, %v19117_v50  ;;  %v5741_v19 = vpop.f32.mrb[239].mxu0  ;;  %v6573_v34 = vld [vmem:[%s18798_s3 + $0x3e8] sm:$0xff]  ;;  %v19125_v1 = vld [vmem:[#allocation105_spill] sm:$0xff] }
 0x6f0   :  { %v11574_v19 = vcombine.low %v6561_v35, %v6565_v58 }
 0x6f1   :  { %v6285_v48 = vadd.f32 %v12319_v60, %v19118_v26  ;;  %v6438_v61 = vmax.f32 %v6282_v46, 0.0  ;;  %v19126_v26 = vld [vmem:[#allocation106_spill] sm:$0xff] }
 0x6f2   :  { %8842 = vmatmul.mubr.bf16.gmra.mrb[172].mxu1 %v11550_v62 }
 0x6f3   :  { %v6439_v30 = vmax.f32 %v6285_v48, 0.0  ;;  %8849 = vmatprep.mubr.bf16.mxu1 %v11559_v49 }
 0x6f4   :  { %v5744_v17 = vpop.f32.mrb[240].mxu0 }
 0x6f5   :  { %v17748_v24 = vpack.c.bf16 %v6439_v30, %v6438_v61  ;;  %v12320_v54 = vadd.f32 %v5744_v17, %v19119_v7  ;;  %v5746_v9 = vpop.f32.mrb[241].mxu0  ;;  %v11583_v30 = vcombine.high %v6569_v16, %v6573_v34 }
 0x6f6   :  { %v5747_v3 = vpop.f32.mrb[242].mxu0  ;;  %v6581_v9 = vld [vmem:[%s18798_s3 + $0x428] sm:$0xff] }
 0x6f7   :  { %v6290_v21 = vadd.f32 %v12320_v54, %v17215_v11  ;;  %v12321_v20 = vadd.f32 %v5747_v3, %v19120_v8  ;;  %v5749_v25 = vpop.f32.mrb[243].mxu0  ;;  %v6577_v54 = vld [vmem:[%s18798_s3 + $0x408] sm:$0xff] }
 0x6f8   :  { %v19127_v3 = vld [vmem:[#allocation107_spill] sm:$0xff] }
 0x6f9   :  { %v6293_v57 = vadd.f32 %v12321_v20, %v17229_v40  ;;  %v6440_v2 = vmax.f32 %v6290_v21, 0.0  ;;  %v11566_v40 = vcombine.low %v6553_v44, %v6557_v10  ;;  %v19128_v20 = vld [vmem:[#allocation23_spill] sm:$0xff] }
 0x6fa   :  { %8850 = vmatmul.mubr.bf16.gmra.mrb[176].mxu1 %v11558_v55 }
 0x6fb   :  { %v6441_v56 = vmax.f32 %v6293_v57, 0.0  ;;  %8857 = vmatprep.mubr.bf16.mxu1 %v11567_v27  ;;  %v19129_v27 = vld [vmem:[#allocation108_spill] sm:$0xff] }
 0x6fc   :  { %v5752_v36 = vpop.f32.mrb[244].mxu0 }
 0x6fd   :  { %v17760_v11 = vpack.c.bf16 %v6441_v56, %v6440_v2  ;;  %v12322_v14 = vadd.f32 %v5752_v36, %v19121_v38  ;;  %v5754_v28 = vpop.f32.mrb[245].mxu0  ;;  %v11591_v56 = vcombine.high %v6577_v54, %v6581_v9  ;;  %v19130_v36 = vld [vmem:[#allocation24_spill] sm:$0xff] }
 0x6fe   :  { %v5755_v18 = vpop.f32.mrb[246].mxu0  ;;  %v6589_v28 = vld [vmem:[%s18798_s3 + $0x468] sm:$0xff] }
 0x6ff   :  { %v6298_v37 = vadd.f32 %v12322_v14, %v19122_v31  ;;  %v12323_v4 = vadd.f32 %v5755_v18, %v19123_v39  ;;  %v5757_v13 = vpop.f32.mrb[247].mxu0  ;;  %v6585_v14 = vld [vmem:[%s18798_s3 + $0x448] sm:$0xff] }
 0x700   :  { %v11599_v31 = vcombine.high %v6585_v14, %v6589_v28  ;;  %v6597_v39 = vld [vmem:[%s18798_s3 + $0x4a8] sm:$0xff] }
 0x701   :  { %v6301_v47 = vadd.f32 %v12323_v4, %v19124_v43  ;;  %v6442_v45 = vmax.f32 %v6298_v37, 0.0  ;;  %v6593_v37 = vld [vmem:[%s18798_s3 + $0x488] sm:$0xff]  ;;  %v11598_v4 = vcombine.low %v6585_v14, %v6589_v28 }
 0x702   :  { %8858 = vmatmul.mubr.bf16.gmra.mrb[180].mxu1 %v11566_v40  ;;  %v11590_v40 = vcombine.low %v6577_v54, %v6581_v9  ;;  %v11607_v13 = vcombine.high %v6593_v37, %v6597_v39  ;;  %v6605_v43 = vld [vmem:[%s18798_s3 + $0x4e8] sm:$0xff] }
 0x703   :  { %v6443_v59 = vmax.f32 %v6301_v47, 0.0  ;;  %8865 = vmatprep.mubr.bf16.mxu1 %v11575_v32  ;;  %v6601_v32 = vld [vmem:[%s18798_s3 + $0x4c8] sm:$0xff]  ;;  %v11606_v47 = vcombine.low %v6593_v37, %v6597_v39 }
 0x704   :  { %v5760_v53 = vpop.f32.mrb[248].mxu0  ;;  %v6681_v28 = vld [vmem:[%s18798_s3 + $0x748] sm:$0xff] }
 0x705   :  { %v17772_v62 = vpack.c.bf16 %v6443_v59, %v6442_v45  ;;  %v12324_v46 = vadd.f32 %v5760_v53, %v19125_v1  ;;  %v5762_v50 = vpop.f32.mrb[249].mxu0  ;;  %v11615_v45 = vcombine.high %v6601_v32, %v6605_v43  ;;  %v6609_v59 = vld [vmem:[%s18798_s3 + $0x508] sm:$0xff] }
 0x706   :  { %v5763_v60 = vpop.f32.mrb[250].mxu0  ;;  %v6613_v53 = vld [vmem:[%s18798_s3 + $0x528] sm:$0xff] }
 0x707   :  { %v6306_v49 = vadd.f32 %v12324_v46, %v17240_v33  ;;  %v12325_v48 = vadd.f32 %v5763_v60, %v19126_v26  ;;  %v5765_v61 = vpop.f32.mrb[251].mxu0  ;;  %v6617_v1 = vld [vmem:[%s18798_s3 + $0x548] sm:$0xff]  ;;  %v11622_v50 = vcombine.low %v6609_v59, %v6613_v53 }
 0x708   :  { %v6621_v46 = vld [vmem:[%s18798_s3 + $0x568] sm:$0xff] }
 0x709   :  { %v6309_v17 = vadd.f32 %v12325_v48, %v17254_v22  ;;  %v6444_v44 = vmax.f32 %v6306_v49, 0.0  ;;  %v11582_v22 = vcombine.low %v6569_v16, %v6573_v34  ;;  %v11614_v16 = vcombine.low %v6601_v32, %v6605_v43  ;;  %v6629_v49 = vld [vmem:[%s18798_s3 + $0x5a8] sm:$0xff] }
 0x70a   :  { %8866 = vmatmul.mubr.bf16.gmra.mrb[184].mxu1 %v11574_v19  ;;  %v11623_v34 = vcombine.high %v6609_v59, %v6613_v53  ;;  %v11631_v60 = vcombine.high %v6617_v1, %v6621_v46  ;;  %v6625_v19 = vld [vmem:[%s18798_s3 + $0x588] sm:$0xff]  ;;  %v11630_v26 = vcombine.low %v6617_v1, %v6621_v46  ;;  %v6450_v53 = vld [vmem:[%s18798_s3 + $0x10] sm:$0xff] }
 0x70b   :  { %v6445_v10 = vmax.f32 %v6309_v17, 0.0  ;;  %8873 = vmatprep.mubr.bf16.mxu1 %v11583_v30  ;;  %v11639_v48 = vcombine.high %v6625_v19, %v6629_v49  ;;  %v6633_v61 = vld [vmem:[%s18798_s3 + $0x5c8] sm:$0xff]  ;;  %v11638_v17 = vcombine.low %v6625_v19, %v6629_v49  ;;  %v6458_v46 = vld [vmem:[%s18798_s3 + $0x50] sm:$0xff] }
 0x70c   :  { %v5768_v7 = vpop.f32.mrb[252].mxu0  ;;  %v6637_v30 = vld [vmem:[%s18798_s3 + $0x5e8] sm:$0xff]  ;;  %v6466_v49 = vld [vmem:[%s18798_s3 + $0x90] sm:$0xff] }
 0x70d   :  { %v17784_v33 = vpack.c.bf16 %v6445_v10, %v6444_v44  ;;  %v12326_v55 = vadd.f32 %v5768_v7, %v19127_v3  ;;  %v5770_v21 = vpop.f32.mrb[253].mxu0  ;;  %v11647_v44 = vcombine.high %v6633_v61, %v6637_v30  ;;  %v6641_v10 = vld [vmem:[%s18798_s3 + $0x608] sm:$0xff]  ;;  %v11646_v54 = vcombine.low %v6633_v61, %v6637_v30  ;;  %v6478_v30 = vld [vmem:[%s18798_s3 + $0xf0] sm:$0xff] }
 0x70e   :  { %v5771_v8 = vpop.f32.mrb[254].mxu0  ;;  %v6645_v7 = vld [vmem:[%s18798_s3 + $0x628] sm:$0xff] }
 0x70f   :  { %v6314_v25 = vadd.f32 %v12326_v55, %v19128_v20  ;;  %v12327_v57 = vadd.f32 %v5771_v8, %v19129_v27  ;;  %v5773_v2 = vpop.f32.mrb[255].mxu0  ;;  %v11655_v9 = vcombine.high %v6641_v10, %v6645_v7  ;;  %v6649_v3 = vld [vmem:[%s18798_s3 + $0x648] sm:$0xff]  ;;  %v11654_v21 = vcombine.low %v6641_v10, %v6645_v7  ;;  %v6494_v7 = vld [vmem:[%s18798_s3 + $0x170] sm:$0xff] }
 0x710   :  { %v6653_v55 = vld [vmem:[%s18798_s3 + $0x668] sm:$0xff] }
 0x711   :  { %v6317_v35 = vadd.f32 %v12327_v57, %v19130_v36  ;;  %v6446_v58 = vmax.f32 %v6314_v25, 0.0  ;;  %v11663_v8 = vcombine.high %v6649_v3, %v6653_v55  ;;  %v6661_v20 = vld [vmem:[%s18798_s3 + $0x6a8] sm:$0xff]  ;;  %v11662_v25 = vcombine.low %v6649_v3, %v6653_v55  ;;  %v6510_v55 = vld [vmem:[%s18798_s3 + $0x1f0] sm:$0xff] }
 0x712   :  { %8874 = vmatmul.mubr.bf16.gmra.mrb[188].mxu1 %v11582_v22  ;;  %v6657_v22 = vld [vmem:[%s18798_s3 + $0x688] sm:$0xff] }
 0x713   :  { %v6447_v38 = vmax.f32 %v6317_v35, 0.0  ;;  %8881 = vmatprep.mubr.bf16.mxu1 %v11591_v56  ;;  %v11671_v27 = vcombine.high %v6657_v22, %v6661_v20  ;;  %v6665_v57 = vld [vmem:[%s18798_s3 + $0x6c8] sm:$0xff]  ;;  %v11670_v56 = vcombine.low %v6657_v22, %v6661_v20  ;;  %v6526_v20 = vld [vmem:[%s18798_s3 + $0x270] sm:$0xff] }
 0x714   :  { %v6669_v2 = vld [vmem:[%s18798_s3 + $0x6e8] sm:$0xff] }
 0x715   :  { %v17796_v18 = vpack.c.bf16 %v6447_v38, %v6446_v58  ;;  %v11679_v36 = vcombine.high %v6665_v57, %v6669_v2  ;;  %v6673_v35 = vld [vmem:[%s18798_s3 + $0x708] sm:$0xff]  ;;  %v11678_v38 = vcombine.low %v6665_v57, %v6669_v2  ;;  %v6538_v2 = vld [vmem:[%s18798_s3 + $0x2d0] sm:$0xff] }
 0x716   :  { %v6677_v58 = vld [vmem:[%s18798_s3 + $0x728] sm:$0xff] }
 0x717   :  { %v11687_v14 = vcombine.high %v6673_v35, %v6677_v58  ;;  %v6689_v39 = vld [vmem:[%s18798_s3 + $0x788] sm:$0xff] }
 0x718   :  { %v6697_v43 = vld [vmem:[%s18798_s3 + $0x7c8] sm:$0xff] }
 0x71a   :  { %8882 = vmatmul.mubr.bf16.gmra.mrb[192].mxu1 %v11590_v40  ;;  %v6685_v40 = vld [vmem:[%s18798_s3 + $0x768] sm:$0xff] }
 0x71b   :  { %8889 = vmatprep.mubr.bf16.mxu1 %v11599_v31  ;;  %v11686_v31 = vcombine.low %v6673_v35, %v6677_v58  ;;  %v11695_v37 = vcombine.high %v6681_v28, %v6685_v40  ;;  %v6546_v35 = vld [vmem:[%s18798_s3 + $0x310] sm:$0xff] }
 0x71c   :  { %v6550_v58 = vld [vmem:[%s18798_s3 + $0x330] sm:$0xff] }
 0x722   :  { %8890 = vmatmul.mubr.bf16.gmra.mrb[196].mxu1 %v11598_v4  ;;  %v6693_v4 = vld [vmem:[%s18798_s3 + $0x7a8] sm:$0xff] }
 0x723   :  { %8897 = vmatprep.mubr.bf16.mxu1 %v11607_v13  ;;  %v11694_v13 = vcombine.low %v6681_v28, %v6685_v40  ;;  %v11703_v32 = vcombine.high %v6689_v39, %v6693_v4  ;;  %v6554_v28 = vld [vmem:[%s18798_s3 + $0x350] sm:$0xff] }
 0x724   :  { %v6558_v40 = vld [vmem:[%s18798_s3 + $0x370] sm:$0xff] }
 0x72a   :  { %8898 = vmatmul.mubr.bf16.gmra.mrb[200].mxu1 %v11606_v47  ;;  %v6701_v47 = vld [vmem:[%s18798_s3 + $0x7e8] sm:$0xff] }
 0x72b   :  { %8905 = vmatprep.mubr.bf16.mxu1 %v11615_v45  ;;  %v11702_v45 = vcombine.low %v6689_v39, %v6693_v4  ;;  %v11711_v59 = vcombine.high %v6697_v43, %v6701_v47  ;;  %v6562_v39 = vld [vmem:[%s18798_s3 + $0x390] sm:$0xff] }
 0x72c   :  { %v6566_v4 = vld [vmem:[%s18798_s3 + $0x3b0] sm:$0xff] }
 0x732   :  { %8906 = vmatmul.mubr.bf16.gmra.mrb[204].mxu1 %v11614_v16  ;;  %v6454_v16 = vld [vmem:[%s18798_s3 + $0x30] sm:$0xff] }
 0x733   :  { %8913 = vmatprep.mubr.bf16.mxu1 %v11623_v34  ;;  %v11710_v34 = vcombine.low %v6697_v43, %v6701_v47  ;;  %v11465_v1 = vcombine.high %v6450_v53, %v6454_v16  ;;  %v6570_v43 = vld [vmem:[%s18798_s3 + $0x3d0] sm:$0xff] }
 0x734   :  { %v6574_v47 = vld [vmem:[%s18798_s3 + $0x3f0] sm:$0xff] }
 0x73a   :  { %8914 = vmatmul.mubr.bf16.gmra.mrb[208].mxu1 %v11622_v50  ;;  %v6462_v50 = vld [vmem:[%s18798_s3 + $0x70] sm:$0xff] }
 0x73b   :  { %8921 = vmatprep.mubr.bf16.mxu1 %v11631_v60  ;;  %v11464_v60 = vcombine.low %v6450_v53, %v6454_v16  ;;  %v11473_v19 = vcombine.high %v6458_v46, %v6462_v50  ;;  %v6578_v53 = vld [vmem:[%s18798_s3 + $0x410] sm:$0xff] }
 0x73c   :  { %v6582_v16 = vld [vmem:[%s18798_s3 + $0x430] sm:$0xff] }
 0x742   :  { %8922 = vmatmul.mubr.bf16.gmra.mrb[212].mxu1 %v11630_v26  ;;  %v6470_v26 = vld [vmem:[%s18798_s3 + $0xb0] sm:$0xff] }
 0x743   :  { %8929 = vmatprep.mubr.bf16.mxu1 %v11639_v48  ;;  %v11472_v48 = vcombine.low %v6458_v46, %v6462_v50  ;;  %v11481_v61 = vcombine.high %v6466_v49, %v6470_v26  ;;  %v6586_v46 = vld [vmem:[%s18798_s3 + $0x450] sm:$0xff] }
 0x744   :  { %v6590_v50 = vld [vmem:[%s18798_s3 + $0x470] sm:$0xff] }
 0x74a   :  { %8930 = vmatmul.mubr.bf16.gmra.mrb[216].mxu1 %v11638_v17  ;;  %v11480_v17 = vcombine.low %v6466_v49, %v6470_v26  ;;  %v6594_v49 = vld [vmem:[%s18798_s3 + $0x490] sm:$0xff] }
 0x74b   :  { %8937 = vmatprep.mubr.bf16.mxu1 %v11647_v44  ;;  %v6486_v44 = vld [vmem:[%s18798_s3 + $0x130] sm:$0xff] }
 0x74c   :  { %v6598_v26 = vld [vmem:[%s18798_s3 + $0x4b0] sm:$0xff] }
 0x752   :  { %8938 = vmatmul.mubr.bf16.gmra.mrb[220].mxu1 %v11646_v54 }
 0x753   :  { %8945 = vmatprep.mubr.bf16.mxu1 %v11655_v9  ;;  %v6502_v9 = vld [vmem:[%s18798_s3 + $0x1b0] sm:$0xff] }
 0x75a   :  { %8946 = vmatmul.mubr.bf16.gmra.mrb[224].mxu1 %v11654_v21 }
 0x75b   :  { %8953 = vmatprep.mubr.bf16.mxu1 %v11663_v8  ;;  %v6518_v8 = vld [vmem:[%s18798_s3 + $0x230] sm:$0xff] }
 0x762   :  { %8954 = vmatmul.mubr.bf16.gmra.mrb[228].mxu1 %v11662_v25 }
 0x763   :  { %8961 = vmatprep.mubr.bf16.mxu1 %v11671_v27 }
 0x76a   :  { %8962 = vmatmul.mubr.bf16.gmra.mrb[232].mxu1 %v11670_v56 }
 0x76b   :  { %8969 = vmatprep.mubr.bf16.mxu1 %v11679_v36 }
 0x772   :  { %8970 = vmatmul.mubr.bf16.gmra.mrb[236].mxu1 %v11678_v38 }
 0x773   :  { %8977 = vmatprep.mubr.bf16.mxu1 %v11687_v14  ;;  %v11561_v14 = vcombine.high %v6546_v35, %v6550_v58 }
 0x77a   :  { %8978 = vmatmul.mubr.bf16.gmra.mrb[240].mxu1 %v11686_v31  ;;  %v11560_v31 = vcombine.low %v6546_v35, %v6550_v58  ;;  %v6674_v35 = vld [vmem:[%s18798_s3 + $0x710] sm:$0xff] }
 0x77b   :  { %8985 = vmatprep.mubr.bf16.mxu1 %v11695_v37  ;;  %v11569_v37 = vcombine.high %v6554_v28, %v6558_v40  ;;  %v6678_v58 = vld [vmem:[%s18798_s3 + $0x730] sm:$0xff] }
 0x782   :  { %8986 = vmatmul.mubr.bf16.gmra.mrb[244].mxu1 %v11694_v13  ;;  %v11568_v13 = vcombine.low %v6554_v28, %v6558_v40  ;;  %v6682_v28 = vld [vmem:[%s18798_s3 + $0x750] sm:$0xff] }
 0x783   :  { %8993 = vmatprep.mubr.bf16.mxu1 %v11703_v32  ;;  %v11577_v32 = vcombine.high %v6562_v39, %v6566_v4  ;;  %v6686_v40 = vld [vmem:[%s18798_s3 + $0x770] sm:$0xff] }
 0x78a   :  { %8994 = vmatmul.mubr.bf16.gmra.mrb[248].mxu1 %v11702_v45  ;;  %v11576_v45 = vcombine.low %v6562_v39, %v6566_v4  ;;  %v6690_v39 = vld [vmem:[%s18798_s3 + $0x790] sm:$0xff] }
 0x78b   :  { %9001 = vmatprep.mubr.bf16.mxu1 %v11711_v59  ;;  %v11585_v59 = vcombine.high %v6570_v43, %v6574_v47  ;;  %v6694_v4 = vld [vmem:[%s18798_s3 + $0x7b0] sm:$0xff] }
 0x792   :  { %9002 = vmatmul.mubr.bf16.gmra.mrb[252].mxu1 %v11710_v34  ;;  %v11584_v34 = vcombine.low %v6570_v43, %v6574_v47  ;;  %v6698_v43 = vld [vmem:[%s18798_s3 + $0x7d0] sm:$0xff] }
 0x793   :  { %9042 = vmatprep.mubr.bf16.mxu1 %v11465_v1  ;;  %v11593_v1 = vcombine.high %v6578_v53, %v6582_v16  ;;  %v6702_v47 = vld [vmem:[%s18798_s3 + $0x7f0] sm:$0xff] }
 0x79a   :  { %9043 = vmatmul.mubr.bf16.vlgmr.msra.gmra.mrb[128].mxu1 %v11464_v60  ;;  %v11592_v60 = vcombine.low %v6578_v53, %v6582_v16  ;;  %v6451_v53 = vld [vmem:[%s18798_s3 + $0x18] sm:$0xff] }
 0x79b   :  { %9300 = vmatpush1.bf16.msra.mxu1 %v17586_v52  ;;  %9050 = vmatprep.mubr.bf16.mxu1 %v11473_v19  ;;  %v6474_v52 = vld [vmem:[%s18798_s3 + $0xd0] sm:$0xff]  ;;  %v11601_v19 = vcombine.high %v6586_v46, %v6590_v50  ;;  %v6455_v16 = vld [vmem:[%s18798_s3 + $0x38] sm:$0xff] }
 0x79c   :  { %9301 = vmatprep.subr.bf16.mxu1 %v18839_v6  ;;  %v11488_v10 = vcombine.low %v6474_v52, %v6478_v30 }
 0x79f   :  { %9302 = vmatpush1.bf16.msra.mxu1 %v17602_v41  ;;  %v11489_v41 = vcombine.high %v6474_v52, %v6478_v30  ;;  %v6602_v52 = vld [vmem:[%s18798_s3 + $0x4d0] sm:$0xff] }
 0x7a0   :  { %9303 = vmatprep.subr.bf16.mxu1 %v18839_v6  ;;  %v6606_v30 = vld [vmem:[%s18798_s3 + $0x4f0] sm:$0xff] }
 0x7a2   :  { %9051 = vmatmul.mubr.bf16.gmra.mrb[132].mxu1 %v11472_v48  ;;  %v11600_v48 = vcombine.low %v6586_v46, %v6590_v50  ;;  %v6459_v46 = vld [vmem:[%s18798_s3 + $0x58] sm:$0xff] }
 0x7a3   :  { %9304 = vmatpush1.bf16.msra.mxu1 %v17618_v42  ;;  %9058 = vmatprep.mubr.bf16.mxu1 %v11481_v61  ;;  %v6482_v42 = vld [vmem:[%s18798_s3 + $0x110] sm:$0xff]  ;;  %v11609_v61 = vcombine.high %v6594_v49, %v6598_v26  ;;  %v6463_v50 = vld [vmem:[%s18798_s3 + $0x78] sm:$0xff] }
 0x7a4   :  { %9305 = vmatprep.subr.bf16.mxu1 %v18839_v6  ;;  %v11496_v54 = vcombine.low %v6482_v42, %v6486_v44 }
 0x7a7   :  { %9306 = vmatpush1.bf16.msra.mxu1 %v17634_v29  ;;  %v11497_v29 = vcombine.high %v6482_v42, %v6486_v44  ;;  %v6610_v42 = vld [vmem:[%s18798_s3 + $0x510] sm:$0xff] }
 0x7a8   :  { %9307 = vmatprep.subr.bf16.mxu1 %v18839_v6  ;;  %v6614_v44 = vld [vmem:[%s18798_s3 + $0x530] sm:$0xff] }
 0x7aa   :  { %9059 = vmatmul.mubr.bf16.gmra.mrb[136].mxu1 %v11480_v17  ;;  %v11608_v17 = vcombine.low %v6594_v49, %v6598_v26  ;;  %v6467_v49 = vld [vmem:[%s18798_s3 + $0x98] sm:$0xff] }
 0x7ab   :  { %9308 = vmatpush1.bf16.msra.mxu1 %v17650_v5  ;;  %9066 = vmatprep.mubr.bf16.mxu1 %v11489_v41  ;;  %v6490_v5 = vld [vmem:[%s18798_s3 + $0x150] sm:$0xff]  ;;  %v11617_v41 = vcombine.high %v6602_v52, %v6606_v30  ;;  %v6471_v26 = vld [vmem:[%s18798_s3 + $0xb8] sm:$0xff] }
 0x7ac   :  { %9309 = vmatprep.subr.bf16.mxu1 %v18839_v6  ;;  %v11504_v3 = vcombine.low %v6490_v5, %v6494_v7 }
 0x7af   :  { %9310 = vmatpush1.bf16.msra.mxu1 %v17666_v15  ;;  %v11505_v15 = vcombine.high %v6490_v5, %v6494_v7  ;;  %v6618_v5 = vld [vmem:[%s18798_s3 + $0x550] sm:$0xff] }
 0x7b0   :  { %9311 = vmatprep.subr.bf16.mxu1 %v18839_v6  ;;  %v6622_v7 = vld [vmem:[%s18798_s3 + $0x570] sm:$0xff] }
 0x7b2   :  { %9067 = vmatmul.mubr.bf16.gmra.mrb[140].mxu1 %v11488_v10  ;;  %v11616_v10 = vcombine.low %v6602_v52, %v6606_v30  ;;  %v6475_v52 = vld [vmem:[%s18798_s3 + $0xd8] sm:$0xff] }
 0x7b3   :  { %9312 = vmatpush1.bf16.msra.mxu1 %v17682_v12  ;;  %9074 = vmatprep.mubr.bf16.mxu1 %v11497_v29  ;;  %v6498_v12 = vld [vmem:[%s18798_s3 + $0x190] sm:$0xff]  ;;  %v11625_v29 = vcombine.high %v6610_v42, %v6614_v44  ;;  %v6479_v30 = vld [vmem:[%s18798_s3 + $0xf8] sm:$0xff] }
 0x7b4   :  { %9313 = vmatprep.subr.bf16.mxu1 %v18839_v6  ;;  %v11512_v21 = vcombine.low %v6498_v12, %v6502_v9 }
 0x7b7   :  { %9314 = vmatpush1.bf16.msra.mxu1 %v17698_v51  ;;  %v11513_v51 = vcombine.high %v6498_v12, %v6502_v9  ;;  %v6626_v12 = vld [vmem:[%s18798_s3 + $0x590] sm:$0xff] }
 0x7b8   :  { %9315 = vmatprep.subr.bf16.mxu1 %v18839_v6  ;;  %v6630_v9 = vld [vmem:[%s18798_s3 + $0x5b0] sm:$0xff] }
 0x7ba   :  { %9075 = vmatmul.mubr.bf16.gmra.mrb[144].mxu1 %v11496_v54  ;;  %v11624_v54 = vcombine.low %v6610_v42, %v6614_v44  ;;  %v6483_v42 = vld [vmem:[%s18798_s3 + $0x118] sm:$0xff] }
 0x7bb   :  { %9316 = vmatpush1.bf16.msra.mxu1 %v17712_v63  ;;  %9082 = vmatprep.mubr.bf16.mxu1 %v11505_v15  ;;  %v6506_v63 = vld [vmem:[%s18798_s3 + $0x1d0] sm:$0xff]  ;;  %v11633_v15 = vcombine.high %v6618_v5, %v6622_v7  ;;  %v6487_v44 = vld [vmem:[%s18798_s3 + $0x138] sm:$0xff] }
 0x7bc   :  { %9317 = vmatprep.subr.bf16.mxu1 %v18839_v6  ;;  %v11520_v22 = vcombine.low %v6506_v63, %v6510_v55 }
 0x7bf   :  { %9318 = vmatpush1.bf16.msra.mxu1 %v17724_v0  ;;  %v11521_v0 = vcombine.high %v6506_v63, %v6510_v55  ;;  %v6634_v63 = vld [vmem:[%s18798_s3 + $0x5d0] sm:$0xff] }
 0x7c0   :  { %9319 = vmatprep.subr.bf16.mxu1 %v18839_v6  ;;  %v6638_v55 = vld [vmem:[%s18798_s3 + $0x5f0] sm:$0xff] }
 0x7c2   :  { %9083 = vmatmul.mubr.bf16.gmra.mrb[148].mxu1 %v11504_v3  ;;  %v11632_v3 = vcombine.low %v6618_v5, %v6622_v7  ;;  %v6491_v5 = vld [vmem:[%s18798_s3 + $0x158] sm:$0xff] }
 0x7c3   :  { %9320 = vmatpush1.bf16.msra.mxu1 %v17736_v23  ;;  %9090 = vmatprep.mubr.bf16.mxu1 %v11513_v51  ;;  %v6514_v23 = vld [vmem:[%s18798_s3 + $0x210] sm:$0xff]  ;;  %v11641_v51 = vcombine.high %v6626_v12, %v6630_v9  ;;  %v6495_v7 = vld [vmem:[%s18798_s3 + $0x178] sm:$0xff] }
 0x7c4   :  { %9321 = vmatprep.subr.bf16.mxu1 %v18839_v6  ;;  %v11528_v25 = vcombine.low %v6514_v23, %v6518_v8 }
 0x7c7   :  { %9322 = vmatpush1.bf16.msra.mxu1 %v17748_v24  ;;  %v11529_v24 = vcombine.high %v6514_v23, %v6518_v8  ;;  %v6642_v23 = vld [vmem:[%s18798_s3 + $0x610] sm:$0xff] }
 0x7c8   :  { %9323 = vmatprep.subr.bf16.mxu1 %v18839_v6  ;;  %v6646_v8 = vld [vmem:[%s18798_s3 + $0x630] sm:$0xff] }
 0x7ca   :  { %9091 = vmatmul.mubr.bf16.gmra.mrb[152].mxu1 %v11512_v21  ;;  %v11640_v21 = vcombine.low %v6626_v12, %v6630_v9  ;;  %v6499_v12 = vld [vmem:[%s18798_s3 + $0x198] sm:$0xff] }
 0x7cb   :  { %9324 = vmatpush1.bf16.msra.mxu1 %v17760_v11  ;;  %9098 = vmatprep.mubr.bf16.mxu1 %v11521_v0  ;;  %v6522_v11 = vld [vmem:[%s18798_s3 + $0x250] sm:$0xff]  ;;  %v11649_v0 = vcombine.high %v6634_v63, %v6638_v55  ;;  %v6503_v9 = vld [vmem:[%s18798_s3 + $0x1b8] sm:$0xff] }
 0x7cc   :  { %9325 = vmatprep.subr.bf16.mxu1 %v18839_v6  ;;  %v11536_v27 = vcombine.low %v6522_v11, %v6526_v20 }
 0x7cf   :  { %9326 = vmatpush1.bf16.msra.mxu1 %v17772_v62  ;;  %v11537_v62 = vcombine.high %v6522_v11, %v6526_v20  ;;  %v6650_v11 = vld [vmem:[%s18798_s3 + $0x650] sm:$0xff] }
 0x7d0   :  { %9327 = vmatprep.subr.bf16.mxu1 %v18839_v6  ;;  %v6654_v20 = vld [vmem:[%s18798_s3 + $0x670] sm:$0xff] }
 0x7d2   :  { %9099 = vmatmul.mubr.bf16.gmra.mrb[156].mxu1 %v11520_v22  ;;  %v11648_v22 = vcombine.low %v6634_v63, %v6638_v55  ;;  %v6507_v63 = vld [vmem:[%s18798_s3 + $0x1d8] sm:$0xff] }
 0x7d3   :  { %9328 = vmatpush1.bf16.msra.mxu1 %v17784_v33  ;;  %9106 = vmatprep.mubr.bf16.mxu1 %v11529_v24  ;;  %v6530_v33 = vld [vmem:[%s18798_s3 + $0x290] sm:$0xff]  ;;  %v11657_v24 = vcombine.high %v6642_v23, %v6646_v8  ;;  %v6511_v55 = vld [vmem:[%s18798_s3 + $0x1f8] sm:$0xff] }
 0x7d4   :  { %9329 = vmatprep.subr.bf16.mxu1 %v18839_v6  ;;  %v6534_v6 = vld [vmem:[%s18798_s3 + $0x2b0] sm:$0xff] }
 0x7d5   :  { %v11545_v57 = vcombine.high %v6530_v33, %v6534_v6  ;;  %v11544_v56 = vcombine.low %v6530_v33, %v6534_v6  ;;  %v6658_v33 = vld [vmem:[%s18798_s3 + $0x690] sm:$0xff] }
 0x7d6   :  { %v6662_v6 = vld [vmem:[%s18798_s3 + $0x6b0] sm:$0xff] }
 0x7d7   :  { %9330 = vmatpush1.bf16.msra.mxu1 %v17796_v18  ;;  %v6542_v18 = vld [vmem:[%s18798_s3 + $0x2f0] sm:$0xff] }
 0x7d8   :  { %v11553_v36 = vcombine.high %v6538_v2, %v6542_v18  ;;  %v11552_v38 = vcombine.low %v6538_v2, %v6542_v18  ;;  %v6666_v2 = vld [vmem:[%s18798_s3 + $0x6d0] sm:$0xff] }
 0x7d9   :  { %v6670_v18 = vld [vmem:[%s18798_s3 + $0x6f0] sm:$0xff] }
 0x7da   :  { %9107 = vmatmul.mubr.bf16.gmra.mrb[160].mxu1 %v11528_v25  ;;  %v11656_v25 = vcombine.low %v6642_v23, %v6646_v8  ;;  %v6515_v23 = vld [vmem:[%s18798_s3 + $0x218] sm:$0xff] }
 0x7db   :  { %9114 = vmatprep.mubr.bf16.mxu1 %v11537_v62  ;;  %v11665_v62 = vcombine.high %v6650_v11, %v6654_v20  ;;  %v6519_v8 = vld [vmem:[%s18798_s3 + $0x238] sm:$0xff] }
 0x7e2   :  { %9115 = vmatmul.mubr.bf16.gmra.mrb[164].mxu1 %v11536_v27  ;;  %v11664_v27 = vcombine.low %v6650_v11, %v6654_v20  ;;  %v6523_v11 = vld [vmem:[%s18798_s3 + $0x258] sm:$0xff] }
 0x7e3   :  { %9122 = vmatprep.mubr.bf16.mxu1 %v11545_v57  ;;  %v11673_v57 = vcombine.high %v6658_v33, %v6662_v6  ;;  %v6527_v20 = vld [vmem:[%s18798_s3 + $0x278] sm:$0xff] }
 0x7ea   :  { %9123 = vmatmul.mubr.bf16.gmra.mrb[168].mxu1 %v11544_v56  ;;  %v11672_v56 = vcombine.low %v6658_v33, %v6662_v6  ;;  %v6531_v33 = vld [vmem:[%s18798_s3 + $0x298] sm:$0xff] }
 0x7eb   :  { %9130 = vmatprep.mubr.bf16.mxu1 %v11553_v36  ;;  %v11681_v36 = vcombine.high %v6666_v2, %v6670_v18  ;;  %v6535_v6 = vld [vmem:[%s18798_s3 + $0x2b8] sm:$0xff] }
 0x7f2   :  { %9131 = vmatmul.mubr.bf16.gmra.mrb[172].mxu1 %v11552_v38  ;;  %v11680_v38 = vcombine.low %v6666_v2, %v6670_v18  ;;  %v6539_v2 = vld [vmem:[%s18798_s3 + $0x2d8] sm:$0xff] }
 0x7f3   :  { %9138 = vmatprep.mubr.bf16.mxu1 %v11561_v14  ;;  %v11689_v14 = vcombine.high %v6674_v35, %v6678_v58  ;;  %v6543_v18 = vld [vmem:[%s18798_s3 + $0x2f8] sm:$0xff] }
 0x7fa   :  { %9139 = vmatmul.mubr.bf16.gmra.mrb[176].mxu1 %v11560_v31  ;;  %v11688_v31 = vcombine.low %v6674_v35, %v6678_v58  ;;  %v6547_v35 = vld [vmem:[%s18798_s3 + $0x318] sm:$0xff] }
 0x7fb   :  { %9146 = vmatprep.mubr.bf16.mxu1 %v11569_v37  ;;  %v11697_v37 = vcombine.high %v6682_v28, %v6686_v40  ;;  %v6551_v58 = vld [vmem:[%s18798_s3 + $0x338] sm:$0xff] }
 0x802   :  { %9147 = vmatmul.mubr.bf16.gmra.mrb[180].mxu1 %v11568_v13  ;;  %v11696_v13 = vcombine.low %v6682_v28, %v6686_v40  ;;  %v6555_v28 = vld [vmem:[%s18798_s3 + $0x358] sm:$0xff] }
 0x803   :  { %9154 = vmatprep.mubr.bf16.mxu1 %v11577_v32  ;;  %v11705_v32 = vcombine.high %v6690_v39, %v6694_v4  ;;  %v6559_v40 = vld [vmem:[%s18798_s3 + $0x378] sm:$0xff] }
 0x80a   :  { %9155 = vmatmul.mubr.bf16.gmra.mrb[184].mxu1 %v11576_v45  ;;  %v11704_v45 = vcombine.low %v6690_v39, %v6694_v4  ;;  %v6563_v39 = vld [vmem:[%s18798_s3 + $0x398] sm:$0xff] }
 0x80b   :  { %9162 = vmatprep.mubr.bf16.mxu1 %v11585_v59  ;;  %v11713_v59 = vcombine.high %v6698_v43, %v6702_v47  ;;  %v6567_v4 = vld [vmem:[%s18798_s3 + $0x3b8] sm:$0xff] }
 0x812   :  { %9163 = vmatmul.mubr.bf16.gmra.mrb[188].mxu1 %v11584_v34  ;;  %v11712_v34 = vcombine.low %v6698_v43, %v6702_v47  ;;  %v6571_v43 = vld [vmem:[%s18798_s3 + $0x3d8] sm:$0xff] }
 0x813   :  { %9170 = vmatprep.mubr.bf16.mxu1 %v11593_v1  ;;  %v11467_v1 = vcombine.high %v6451_v53, %v6455_v16  ;;  %v6575_v47 = vld [vmem:[%s18798_s3 + $0x3f8] sm:$0xff] }
 0x81a   :  { %9171 = vmatmul.mubr.bf16.gmra.mrb[192].mxu1 %v11592_v60  ;;  %v11466_v60 = vcombine.low %v6451_v53, %v6455_v16  ;;  %v6579_v53 = vld [vmem:[%s18798_s3 + $0x418] sm:$0xff] }
 0x81b   :  { %9178 = vmatprep.mubr.bf16.mxu1 %v11601_v19  ;;  %v11475_v19 = vcombine.high %v6459_v46, %v6463_v50  ;;  %v6583_v16 = vld [vmem:[%s18798_s3 + $0x438] sm:$0xff] }
 0x822   :  { %9179 = vmatmul.mubr.bf16.gmra.mrb[196].mxu1 %v11600_v48  ;;  %v11474_v48 = vcombine.low %v6459_v46, %v6463_v50  ;;  %v6587_v46 = vld [vmem:[%s18798_s3 + $0x458] sm:$0xff] }
 0x823   :  { %9186 = vmatprep.mubr.bf16.mxu1 %v11609_v61  ;;  %v11483_v61 = vcombine.high %v6467_v49, %v6471_v26  ;;  %v6591_v50 = vld [vmem:[%s18798_s3 + $0x478] sm:$0xff] }
 0x82a   :  { %9187 = vmatmul.mubr.bf16.gmra.mrb[200].mxu1 %v11608_v17  ;;  %v11482_v17 = vcombine.low %v6467_v49, %v6471_v26  ;;  %v6595_v49 = vld [vmem:[%s18798_s3 + $0x498] sm:$0xff] }
 0x82b   :  { %9194 = vmatprep.mubr.bf16.mxu1 %v11617_v41  ;;  %v11491_v41 = vcombine.high %v6475_v52, %v6479_v30  ;;  %v6599_v26 = vld [vmem:[%s18798_s3 + $0x4b8] sm:$0xff] }
 0x832   :  { %9195 = vmatmul.mubr.bf16.gmra.mrb[204].mxu1 %v11616_v10  ;;  %v11490_v10 = vcombine.low %v6475_v52, %v6479_v30  ;;  %v6603_v52 = vld [vmem:[%s18798_s3 + $0x4d8] sm:$0xff] }
 0x833   :  { %9202 = vmatprep.mubr.bf16.mxu1 %v11625_v29  ;;  %v11499_v29 = vcombine.high %v6483_v42, %v6487_v44  ;;  %v6607_v30 = vld [vmem:[%s18798_s3 + $0x4f8] sm:$0xff] }
 0x83a   :  { %9203 = vmatmul.mubr.bf16.gmra.mrb[208].mxu1 %v11624_v54  ;;  %v11498_v54 = vcombine.low %v6483_v42, %v6487_v44  ;;  %v6611_v42 = vld [vmem:[%s18798_s3 + $0x518] sm:$0xff] }
 0x83b   :  { %9210 = vmatprep.mubr.bf16.mxu1 %v11633_v15  ;;  %v11507_v15 = vcombine.high %v6491_v5, %v6495_v7  ;;  %v6615_v44 = vld [vmem:[%s18798_s3 + $0x538] sm:$0xff] }
 0x842   :  { %9211 = vmatmul.mubr.bf16.gmra.mrb[212].mxu1 %v11632_v3  ;;  %v11506_v3 = vcombine.low %v6491_v5, %v6495_v7  ;;  %v6619_v5 = vld [vmem:[%s18798_s3 + $0x558] sm:$0xff] }
 0x843   :  { %9218 = vmatprep.mubr.bf16.mxu1 %v11641_v51  ;;  %v11515_v51 = vcombine.high %v6499_v12, %v6503_v9  ;;  %v6623_v7 = vld [vmem:[%s18798_s3 + $0x578] sm:$0xff] }
 0x84a   :  { %9219 = vmatmul.mubr.bf16.gmra.mrb[216].mxu1 %v11640_v21  ;;  %v11514_v21 = vcombine.low %v6499_v12, %v6503_v9  ;;  %v6627_v12 = vld [vmem:[%s18798_s3 + $0x598] sm:$0xff] }
 0x84b   :  { %9226 = vmatprep.mubr.bf16.mxu1 %v11649_v0  ;;  %v11523_v0 = vcombine.high %v6507_v63, %v6511_v55  ;;  %v6631_v9 = vld [vmem:[%s18798_s3 + $0x5b8] sm:$0xff] }
 0x852   :  { %9227 = vmatmul.mubr.bf16.gmra.mrb[220].mxu1 %v11648_v22  ;;  %v11522_v22 = vcombine.low %v6507_v63, %v6511_v55  ;;  %v6635_v63 = vld [vmem:[%s18798_s3 + $0x5d8] sm:$0xff] }
 0x853   :  { %9234 = vmatprep.mubr.bf16.mxu1 %v11657_v24  ;;  %v11531_v24 = vcombine.high %v6515_v23, %v6519_v8  ;;  %v6639_v55 = vld [vmem:[%s18798_s3 + $0x5f8] sm:$0xff] }
 0x85a   :  { %9235 = vmatmul.mubr.bf16.gmra.mrb[224].mxu1 %v11656_v25  ;;  %v11530_v25 = vcombine.low %v6515_v23, %v6519_v8  ;;  %v6643_v23 = vld [vmem:[%s18798_s3 + $0x618] sm:$0xff] }
 0x85b   :  { %9242 = vmatprep.mubr.bf16.mxu1 %v11665_v62  ;;  %v11539_v62 = vcombine.high %v6523_v11, %v6527_v20  ;;  %v6647_v8 = vld [vmem:[%s18798_s3 + $0x638] sm:$0xff] }
 0x862   :  { %9243 = vmatmul.mubr.bf16.gmra.mrb[228].mxu1 %v11664_v27  ;;  %v11538_v27 = vcombine.low %v6523_v11, %v6527_v20  ;;  %v6651_v11 = vld [vmem:[%s18798_s3 + $0x658] sm:$0xff] }
 0x863   :  { %9250 = vmatprep.mubr.bf16.mxu1 %v11673_v57  ;;  %v11547_v57 = vcombine.high %v6531_v33, %v6535_v6  ;;  %v6655_v20 = vld [vmem:[%s18798_s3 + $0x678] sm:$0xff] }
 0x86a   :  { %9251 = vmatmul.mubr.bf16.gmra.mrb[232].mxu1 %v11672_v56  ;;  %v11546_v56 = vcombine.low %v6531_v33, %v6535_v6  ;;  %v6659_v33 = vld [vmem:[%s18798_s3 + $0x698] sm:$0xff] }
 0x86b   :  { %9258 = vmatprep.mubr.bf16.mxu1 %v11681_v36  ;;  %v11555_v36 = vcombine.high %v6539_v2, %v6543_v18  ;;  %v6663_v6 = vld [vmem:[%s18798_s3 + $0x6b8] sm:$0xff] }
 0x872   :  { %9259 = vmatmul.mubr.bf16.gmra.mrb[236].mxu1 %v11680_v38  ;;  %v11554_v38 = vcombine.low %v6539_v2, %v6543_v18  ;;  %v6667_v2 = vld [vmem:[%s18798_s3 + $0x6d8] sm:$0xff] }
 0x873   :  { %9266 = vmatprep.mubr.bf16.mxu1 %v11689_v14  ;;  %v11563_v14 = vcombine.high %v6547_v35, %v6551_v58  ;;  %v6671_v18 = vld [vmem:[%s18798_s3 + $0x6f8] sm:$0xff] }
 0x87a   :  { %9267 = vmatmul.mubr.bf16.gmra.mrb[240].mxu1 %v11688_v31  ;;  %v11562_v31 = vcombine.low %v6547_v35, %v6551_v58  ;;  %v6675_v35 = vld [vmem:[%s18798_s3 + $0x718] sm:$0xff] }
 0x87b   :  { %9274 = vmatprep.mubr.bf16.mxu1 %v11697_v37  ;;  %v11571_v37 = vcombine.high %v6555_v28, %v6559_v40  ;;  %v6679_v58 = vld [vmem:[%s18798_s3 + $0x738] sm:$0xff] }
 0x882   :  { %9275 = vmatmul.mubr.bf16.gmra.mrb[244].mxu1 %v11696_v13  ;;  %v11570_v13 = vcombine.low %v6555_v28, %v6559_v40 }
 0x883   :  { %9282 = vmatprep.mubr.bf16.mxu1 %v11705_v32  ;;  %v11579_v32 = vcombine.high %v6563_v39, %v6567_v4 }
 0x88a   :  { %9283 = vmatmul.mubr.bf16.gmra.mrb[248].mxu1 %v11704_v45  ;;  %v11578_v45 = vcombine.low %v6563_v39, %v6567_v4  ;;  %v11691_v39 = vcombine.high %v6675_v35, %v6679_v58  ;;  %v19132_v4 = vld [vmem:[#allocation112_spill] sm:$0xff] }
 0x88b   :  { %9290 = vmatprep.mubr.bf16.mxu1 %v11713_v59  ;;  %v11587_v59 = vcombine.high %v6571_v43, %v6575_v47 }
 0x892   :  { %9291 = vmatmul.mubr.bf16.gmra.mrb[252].mxu1 %v11712_v34  ;;  %v11586_v34 = vcombine.low %v6571_v43, %v6575_v47 }
 0x893   :  { %9331 = vmatprep.mubr.bf16.mxu1 %v11467_v1  ;;  %v11595_v1 = vcombine.high %v6579_v53, %v6583_v16 }
 0x89a   :  { %9332 = vmatmul.mubr.bf16.vlgmr.msra.gmra.mrb[128].mxu1 %v11466_v60  ;;  %v11594_v60 = vcombine.low %v6579_v53, %v6583_v16  ;;  %v6687_v53 = vld [vmem:[%s18798_s3 + $0x778] sm:$0xff] }
 0x89b   :  { %9339 = vmatprep.mubr.bf16.mxu1 %v11475_v19  ;;  %v11603_v19 = vcombine.high %v6587_v46, %v6591_v50 }
 0x8a2   :  { %9340 = vmatmul.mubr.bf16.gmra.mrb[132].mxu1 %v11474_v48  ;;  %v11602_v48 = vcombine.low %v6587_v46, %v6591_v50  ;;  %v11690_v50 = vcombine.low %v6675_v35, %v6679_v58 }
 0x8a3   :  { %9347 = vmatprep.mubr.bf16.mxu1 %v11483_v61  ;;  %v11611_v61 = vcombine.high %v6595_v49, %v6599_v26 }
 0x8aa   :  { %9348 = vmatmul.mubr.bf16.gmra.mrb[136].mxu1 %v11482_v17  ;;  %v11610_v17 = vcombine.low %v6595_v49, %v6599_v26  ;;  %v19134_v49 = vld [vmem:[#allocation116_spill] sm:$0xff] }
 0x8ab   :  { %9355 = vmatprep.mubr.bf16.mxu1 %v11491_v41  ;;  %v11619_v41 = vcombine.high %v6603_v52, %v6607_v30 }
 0x8b2   :  { %9356 = vmatmul.mubr.bf16.gmra.mrb[140].mxu1 %v11490_v10  ;;  %v11618_v10 = vcombine.low %v6603_v52, %v6607_v30 }
 0x8b3   :  { %9363 = vmatprep.mubr.bf16.mxu1 %v11499_v29  ;;  %v11627_v29 = vcombine.high %v6611_v42, %v6615_v44 }
 0x8ba   :  { %9364 = vmatmul.mubr.bf16.gmra.mrb[144].mxu1 %v11498_v54  ;;  %v11626_v54 = vcombine.low %v6611_v42, %v6615_v44  ;;  %v19135_v44 = vld [vmem:[#allocation119_spill] sm:$0xff] }
 0x8bb   :  { %9371 = vmatprep.mubr.bf16.mxu1 %v11507_v15  ;;  %v11635_v15 = vcombine.high %v6619_v5, %v6623_v7 }
 0x8c2   :  { %9372 = vmatmul.mubr.bf16.gmra.mrb[148].mxu1 %v11506_v3  ;;  %v11634_v3 = vcombine.low %v6619_v5, %v6623_v7 }
 0x8c3   :  { %9379 = vmatprep.mubr.bf16.mxu1 %v11515_v51  ;;  %v11643_v51 = vcombine.high %v6627_v12, %v6631_v9 }
 0x8ca   :  { %9380 = vmatmul.mubr.bf16.gmra.mrb[152].mxu1 %v11514_v21  ;;  %v11642_v21 = vcombine.low %v6627_v12, %v6631_v9 }
 0x8cb   :  { %9387 = vmatprep.mubr.bf16.mxu1 %v11523_v0  ;;  %v11651_v0 = vcombine.high %v6635_v63, %v6639_v55 }
 0x8d2   :  { %9388 = vmatmul.mubr.bf16.gmra.mrb[156].mxu1 %v11522_v22  ;;  %v11650_v22 = vcombine.low %v6635_v63, %v6639_v55  ;;  %v6699_v55 = vld [vmem:[%s18798_s3 + $0x7d8] sm:$0xff] }
 0x8d3   :  { %9395 = vmatprep.mubr.bf16.mxu1 %v11531_v24  ;;  %v11659_v24 = vcombine.high %v6643_v23, %v6647_v8 }
 0x8da   :  { %9396 = vmatmul.mubr.bf16.gmra.mrb[160].mxu1 %v11530_v25  ;;  %v11658_v25 = vcombine.low %v6643_v23, %v6647_v8  ;;  %v19137_v23 = vld [vmem:[#allocation123_spill] sm:$0xff] }
 0x8db   :  { %9403 = vmatprep.mubr.bf16.mxu1 %v11539_v62  ;;  %v11667_v62 = vcombine.high %v6651_v11, %v6655_v20 }
 0x8e2   :  { %9404 = vmatmul.mubr.bf16.gmra.mrb[164].mxu1 %v11538_v27  ;;  %v11666_v27 = vcombine.low %v6651_v11, %v6655_v20 }
 0x8e3   :  { %9411 = vmatprep.mubr.bf16.mxu1 %v11547_v57  ;;  %v11675_v57 = vcombine.high %v6659_v33, %v6663_v6 }
 0x8ea   :  { %9412 = vmatmul.mubr.bf16.gmra.mrb[168].mxu1 %v11546_v56  ;;  %v11674_v56 = vcombine.low %v6659_v33, %v6663_v6 }
 0x8eb   :  { %9419 = vmatprep.mubr.bf16.mxu1 %v11555_v36  ;;  %v11683_v36 = vcombine.high %v6667_v2, %v6671_v18 }
 0x8f2   :  { %9420 = vmatmul.mubr.bf16.gmra.mrb[172].mxu1 %v11554_v38 }
 0x8f3   :  { %9427 = vmatprep.mubr.bf16.mxu1 %v11563_v14  ;;  %v19131_v14 = vld [vmem:[#allocation111_spill] sm:$0xff] }
 0x8fa   :  { %9428 = vmatmul.mubr.bf16.gmra.mrb[176].mxu1 %v11562_v31  ;;  %v11682_v31 = vcombine.low %v6667_v2, %v6671_v18  ;;  %v19139_v18 = vld [vmem:[#allocation127_spill] sm:$0xff] }
 0x8fb   :  { %9435 = vmatprep.mubr.bf16.mxu1 %v11571_v37 }
 0x902   :  { %9436 = vmatmul.mubr.bf16.gmra.mrb[180].mxu1 %v11570_v13 }
 0x903   :  { %9443 = vmatprep.mubr.bf16.mxu1 %v11579_v32 }
 0x90a   :  { %9444 = vmatmul.mubr.bf16.gmra.mrb[184].mxu1 %v11578_v45 }
 0x90b   :  { %9451 = vmatprep.mubr.bf16.mxu1 %v11587_v59  ;;  %v6683_v59 = vld [vmem:[%s18798_s3 + $0x758] sm:$0xff] }
 0x90c   :  { %v11698_v5 = vcombine.low %v6683_v59, %v6687_v53 }
 0x912   :  { %9452 = vmatmul.mubr.bf16.gmra.mrb[188].mxu1 %v11586_v34  ;;  %v19133_v34 = vld [vmem:[#allocation115_spill] sm:$0xff] }
 0x913   :  { %9459 = vmatprep.mubr.bf16.mxu1 %v11595_v1 }
 0x91a   :  { %9460 = vmatmul.mubr.bf16.gmra.mrb[192].mxu1 %v11594_v60 }
 0x91b   :  { %9467 = vmatprep.mubr.bf16.mxu1 %v11603_v19  ;;  %v11699_v19 = vcombine.high %v6683_v59, %v6687_v53  ;;  %v19142_v59 = vld [vmem:[#allocation132_spill] sm:$0xff] }
 0x922   :  { %9468 = vmatmul.mubr.bf16.gmra.mrb[196].mxu1 %v11602_v48 }
 0x923   :  { %9475 = vmatprep.mubr.bf16.mxu1 %v11611_v61 }
 0x92a   :  { %9476 = vmatmul.mubr.bf16.gmra.mrb[200].mxu1 %v11610_v17  ;;  %v6691_v17 = vld [vmem:[%s18798_s3 + $0x798] sm:$0xff] }
 0x92b   :  { %9483 = vmatprep.mubr.bf16.mxu1 %v11619_v41  ;;  %v6695_v41 = vld [vmem:[%s18798_s3 + $0x7b8] sm:$0xff] }
 0x932   :  { %9484 = vmatmul.mubr.bf16.gmra.mrb[204].mxu1 %v11618_v10 }
 0x933   :  { %9491 = vmatprep.mubr.bf16.mxu1 %v11627_v29 }
 0x93a   :  { %9492 = vmatmul.mubr.bf16.gmra.mrb[208].mxu1 %v11626_v54  ;;  %v11707_v54 = vcombine.high %v6691_v17, %v6695_v41 }
 0x93b   :  { %9499 = vmatprep.mubr.bf16.mxu1 %v11635_v15  ;;  %v19136_v15 = vld [vmem:[#allocation120_spill] sm:$0xff] }
 0x942   :  { %9500 = vmatmul.mubr.bf16.gmra.mrb[212].mxu1 %v11634_v3 }
 0x943   :  { %9507 = vmatprep.mubr.bf16.mxu1 %v11643_v51 }
 0x94a   :  { %9508 = vmatmul.mubr.bf16.gmra.mrb[216].mxu1 %v11642_v21  ;;  %v6703_v21 = vld [vmem:[%s18798_s3 + $0x7f8] sm:$0xff] }
 0x94b   :  { %9515 = vmatprep.mubr.bf16.mxu1 %v11651_v0  ;;  %v11715_v20 = vcombine.high %v6699_v55, %v6703_v21  ;;  %v11714_v35 = vcombine.low %v6699_v55, %v6703_v21  ;;  %v19145_v21 = vld [vmem:[#allocation109_spill] sm:$0xff] }
 0x952   :  { %9516 = vmatmul.mubr.bf16.gmra.mrb[220].mxu1 %v11650_v22 }
 0x953   :  { %9523 = vmatprep.mubr.bf16.mxu1 %v11659_v24  ;;  %v11706_v24 = vcombine.low %v6691_v17, %v6695_v41 }
 0x95a   :  { %9524 = vmatmul.mubr.bf16.gmra.mrb[224].mxu1 %v11658_v25  ;;  %v19138_v25 = vld [vmem:[#allocation124_spill] sm:$0xff] }
 0x95b   :  { %9531 = vmatprep.mubr.bf16.mxu1 %v11667_v62 }
 0x962   :  { %9532 = vmatmul.mubr.bf16.gmra.mrb[228].mxu1 %v11666_v27 }
 0x963   :  { %9539 = vmatprep.mubr.bf16.mxu1 %v11675_v57 }
 0x96a   :  { %9540 = vmatmul.mubr.bf16.gmra.mrb[232].mxu1 %v11674_v56 }
 0x96b   :  { %9547 = vmatprep.mubr.bf16.mxu1 %v11683_v36 }
 0x96d   :  { %v9333_v38 = vpop.f32.mrb[128].mxu1 }
 0x96e   :  { %v12328_v28 = vadd.f32 %v9333_v38, %v19131_v14  ;;  %v9335_v40 = vpop.f32.mrb[129].mxu1  ;;  %v13983_v38 = vld [vmem:[%s18800_s5 + $0x4] ss:$16 sps:$4 sm:$0xff]  }
 0x96f   :  { %v9336_v37 = vpop.f32.mrb[130].mxu1  ;;  %v19140_v14 = vld [vmem:[#allocation128_spill] sm:$0xff] }
 0x970   :  { %v12329_v13 = vadd.f32 %v9336_v37, %v19132_v4  ;;  %v9338_v32 = vpop.f32.mrb[131].mxu1  ;;  %v9588_v43 = vmax.f32 %v12328_v28, 0.0 }
 0x972   :  { %v9589_v47 = vmax.f32 %v12329_v13, 0.0  ;;  %9548 = vmatmul.mubr.bf16.gmra.mrb[236].mxu1 %v11682_v31  ;;  %v19141_v13 = vld [vmem:[#allocation131_spill] sm:$0xff] }
 0x973   :  { %9555 = vmatprep.mubr.bf16.mxu1 %v11691_v39 }
 0x974   :  { %v18281_v45 = vpack.c.bf16 %v9589_v47, %v9588_v43 }
 0x975   :  { %v9341_v16 = vpop.f32.mrb[132].mxu1 }
 0x976   :  { %v12330_v1 = vadd.f32 %v9341_v16, %v19133_v34  ;;  %v9343_v46 = vpop.f32.mrb[133].mxu1 }
 0x977   :  { %v9344_v60 = vpop.f32.mrb[134].mxu1 }
 0x978   :  { %v12331_v26 = vadd.f32 %v9344_v60, %v19134_v49  ;;  %v9346_v48 = vpop.f32.mrb[135].mxu1  ;;  %v9590_v61 = vmax.f32 %v12330_v1, 0.0  ;;  %v19143_v60 = vld [vmem:[#allocation135_spill] sm:$0xff] }
 0x979   :  { %v19144_v48 = vld [vmem:[#allocation136_spill] sm:$0xff] }
 0x97a   :  { %v9591_v52 = vmax.f32 %v12331_v26, 0.0  ;;  %9556 = vmatmul.mubr.bf16.gmra.mrb[240].mxu1 %v11690_v50 }
 0x97b   :  { %9563 = vmatprep.mubr.bf16.mxu1 %v11699_v19 }
 0x97c   :  { %v18291_v30 = vpack.c.bf16 %v9591_v52, %v9590_v61 }
 0x97d   :  { %v9349_v42 = vpop.f32.mrb[136].mxu1 }
 0x97e   :  { %v12332_v10 = vadd.f32 %v9349_v42, %v19135_v44  ;;  %v9351_v29 = vpop.f32.mrb[137].mxu1  ;;  %v6905_v44 = vpop.permute.xlu0 %6904 }
 0x97f   :  { %v9352_v7 = vpop.f32.mrb[138].mxu1 }
 0x980   :  { %v12333_v12 = vadd.f32 %v9352_v7, %v19136_v15  ;;  %v9354_v9 = vpop.f32.mrb[139].mxu1  ;;  %v9592_v3 = vmax.f32 %v12332_v10, 0.0  ;;  %v6910_v7 = vpop.permute.xlu1 %6909 }
 0x982   :  { %v9593_v51 = vmax.f32 %v12333_v12, 0.0  ;;  %9564 = vmatmul.mubr.bf16.gmra.mrb[244].mxu1 %v11698_v5 }
 0x983   :  { %9571 = vmatprep.mubr.bf16.mxu1 %v11707_v54 }
 0x984   :  { %v18301_v63 = vpack.c.bf16 %v9593_v51, %v9592_v3 }
 0x985   :  { %v9357_v0 = vpop.f32.mrb[140].mxu1 }
 0x986   :  { %v12334_v8 = vadd.f32 %v9357_v0, %v19137_v23  ;;  %v9359_v22 = vpop.f32.mrb[141].mxu1 }
 0x987   :  { %v9360_v11 = vpop.f32.mrb[142].mxu1  ;;  %v19146_v22 = vld [vmem:[#allocation110_spill] sm:$0xff] }
 0x988   :  { %v12335_v62 = vadd.f32 %v9360_v11, %v19138_v25  ;;  %v9362_v33 = vpop.f32.mrb[143].mxu1  ;;  %v9594_v6 = vmax.f32 %v12334_v8, 0.0 }
 0x98a   :  { %v9595_v27 = vmax.f32 %v12335_v62, 0.0  ;;  %9572 = vmatmul.mubr.bf16.gmra.mrb[248].mxu1 %v11706_v24 }
 0x98b   :  { %9579 = vmatprep.mubr.bf16.mxu1 %v11715_v20 }
 0x98c   :  { %v18311_v57 = vpack.c.bf16 %v9595_v27, %v9594_v6  ;;  %v19147_v6 = vld [vmem:[#allocation113_spill] sm:$0xff] }
 0x98d   :  { %v9365_v2 = vpop.f32.mrb[144].mxu1 }
 0x98e   :  { %v12336_v56 = vadd.f32 %v9365_v2, %v19139_v18  ;;  %v9367_v36 = vpop.f32.mrb[145].mxu1 }
 0x98f   :  { %v9368_v58 = vpop.f32.mrb[146].mxu1 }
 0x990   :  { %v12337_v28 = vadd.f32 %v9368_v58, %v19140_v14  ;;  %v9370_v40 = vpop.f32.mrb[147].mxu1  ;;  %v9596_v31 = vmax.f32 %v12336_v56, 0.0  ;;  %v19148_v56 = vld [vmem:[#allocation114_spill] sm:$0xff] }
 0x991   :  { %v19149_v40 = vld [vmem:[#allocation117_spill] sm:$0xff] }
 0x992   :  { %v9597_v37 = vmax.f32 %v12337_v28, 0.0  ;;  %9580 = vmatmul.mubr.bf16.gmra.mrb[252].mxu1 %v11714_v35 }
 0x993   :  { %10292 = vmatprep.mubr.bf16.mxu1 %v13983_v38 }
 0x994   :  { %v18318_v39 = vpack.c.bf16 %v9597_v37, %v9596_v31 }
 0x995   :  { %v9373_v4 = vpop.f32.mrb[148].mxu1 }
 0x996   :  { %v12338_v32 = vadd.f32 %v9373_v4, %v19141_v13  ;;  %v9375_v43 = vpop.f32.mrb[149].mxu1  ;;  %v19150_v13 = vld [vmem:[#allocation118_spill] sm:$0xff] }
 0x997   :  { %v9376_v47 = vpop.f32.mrb[150].mxu1 }
 0x998   :  { %v12339_v53 = vadd.f32 %v9376_v47, %v19142_v59  ;;  %v9378_v16 = vpop.f32.mrb[151].mxu1  ;;  %v9598_v34 = vmax.f32 %v12338_v32, 0.0 }
 0x999   :  { %v19151_v16 = vld [vmem:[#allocation121_spill] sm:$0xff] }
 0x99a   :  { %v9599_v1 = vmax.f32 %v12339_v53, 0.0 }
 0x99c   :  { %v18322_v46 = vpack.c.bf16 %v9599_v1, %v9598_v34 }
 0x99d   :  { %v9381_v50 = vpop.f32.mrb[152].mxu1 }
 0x99e   :  { %v12340_v19 = vadd.f32 %v9381_v50, %v19143_v60  ;;  %v9383_v49 = vpop.f32.mrb[153].mxu1  ;;  %v19152_v60 = vld [vmem:[#allocation122_spill] sm:$0xff] }
 0x99f   :  { %v9384_v26 = vpop.f32.mrb[154].mxu1 }
 0x9a0   :  { %v12341_v61 = vadd.f32 %v9384_v26, %v19144_v48  ;;  %v9386_v52 = vpop.f32.mrb[155].mxu1  ;;  %v9600_v17 = vmax.f32 %v12340_v19, 0.0 }
 0x9a1   :  { %v18343_v52 = vpop.permute.xlu1 %7079 }
 0x9a2   :  { %v9601_v41 = vmax.f32 %v12341_v61, 0.0 }
 0x9a4   :  { %v18326_v42 = vpack.c.bf16 %v9601_v41, %v9600_v17  ;;  %v19153_v41 = vld [vmem:[#allocation125_spill] sm:$0xff] }
 0x9a5   :  { %v9389_v10 = vpop.f32.mrb[156].mxu1 }
 0x9a6   :  { %v12342_v29 = vadd.f32 %v9389_v10, %v6905_v44  ;;  %v9391_v5 = vpop.f32.mrb[157].mxu1 }
 0x9a7   :  { %v9392_v54 = vpop.f32.mrb[158].mxu1  ;;  %v19154_v5 = vld [vmem:[#allocation126_spill] sm:$0xff] }
 0x9a8   :  { %v12343_v15 = vadd.f32 %v9392_v54, %v6910_v7  ;;  %v9394_v12 = vpop.f32.mrb[159].mxu1  ;;  %v9602_v9 = vmax.f32 %v12342_v29, 0.0 }
 0x9aa   :  { %v9603_v3 = vmax.f32 %v12343_v15, 0.0 }
 0x9ac   :  { %v18328_v51 = vpack.c.bf16 %v9603_v3, %v9602_v9  ;;  %v7000_v9 = vpop.permute.xlu1 %6999 }
 0x9ad   :  { %v9397_v55 = vpop.f32.mrb[160].mxu1 }
 0x9ae   :  { %v12344_v0 = vadd.f32 %v9397_v55, %v19145_v21  ;;  %v9399_v23 = vpop.f32.mrb[161].mxu1  ;;  %v19155_v21 = vld [vmem:[#allocation129_spill] sm:$0xff] }
 0x9af   :  { %v9400_v8 = vpop.f32.mrb[162].mxu1 }
 0x9b0   :  { %v12345_v24 = vadd.f32 %v9400_v8, %v19146_v22  ;;  %v9402_v11 = vpop.f32.mrb[163].mxu1  ;;  %v9604_v20 = vmax.f32 %v12344_v0, 0.0 }
 0x9b2   :  { %v9605_v25 = vmax.f32 %v12345_v24, 0.0  ;;  %v19156_v24 = vld [vmem:[#allocation130_spill] sm:$0xff] }
 0x9b4   :  { %v9724_v62 = vpack.c.bf16 %v9605_v25, %v9604_v20  ;;  %v18353_v20 = vpop.permute.xlu1 %7089 }
 0x9b5   :  { %v9405_v33 = vpop.f32.mrb[164].mxu1 }
 0x9b6   :  { %v12346_v27 = vadd.f32 %v9405_v33, %v19147_v6  ;;  %v9407_v2 = vpop.f32.mrb[165].mxu1  ;;  %11846 = vmatprep.subr.bf16.mxu1 %v9724_v62 }
 0x9b7   :  { %v9408_v18 = vpop.f32.mrb[166].mxu1  ;;  %11847 = vmatpush3.bf16.msra.mxu1 %v18281_v45  ;;  %v19157_v2 = vld [vmem:[#allocation133_spill] sm:$0xff] }
 0x9b8   :  { %v12347_v36 = vadd.f32 %v9408_v18, %v19148_v56  ;;  %v9410_v35 = vpop.f32.mrb[167].mxu1  ;;  %v9606_v58 = vmax.f32 %v12346_v27, 0.0 }
 0x9ba   :  { %v9607_v38 = vmax.f32 %v12347_v36, 0.0  ;;  %v7010_v36 = vpop.permute.xlu1 %7009 }
 0x9bc   :  { %v9725_v14 = vpack.c.bf16 %v9607_v38, %v9606_v58  ;;  %v19158_v58 = vld [vmem:[#allocation134_spill] sm:$0xff] }
 0x9bd   :  { %v9413_v28 = vpop.f32.mrb[168].mxu1 }
 0x9be   :  { %v12348_v31 = vadd.f32 %v9413_v28, %v19149_v40  ;;  %v9415_v37 = vpop.f32.mrb[169].mxu1  ;;  %11848 = vmatprep.subr.bf16.mxu1 %v9725_v14 }
 0x9bf   :  { %v9416_v4 = vpop.f32.mrb[170].mxu1  ;;  %11849 = vmatpush3.bf16.msra.mxu1 %v18291_v30  ;;  %v18341_v30 = vpop.permute.xlu0 %7074 }
 0x9c0   :  { %v12349_v32 = vadd.f32 %v9416_v4, %v19150_v13  ;;  %v9418_v43 = vpop.f32.mrb[171].mxu1  ;;  %v9608_v47 = vmax.f32 %v12348_v31, 0.0  ;;  %v18360_v37 = vpop.permute.xlu1 %7099  ;;  %v19159_v13 = vld [vmem:[#allocation137_spill] sm:$0xff] }
 0x9c2   :  { %v9609_v59 = vmax.f32 %v12349_v32, 0.0 }
 0x9c3   :  { %v6995_v54 = vpop.permute.xlu0 %6994 }
 0x9c4   :  { %v9726_v45 = vpack.c.bf16 %v9609_v59, %v9608_v47  ;;  %v19160_v59 = vld [vmem:[#allocation138_spill] sm:$0xff] }
 0x9c5   :  { %v9421_v53 = vpop.f32.mrb[172].mxu1 }
 0x9c6   :  { %v12350_v34 = vadd.f32 %v9421_v53, %v19151_v16  ;;  %v9423_v1 = vpop.f32.mrb[173].mxu1  ;;  %11850 = vmatprep.subr.bf16.mxu1 %v9726_v45 }
 0x9c7   :  { %v9424_v50 = vpop.f32.mrb[174].mxu1  ;;  %11851 = vmatpush3.bf16.msra.mxu1 %v18301_v63  ;;  %v18349_v8 = vpop.permute.xlu0 %7084 }
 0x9c8   :  { %v12351_v19 = vadd.f32 %v9424_v50, %v19152_v60  ;;  %v9426_v49 = vpop.f32.mrb[175].mxu1  ;;  %v9610_v26 = vmax.f32 %v12350_v34, 0.0  ;;  %v7020_v1 = vpop.permute.xlu1 %7019 }
 0x9ca   :  { %v9611_v48 = vmax.f32 %v12351_v19, 0.0 }
 0x9cb   :  { %v7005_v6 = vpop.permute.xlu0 %7004 }
 0x9cc   :  { %v9727_v61 = vpack.c.bf16 %v9611_v48, %v9610_v26  ;;  %v13981_v26 = vld [vmem:[%s18800_s5] ss:$16 sps:$4 sm:$0xff]  }
 0x9cd   :  { %v9429_v17 = vpop.f32.mrb[176].mxu1 }
 0x9ce   :  { %v12352_v44 = vadd.f32 %v9429_v17, %v19153_v41  ;;  %v9431_v10 = vpop.f32.mrb[177].mxu1  ;;  %11852 = vmatprep.subr.bf16.mxu1 %v9727_v61 }
 0x9cf   :  { %v9432_v29 = vpop.f32.mrb[178].mxu1  ;;  %11853 = vmatpush3.bf16.msra.mxu1 %v18311_v57  ;;  %v18358_v40 = vpop.permute.xlu0 %7094 }
 0x9d0   :  { %v12353_v63 = vadd.f32 %v9432_v29, %v19154_v5  ;;  %v9434_v7 = vpop.f32.mrb[179].mxu1  ;;  %v9612_v15 = vmax.f32 %v12352_v44, 0.0  ;;  %v18374_v44 = vpop.permute.xlu1 %7109 }
 0x9d2   :  { %v9613_v12 = vmax.f32 %v12353_v63, 0.0 }
 0x9d3   :  { %v7015_v53 = vpop.permute.xlu0 %7014 }
 0x9d4   :  { %v9728_v3 = vpack.c.bf16 %v9613_v12, %v9612_v15  ;;  %v7030_v12 = vpop.permute.xlu1 %7029 }
 0x9d5   :  { %v9437_v55 = vpop.f32.mrb[180].mxu1 }
 0x9d6   :  { %v12354_v0 = vadd.f32 %v9437_v55, %v19155_v21  ;;  %v9439_v23 = vpop.f32.mrb[181].mxu1  ;;  %11854 = vmatprep.subr.bf16.mxu1 %v9728_v3 }
 0x9d7   :  { %v9440_v22 = vpop.f32.mrb[182].mxu1  ;;  %11855 = vmatpush3.bf16.msra.mxu1 %v18318_v39  ;;  %v18368_v48 = vpop.permute.xlu0 %7104 }
 0x9d8   :  { %v12355_v57 = vadd.f32 %v9440_v22, %v19156_v24  ;;  %v9442_v11 = vpop.f32.mrb[183].mxu1  ;;  %v9614_v25 = vmax.f32 %v12354_v0, 0.0 }
 0x9da   :  { %v9615_v62 = vmax.f32 %v12355_v57, 0.0  ;;  %v18388_v57 = vpop.permute.xlu1 %7119 }
 0x9db   :  { %v7025_v63 = vpop.permute.xlu0 %7024 }
 0x9dc   :  { %v9729_v33 = vpack.c.bf16 %v9615_v62, %v9614_v25 }
 0x9dd   :  { %v9445_v27 = vpop.f32.mrb[184].mxu1 }
 0x9de   :  { %v12356_v18 = vadd.f32 %v9445_v27, %v19157_v2  ;;  %v9447_v56 = vpop.f32.mrb[185].mxu1  ;;  %11856 = vmatprep.subr.bf16.mxu1 %v9729_v33  ;;  %v13987_v33 = vld [vmem:[%s18800_s5 + $0x40] ss:$16 sps:$4 sm:$0xff]   ;;  %v13992_v27 = vld [vmem:[%s18800_s5 + $0x64] ss:$16 sps:$4 sm:$0xff]  }
 0x9df   :  { %v9448_v35 = vpop.f32.mrb[186].mxu1  ;;  %11857 = vmatpush3.bf16.msra.mxu1 %v18322_v46  ;;  %v18384_v22 = vpop.permute.xlu0 %7114 }
 0x9e0   :  { %v12357_v39 = vadd.f32 %v9448_v35, %v19158_v58  ;;  %v9450_v38 = vpop.f32.mrb[187].mxu1  ;;  %v9616_v14 = vmax.f32 %v12356_v18, 0.0  ;;  %v7040_v58 = vpop.permute.xlu1 %7039 }
 0x9e2   :  { %v9617_v28 = vmax.f32 %v12357_v39, 0.0 }
 0x9e3   :  { %v7035_v56 = vpop.permute.xlu0 %7034 }
 0x9e4   :  { %v9730_v31 = vpack.c.bf16 %v9617_v28, %v9616_v14 }
 0x9e5   :  { %v9453_v4 = vpop.f32.mrb[188].mxu1 }
 0x9e6   :  { %v12358_v32 = vadd.f32 %v9453_v4, %v19159_v13  ;;  %v9455_v43 = vpop.f32.mrb[189].mxu1  ;;  %11858 = vmatprep.subr.bf16.mxu1 %v9730_v31  ;;  %v13990_v31 = vld [vmem:[%s18800_s5 + $0x60] ss:$16 sps:$4 sm:$0xff]  }
 0x9e7   :  { %v9456_v47 = vpop.f32.mrb[190].mxu1  ;;  %11859 = vmatpush3.bf16.msra.mxu1 %v18326_v42  ;;  %v13986_v42 = vld [vmem:[%s18800_s5 + $0x24] ss:$16 sps:$4 sm:$0xff]   ;;  %v18401_v4 = vpop.permute.xlu0 %7124 }
 0x9e8   :  { %v12359_v46 = vadd.f32 %v9456_v47, %v19160_v59  ;;  %v9458_v45 = vpop.f32.mrb[191].mxu1  ;;  %v9618_v16 = vmax.f32 %v12358_v32, 0.0  ;;  %v13995_v32 = vld [vmem:[%s18800_s5 + $0x84] ss:$16 sps:$4 sm:$0xff]   ;;  %v18406_v59 = vpop.permute.xlu1 %7129 }
 0x9ea   :  { %v9619_v34 = vmax.f32 %v12359_v46, 0.0 }
 0x9ec   :  { %v9731_v50 = vpack.c.bf16 %v9619_v34, %v9618_v16  ;;  %v7045_v16 = vpop.permute.xlu0 %7044 }
 0x9ed   :  { %v9461_v60 = vpop.f32.mrb[192].mxu1 }
 0x9ee   :  { %v12360_v19 = vadd.f32 %v9461_v60, %v6995_v54  ;;  %v9463_v49 = vpop.f32.mrb[193].mxu1  ;;  %11860 = vmatprep.subr.bf16.mxu1 %v9731_v50  ;;  %v13993_v60 = vld [vmem:[%s18800_s5 + $0x80] ss:$16 sps:$4 sm:$0xff]  }
 0x9ef   :  { %v9464_v61 = vpop.f32.mrb[194].mxu1  ;;  %11861 = vmatpush3.bf16.msra.mxu1 %v18328_v51  ;;  %v13984_v51 = vld [vmem:[%s18800_s5 + $0x20] ss:$16 sps:$4 sm:$0xff]  }
 0x9f0   :  { %v12361_v17 = vadd.f32 %v9464_v61, %v7000_v9  ;;  %v9466_v41 = vpop.f32.mrb[195].mxu1  ;;  %v9620_v10 = vmax.f32 %v12360_v19, 0.0  ;;  %v13989_v9 = vld [vmem:[%s18800_s5 + $0x44] ss:$16 sps:$4 sm:$0xff]   ;;  %v7050_v19 = vpop.permute.xlu1 %7049 }
 0x9f2   :  { %v9621_v29 = vmax.f32 %v12361_v17, 0.0  ;;  %10293 = vmatmul.mubr.bf16.vlgmr.msra.gmra.mrb[0].mxu1 %v13981_v26  ;;  %v13998_v26 = vld [vmem:[%s18800_s5 + $0xa4] ss:$16 sps:$4 sm:$0xff]  }
 0x9f3   :  { %10300 = vmatprep.mubr.bf16.mxu1 %v13986_v42 }
 0x9f4   :  { %v18376_v5 = vpack.c.bf16 %v9621_v29, %v9620_v10  ;;  %v18416_v10 = vpop.permute.xlu0 %7134 }
 0x9f5   :  { %v9469_v7 = vpop.f32.mrb[196].mxu1 }
 0x9f6   :  { %v12362_v54 = vadd.f32 %v9469_v7, %v7005_v6  ;;  %v9471_v15 = vpop.f32.mrb[197].mxu1 }
 0x9f7   :  { %v9472_v3 = vpop.f32.mrb[198].mxu1 }
 0x9f8   :  { %v12363_v55 = vadd.f32 %v9472_v3, %v7010_v36  ;;  %v9474_v21 = vpop.f32.mrb[199].mxu1  ;;  %v9622_v0 = vmax.f32 %v12362_v54, 0.0  ;;  %v14001_v3 = vld [vmem:[%s18800_s5 + $0xc4] ss:$16 sps:$4 sm:$0xff]  }
 0x9f9   :  { %v7055_v21 = vpop.permute.xlu0 %7054 }
 0x9fa   :  { %v9623_v23 = vmax.f32 %v12363_v55, 0.0  ;;  %10301 = vmatmul.mubr.bf16.gmra.mrb[4].mxu1 %v13984_v51  ;;  %v13996_v51 = vld [vmem:[%s18800_s5 + $0xa0] ss:$16 sps:$4 sm:$0xff]  }
 0x9fb   :  { %10308 = vmatprep.mubr.bf16.mxu1 %v13989_v9 }
 0x9fc   :  { %v18386_v24 = vpack.c.bf16 %v9623_v23, %v9622_v0 }
 0x9fd   :  { %v9477_v11 = vpop.f32.mrb[200].mxu1 }
 0x9fe   :  { %v12364_v25 = vadd.f32 %v9477_v11, %v7015_v53  ;;  %v9479_v62 = vpop.f32.mrb[201].mxu1 }
 0x9ff   :  { %v9480_v6 = vpop.f32.mrb[202].mxu1 }
 0xa00   :  { %v12365_v2 = vadd.f32 %v9480_v6, %v7020_v1  ;;  %v9482_v18 = vpop.f32.mrb[203].mxu1  ;;  %v9624_v36 = vmax.f32 %v12364_v25, 0.0 }
 0xa02   :  { %v9625_v35 = vmax.f32 %v12365_v2, 0.0  ;;  %10309 = vmatmul.mubr.bf16.gmra.mrb[8].mxu1 %v13987_v33  ;;  %v18433_v2 = vpop.permute.xlu0 %7144 }
 0xa03   :  { %10316 = vmatprep.mubr.bf16.mxu1 %v13992_v27  ;;  %v13999_v27 = vld [vmem:[%s18800_s5 + $0xc0] ss:$16 sps:$4 sm:$0xff]  }
 0xa04   :  { %v18396_v39 = vpack.c.bf16 %v9625_v35, %v9624_v36 }
 0xa05   :  { %v9485_v38 = vpop.f32.mrb[204].mxu1 }
 0xa06   :  { %v12366_v14 = vadd.f32 %v9485_v38, %v7025_v63  ;;  %v9487_v28 = vpop.f32.mrb[205].mxu1  ;;  %v18420_v63 = vpop.permute.xlu1 %7139 }
 0xa07   :  { %v9488_v13 = vpop.f32.mrb[206].mxu1 }
 0xa08   :  { %v12367_v43 = vadd.f32 %v9488_v13, %v7030_v12  ;;  %v9490_v47 = vpop.f32.mrb[207].mxu1  ;;  %v9626_v46 = vmax.f32 %v12366_v14, 0.0 }
 0xa09   :  { %v14002_v47 = vld [vmem:[%s18800_s5 + $0xe0] ss:$16 sps:$4 sm:$0xff]  }
 0xa0a   :  { %v9627_v45 = vmax.f32 %v12367_v43, 0.0  ;;  %10317 = vmatmul.mubr.bf16.gmra.mrb[12].mxu1 %v13990_v31  ;;  %v7060_v11 = vpop.permute.xlu1 %7059  ;;  %v7065_v31 = vpop.permute.xlu0 %7064 }
 0xa0b   :  { %10324 = vmatprep.mubr.bf16.mxu1 %v13995_v32 }
 0xa0c   :  { %v18408_v53 = vpack.c.bf16 %v9627_v45, %v9626_v46 }
 0xa0d   :  { %v9493_v34 = vpop.f32.mrb[208].mxu1 }
 0xa0e   :  { %v12368_v1 = vadd.f32 %v9493_v34, %v7035_v56  ;;  %v9495_v50 = vpop.f32.mrb[209].mxu1  ;;  %v14004_v56 = vld [vmem:[%s18800_s5 + $0xe4] ss:$16 sps:$4 sm:$0xff]  }
 0xa0f   :  { %v9496_v49 = vpop.f32.mrb[210].mxu1 }
 0xa10   :  { %v12369_v61 = vadd.f32 %v9496_v49, %v7040_v58  ;;  %v9498_v42 = vpop.f32.mrb[211].mxu1  ;;  %v9628_v17 = vmax.f32 %v12368_v1, 0.0  ;;  %v18438_v58 = vpop.permute.xlu1 %7149 }
 0xa11   :  { %v14005_v42 = vld [vmem:[%s18800_s5 + $0x100] ss:$16 sps:$4 sm:$0xff]  }
 0xa12   :  { %v9629_v41 = vmax.f32 %v12369_v61, 0.0  ;;  %10325 = vmatmul.mubr.bf16.gmra.mrb[16].mxu1 %v13993_v60 }
 0xa13   :  { %10332 = vmatprep.mubr.bf16.mxu1 %v13998_v26 }
 0xa14   :  { %v18418_v29 = vpack.c.bf16 %v9629_v41, %v9628_v17  ;;  %v7070_v46 = vpop.permute.xlu1 %7069  ;;  %v14010_v41 = vld [vmem:[%s18800_s5 + $0x124] ss:$16 sps:$4 sm:$0xff]  }
 0xa15   :  { %v9501_v7 = vpop.f32.mrb[212].mxu1 }
 0xa16   :  { %v12370_v54 = vadd.f32 %v9501_v7, %v7045_v16  ;;  %v9503_v15 = vpop.f32.mrb[213].mxu1  ;;  %v14007_v16 = vld [vmem:[%s18800_s5 + $0x104] ss:$16 sps:$4 sm:$0xff]  }
 0xa17   :  { %v9504_v12 = vpop.f32.mrb[214].mxu1 }
 0xa18   :  { %v12371_v9 = vadd.f32 %v9504_v12, %v7050_v19  ;;  %v9506_v55 = vpop.f32.mrb[215].mxu1  ;;  %v9630_v0 = vmax.f32 %v12370_v54, 0.0 }
 0xa19   :  { %v14008_v55 = vld [vmem:[%s18800_s5 + $0x120] ss:$16 sps:$4 sm:$0xff]  }
 0xa1a   :  { %v9631_v23 = vmax.f32 %v12371_v9, 0.0  ;;  %10333 = vmatmul.mubr.bf16.gmra.mrb[20].mxu1 %v13996_v51 }
 0xa1b   :  { %10340 = vmatprep.mubr.bf16.mxu1 %v14001_v3 }
 0xa1c   :  { %v18428_v25 = vpack.c.bf16 %v9631_v23, %v9630_v0 }
 0xa1d   :  { %v9509_v62 = vpop.f32.mrb[216].mxu1 }
 0xa1e   :  { %v12372_v33 = vadd.f32 %v9509_v62, %v7055_v21  ;;  %v9511_v6 = vpop.f32.mrb[217].mxu1 }
 0xa1f   :  { %v9512_v18 = vpop.f32.mrb[218].mxu1 }
 0xa20   :  { %v12373_v36 = vadd.f32 %v9512_v18, %v7060_v11  ;;  %v9514_v35 = vpop.f32.mrb[219].mxu1  ;;  %v9632_v38 = vmax.f32 %v12372_v33, 0.0 }
 0xa22   :  { %v9633_v14 = vmax.f32 %v12373_v36, 0.0  ;;  %10341 = vmatmul.mubr.bf16.gmra.mrb[24].mxu1 %v13999_v27 }
 0xa23   :  { %10348 = vmatprep.mubr.bf16.mxu1 %v14004_v56 }
 0xa24   :  { %v18440_v28 = vpack.c.bf16 %v9633_v14, %v9632_v38 }
 0xa25   :  { %v9517_v13 = vpop.f32.mrb[220].mxu1 }
 0xa26   :  { %v12374_v32 = vadd.f32 %v9517_v13, %v7065_v31  ;;  %v9519_v43 = vpop.f32.mrb[221].mxu1 }
 0xa27   :  { %v9520_v45 = vpop.f32.mrb[222].mxu1 }
 0xa28   :  { %v12375_v34 = vadd.f32 %v9520_v45, %v7070_v46  ;;  %v9522_v1 = vpop.f32.mrb[223].mxu1  ;;  %v9634_v50 = vmax.f32 %v12374_v32, 0.0 }
 0xa2a   :  { %v9635_v60 = vmax.f32 %v12375_v34, 0.0  ;;  %10349 = vmatmul.mubr.bf16.gmra.mrb[28].mxu1 %v14002_v47 }
 0xa2b   :  { %10356 = vmatprep.mubr.bf16.mxu1 %v14007_v16 }
 0xa2c   :  { %v18448_v19 = vpack.c.bf16 %v9635_v60, %v9634_v50 }
 0xa2d   :  { %v9525_v49 = vpop.f32.mrb[224].mxu1 }
 0xa2e   :  { %v12376_v26 = vadd.f32 %v9525_v49, %v18341_v30  ;;  %v9527_v61 = vpop.f32.mrb[225].mxu1 }
 0xa2f   :  { %v9528_v17 = vpop.f32.mrb[226].mxu1 }
 0xa30   :  { %v12377_v7 = vadd.f32 %v9528_v17, %v18343_v52  ;;  %v9530_v54 = vpop.f32.mrb[227].mxu1  ;;  %v9636_v15 = vmax.f32 %v12376_v26, 0.0  ;;  %v14013_v52 = vld [vmem:[%s18800_s5 + $0x144] ss:$16 sps:$4 sm:$0xff]  }
 0xa32   :  { %v9637_v51 = vmax.f32 %v12377_v7, 0.0  ;;  %10357 = vmatmul.mubr.bf16.gmra.mrb[32].mxu1 %v14005_v42 }
 0xa33   :  { %10364 = vmatprep.mubr.bf16.mxu1 %v14010_v41 }
 0xa34   :  { %v9740_v12 = vpack.c.bf16 %v9637_v51, %v9636_v15 }
 0xa35   :  { %v9533_v3 = vpop.f32.mrb[228].mxu1 }
 0xa36   :  { %v12378_v30 = vadd.f32 %v9533_v3, %v18349_v8  ;;  %v9535_v9 = vpop.f32.mrb[229].mxu1  ;;  %11958 = vmatprep.subr.bf16.mxu1 %v9740_v12 }
 0xa37   :  { %v9536_v21 = vpop.f32.mrb[230].mxu1  ;;  %11959 = vmatpush3.bf16.msra.mxu1 %v18376_v5  ;;  %v14011_v5 = vld [vmem:[%s18800_s5 + $0x140] ss:$16 sps:$4 sm:$0xff]  }
 0xa38   :  { %v12379_v0 = vadd.f32 %v9536_v21, %v18353_v20  ;;  %v9538_v23 = vpop.f32.mrb[231].mxu1  ;;  %v9638_v11 = vmax.f32 %v12378_v30, 0.0  ;;  %v14016_v20 = vld [vmem:[%s18800_s5 + $0x164] ss:$16 sps:$4 sm:$0xff]  }
 0xa3a   :  { %v9639_v62 = vmax.f32 %v12379_v0, 0.0  ;;  %10365 = vmatmul.mubr.bf16.gmra.mrb[36].mxu1 %v14008_v55 }
 0xa3b   :  { %10372 = vmatprep.mubr.bf16.mxu1 %v14013_v52 }
 0xa3c   :  { %v9741_v8 = vpack.c.bf16 %v9639_v62, %v9638_v11 }
 0xa3d   :  { %v9541_v33 = vpop.f32.mrb[232].mxu1 }
 0xa3e   :  { %v12380_v6 = vadd.f32 %v9541_v33, %v18358_v40  ;;  %v9543_v27 = vpop.f32.mrb[233].mxu1  ;;  %11960 = vmatprep.subr.bf16.mxu1 %v9741_v8 }
 0xa3f   :  { %v9544_v18 = vpop.f32.mrb[234].mxu1  ;;  %11961 = vmatpush3.bf16.msra.mxu1 %v18386_v24  ;;  %v14014_v24 = vld [vmem:[%s18800_s5 + $0x160] ss:$16 sps:$4 sm:$0xff]  }
 0xa40   :  { %v12381_v56 = vadd.f32 %v9544_v18, %v18360_v37  ;;  %v9546_v36 = vpop.f32.mrb[235].mxu1  ;;  %v9640_v35 = vmax.f32 %v12380_v6, 0.0  ;;  %v14019_v37 = vld [vmem:[%s18800_s5 + $0x184] ss:$16 sps:$4 sm:$0xff]  }
 0xa41   :  { %v14040_v36 = vld [vmem:[%s18800_s5 + $0x6c] ss:$16 sps:$4 sm:$0xff]  }
 0xa42   :  { %v9641_v38 = vmax.f32 %v12381_v56, 0.0  ;;  %10373 = vmatmul.mubr.bf16.gmra.mrb[40].mxu1 %v14011_v5  ;;  %v14037_v56 = vld [vmem:[%s18800_s5 + $0x4c] ss:$16 sps:$4 sm:$0xff]  }
 0xa43   :  { %10380 = vmatprep.mubr.bf16.mxu1 %v14016_v20  ;;  %v14029_v20 = vld [vmem:[%s18800_s5 + $0x8] ss:$16 sps:$4 sm:$0xff]  }
 0xa44   :  { %v9742_v40 = vpack.c.bf16 %v9641_v38, %v9640_v35  ;;  %v14038_v35 = vld [vmem:[%s18800_s5 + $0x68] ss:$16 sps:$4 sm:$0xff]   ;;  %v14043_v38 = vld [vmem:[%s18800_s5 + $0x8c] ss:$16 sps:$4 sm:$0xff]  }
 0xa45   :  { %v9549_v14 = vpop.f32.mrb[236].mxu1 }
 0xa46   :  { %v12382_v31 = vadd.f32 %v9549_v14, %v18368_v48  ;;  %v9551_v13 = vpop.f32.mrb[237].mxu1  ;;  %11962 = vmatprep.subr.bf16.mxu1 %v9742_v40  ;;  %v14041_v40 = vld [vmem:[%s18800_s5 + $0x88] ss:$16 sps:$4 sm:$0xff]   ;;  %v14046_v14 = vld [vmem:[%s18800_s5 + $0xac] ss:$16 sps:$4 sm:$0xff]  }
 0xa47   :  { %v9552_v32 = vpop.f32.mrb[238].mxu1  ;;  %11963 = vmatpush3.bf16.msra.mxu1 %v18396_v39  ;;  %v14017_v39 = vld [vmem:[%s18800_s5 + $0x180] ss:$16 sps:$4 sm:$0xff]   ;;  %v14049_v13 = vld [vmem:[%s18800_s5 + $0xcc] ss:$16 sps:$4 sm:$0xff]  }
 0xa48   :  { %v12383_v43 = vadd.f32 %v9552_v32, %v18374_v44  ;;  %v9554_v47 = vpop.f32.mrb[239].mxu1  ;;  %v9642_v46 = vmax.f32 %v12382_v31, 0.0  ;;  %v14022_v44 = vld [vmem:[%s18800_s5 + $0x1a4] ss:$16 sps:$4 sm:$0xff]   ;;  %v14044_v31 = vld [vmem:[%s18800_s5 + $0xa8] ss:$16 sps:$4 sm:$0xff]  }
 0xa49   :  { %v14052_v32 = vld [vmem:[%s18800_s5 + $0xec] ss:$16 sps:$4 sm:$0xff]   ;;  %v14053_v47 = vld [vmem:[%s18800_s5 + $0x108] ss:$16 sps:$4 sm:$0xff]  }
 0xa4a   :  { %v9643_v45 = vmax.f32 %v12383_v43, 0.0  ;;  %10381 = vmatmul.mubr.bf16.gmra.mrb[44].mxu1 %v14014_v24  ;;  %v14047_v24 = vld [vmem:[%s18800_s5 + $0xc8] ss:$16 sps:$4 sm:$0xff]   ;;  %v14055_v43 = vld [vmem:[%s18800_s5 + $0x10c] ss:$16 sps:$4 sm:$0xff]  }
 0xa4b   :  { %10388 = vmatprep.mubr.bf16.mxu1 %v14019_v37  ;;  %v14050_v37 = vld [vmem:[%s18800_s5 + $0xe8] ss:$16 sps:$4 sm:$0xff]  }
 0xa4c   :  { %v9743_v48 = vpack.c.bf16 %v9643_v45, %v9642_v46  ;;  %v14058_v46 = vld [vmem:[%s18800_s5 + $0x12c] ss:$16 sps:$4 sm:$0xff]   ;;  %v14056_v45 = vld [vmem:[%s18800_s5 + $0x128] ss:$16 sps:$4 sm:$0xff]  }
 0xa4d   :  { %v9557_v16 = vpop.f32.mrb[240].mxu1 }
 0xa4e   :  { %v12384_v34 = vadd.f32 %v9557_v16, %v18384_v22  ;;  %v9559_v1 = vpop.f32.mrb[241].mxu1  ;;  %11964 = vmatprep.subr.bf16.mxu1 %v9743_v48  ;;  %v14061_v48 = vld [vmem:[%s18800_s5 + $0x14c] ss:$16 sps:$4 sm:$0xff]   ;;  %v14059_v16 = vld [vmem:[%s18800_s5 + $0x148] ss:$16 sps:$4 sm:$0xff]  }
 0xa4f   :  { %v9560_v50 = vpop.f32.mrb[242].mxu1  ;;  %11965 = vmatpush3.bf16.msra.mxu1 %v18408_v53  ;;  %v14020_v53 = vld [vmem:[%s18800_s5 + $0x1a0] ss:$16 sps:$4 sm:$0xff]  }
 0xa50   :  { %v12385_v60 = vadd.f32 %v9560_v50, %v18388_v57  ;;  %v9562_v49 = vpop.f32.mrb[243].mxu1  ;;  %v9644_v26 = vmax.f32 %v12384_v34, 0.0  ;;  %v14025_v57 = vld [vmem:[%s18800_s5 + $0x1c4] ss:$16 sps:$4 sm:$0xff]   ;;  %v14064_v34 = vld [vmem:[%s18800_s5 + $0x16c] ss:$16 sps:$4 sm:$0xff]  }
 0xa51   :  { %v14062_v50 = vld [vmem:[%s18800_s5 + $0x168] ss:$16 sps:$4 sm:$0xff]   ;;  %v14067_v49 = vld [vmem:[%s18800_s5 + $0x18c] ss:$16 sps:$4 sm:$0xff]  }
 0xa52   :  { %v9645_v61 = vmax.f32 %v12385_v60, 0.0  ;;  %10389 = vmatmul.mubr.bf16.gmra.mrb[48].mxu1 %v14017_v39 }
 0xa53   :  { %10396 = vmatprep.mubr.bf16.mxu1 %v14022_v44 }
 0xa54   :  { %v9744_v22 = vpack.c.bf16 %v9645_v61, %v9644_v26 }
 0xa55   :  { %v9565_v42 = vpop.f32.mrb[244].mxu1 }
 0xa56   :  { %v12386_v17 = vadd.f32 %v9565_v42, %v18401_v4  ;;  %v9567_v41 = vpop.f32.mrb[245].mxu1  ;;  %11966 = vmatprep.subr.bf16.mxu1 %v9744_v22 }
 0xa57   :  { %v9568_v7 = vpop.f32.mrb[246].mxu1  ;;  %11967 = vmatpush3.bf16.msra.mxu1 %v18418_v29  ;;  %v14023_v29 = vld [vmem:[%s18800_s5 + $0x1c0] ss:$16 sps:$4 sm:$0xff]  }
 0xa58   :  { %v12387_v54 = vadd.f32 %v9568_v7, %v18406_v59  ;;  %v9570_v15 = vpop.f32.mrb[247].mxu1  ;;  %v9646_v51 = vmax.f32 %v12386_v17, 0.0  ;;  %v14028_v59 = vld [vmem:[%s18800_s5 + $0x1e4] ss:$16 sps:$4 sm:$0xff]   ;;  %v14065_v17 = vld [vmem:[%s18800_s5 + $0x188] ss:$16 sps:$4 sm:$0xff]  }
 0xa59   :  { %v14070_v7 = vld [vmem:[%s18800_s5 + $0x1ac] ss:$16 sps:$4 sm:$0xff]  }
 0xa5a   :  { %v9647_v12 = vmax.f32 %v12387_v54, 0.0  ;;  %10397 = vmatmul.mubr.bf16.gmra.mrb[52].mxu1 %v14020_v53 }
 0xa5b   :  { %10404 = vmatprep.mubr.bf16.mxu1 %v14025_v57 }
 0xa5c   :  { %v9745_v4 = vpack.c.bf16 %v9647_v12, %v9646_v51  ;;  %v14068_v12 = vld [vmem:[%s18800_s5 + $0x1a8] ss:$16 sps:$4 sm:$0xff]  }
 0xa5d   :  { %v9573_v3 = vpop.f32.mrb[248].mxu1 }
 0xa5e   :  { %v12388_v30 = vadd.f32 %v9573_v3, %v18416_v10  ;;  %v9575_v9 = vpop.f32.mrb[249].mxu1  ;;  %11968 = vmatprep.subr.bf16.mxu1 %v9745_v4 }
 0xa5f   :  { %v9576_v55 = vpop.f32.mrb[250].mxu1  ;;  %11969 = vmatpush3.bf16.msra.mxu1 %v18428_v25  ;;  %v14026_v25 = vld [vmem:[%s18800_s5 + $0x1e0] ss:$16 sps:$4 sm:$0xff]  }
 0xa60   :  { %v12389_v21 = vadd.f32 %v9576_v55, %v18420_v63  ;;  %v9578_v52 = vpop.f32.mrb[251].mxu1  ;;  %v9648_v0 = vmax.f32 %v12388_v30, 0.0  ;;  %v14031_v63 = vld [vmem:[%s18800_s5 + $0xc] ss:$16 sps:$4 sm:$0xff]  }
 0xa61   :  { %v14073_v30 = vld [vmem:[%s18800_s5 + $0x1cc] ss:$16 sps:$4 sm:$0xff]  }
 0xa62   :  { %v9649_v23 = vmax.f32 %v12389_v21, 0.0  ;;  %10405 = vmatmul.mubr.bf16.gmra.mrb[56].mxu1 %v14023_v29  ;;  %v14071_v21 = vld [vmem:[%s18800_s5 + $0x1c8] ss:$16 sps:$4 sm:$0xff]  }
 0xa63   :  { %10412 = vmatprep.mubr.bf16.mxu1 %v14028_v59 }
 0xa64   :  { %v9746_v10 = vpack.c.bf16 %v9649_v23, %v9648_v0  ;;  %v14076_v23 = vld [vmem:[%s18800_s5 + $0x1ec] ss:$16 sps:$4 sm:$0xff]  }
 0xa65   :  { %v9581_v11 = vpop.f32.mrb[252].mxu1 }
 0xa66   :  { %v12390_v62 = vadd.f32 %v9581_v11, %v18433_v2  ;;  %v9583_v8 = vpop.f32.mrb[253].mxu1  ;;  %11970 = vmatprep.subr.bf16.mxu1 %v9746_v10 }
 0xa67   :  { %v9584_v33 = vpop.f32.mrb[254].mxu1  ;;  %11971 = vmatpush3.bf16.msra.mxu1 %v18440_v28  ;;  %v14034_v28 = vld [vmem:[%s18800_s5 + $0x2c] ss:$16 sps:$4 sm:$0xff]  }
 0xa68   :  { %v12391_v6 = vadd.f32 %v9584_v33, %v18438_v58  ;;  %v9586_v27 = vpop.f32.mrb[255].mxu1  ;;  %v9650_v5 = vmax.f32 %v12390_v62, 0.0  ;;  %v14032_v58 = vld [vmem:[%s18800_s5 + $0x28] ss:$16 sps:$4 sm:$0xff]  }
 0xa6a   :  { %v9651_v18 = vmax.f32 %v12391_v6, 0.0  ;;  %10413 = vmatmul.mubr.bf16.gmra.mrb[60].mxu1 %v14026_v25  ;;  %v14074_v25 = vld [vmem:[%s18800_s5 + $0x1e8] ss:$16 sps:$4 sm:$0xff]  }
 0xa6b   :  { %10453 = vmatprep.mubr.bf16.mxu1 %v14031_v63 }
 0xa6c   :  { %v9747_v2 = vpack.c.bf16 %v9651_v18, %v9650_v5 }
 0xa6e   :  { %11972 = vmatprep.subr.bf16.mxu1 %v9747_v2 }
 0xa6f   :  { %11973 = vmatpush3.bf16.msra.mxu1 %v18448_v19  ;;  %v14035_v19 = vld [vmem:[%s18800_s5 + $0x48] ss:$16 sps:$4 sm:$0xff]  }
 0xa72   :  { %10454 = vmatmul.mubr.bf16.vlgmr.msra.gmra.mrb[64].mxu1 %v14029_v20 }
 0xa73   :  { %10461 = vmatprep.mubr.bf16.mxu1 %v14034_v28 }
 0xa7a   :  { %10462 = vmatmul.mubr.bf16.gmra.mrb[68].mxu1 %v14032_v58 }
 0xa7b   :  { %10469 = vmatprep.mubr.bf16.mxu1 %v14037_v56 }
 0xa82   :  { %10470 = vmatmul.mubr.bf16.gmra.mrb[72].mxu1 %v14035_v19 }
 0xa83   :  { %10477 = vmatprep.mubr.bf16.mxu1 %v14040_v36 }
 0xa8a   :  { %10478 = vmatmul.mubr.bf16.gmra.mrb[76].mxu1 %v14038_v35 }
 0xa8b   :  { %10485 = vmatprep.mubr.bf16.mxu1 %v14043_v38 }
 0xa92   :  { %10486 = vmatmul.mubr.bf16.gmra.mrb[80].mxu1 %v14041_v40 }
 0xa93   :  { %10493 = vmatprep.mubr.bf16.mxu1 %v14046_v14 }
 0xa9a   :  { %10494 = vmatmul.mubr.bf16.gmra.mrb[84].mxu1 %v14044_v31 }
 0xa9b   :  { %10501 = vmatprep.mubr.bf16.mxu1 %v14049_v13 }
 0xaa2   :  { %10502 = vmatmul.mubr.bf16.gmra.mrb[88].mxu1 %v14047_v24 }
 0xaa3   :  { %10509 = vmatprep.mubr.bf16.mxu1 %v14052_v32 }
 0xaaa   :  { %10510 = vmatmul.mubr.bf16.gmra.mrb[92].mxu1 %v14050_v37 }
 0xaab   :  { %10517 = vmatprep.mubr.bf16.mxu1 %v14055_v43 }
 0xab2   :  { %10518 = vmatmul.mubr.bf16.gmra.mrb[96].mxu1 %v14053_v47 }
 0xab3   :  { %10525 = vmatprep.mubr.bf16.mxu1 %v14058_v46 }
 0xaba   :  { %10526 = vmatmul.mubr.bf16.gmra.mrb[100].mxu1 %v14056_v45 }
 0xabb   :  { %10533 = vmatprep.mubr.bf16.mxu1 %v14061_v48  ;;  %v18649_v48 = vpop.permute.xlu0 %9782 }
 0xac2   :  { %10534 = vmatmul.mubr.bf16.gmra.mrb[104].mxu1 %v14059_v16 }
 0xac3   :  { %10541 = vmatprep.mubr.bf16.mxu1 %v14064_v34 }
 0xac5   :  { %v11862_v1 = vpop.f32.mrb[0].mxu1 }
 0xac6   :  { %v11863_v39 = vpop.f32.mrb[1].mxu1 }
 0xac7   :  { %v18591_v44 = vadd.f32 %v11863_v39, %v11862_v1  ;;  %v11865_v60 = vpop.f32.mrb[2].mxu1  ;;  %v18653_v1 = vpop.permute.xlu1 %9787 }
 0xac8   :  { %v11866_v26 = vpop.f32.mrb[3].mxu1 }
 0xac9   :  { %v18596_v61 = vadd.f32 %v11866_v26, %v11865_v60 }
 0xaca   :  { %10542 = vmatmul.mubr.bf16.gmra.mrb[108].mxu1 %v14062_v50  ;;  %v18655_v50 = vpop.permute.xlu0 %9792 }
 0xacb   :  { %10549 = vmatprep.mubr.bf16.mxu1 %v14067_v49 }
 0xacd   :  { %v11868_v22 = vpop.f32.mrb[4].mxu1 }
 0xace   :  { %v11869_v42 = vpop.f32.mrb[5].mxu1 }
 0xacf   :  { %v18601_v41 = vadd.f32 %v11869_v42, %v11868_v22  ;;  %v11871_v53 = vpop.f32.mrb[6].mxu1  ;;  %v18659_v22 = vpop.permute.xlu1 %9797 }
 0xad0   :  { %v11872_v57 = vpop.f32.mrb[7].mxu1 }
 0xad1   :  { %v18606_v54 = vadd.f32 %v11872_v57, %v11871_v53  ;;  %v18663_v53 = vpop.permute.xlu0 %9802 }
 0xad2   :  { %10550 = vmatmul.mubr.bf16.gmra.mrb[112].mxu1 %v14065_v17 }
 0xad3   :  { %10557 = vmatprep.mubr.bf16.mxu1 %v14070_v7  ;;  %v18665_v57 = vpop.permute.xlu1 %9807 }
 0xad5   :  { %v11874_v15 = vpop.f32.mrb[8].mxu1 }
 0xad6   :  { %v11875_v51 = vpop.f32.mrb[9].mxu1 }
 0xad7   :  { %v18611_v4 = vadd.f32 %v11875_v51, %v11874_v15  ;;  %v11877_v3 = vpop.f32.mrb[10].mxu1 }
 0xad8   :  { %v11878_v9 = vpop.f32.mrb[11].mxu1 }
 0xad9   :  { %v18616_v29 = vadd.f32 %v11878_v9, %v11877_v3  ;;  %v18671_v9 = vpop.permute.xlu0 %9812 }
 0xada   :  { %10558 = vmatmul.mubr.bf16.gmra.mrb[116].mxu1 %v14068_v12 }
 0xadb   :  { %10565 = vmatprep.mubr.bf16.mxu1 %v14073_v30 }
 0xadd   :  { %v11880_v55 = vpop.f32.mrb[12].mxu1 }
 0xade   :  { %v11881_v59 = vpop.f32.mrb[13].mxu1 }
 0xadf   :  { %v18621_v52 = vadd.f32 %v11881_v59, %v11880_v55  ;;  %v11883_v0 = vpop.f32.mrb[14].mxu1  ;;  %v18673_v55 = vpop.permute.xlu1 %9817 }
 0xae0   :  { %v11884_v10 = vpop.f32.mrb[15].mxu1 }
 0xae1   :  { %v18626_v11 = vadd.f32 %v11884_v10, %v11883_v0  ;;  %v18677_v10 = vpop.permute.xlu0 %9822 }
 0xae2   :  { %10566 = vmatmul.mubr.bf16.gmra.mrb[120].mxu1 %v14071_v21 }
 0xae3   :  { %10573 = vmatprep.mubr.bf16.mxu1 %v14076_v23 }
 0xae5   :  { %v11886_v62 = vpop.f32.mrb[16].mxu1 }
 0xae6   :  { %v11887_v8 = vpop.f32.mrb[17].mxu1 }
 0xae7   :  { %v18631_v33 = vadd.f32 %v11887_v8, %v11886_v62  ;;  %v11889_v63 = vpop.f32.mrb[18].mxu1 }
 0xae8   :  { %v11890_v6 = vpop.f32.mrb[19].mxu1 }
 0xae9   :  { %v18633_v27 = vadd.f32 %v11890_v6, %v11889_v63  ;;  %v18683_v6 = vpop.permute.xlu0 %9832 }
 0xaea   :  { %10574 = vmatmul.mubr.bf16.gmra.mrb[124].mxu1 %v14074_v25  ;;  %v18681_v25 = vpop.permute.xlu1 %9827 }
 0xaed   :  { %v11892_v5 = vpop.f32.mrb[20].mxu1 }
 0xaee   :  { %v11893_v18 = vpop.f32.mrb[21].mxu1 }
 0xaef   :  { %v18635_v2 = vadd.f32 %v11893_v18, %v11892_v5  ;;  %v11895_v20 = vpop.f32.mrb[22].mxu1 }
 0xaf0   :  { %v11896_v28 = vpop.f32.mrb[23].mxu1 }
 0xaf1   :  { %v18637_v58 = vadd.f32 %v11896_v28, %v11895_v20  ;;  %v18687_v28 = vpop.permute.xlu1 %9837 }
 0xaf5   :  { %v11898_v56 = vpop.f32.mrb[24].mxu1 }
 0xaf6   :  { %v11899_v19 = vpop.f32.mrb[25].mxu1 }
 0xaf7   :  { %v18639_v36 = vadd.f32 %v11899_v19, %v11898_v56  ;;  %v11901_v35 = vpop.f32.mrb[26].mxu1 }
 0xaf8   :  { %v11902_v38 = vpop.f32.mrb[27].mxu1 }
 0xaf9   :  { %v18641_v40 = vadd.f32 %v11902_v38, %v11901_v35  ;;  %v18691_v35 = vpop.permute.xlu0 %9842 }
 0xafd   :  { %v11904_v14 = vpop.f32.mrb[28].mxu1 }
 0xafe   :  { %v11905_v31 = vpop.f32.mrb[29].mxu1 }
 0xaff   :  { %v18643_v13 = vadd.f32 %v11905_v31, %v11904_v14  ;;  %v11907_v24 = vpop.f32.mrb[30].mxu1  ;;  %v18693_v14 = vpop.permute.xlu1 %9847 }
 0xb00   :  { %v11908_v32 = vpop.f32.mrb[31].mxu1 }
 0xb01   :  { %v18645_v37 = vadd.f32 %v11908_v32, %v11907_v24 }
 0xb05   :  { %v11910_v43 = vpop.f32.mrb[32].mxu1 }
 0xb06   :  { %v11911_v47 = vpop.f32.mrb[33].mxu1 }
 0xb07   :  { %v18647_v46 = vadd.f32 %v11911_v47, %v11910_v43  ;;  %v11913_v45 = vpop.f32.mrb[34].mxu1 }
 0xb08   :  { %v11914_v16 = vpop.f32.mrb[35].mxu1 }
 0xb09   :  { %v18651_v34 = vadd.f32 %v11914_v16, %v11913_v45  ;;  %v18699_v45 = vpop.permute.xlu0 %9852  ;;  %v18701_v16 = vpop.permute.xlu1 %9857 }
 0xb0d   :  { %v11916_v39 = vpop.f32.mrb[36].mxu1 }
 0xb0e   :  { %v11917_v60 = vpop.f32.mrb[37].mxu1 }
 0xb0f   :  { %v18657_v49 = vadd.f32 %v11917_v60, %v11916_v39  ;;  %v11919_v26 = vpop.f32.mrb[38].mxu1 }
 0xb10   :  { %v11920_v42 = vpop.f32.mrb[39].mxu1 }
 0xb11   :  { %v18661_v17 = vadd.f32 %v11920_v42, %v11919_v26 }
 0xb15   :  { %v11922_v7 = vpop.f32.mrb[40].mxu1 }
 0xb16   :  { %v11923_v15 = vpop.f32.mrb[41].mxu1 }
 0xb17   :  { %v18667_v51 = vadd.f32 %v11923_v15, %v11922_v7  ;;  %v11925_v12 = vpop.f32.mrb[42].mxu1  ;;  %v18705_v7 = vpop.permute.xlu0 %9862 }
 0xb18   :  { %v11926_v3 = vpop.f32.mrb[43].mxu1 }
 0xb19   :  { %v18669_v30 = vadd.f32 %v11926_v3, %v11925_v12  ;;  %v18709_v3 = vpop.permute.xlu1 %9867 }
 0xb1d   :  { %v11928_v59 = vpop.f32.mrb[44].mxu1 }
 0xb1e   :  { %v11929_v21 = vpop.f32.mrb[45].mxu1 }
 0xb1f   :  { %v18675_v0 = vadd.f32 %v11929_v21, %v11928_v59  ;;  %v11931_v23 = vpop.f32.mrb[46].mxu1  ;;  %v18711_v21 = vpop.permute.xlu0 %9872 }
 0xb20   :  { %v11932_v62 = vpop.f32.mrb[47].mxu1 }
 0xb21   :  { %19161 = vst [vmem:[#allocation25_spill] sm:$0xff] %v18675_v0  ;;  %v18679_v8 = vadd.f32 %v11932_v62, %v11931_v23 }
 0xb23   :  { %19162 = vst [vmem:[#allocation26_spill] sm:$0xff] %v18679_v8 }
 0xb25   :  { %v11934_v63 = vpop.f32.mrb[48].mxu1 }
 0xb26   :  { %v11935_v5 = vpop.f32.mrb[49].mxu1 }
 0xb27   :  { %v18685_v18 = vadd.f32 %v11935_v5, %v11934_v63  ;;  %v11937_v20 = vpop.f32.mrb[50].mxu1  ;;  %v18715_v5 = vpop.permute.xlu1 %9877 }
 0xb28   :  { %v11938_v56 = vpop.f32.mrb[51].mxu1 }
 0xb29   :  { %19163 = vst [vmem:[#allocation27_spill] sm:$0xff] %v18685_v18  ;;  %v18689_v19 = vadd.f32 %v11938_v56, %v11937_v20 }
 0xb2b   :  { %19164 = vst [vmem:[#allocation28_spill] sm:$0xff] %v18689_v19  ;;  %v10303_v19 = vadd.f32 %v18601_v41, %v18655_v50  ;;  %v10311_v50 = vadd.f32 %v18611_v4, %v18663_v53  ;;  %v10319_v53 = vadd.f32 %v18621_v52, %v18671_v9  ;;  %v10327_v52 = vadd.f32 %v18631_v33, %v18677_v10 }
 0xb2c   :  { %v10335_v10 = vadd.f32 %v18635_v2, %v18683_v6  ;;  %v10343_v6 = vadd.f32 %v18639_v36, %v18691_v35  ;;  %v10351_v36 = vadd.f32 %v18643_v13, %v18699_v45 }
 0xb2d   :  { %v11940_v38 = vpop.f32.mrb[52].mxu1 }
 0xb2e   :  { %v11941_v31 = vpop.f32.mrb[53].mxu1 }
 0xb2f   :  { %v18695_v24 = vadd.f32 %v11941_v31, %v11940_v38  ;;  %v11943_v32 = vpop.f32.mrb[54].mxu1  ;;  %v18719_v38 = vpop.permute.xlu0 %9882 }
 0xb30   :  { %v11944_v43 = vpop.f32.mrb[55].mxu1 }
 0xb31   :  { %19165 = vst [vmem:[#allocation29_spill] sm:$0xff] %v18695_v24  ;;  %v18697_v47 = vadd.f32 %v11944_v43, %v11943_v32  ;;  %v18721_v32 = vpop.permute.xlu1 %9887 }
 0xb33   :  { %19166 = vst [vmem:[#allocation30_spill] sm:$0xff] %v18697_v47 }
 0xb35   :  { %v11946_v39 = vpop.f32.mrb[56].mxu1 }
 0xb36   :  { %v11947_v60 = vpop.f32.mrb[57].mxu1 }
 0xb37   :  { %v18703_v26 = vadd.f32 %v11947_v60, %v11946_v39  ;;  %v11949_v42 = vpop.f32.mrb[58].mxu1  ;;  %v10295_v39 = vadd.f32 %v18591_v44, %v18649_v48 }
 0xb38   :  { %v11950_v15 = vpop.f32.mrb[59].mxu1 }
 0xb39   :  { %19167 = vst [vmem:[#allocation31_spill] sm:$0xff] %v18703_v26  ;;  %v18707_v12 = vadd.f32 %v11950_v15, %v11949_v42 }
 0xb3b   :  { %19168 = vst [vmem:[#allocation32_spill] sm:$0xff] %v18707_v12  ;;  %v10649_v12 = vpop.permute.xlu0 %10648 }
 0xb3d   :  { %v11952_v59 = vpop.f32.mrb[60].mxu1 }
 0xb3e   :  { %v11953_v23 = vpop.f32.mrb[61].mxu1 }
 0xb3f   :  { %v18713_v62 = vadd.f32 %v11953_v23, %v11952_v59  ;;  %v11955_v63 = vpop.f32.mrb[62].mxu1  ;;  %v10298_v59 = vadd.f32 %v18596_v61, %v18653_v1  ;;  %v10306_v61 = vadd.f32 %v18606_v54, %v18659_v22  ;;  %v10314_v22 = vadd.f32 %v18616_v29, %v18665_v57 }
 0xb40   :  { %v11956_v20 = vpop.f32.mrb[63].mxu1  ;;  %v10322_v29 = vadd.f32 %v18626_v11, %v18673_v55  ;;  %v10330_v55 = vadd.f32 %v18633_v27, %v18681_v25  ;;  %v10338_v25 = vadd.f32 %v18637_v58, %v18687_v28  ;;  %v10346_v58 = vadd.f32 %v18641_v40, %v18693_v14 }
 0xb41   :  { %19169 = vst [vmem:[#allocation33_spill] sm:$0xff] %v18713_v62  ;;  %v18717_v56 = vadd.f32 %v11956_v20, %v11955_v63  ;;  %v10354_v14 = vadd.f32 %v18645_v37, %v18701_v16 }
 0xb43   :  { %19170 = vst [vmem:[#allocation34_spill] sm:$0xff] %v18717_v56  ;;  %v10654_v56 = vpop.permute.xlu1 %10653 }
 0xb45   :  { %v11974_v31 = vpop.f32.mrb[64].mxu1 }
 0xb46   :  { %v11975_v43 = vpop.f32.mrb[65].mxu1 }
 0xb47   :  { %v11976_v60 = vadd.f32 %v11975_v43, %v11974_v31  ;;  %v11977_v42 = vpop.f32.mrb[66].mxu1  ;;  %v10659_v43 = vpop.permute.xlu0 %10658 }
 0xb48   :  { %v11978_v15 = vpop.f32.mrb[67].mxu1 }
 0xb49   :  { %v10456_v23 = vadd.f32 %v11976_v60, %v10295_v39  ;;  %v11979_v62 = vadd.f32 %v11978_v15, %v11977_v42 }
 0xb4b   :  { %v10582_v63 = vmax.f32 %v10456_v23, 0.0  ;;  %v10459_v20 = vadd.f32 %v11979_v62, %v10298_v59  ;;  %v10664_v62 = vpop.permute.xlu1 %10663  ;;  %v10669_v0 = vpop.permute.xlu0 %10668 }
 0xb4d   :  { %v10583_v26 = vmax.f32 %v10459_v20, 0.0  ;;  %v11980_v47 = vpop.f32.mrb[68].mxu1  ;;  %v10806_v18 = vmul.f32 %v10649_v12, %v10582_v63 }
 0xb4e   :  { %v11981_v24 = vpop.f32.mrb[69].mxu1 }
 0xb4f   :  { %v10807_v44 = vmul.f32 %v10654_v56, %v10583_v26  ;;  %v11982_v48 = vadd.f32 %v11981_v24, %v11980_v47  ;;  %v11983_v31 = vpop.f32.mrb[70].mxu1  ;;  %v10674_v56 = vpop.permute.xlu1 %10673 }
 0xb50   :  { %v11984_v8 = vpop.f32.mrb[71].mxu1 }
 0xb51   :  { %v10838_v1 = vadd.f32 %v10807_v44, %v10806_v18  ;;  %v10464_v39 = vadd.f32 %v11982_v48, %v10303_v19  ;;  %v11985_v60 = vadd.f32 %v11984_v8, %v11983_v31  ;;  %v10679_v48 = vpop.permute.xlu0 %10678 }
 0xb53   :  { %v10584_v42 = vmax.f32 %v10464_v39, 0.0  ;;  %v10467_v15 = vadd.f32 %v11985_v60, %v10306_v61  ;;  %v10684_v39 = vpop.permute.xlu1 %10683 }
 0xb55   :  { %v10808_v59 = vmul.f32 %v10659_v43, %v10584_v42  ;;  %v10585_v23 = vmax.f32 %v10467_v15, 0.0  ;;  %v11986_v20 = vpop.f32.mrb[72].mxu1 }
 0xb56   :  { %v11987_v41 = vpop.f32.mrb[73].mxu1 }
 0xb57   :  { %v10839_v24 = vadd.f32 %v10838_v1, %v10808_v59  ;;  %v10809_v47 = vmul.f32 %v10664_v62, %v10585_v23  ;;  %v11988_v26 = vadd.f32 %v11987_v41, %v11986_v20  ;;  %v11989_v12 = vpop.f32.mrb[74].mxu1  ;;  %v10689_v20 = vpop.permute.xlu0 %10688 }
 0xb58   :  { %v11990_v54 = vpop.f32.mrb[75].mxu1 }
 0xb59   :  { %v10840_v8 = vadd.f32 %v10839_v24, %v10809_v47  ;;  %v10472_v18 = vadd.f32 %v11988_v26, %v10311_v50  ;;  %v11991_v19 = vadd.f32 %v11990_v54, %v11989_v12  ;;  %v10694_v50 = vpop.permute.xlu1 %10693 }
 0xb5b   :  { %v10586_v63 = vmax.f32 %v10472_v18, 0.0  ;;  %v10475_v44 = vadd.f32 %v11991_v19, %v10314_v22 }
 0xb5d   :  { %v10810_v31 = vmul.f32 %v10669_v0, %v10586_v63  ;;  %v10587_v43 = vmax.f32 %v10475_v44, 0.0  ;;  %v11992_v61 = vpop.f32.mrb[76].mxu1  ;;  %v10704_v44 = vpop.permute.xlu1 %10703 }
 0xb5e   :  { %v11993_v4 = vpop.f32.mrb[77].mxu1 }
 0xb5f   :  { %v10841_v1 = vadd.f32 %v10840_v8, %v10810_v31  ;;  %v10811_v60 = vmul.f32 %v10674_v56, %v10587_v43  ;;  %v11994_v62 = vadd.f32 %v11993_v4, %v11992_v61  ;;  %v11995_v42 = vpop.f32.mrb[78].mxu1  ;;  %v10699_v8 = vpop.permute.xlu0 %10698 }
 0xb60   :  { %v11996_v15 = vpop.f32.mrb[79].mxu1 }
 0xb61   :  { %v10842_v57 = vadd.f32 %v10841_v1, %v10811_v60  ;;  %v10480_v59 = vadd.f32 %v11994_v62, %v10319_v53  ;;  %v11997_v23 = vadd.f32 %v11996_v15, %v11995_v42  ;;  %v10714_v42 = vpop.permute.xlu1 %10713 }
 0xb63   :  { %v10588_v0 = vmax.f32 %v10480_v59, 0.0  ;;  %v10483_v41 = vadd.f32 %v11997_v23, %v10322_v29  ;;  %v10709_v53 = vpop.permute.xlu0 %10708 }
 0xb65   :  { %v10812_v24 = vmul.f32 %v10679_v48, %v10588_v0  ;;  %v10589_v47 = vmax.f32 %v10483_v41, 0.0  ;;  %v11998_v26 = vpop.f32.mrb[80].mxu1 }
 0xb66   :  { %v11999_v12 = vpop.f32.mrb[81].mxu1 }
 0xb67   :  { %v10843_v9 = vadd.f32 %v10842_v57, %v10812_v24  ;;  %v10813_v56 = vmul.f32 %v10684_v39, %v10589_v47  ;;  %v12000_v54 = vadd.f32 %v11999_v12, %v11998_v26  ;;  %v12001_v22 = vpop.f32.mrb[82].mxu1  ;;  %v10724_v47 = vpop.permute.xlu1 %10723 }
 0xb68   :  { %v12002_v11 = vpop.f32.mrb[83].mxu1 }
 0xb69   :  { %v10844_v18 = vadd.f32 %v10843_v9, %v10813_v56  ;;  %v10488_v19 = vadd.f32 %v12000_v54, %v10327_v52  ;;  %v12003_v63 = vadd.f32 %v12002_v11, %v12001_v22 }
 0xb6b   :  { %v10590_v48 = vmax.f32 %v10488_v19, 0.0  ;;  %v10491_v31 = vadd.f32 %v12003_v63, %v10330_v55  ;;  %v10734_v55 = vpop.permute.xlu1 %10733 }
 0xb6d   :  { %v10814_v43 = vmul.f32 %v10689_v20, %v10590_v48  ;;  %v10591_v61 = vmax.f32 %v10491_v31, 0.0  ;;  %v12004_v4 = vpop.f32.mrb[84].mxu1  ;;  %v10719_v20 = vpop.permute.xlu0 %10718 }
 0xb6e   :  { %v12005_v33 = vpop.f32.mrb[85].mxu1 }
 0xb6f   :  { %v10845_v39 = vadd.f32 %v10844_v18, %v10814_v43  ;;  %v10815_v1 = vmul.f32 %v10694_v50, %v10591_v61  ;;  %v12006_v60 = vadd.f32 %v12005_v33, %v12004_v4  ;;  %v12007_v62 = vpop.f32.mrb[86].mxu1 }
 0xb70   :  { %v12008_v27 = vpop.f32.mrb[87].mxu1 }
 0xb71   :  { %v10846_v15 = vadd.f32 %v10845_v39, %v10815_v1  ;;  %v10496_v29 = vadd.f32 %v12006_v60, %v10335_v10  ;;  %v12009_v57 = vadd.f32 %v12008_v27, %v12007_v62  ;;  %v10729_v22 = vpop.permute.xlu0 %10728  ;;  %v18755_v39 = vpop.permute.xlu1 %9892 }
 0xb73   :  { %v10592_v59 = vmax.f32 %v10496_v29, 0.0  ;;  %v10499_v23 = vadd.f32 %v12009_v57, %v10338_v25 }
 0xb75   :  { %v10816_v0 = vmul.f32 %v10699_v8, %v10592_v59  ;;  %v10593_v41 = vmax.f32 %v10499_v23, 0.0  ;;  %v12010_v24 = vpop.f32.mrb[88].mxu1  ;;  %v10739_v61 = vpop.permute.xlu0 %10738  ;;  %v10362_v59 = vadd.f32 %v18651_v34, %v18709_v3  ;;  %v10370_v34 = vadd.f32 %v18661_v17, %v18715_v5 }
 0xb76   :  { %v12011_v2 = vpop.f32.mrb[89].mxu1  ;;  %v9898_v37 = vpop.permute.xlu1 %9897  ;;  %v10378_v5 = vadd.f32 %v18669_v30, %v18721_v32  ;;  %v19172_v32 = vld [vmem:[#allocation26_spill] sm:$0xff] }
 0xb77   :  { %v10847_v50 = vadd.f32 %v10846_v15, %v10816_v0  ;;  %v10817_v26 = vmul.f32 %v10704_v44, %v10593_v41  ;;  %v12012_v12 = vadd.f32 %v12011_v2, %v12010_v24  ;;  %v12013_v52 = vpop.f32.mrb[90].mxu1 }
 0xb78   :  { %v12014_v9 = vpop.f32.mrb[91].mxu1 }
 0xb79   :  { %v10848_v28 = vadd.f32 %v10847_v50, %v10817_v26  ;;  %v10504_v56 = vadd.f32 %v12012_v12, %v10343_v6  ;;  %v12015_v54 = vadd.f32 %v12014_v9, %v12013_v52  ;;  %v10744_v13 = vpop.permute.xlu0 %10743 }
 0xb7a   :  { %v9903_v12 = vpop.permute.xlu1 %9902 }
 0xb7b   :  { %v10594_v8 = vmax.f32 %v10504_v56, 0.0  ;;  %v10507_v11 = vadd.f32 %v12015_v54, %v10346_v58 }
 0xb7d   :  { %v10818_v18 = vmul.f32 %v10709_v53, %v10594_v8  ;;  %v10595_v19 = vmax.f32 %v10507_v11, 0.0  ;;  %v12016_v63 = vpop.f32.mrb[92].mxu1  ;;  %v10749_v2 = vpop.permute.xlu0 %10748 }
 0xb7e   :  { %v12017_v48 = vpop.f32.mrb[93].mxu1 }
 0xb7f   :  { %v10849_v35 = vadd.f32 %v10848_v28, %v10818_v18  ;;  %v10819_v44 = vmul.f32 %v10714_v42, %v10595_v19  ;;  %v12018_v31 = vadd.f32 %v12017_v48, %v12016_v63  ;;  %v12019_v43 = vpop.f32.mrb[94].mxu1  ;;  %v10359_v42 = vadd.f32 %v18647_v46, %v18705_v7  ;;  %v9908_v18 = vpop.permute.xlu1 %9907 }
 0xb80   :  { %v12020_v40 = vpop.f32.mrb[95].mxu1  ;;  %v10367_v7 = vadd.f32 %v18657_v49, %v18711_v21  ;;  %v10375_v49 = vadd.f32 %v18667_v51, %v18719_v38  ;;  %v19171_v38 = vld [vmem:[#allocation25_spill] sm:$0xff] }
 0xb81   :  { %v10850_v4 = vadd.f32 %v10849_v35, %v10819_v44  ;;  %v10512_v33 = vadd.f32 %v12018_v31, %v10351_v36  ;;  %v12021_v10 = vadd.f32 %v12020_v40, %v12019_v43  ;;  %v10754_v8 = vpop.permute.xlu0 %10753 }
 0xb83   :  { %v10596_v53 = vmax.f32 %v10512_v33, 0.0  ;;  %v10515_v1 = vadd.f32 %v12021_v10, %v10354_v14 }
 0xb85   :  { %v10820_v60 = vmul.f32 %v10719_v20, %v10596_v53  ;;  %v10597_v62 = vmax.f32 %v10515_v1, 0.0  ;;  %v12022_v27 = vpop.f32.mrb[96].mxu1  ;;  %v10759_v31 = vpop.permute.xlu0 %10758 }
 0xb86   :  { %v12023_v45 = vpop.f32.mrb[97].mxu1 }
 0xb87   :  { %v10851_v25 = vadd.f32 %v10850_v4, %v10820_v60  ;;  %v10821_v15 = vmul.f32 %v10724_v47, %v10597_v62  ;;  %v12024_v29 = vadd.f32 %v12023_v45, %v12022_v27  ;;  %v12025_v57 = vpop.f32.mrb[98].mxu1  ;;  %v9913_v4 = vpop.permute.xlu1 %9912  ;;  %v10383_v62 = vadd.f32 %v19171_v38, %v18755_v39  ;;  %v19173_v39 = vld [vmem:[#allocation27_spill] sm:$0xff] }
 0xb88   :  { %v12026_v16 = vpop.f32.mrb[99].mxu1 }
 0xb89   :  { %v10852_v23 = vadd.f32 %v10851_v25, %v10821_v15  ;;  %v10520_v0 = vadd.f32 %v12024_v29, %v10359_v42  ;;  %v12027_v41 = vadd.f32 %v12026_v16, %v12025_v57  ;;  %v10764_v60 = vpop.permute.xlu0 %10763  ;;  %v10386_v15 = vadd.f32 %v19172_v32, %v9898_v37 }
 0xb8b   :  { %v10598_v20 = vmax.f32 %v10520_v0, 0.0  ;;  %v10523_v24 = vadd.f32 %v12027_v41, %v10362_v59  ;;  %v9918_v25 = vpop.permute.xlu1 %9917 }
 0xb8d   :  { %v10822_v6 = vmul.f32 %v10729_v22, %v10598_v20  ;;  %v10599_v50 = vmax.f32 %v10523_v24, 0.0  ;;  %v12028_v26 = vpop.f32.mrb[100].mxu1  ;;  %v10769_v0 = vpop.permute.xlu0 %10768 }
 0xb8e   :  { %v12029_v46 = vpop.f32.mrb[101].mxu1 }
 0xb8f   :  { %v10853_v47 = vadd.f32 %v10852_v23, %v10822_v6  ;;  %v10823_v52 = vmul.f32 %v10734_v55, %v10599_v50  ;;  %v12030_v9 = vadd.f32 %v12029_v46, %v12028_v26  ;;  %v12031_v58 = vpop.f32.mrb[102].mxu1  ;;  %v10391_v50 = vadd.f32 %v19173_v39, %v9903_v12 }
 0xb90   :  { %v12032_v28 = vpop.f32.mrb[103].mxu1 }
 0xb91   :  { %v10854_v3 = vadd.f32 %v10853_v47, %v10823_v52  ;;  %v10528_v56 = vadd.f32 %v12030_v9, %v10367_v7  ;;  %v12033_v54 = vadd.f32 %v12032_v28, %v12031_v58  ;;  %v19174_v9 = vld [vmem:[#allocation28_spill] sm:$0xff] }
 0xb92   :  { %v10394_v37 = vadd.f32 %v19174_v9, %v9908_v18  ;;  %v19176_v18 = vld [vmem:[#allocation30_spill] sm:$0xff] }
 0xb93   :  { %v10600_v22 = vmax.f32 %v10528_v56, 0.0  ;;  %v10531_v11 = vadd.f32 %v12033_v54, %v10370_v34 }
 0xb95   :  { %v10824_v19 = vmul.f32 %v10739_v61, %v10600_v22  ;;  %v10601_v63 = vmax.f32 %v10531_v11, 0.0  ;;  %v12034_v48 = vpop.f32.mrb[104].mxu1 }
 0xb96   :  { %v12035_v36 = vpop.f32.mrb[105].mxu1 }
 0xb97   :  { %v10855_v21 = vadd.f32 %v10854_v3, %v10824_v19  ;;  %v10825_v55 = vmul.f32 %v10744_v13, %v10601_v63  ;;  %v12036_v35 = vadd.f32 %v12035_v36, %v12034_v48  ;;  %v12037_v44 = vpop.f32.mrb[106].mxu1  ;;  %v10774_v3 = vpop.permute.xlu0 %10773  ;;  %v19175_v48 = vld [vmem:[#allocation29_spill] sm:$0xff] }
 0xb98   :  { %v12038_v17 = vpop.f32.mrb[107].mxu1  ;;  %v10399_v12 = vadd.f32 %v19175_v48, %v9913_v4  ;;  %v19177_v4 = vld [vmem:[#allocation31_spill] sm:$0xff] }
 0xb99   :  { %v10856_v43 = vadd.f32 %v10855_v21, %v10825_v55  ;;  %v10536_v40 = vadd.f32 %v12036_v35, %v10375_v49  ;;  %v12039_v14 = vadd.f32 %v12038_v17, %v12037_v44 }
 0xb9b   :  { %v10602_v61 = vmax.f32 %v10536_v40, 0.0  ;;  %v10539_v33 = vadd.f32 %v12039_v14, %v10378_v5  ;;  %v10779_v35 = vpop.permute.xlu0 %10778 }
 0xb9d   :  { %v10826_v10 = vmul.f32 %v10749_v2, %v10602_v61  ;;  %v10603_v53 = vmax.f32 %v10539_v33, 0.0  ;;  %v12040_v1 = vpop.f32.mrb[108].mxu1  ;;  %v9923_v2 = vpop.permute.xlu1 %9922 }
 0xb9e   :  { %v12041_v51 = vpop.f32.mrb[109].mxu1 }
 0xb9f   :  { %v10857_v27 = vadd.f32 %v10856_v43, %v10826_v10  ;;  %v10827_v13 = vmul.f32 %v10754_v8, %v10603_v53  ;;  %v12042_v45 = vadd.f32 %v12041_v51, %v12040_v1  ;;  %v12043_v42 = vpop.f32.mrb[110].mxu1  ;;  %v10784_v1 = vpop.permute.xlu0 %10783  ;;  %v10407_v51 = vadd.f32 %v19177_v4, %v9923_v2  ;;  %v19179_v2 = vld [vmem:[#allocation33_spill] sm:$0xff] }
 0xba0   :  { %v12044_v30 = vpop.f32.mrb[111].mxu1 }
 0xba1   :  { %v10858_v29 = vadd.f32 %v10857_v27, %v10827_v13  ;;  %v10544_v57 = vadd.f32 %v12042_v45, %v10383_v62  ;;  %v12045_v16 = vadd.f32 %v12044_v30, %v12043_v42  ;;  %v9928_v8 = vpop.permute.xlu1 %9927 }
 0xba3   :  { %v10604_v59 = vmax.f32 %v10544_v57, 0.0  ;;  %v10547_v23 = vadd.f32 %v12045_v16, %v10386_v15 }
 0xba5   :  { %v10828_v41 = vmul.f32 %v10759_v31, %v10604_v59  ;;  %v10605_v20 = vmax.f32 %v10547_v23, 0.0  ;;  %v12046_v24 = vpop.f32.mrb[112].mxu1  ;;  %v10402_v31 = vadd.f32 %v19176_v18, %v9918_v25  ;;  %v9933_v40 = vpop.permute.xlu1 %9932  ;;  %v19178_v25 = vld [vmem:[#allocation32_spill] sm:$0xff] }
 0xba6   :  { %v12047_v6 = vpop.f32.mrb[113].mxu1  ;;  %v10410_v30 = vadd.f32 %v19178_v25, %v9928_v8  ;;  %v10789_v59 = vpop.permute.xlu0 %10788 }
 0xba7   :  { %v10859_v26 = vadd.f32 %v10858_v29, %v10828_v41  ;;  %v10829_v46 = vmul.f32 %v10764_v60, %v10605_v20  ;;  %v12048_v7 = vadd.f32 %v12047_v6, %v12046_v24  ;;  %v12049_v47 = vpop.f32.mrb[114].mxu1  ;;  %v10415_v6 = vadd.f32 %v19179_v2, %v9933_v40 }
 0xba8   :  { %v12050_v52 = vpop.f32.mrb[115].mxu1 }
 0xba9   :  { %v10860_v58 = vadd.f32 %v10859_v26, %v10829_v46  ;;  %v10552_v28 = vadd.f32 %v12048_v7, %v10391_v50  ;;  %v12051_v34 = vadd.f32 %v12050_v52, %v12049_v47  ;;  %v9938_v45 = vpop.permute.xlu1 %9937  ;;  %v19180_v47 = vld [vmem:[#allocation34_spill] sm:$0xff] }
 0xbaa   :  { %v10418_v52 = vadd.f32 %v19180_v47, %v9938_v45 }
 0xbab   :  { %v10606_v56 = vmax.f32 %v10552_v28, 0.0  ;;  %v10555_v54 = vadd.f32 %v12051_v34, %v10394_v37 }
 0xbad   :  { %v10830_v22 = vmul.f32 %v10769_v0, %v10606_v56  ;;  %v10607_v11 = vmax.f32 %v10555_v54, 0.0  ;;  %v12052_v19 = vpop.f32.mrb[116].mxu1  ;;  %v10794_v20 = vpop.permute.xlu1 %10793 }
 0xbae   :  { %v12053_v63 = vpop.f32.mrb[117].mxu1 }
 0xbaf   :  { %v10861_v36 = vadd.f32 %v10860_v58, %v10830_v22  ;;  %v10831_v49 = vmul.f32 %v10774_v3, %v10607_v11  ;;  %v12054_v21 = vadd.f32 %v12053_v63, %v12052_v19  ;;  %v12055_v55 = vpop.f32.mrb[118].mxu1  ;;  %v10799_v3 = vpop.permute.xlu0 %10798 }
 0xbb0   :  { %v12056_v44 = vpop.f32.mrb[119].mxu1 }
 0xbb1   :  { %v10862_v17 = vadd.f32 %v10861_v36, %v10831_v49  ;;  %v10560_v5 = vadd.f32 %v12054_v21, %v10399_v12  ;;  %v12057_v43 = vadd.f32 %v12056_v44, %v12055_v55  ;;  %v10804_v8 = vpop.permute.xlu1 %10803  ;;  %v10876_v21 = vstv %s18803_s8 }
 0xbb3   :  { %v10608_v14 = vmax.f32 %v10560_v5, 0.0  ;;  %v10563_v61 = vadd.f32 %v12057_v43, %v10402_v31 }
 0xbb5   :  { %v10832_v33 = vmul.f32 %v10779_v35, %v10608_v14  ;;  %v10609_v10 = vmax.f32 %v10563_v61, 0.0  ;;  %v12058_v53 = vpop.f32.mrb[120].mxu1 }
 0xbb6   :  { %v12059_v60 = vpop.f32.mrb[121].mxu1 }
 0xbb7   :  { %v10863_v38 = vadd.f32 %v10862_v17, %v10832_v33  ;;  %v10833_v62 = vmul.f32 %v10784_v1, %v10609_v10  ;;  %v12060_v27 = vadd.f32 %v12059_v60, %v12058_v53  ;;  %v12061_v13 = vpop.f32.mrb[122].mxu1 }
 0xbb8   :  { %v12062_v42 = vpop.f32.mrb[123].mxu1 }
 0xbb9   :  { %v10864_v32 = vadd.f32 %v10863_v38, %v10833_v62  ;;  %v10568_v15 = vadd.f32 %v12060_v27, %v10407_v51  ;;  %v12063_v29 = vadd.f32 %v12062_v42, %v12061_v13 }
 0xbbb   :  { %v10610_v57 = vmax.f32 %v10568_v15, 0.0  ;;  %v10571_v16 = vadd.f32 %v12063_v29, %v10410_v30 }
 0xbbd   :  { %v10834_v23 = vmul.f32 %v10789_v59, %v10610_v57  ;;  %v10611_v0 = vmax.f32 %v10571_v16, 0.0  ;;  %v12064_v41 = vpop.f32.mrb[124].mxu1 }
 0xbbe   :  { %v12065_v24 = vpop.f32.mrb[125].mxu1 }
 0xbbf   :  { %v10865_v39 = vadd.f32 %v10864_v32, %v10834_v23  ;;  %v10835_v50 = vmul.f32 %v10794_v20, %v10611_v0  ;;  %v12066_v26 = vadd.f32 %v12065_v24, %v12064_v41  ;;  %v12067_v46 = vpop.f32.mrb[126].mxu1 }
 0xbc0   :  { %v12068_v7 = vpop.f32.mrb[127].mxu1 }
 0xbc1   :  { %v10866_v9 = vadd.f32 %v10865_v39, %v10835_v50  ;;  %v10576_v37 = vadd.f32 %v12066_v26, %v10415_v6  ;;  %v12069_v58 = vadd.f32 %v12068_v7, %v12067_v46 }
 0xbc3   :  { %v10612_v28 = vmax.f32 %v10576_v37, 0.0  ;;  %v10579_v34 = vadd.f32 %v12069_v58, %v10418_v52 }
 0xbc5   :  { %v10836_v56 = vmul.f32 %v10799_v3, %v10612_v28  ;;  %v10613_v54 = vmax.f32 %v10579_v34, 0.0 }
 0xbc7   :  { %v10867_v22 = vadd.f32 %v10866_v9, %v10836_v56  ;;  %v10837_v11 = vmul.f32 %v10804_v8, %v10613_v54 }
 0xbc9   :  { %v10868_v19 = vadd.f32 %v10867_v22, %v10837_v11 }
 0xbcb   :  { %v10869_v63 = vrot.slane %v10868_v19, 4 }
 0xbcd   :  { %v10870_v48 = vadd.f32 %v10869_v63, %v10868_v19 }
 0xbcf   :  { %v10871_v12 = vrot.slane %v10870_v48, 2 }
 0xbd1   :  { %v10872_v36 = vadd.f32 %v10871_v12, %v10870_v48 }
 0xbd3   :  { %v10873_v49 = vrot.slane %v10872_v36, 1 }
 0xbd5   :  { %v10874_v55 = vadd.f32 %v10873_v49, %v10872_v36 }
 0xbd7   :  { %v10877_v35 = vadd.f32 %v10876_v21, %v10874_v55 }
 0xbd9   :  { %v11780_v44 = vmul.f32 -1.442695, %v10877_v35 }
 0xbdb   :  { %14077 = vpow2.f32 %v11780_v44 }
 0xbe5   :  { %v14078_v18 = vpop.eup %14077 }
 0xbe6   :  { %v10881_v31 = vadd.f32 1.0, %v14078_v18 }
 0xbe8   :  { %14079 = vrcp.f32 %v10881_v31 }
 0xbf2   :  { %v14080_v17 = vpop.eup %14079 }
 0xbf3   :  { %10884 = vst [vmem:[#allocation3] sm:$0x1] %v14080_v17 }
 0xbf4   :  { %14092 = shalt.err (!%p14089_p4)
}
 0xbf5   :  { %s14093_s21 = scalar_lea.hbm %s18804_s9, 16 }
 0xbf6   :  { %p14094_p5 = scmp.ne.s32.totalorder %s18804_s9, %s14093_s21  ;;  %p14097_p6 = scmp.lt.u32.totalorder %s14093_s21, %s18804_s9 }
 0xbf8   :  { %p14099_p7 = pnand %p14097_p6, %p14094_p5 }
 0xbfa   :  { %14102 = shalt.err (!%p14099_p7)
}
 0xbfb   :  { %10894 = dma.vmem_to_hbm [thread:$0]  %s10892_s17, 16, %s18804_s9, [#allocation4]  }
 0xbfc   :  { %14103 = dma.done.wait [#allocation4], 16  }
 0xbfd   :  { %14104 = vsyncadd [#allocation4], 4294967280 }
 0xbfe   :  { %10898 = vsyncpa [#allocation4], 1 }

</bundles_post_ra>
